<compile_context>
chip_gen: v7x
topology: tpu7x:2x2x1
jax: 0.10.0
libtpu: 0.0.40
codegen_flags: <defaults>
</compile_context>

<pallas_src>
import functools

import jax
import jax.numpy as jnp
from jax.experimental import pallas as pl
from jax.experimental.pallas import tpu as pltpu


_VMEM_LIMIT = 32 * 1024 * 1024   # scoped-VMEM budget, safe on v5e / v6e / v7x
_EPS = 1e-5


def _round_up(x, m):
    return (x + m - 1) // m * m


def _pick_tk(k):
    for c in (512, 256, 128):
        if k % c == 0:
            return c
    return k


def _rows_tile(m):
    if m % 8:
        return m
    for c in (512, 256, 128, 64, 32, 16, 8):
        if m % c == 0:
            return c
    return m


# --------------------------------------------------------------------------
# Fused conv-as-matmul kernel:  acc = A @ B  (bf16 operands, f32 accumulator),
# epilogue = training-mode BatchNorm over the M rows [+ residual add] [+ReLU],
# stored as bf16.  Requires gm == 1 (always true here: tm = Mp).
# --------------------------------------------------------------------------
def _conv_bn_kernel(m_valid, relu, has_res, *refs):
    if has_res:
        a_ref, b_ref, res_ref, o_ref, acc_ref = refs
    else:
        a_ref, b_ref, o_ref, acc_ref = refs
        res_ref = None

    k = pl.program_id(1)

    @pl.when(k == 0)
    def _():
        acc_ref[...] = jnp.zeros_like(acc_ref)

    acc_ref[...] += jnp.dot(a_ref[...], b_ref[...],
                            preferred_element_type=jnp.float32)

    @pl.when(k == pl.num_programs(1) - 1)
    def _():
        acc = acc_ref[...]
        inv_m = 1.0 / m_valid            # zero-padded rows contribute 0 to sums
        mean = jnp.sum(acc, axis=0, keepdims=True) * inv_m
        var = jnp.maximum(
            jnp.sum(acc * acc, axis=0, keepdims=True) * inv_m - mean * mean,
            0.0)
        y = (acc - mean) * jax.lax.rsqrt(var + _EPS)
        if has_res:
            y = y + res_ref[...].astype(jnp.float32)
        if relu:
            y = jnp.maximum(y, 0.0)
        o_ref[...] = y.astype(o_ref.dtype)


def conv_bn(a, w, res=None, relu=True):
    """BN((M, K) @ (Kw, N)) with optional fused residual add and ReLU.

    `w` is pre-padded: Kw and N are multiples of 128 and Kw >= K (extra rows
    are zero).  Returns a bf16 (Mp, N) slab; rows >= M are don't-care, padded
    output channels are exactly zero.
    """
    M, K = a.shape
    Kw, N = w.shape
    Mp = _round_up(M, 8)

    a = a.astype(jnp.bfloat16)
    if Mp != M or Kw != K:
        a = jnp.pad(a, ((0, Mp - M), (0, Kw - K)))
    w = w.astype(jnp.bfloat16)

    tn = N if N <= 256 else 256          # N split => v7x TCs share weight DMA
    tk = _pick_tk(Kw)
    gn, gk = N // tn, Kw // tk

    in_specs = [pl.BlockSpec((Mp, tk), lambda j, k: (0, k)),
                pl.BlockSpec((tk, tn), lambda j, k: (k, j))]
    args = [a, w]
    has_res = res is not None
    if has_res:
        res = res.astype(jnp.bfloat16)
        if res.shape[0] < Mp:
            res = jnp.pad(res, ((0, Mp - res.shape[0]), (0, 0)))
        elif res.shape[0] > Mp:
            res = res[:Mp]
        in_specs.append(pl.BlockSpec((Mp, tn), lambda j, k: (0, j)))
        args.append(res)

    kernel = functools.partial(_conv_bn_kernel, float(M), relu, has_res)
    return pl.pallas_call(
        kernel,
        out_shape=jax.ShapeDtypeStruct((Mp, N), jnp.bfloat16),
        grid_spec=pltpu.PrefetchScalarGridSpec(
            num_scalar_prefetch=0,
            grid=(gn, gk),
            in_specs=in_specs,
            out_specs=pl.BlockSpec((Mp, tn), lambda j, k: (0, j)),
            scratch_shapes=[pltpu.VMEM((Mp, tn), jnp.float32)]),
        compiler_params=pltpu.CompilerParams(
            dimension_semantics=("parallel", "arbitrary"),
            vmem_limit_bytes=_VMEM_LIMIT),
    )(*args)


# --------------------------------------------------------------------------
# Stats-free matmul with fused bias (final FC layer), f32 output.
# --------------------------------------------------------------------------
def _linear_bias_kernel(a_ref, b_ref, bias_ref, o_ref, acc_ref):
    k = pl.program_id(1)

    @pl.when(k == 0)
    def _():
        acc_ref[...] = jnp.zeros_like(acc_ref)

    acc_ref[...] += jnp.dot(a_ref[...], b_ref[...],
                            preferred_element_type=jnp.float32)

    @pl.when(k == pl.num_programs(1) - 1)
    def _():
        o_ref[...] = (acc_ref[...] + bias_ref[...]).astype(o_ref.dtype)


def linear_bias(a, w, bias):
    M, K = a.shape
    Kw, N = w.shape
    Mp = _round_up(M, 8)
    a = a.astype(jnp.bfloat16)
    if Mp != M or Kw != K:
        a = jnp.pad(a, ((0, Mp - M), (0, Kw - K)))
    w = w.astype(jnp.bfloat16)
    bias = bias.reshape(1, N).astype(jnp.float32)

    tn = N if N <= 256 else 256
    tk = _pick_tk(Kw)
    gn, gk = N // tn, Kw // tk

    return pl.pallas_call(
        _linear_bias_kernel,
        out_shape=jax.ShapeDtypeStruct((Mp, N), jnp.float32),
        grid_spec=pltpu.PrefetchScalarGridSpec(
            num_scalar_prefetch=0,
            grid=(gn, gk),
            in_specs=[pl.BlockSpec((Mp, tk), lambda j, k: (0, k)),
                      pl.BlockSpec((tk, tn), lambda j, k: (k, j)),
                      pl.BlockSpec((1, tn), lambda j, k: (0, j))],
            out_specs=pl.BlockSpec((Mp, tn), lambda j, k: (0, j)),
            scratch_shapes=[pltpu.VMEM((Mp, tn), jnp.float32)]),
        compiler_params=pltpu.CompilerParams(
            dimension_semantics=("parallel", "arbitrary"),
            vmem_limit_bytes=_VMEM_LIMIT),
    )(a, w, bias)


# --------------------------------------------------------------------------
# Max-pool 3x3 / stride 2 / pad 1 (lane-dense, row-tiled 9-way max).
# --------------------------------------------------------------------------
def _max9_kernel(*refs):
    o_ref = refs[-1]
    m = refs[0][...]
    for r in refs[1:-1]:
        m = jnp.maximum(m, r[...])
    o_ref[...] = m


def maxpool_3x3_s2_p1(x_nhwc):
    N, H, W, C = x_nhwc.shape
    Ho = (H - 1) // 2 + 1
    Wo = (W - 1) // 2 + 1
    M = N * Ho * Wo
    xp = jnp.pad(x_nhwc, ((0, 0), (1, 1), (1, 1), (0, 0)),
                 constant_values=-jnp.inf)
    slabs = [xp[:, i:i + 2 * Ho - 1:2, j:j + 2 * Wo - 1:2, :].reshape(M, C)
             for i in range(3) for j in range(3)]
    tm = _rows_tile(M)
    out = pl.pallas_call(
        _max9_kernel,
        out_shape=jax.ShapeDtypeStruct((M, C), x_nhwc.dtype),
        grid=(M // tm,),
        in_specs=[pl.BlockSpec((tm, C), lambda i: (i, 0)) for _ in range(9)],
        out_specs=pl.BlockSpec((tm, C), lambda i: (i, 0)),
        compiler_params=pltpu.CompilerParams(
            dimension_semantics=("parallel",),
            vmem_limit_bytes=_VMEM_LIMIT),
    )(*slabs)
    return out, (N, Ho, Wo)


# --------------------------------------------------------------------------
# adaptive_avg_pool2d((1,1)) — degenerate (H=W=1) is a reshape; general case
# uses a tiny per-sample mean kernel.
# --------------------------------------------------------------------------
def _avgpool_kernel(x_ref, o_ref):
    o_ref[...] = jnp.mean(x_ref[...].astype(jnp.float32), axis=1,
                          keepdims=True).astype(o_ref.dtype)


def avgpool_to_1x1(x2d, shape):
    N, H, W = shape
    HW = H * W
    C = x2d.shape[1]
    x2d = x2d[:N * HW]
    if HW == 1:
        return x2d
    x3d = x2d.reshape(N, HW, C)
    out = pl.pallas_call(
        _avgpool_kernel,
        out_shape=jax.ShapeDtypeStruct((N, 1, C), jnp.float32),
        grid=(N,),
        in_specs=[pl.BlockSpec((1, HW, C), lambda i: (i, 0, 0))],
        out_specs=pl.BlockSpec((1, 1, C), lambda i: (i, 0, 0)),
        compiler_params=pltpu.CompilerParams(
            dimension_semantics=("parallel",),
            vmem_limit_bytes=_VMEM_LIMIT),
    )(x3d)
    return out.reshape(N, C)


# --------------------------------------------------------------------------
# im2col (bf16, channel-padded layout already lane-dense).
# TODO(synk): fold the kh*kw taps into the matmul K loop instead of
#             materializing the patch matrix in HBM.
# --------------------------------------------------------------------------
def im2col(x_nhwc, kh, kw, stride, pad):
    N, H, W, C = x_nhwc.shape
    Ho = (H + 2 * pad - kh) // stride + 1
    Wo = (W + 2 * pad - kw) // stride + 1
    M = N * Ho * Wo
    xp = (jnp.pad(x_nhwc, ((0, 0), (pad, pad), (pad, pad), (0, 0)))
          if pad else x_nhwc)
    cols = [xp[:, i:i + stride * (Ho - 1) + 1:stride,
               j:j + stride * (Wo - 1) + 1:stride, :].reshape(M, C)
            for i in range(kh) for j in range(kw)]
    return jnp.concatenate(cols, axis=1), (N, Ho, Wo)


# --------------------------------------------------------------------------
# ResNet assembly (BasicBlock, expansion = 1).
# --------------------------------------------------------------------------
def basic_block(x2d, shape, blk):
    N, H, W = shape
    C = x2d.shape[1]
    x4 = x2d[:N * H * W].reshape(N, H, W, C)
    stride = blk["stride"]

    # conv1 (3x3/s) + BN + ReLU, fused in one pallas_call.
    p1, (N, Ho, Wo) = im2col(x4, 3, 3, stride, 1)
    a1 = conv_bn(p1, blk["conv1"], relu=True)
    M = N * Ho * Wo

    # shortcut path: 1x1/s conv + BN (no ReLU), or identity.
    if blk["short"] is not None:
        xs = x4[:, ::stride, ::stride, :] if stride > 1 else x4
        res = conv_bn(xs.reshape(M, C), blk["short"], relu=False)
    else:
        res = x2d

    # conv2 (3x3/1) + BN + residual add + ReLU, all fused in the epilogue.
    p2, _ = im2col(a1[:M].reshape(N, Ho, Wo, -1), 3, 3, 1, 1)
    out = conv_bn(p2, blk["conv2"], res=res, relu=True)
    return out, (N, Ho, Wo)


def resnet_forward(params, x_nchw):
    x = jnp.transpose(x_nchw, (0, 2, 3, 1)).astype(jnp.bfloat16)  # NCHW->NHWC

    # stem: conv7x7/2 + BN + ReLU (fused) + maxpool 3x3/2.
    p, (N, Ho, Wo) = im2col(x, 7, 7, 2, 3)
    a = conv_bn(p, params["conv1"], relu=True)
    M = N * Ho * Wo
    x2d, shape = maxpool_3x3_s2_p1(a[:M].reshape(N, Ho, Wo, -1))

    # residual stages
    for layer in params["layers"]:
        for blk in layer:
            x2d, shape = basic_block(x2d, shape, blk)

    feat = avgpool_to_1x1(x2d, shape)                       # (N, 512)
    logits = linear_bias(feat, params["fc_w"], params["fc_b"])
    return logits[:shape[0], :params["classes"]]


# --------------------------------------------------------------------------
# Deterministic parameter construction (synthetic; mirrors __init__ shapes).
# Weights are stored as channel-padded (lane-dense) im2col matrices.
# --------------------------------------------------------------------------
def _conv_weight(key, kh, kw, cin, cout, cin_pad, cout_pad):
    # kaiming_normal_(mode='fan_out', nonlinearity='relu')
    std = (2.0 / (cout * kh * kw)) ** 0.5
    w = jax.random.normal(key, (kh, kw, cin, cout), jnp.float32) * std
    w = jnp.pad(w, ((0, 0), (0, 0), (0, cin_pad - cin), (0, cout_pad - cout)))
    w = w.reshape(kh * kw * cin_pad, cout_pad)
    k_rows = _round_up(w.shape[0], 128)
    if k_rows != w.shape[0]:
        w = jnp.pad(w, ((0, k_rows - w.shape[0]), (0, 0)))
    return w.astype(jnp.bfloat16)


def init_params(key, layers=(1, 1, 1, 1), classes=10):
    ki = iter(jax.random.split(key, 64))
    cpad = lambda c: _round_up(c, 128)

    params = {"conv1": _conv_weight(next(ki), 7, 7, 3, 64, 3, cpad(64)),
              "classes": classes}
    planes = 64
    stages = []
    for li, (feat, nblocks) in enumerate(zip((64, 128, 256, 512), layers)):
        stride0 = 1 if li == 0 else 2
        blocks = []
        for bi in range(nblocks):
            s = stride0 if bi == 0 else 1
            need_short = (s != 1) or (planes != feat)     # expansion = 1
            blocks.append({
                "conv1": _conv_weight(next(ki), 3, 3, planes, feat,
                                      cpad(planes), cpad(feat)),
                "conv2": _conv_weight(next(ki), 3, 3, feat, feat,
                                      cpad(feat), cpad(feat)),
                "short": (_conv_weight(next(ki), 1, 1, planes, feat,
                                       cpad(planes), cpad(feat))
                          if need_short else None),
                "stride": s,
            })
            planes = feat
        stages.append(blocks)
    params["layers"] = stages

    bound = 1.0 / (512 ** 0.5)
    fc_w = jax.random.uniform(next(ki), (512, classes), jnp.float32,
                              -bound, bound)
    fc_b = jax.random.uniform(next(ki), (classes,), jnp.float32,
                              -bound, bound)
    np_cls = cpad(classes)
    params["fc_w"] = jnp.pad(fc_w, ((0, 0), (0, np_cls - classes)))
    params["fc_b"] = jnp.pad(fc_b, ((0, np_cls - classes),)).reshape(1, np_cls)
    return params


if __name__ == "__main__":
    key = jax.random.PRNGKey(0)
    pkey, xkey = jax.random.split(key)
    params = init_params(pkey, layers=(1, 1, 1, 1), classes=10)

    # PyTorch-style NCHW input: batch=2, channels=3, spatial=32
    x = jax.random.normal(xkey, (2, 3, 32, 32), jnp.float32)

    fwd = jax.jit(lambda inp: resnet_forward(params, inp))
    out = jax.block_until_ready(fwd(x))

    assert out.shape == (2, 10), out.shape
    assert bool(jnp.all(jnp.isfinite(out)))
    print("KERNEL_OK")
</pallas_src>

<mosaic_0001>
module attributes {stable_mosaic.version = 11 : i64} {
  func.func @_conv_bn_kernel(%arg0: i32, %arg1: i32, %arg2: memref<512x256xbf16, #tpu.memory_space<vmem>>, %arg3: memref<256x128xbf16, #tpu.memory_space<vmem>>, %arg4: memref<512x128xbf16, #tpu.memory_space<vmem>>, %arg5: memref<512x128xf32, #tpu.memory_space<vmem>>) attributes {dimension_semantics = [#tpu.dimension_semantics<parallel>, #tpu.dimension_semantics<arbitrary>], iteration_bounds = array<i64: 1, 1>, scalar_prefetch = 0 : i64, scratch_operands = 1 : i64, tpu.core_type = #tpu.core_type<tc>, window_params = [{transform_indices = @transform_0, window_bounds = array<i64: 512, 256>}, {transform_indices = @transform_1, window_bounds = array<i64: 256, 128>}, {transform_indices = @transform_2, window_bounds = array<i64: 512, 128>}]} {
    %c0_i32 = arith.constant 0 : i32
    %0 = arith.cmpi eq, %arg1, %c0_i32 : i32
    %1 = arith.extui %0 : i1 to i32
    %c0_i32_0 = arith.constant 0 : i32
    %2 = arith.cmpi ne, %1, %c0_i32_0 : i32
    scf.if %2 {
      %cst_10 = arith.constant 0.000000e+00 : f32
      %12 = vector.broadcast %cst_10 : f32 to vector<512x128xf32>
      %c0_11 = arith.constant 0 : index
      %c0_12 = arith.constant 0 : index
      %13 = vector.load %arg5[%c0_11, %c0_12] : memref<512x128xf32, #tpu.memory_space<vmem>>, vector<512x128xf32>
      tpu.vector_store %arg5[%c0_11, %c0_12], %12 {strides = array<i32>} : memref<512x128xf32, #tpu.memory_space<vmem>>, vector<512x128xf32>,
    } else {
    }
    %c0 = arith.constant 0 : index
    %c0_1 = arith.constant 0 : index
    %3 = vector.load %arg5[%c0, %c0_1] : memref<512x128xf32, #tpu.memory_space<vmem>>, vector<512x128xf32>
    %c0_2 = arith.constant 0 : index
    %c0_3 = arith.constant 0 : index
    %4 = vector.load %arg2[%c0_2, %c0_3] : memref<512x256xbf16, #tpu.memory_space<vmem>>, vector<512x256xbf16>
    %c0_4 = arith.constant 0 : index
    %c0_5 = arith.constant 0 : index
    %5 = vector.load %arg3[%c0_4, %c0_5] : memref<256x128xbf16, #tpu.memory_space<vmem>>, vector<256x128xbf16>
    %cst = arith.constant dense<0.000000e+00> : vector<512x128xf32>
    %6 = tpu.matmul %4, %5, %cst {dimension_numbers = #tpu.dot_dimension_numbers<[1], [0], [0], [1], [0, 0, 1, 1], [], []>} : vector<512x256xbf16>, vector<256x128xbf16>, vector<512x128xf32> -> vector<512x128xf32>
    %7 = arith.addf %3, %6 : vector<512x128xf32>
    %c0_6 = arith.constant 0 : index
    %c0_7 = arith.constant 0 : index
    %8 = vector.load %arg5[%c0_6, %c0_7] : memref<512x128xf32, #tpu.memory_space<vmem>>, vector<512x128xf32>
    tpu.vector_store %arg5[%c0_6, %c0_7], %7 {strides = array<i32>} : memref<512x128xf32, #tpu.memory_space<vmem>>, vector<512x128xf32>,
    %c0_i32_8 = arith.constant 0 : i32
    %9 = arith.cmpi eq, %arg1, %c0_i32_8 : i32
    %10 = arith.extui %9 : i1 to i32
    %c0_i32_9 = arith.constant 0 : i32
    %11 = arith.cmpi ne, %10, %c0_i32_9 : i32
    scf.if %11 {
      %c0_10 = arith.constant 0 : index
      %c0_11 = arith.constant 0 : index
      %12 = vector.load %arg5[%c0_10, %c0_11] : memref<512x128xf32, #tpu.memory_space<vmem>>, vector<512x128xf32>
      %cst_12 = arith.constant dense<0.000000e+00> : vector<128xf32>
      %13 = vector.multi_reduction <add>, %12, %cst_12 [0] : vector<512x128xf32> to vector<128xf32>
      %14 = vector.shape_cast %13 : vector<128xf32> to vector<1x128xf32>
      %cst_13 = arith.constant 0.001953125 : f32
      %15 = vector.broadcast %cst_13 : f32 to vector<1x128xf32>
      %16 = arith.mulf %14, %15 : vector<1x128xf32>
      %17 = arith.mulf %12, %12 : vector<512x128xf32>
      %cst_14 = arith.constant dense<0.000000e+00> : vector<128xf32>
      %18 = vector.multi_reduction <add>, %17, %cst_14 [0] : vector<512x128xf32> to vector<128xf32>
      %19 = vector.shape_cast %18 : vector<128xf32> to vector<1x128xf32>
      %cst_15 = arith.constant 0.001953125 : f32
      %20 = vector.broadcast %cst_15 : f32 to vector<1x128xf32>
      %21 = arith.mulf %19, %20 : vector<1x128xf32>
      %22 = arith.mulf %16, %16 : vector<1x128xf32>
      %23 = arith.subf %21, %22 : vector<1x128xf32>
      %cst_16 = arith.constant 0.000000e+00 : f32
      %24 = vector.broadcast %cst_16 : f32 to vector<1x128xf32>
      %25 = arith.maximumf %23, %24 : vector<1x128xf32>
      %26 = vector.broadcast %16 : vector<1x128xf32> to vector<512x128xf32>
      %27 = arith.subf %12, %26 : vector<512x128xf32>
      %cst_17 = arith.constant 9.99999974E-6 : f32
      %28 = vector.broadcast %cst_17 : f32 to vector<1x128xf32>
      %29 = arith.addf %25, %28 : vector<1x128xf32>
      %30 = math.rsqrt %29 : vector<1x128xf32>
      %31 = vector.broadcast %30 : vector<1x128xf32> to vector<512x128xf32>
      %32 = arith.mulf %27, %31 : vector<512x128xf32>
      %cst_18 = arith.constant 0.000000e+00 : f32
      %33 = vector.broadcast %cst_18 : f32 to vector<512x128xf32>
      %34 = arith.maximumf %32, %33 : vector<512x128xf32>
      %35 = arith.truncf %34 : vector<512x128xf32> to vector<512x128xbf16>
      %c0_19 = arith.constant 0 : index
      %c0_20 = arith.constant 0 : index
      %36 = vector.load %arg4[%c0_19, %c0_20] : memref<512x128xbf16, #tpu.memory_space<vmem>>, vector<512x128xbf16>
      tpu.vector_store %arg4[%c0_19, %c0_20], %35 {strides = array<i32>} : memref<512x128xbf16, #tpu.memory_space<vmem>>, vector<512x128xbf16>,
    } else {
    }
    return
  }
  func.func @transform_0(%arg0: i32, %arg1: i32) -> (i32, i32) {
    %c0_i32 = arith.constant 0 : i32
    %c0_i32_0 = arith.constant 0 : i32
    return %c0_i32, %arg1 : i32, i32
  }
  func.func @transform_1(%arg0: i32, %arg1: i32) -> (i32, i32) {
    %c0_i32 = arith.constant 0 : i32
    return %arg1, %arg0 : i32, i32
  }
  func.func @transform_2(%arg0: i32, %arg1: i32) -> (i32, i32) {
    %c0_i32 = arith.constant 0 : i32
    %c0_i32_0 = arith.constant 0 : i32
    return %c0_i32, %arg0 : i32, i32
  }
}

module attributes {stable_mosaic.version = 11 : i64} {
  func.func @_max9_kernel(%arg0: i32, %arg1: memref<128x128xbf16, #tpu.memory_space<vmem>>, %arg2: memref<128x128xbf16, #tpu.memory_space<vmem>>, %arg3: memref<128x128xbf16, #tpu.memory_space<vmem>>, %arg4: memref<128x128xbf16, #tpu.memory_space<vmem>>, %arg5: memref<128x128xbf16, #tpu.memory_space<vmem>>, %arg6: memref<128x128xbf16, #tpu.memory_space<vmem>>, %arg7: memref<128x128xbf16, #tpu.memory_space<vmem>>, %arg8: memref<128x128xbf16, #tpu.memory_space<vmem>>, %arg9: memref<128x128xbf16, #tpu.memory_space<vmem>>, %arg10: memref<128x128xbf16, #tpu.memory_space<vmem>>) attributes {dimension_semantics = [#tpu.dimension_semantics<parallel>], iteration_bounds = array<i64: 1>, scalar_prefetch = 0 : i64, scratch_operands = 0 : i64, tpu.core_type = #tpu.core_type<tc>, window_params = [{transform_indices = @transform_0, window_bounds = array<i64: 128, 128>}, {transform_indices = @transform_1, window_bounds = array<i64: 128, 128>}, {transform_indices = @transform_2, window_bounds = array<i64: 128, 128>}, {transform_indices = @transform_3, window_bounds = array<i64: 128, 128>}, {transform_indices = @transform_4, window_bounds = array<i64: 128, 128>}, {transform_indices = @transform_5, window_bounds = array<i64: 128, 128>}, {transform_indices = @transform_6, window_bounds = array<i64: 128, 128>}, {transform_indices = @transform_7, window_bounds = array<i64: 128, 128>}, {transform_indices = @transform_8, window_bounds = array<i64: 128, 128>}, {transform_indices = @transform_9, window_bounds = array<i64: 128, 128>}]} {
    %c0 = arith.constant 0 : index
    %c0_0 = arith.constant 0 : index
    %0 = vector.load %arg1[%c0, %c0_0] : memref<128x128xbf16, #tpu.memory_space<vmem>>, vector<128x128xbf16>
    %c0_1 = arith.constant 0 : index
    %c0_2 = arith.constant 0 : index
    %1 = vector.load %arg2[%c0_1, %c0_2] : memref<128x128xbf16, #tpu.memory_space<vmem>>, vector<128x128xbf16>
    %2 = arith.maximumf %0, %1 : vector<128x128xbf16>
    %c0_3 = arith.constant 0 : index
    %c0_4 = arith.constant 0 : index
    %3 = vector.load %arg3[%c0_3, %c0_4] : memref<128x128xbf16, #tpu.memory_space<vmem>>, vector<128x128xbf16>
    %4 = arith.maximumf %2, %3 : vector<128x128xbf16>
    %c0_5 = arith.constant 0 : index
    %c0_6 = arith.constant 0 : index
    %5 = vector.load %arg4[%c0_5, %c0_6] : memref<128x128xbf16, #tpu.memory_space<vmem>>, vector<128x128xbf16>
    %6 = arith.maximumf %4, %5 : vector<128x128xbf16>
    %c0_7 = arith.constant 0 : index
    %c0_8 = arith.constant 0 : index
    %7 = vector.load %arg5[%c0_7, %c0_8] : memref<128x128xbf16, #tpu.memory_space<vmem>>, vector<128x128xbf16>
    %8 = arith.maximumf %6, %7 : vector<128x128xbf16>
    %c0_9 = arith.constant 0 : index
    %c0_10 = arith.constant 0 : index
    %9 = vector.load %arg6[%c0_9, %c0_10] : memref<128x128xbf16, #tpu.memory_space<vmem>>, vector<128x128xbf16>
    %10 = arith.maximumf %8, %9 : vector<128x128xbf16>
    %c0_11 = arith.constant 0 : index
    %c0_12 = arith.constant 0 : index
    %11 = vector.load %arg7[%c0_11, %c0_12] : memref<128x128xbf16, #tpu.memory_space<vmem>>, vector<128x128xbf16>
    %12 = arith.maximumf %10, %11 : vector<128x128xbf16>
    %c0_13 = arith.constant 0 : index
    %c0_14 = arith.constant 0 : index
    %13 = vector.load %arg8[%c0_13, %c0_14] : memref<128x128xbf16, #tpu.memory_space<vmem>>, vector<128x128xbf16>
    %14 = arith.maximumf %12, %13 : vector<128x128xbf16>
    %c0_15 = arith.constant 0 : index
    %c0_16 = arith.constant 0 : index
    %15 = vector.load %arg9[%c0_15, %c0_16] : memref<128x128xbf16, #tpu.memory_space<vmem>>, vector<128x128xbf16>
    %16 = arith.maximumf %14, %15 : vector<128x128xbf16>
    %c0_17 = arith.constant 0 : index
    %c0_18 = arith.constant 0 : index
    %17 = vector.load %arg10[%c0_17, %c0_18] : memref<128x128xbf16, #tpu.memory_space<vmem>>, vector<128x128xbf16>
    tpu.vector_store %arg10[%c0_17, %c0_18], %16 {strides = array<i32>} : memref<128x128xbf16, #tpu.memory_space<vmem>>, vector<128x128xbf16>,
    return
  }
  func.func @transform_0(%arg0: i32) -> (i32, i32) {
    %c0_i32 = arith.constant 0 : i32
    %c0_i32_0 = arith.constant 0 : i32
    return %arg0, %c0_i32 : i32, i32
  }
  func.func @transform_1(%arg0: i32) -> (i32, i32) {
    %c0_i32 = arith.constant 0 : i32
    %c0_i32_0 = arith.constant 0 : i32
    return %arg0, %c0_i32 : i32, i32
  }
  func.func @transform_2(%arg0: i32) -> (i32, i32) {
    %c0_i32 = arith.constant 0 : i32
    %c0_i32_0 = arith.constant 0 : i32
    return %arg0, %c0_i32 : i32, i32
  }
  func.func @transform_3(%arg0: i32) -> (i32, i32) {
    %c0_i32 = arith.constant 0 : i32
    %c0_i32_0 = arith.constant 0 : i32
    return %arg0, %c0_i32 : i32, i32
  }
  func.func @transform_4(%arg0: i32) -> (i32, i32) {
    %c0_i32 = arith.constant 0 : i32
    %c0_i32_0 = arith.constant 0 : i32
    return %arg0, %c0_i32 : i32, i32
  }
  func.func @transform_5(%arg0: i32) -> (i32, i32) {
    %c0_i32 = arith.constant 0 : i32
    %c0_i32_0 = arith.constant 0 : i32
    return %arg0, %c0_i32 : i32, i32
  }
  func.func @transform_6(%arg0: i32) -> (i32, i32) {
    %c0_i32 = arith.constant 0 : i32
    %c0_i32_0 = arith.constant 0 : i32
    return %arg0, %c0_i32 : i32, i32
  }
  func.func @transform_7(%arg0: i32) -> (i32, i32) {
    %c0_i32 = arith.constant 0 : i32
    %c0_i32_0 = arith.constant 0 : i32
    return %arg0, %c0_i32 : i32, i32
  }
  func.func @transform_8(%arg0: i32) -> (i32, i32) {
    %c0_i32 = arith.constant 0 : i32
    %c0_i32_0 = arith.constant 0 : i32
    return %arg0, %c0_i32 : i32, i32
  }
  func.func @transform_9(%arg0: i32) -> (i32, i32) {
    %c0_i32 = arith.constant 0 : i32
    %c0_i32_0 = arith.constant 0 : i32
    return %arg0, %c0_i32 : i32, i32
  }
}

module attributes {stable_mosaic.version = 11 : i64} {
  func.func @_conv_bn_kernel(%arg0: i32, %arg1: i32, %arg2: memref<128x128xbf16, #tpu.memory_space<vmem>>, %arg3: memref<128x128xbf16, #tpu.memory_space<vmem>>, %arg4: memref<128x128xbf16, #tpu.memory_space<vmem>>, %arg5: memref<128x128xf32, #tpu.memory_space<vmem>>) attributes {dimension_semantics = [#tpu.dimension_semantics<parallel>, #tpu.dimension_semantics<arbitrary>], iteration_bounds = array<i64: 1, 9>, scalar_prefetch = 0 : i64, scratch_operands = 1 : i64, tpu.core_type = #tpu.core_type<tc>, window_params = [{transform_indices = @transform_0, window_bounds = array<i64: 128, 128>}, {transform_indices = @transform_1, window_bounds = array<i64: 128, 128>}, {transform_indices = @transform_2, window_bounds = array<i64: 128, 128>}]} {
    %c0_i32 = arith.constant 0 : i32
    %0 = arith.cmpi eq, %arg1, %c0_i32 : i32
    %1 = arith.extui %0 : i1 to i32
    %c0_i32_0 = arith.constant 0 : i32
    %2 = arith.cmpi ne, %1, %c0_i32_0 : i32
    scf.if %2 {
      %cst_9 = arith.constant 0.000000e+00 : f32
      %12 = vector.broadcast %cst_9 : f32 to vector<128x128xf32>
      %c0_10 = arith.constant 0 : index
      %c0_11 = arith.constant 0 : index
      %13 = vector.load %arg5[%c0_10, %c0_11] : memref<128x128xf32, #tpu.memory_space<vmem>>, vector<128x128xf32>
      tpu.vector_store %arg5[%c0_10, %c0_11], %12 {strides = array<i32>} : memref<128x128xf32, #tpu.memory_space<vmem>>, vector<128x128xf32>,
    } else {
    }
    %c0 = arith.constant 0 : index
    %c0_1 = arith.constant 0 : index
    %3 = vector.load %arg5[%c0, %c0_1] : memref<128x128xf32, #tpu.memory_space<vmem>>, vector<128x128xf32>
    %c0_2 = arith.constant 0 : index
    %c0_3 = arith.constant 0 : index
    %4 = vector.load %arg2[%c0_2, %c0_3] : memref<128x128xbf16, #tpu.memory_space<vmem>>, vector<128x128xbf16>
    %c0_4 = arith.constant 0 : index
    %c0_5 = arith.constant 0 : index
    %5 = vector.load %arg3[%c0_4, %c0_5] : memref<128x128xbf16, #tpu.memory_space<vmem>>, vector<128x128xbf16>
    %cst = arith.constant dense<0.000000e+00> : vector<128x128xf32>
    %6 = tpu.matmul %4, %5, %cst {dimension_numbers = #tpu.dot_dimension_numbers<[1], [0], [0], [1], [0, 0, 1, 1], [], []>} : vector<128x128xbf16>, vector<128x128xbf16>, vector<128x128xf32> -> vector<128x128xf32>
    %7 = arith.addf %3, %6 : vector<128x128xf32>
    %c0_6 = arith.constant 0 : index
    %c0_7 = arith.constant 0 : index
    %8 = vector.load %arg5[%c0_6, %c0_7] : memref<128x128xf32, #tpu.memory_space<vmem>>, vector<128x128xf32>
    tpu.vector_store %arg5[%c0_6, %c0_7], %7 {strides = array<i32>} : memref<128x128xf32, #tpu.memory_space<vmem>>, vector<128x128xf32>,
    %c8_i32 = arith.constant 8 : i32
    %9 = arith.cmpi eq, %arg1, %c8_i32 : i32
    %10 = arith.extui %9 : i1 to i32
    %c0_i32_8 = arith.constant 0 : i32
    %11 = arith.cmpi ne, %10, %c0_i32_8 : i32
    scf.if %11 {
      %c0_9 = arith.constant 0 : index
      %c0_10 = arith.constant 0 : index
      %12 = vector.load %arg5[%c0_9, %c0_10] : memref<128x128xf32, #tpu.memory_space<vmem>>, vector<128x128xf32>
      %cst_11 = arith.constant dense<0.000000e+00> : vector<128xf32>
      %13 = vector.multi_reduction <add>, %12, %cst_11 [0] : vector<128x128xf32> to vector<128xf32>
      %14 = vector.shape_cast %13 : vector<128xf32> to vector<1x128xf32>
      %cst_12 = arith.constant 7.812500e-03 : f32
      %15 = vector.broadcast %cst_12 : f32 to vector<1x128xf32>
      %16 = arith.mulf %14, %15 : vector<1x128xf32>
      %17 = arith.mulf %12, %12 : vector<128x128xf32>
      %cst_13 = arith.constant dense<0.000000e+00> : vector<128xf32>
      %18 = vector.multi_reduction <add>, %17, %cst_13 [0] : vector<128x128xf32> to vector<128xf32>
      %19 = vector.shape_cast %18 : vector<128xf32> to vector<1x128xf32>
      %cst_14 = arith.constant 7.812500e-03 : f32
      %20 = vector.broadcast %cst_14 : f32 to vector<1x128xf32>
      %21 = arith.mulf %19, %20 : vector<1x128xf32>
      %22 = arith.mulf %16, %16 : vector<1x128xf32>
      %23 = arith.subf %21, %22 : vector<1x128xf32>
      %cst_15 = arith.constant 0.000000e+00 : f32
      %24 = vector.broadcast %cst_15 : f32 to vector<1x128xf32>
      %25 = arith.maximumf %23, %24 : vector<1x128xf32>
      %26 = vector.broadcast %16 : vector<1x128xf32> to vector<128x128xf32>
      %27 = arith.subf %12, %26 : vector<128x128xf32>
      %cst_16 = arith.constant 9.99999974E-6 : f32
      %28 = vector.broadcast %cst_16 : f32 to vector<1x128xf32>
      %29 = arith.addf %25, %28 : vector<1x128xf32>
      %30 = math.rsqrt %29 : vector<1x128xf32>
      %31 = vector.broadcast %30 : vector<1x128xf32> to vector<128x128xf32>
      %32 = arith.mulf %27, %31 : vector<128x128xf32>
      %cst_17 = arith.constant 0.000000e+00 : f32
      %33 = vector.broadcast %cst_17 : f32 to vector<128x128xf32>
      %34 = arith.maximumf %32, %33 : vector<128x128xf32>
      %35 = arith.truncf %34 : vector<128x128xf32> to vector<128x128xbf16>
      %c0_18 = arith.constant 0 : index
      %c0_19 = arith.constant 0 : index
      %36 = vector.load %arg4[%c0_18, %c0_19] : memref<128x128xbf16, #tpu.memory_space<vmem>>, vector<128x128xbf16>
      tpu.vector_store %arg4[%c0_18, %c0_19], %35 {strides = array<i32>} : memref<128x128xbf16, #tpu.memory_space<vmem>>, vector<128x128xbf16>,
    } else {
    }
    return
  }
  func.func @transform_0(%arg0: i32, %arg1: i32) -> (i32, i32) {
    %c0_i32 = arith.constant 0 : i32
    %c0_i32_0 = arith.constant 0 : i32
    return %c0_i32, %arg1 : i32, i32
  }
  func.func @transform_1(%arg0: i32, %arg1: i32) -> (i32, i32) {
    %c0_i32 = arith.constant 0 : i32
    return %arg1, %arg0 : i32, i32
  }
  func.func @transform_2(%arg0: i32, %arg1: i32) -> (i32, i32) {
    %c0_i32 = arith.constant 0 : i32
    %c0_i32_0 = arith.constant 0 : i32
    return %c0_i32, %arg0 : i32, i32
  }
}

module attributes {stable_mosaic.version = 11 : i64} {
  func.func @_conv_bn_kernel(%arg0: i32, %arg1: i32, %arg2: memref<128x128xbf16, #tpu.memory_space<vmem>>, %arg3: memref<128x128xbf16, #tpu.memory_space<vmem>>, %arg4: memref<128x128xbf16, #tpu.memory_space<vmem>>, %arg5: memref<128x128xbf16, #tpu.memory_space<vmem>>, %arg6: memref<128x128xf32, #tpu.memory_space<vmem>>) attributes {dimension_semantics = [#tpu.dimension_semantics<parallel>, #tpu.dimension_semantics<arbitrary>], iteration_bounds = array<i64: 1, 9>, scalar_prefetch = 0 : i64, scratch_operands = 1 : i64, tpu.core_type = #tpu.core_type<tc>, window_params = [{transform_indices = @transform_0, window_bounds = array<i64: 128, 128>}, {transform_indices = @transform_1, window_bounds = array<i64: 128, 128>}, {transform_indices = @transform_2, window_bounds = array<i64: 128, 128>}, {transform_indices = @transform_3, window_bounds = array<i64: 128, 128>}]} {
    %c0_i32 = arith.constant 0 : i32
    %0 = arith.cmpi eq, %arg1, %c0_i32 : i32
    %1 = arith.extui %0 : i1 to i32
    %c0_i32_0 = arith.constant 0 : i32
    %2 = arith.cmpi ne, %1, %c0_i32_0 : i32
    scf.if %2 {
      %cst_9 = arith.constant 0.000000e+00 : f32
      %12 = vector.broadcast %cst_9 : f32 to vector<128x128xf32>
      %c0_10 = arith.constant 0 : index
      %c0_11 = arith.constant 0 : index
      %13 = vector.load %arg6[%c0_10, %c0_11] : memref<128x128xf32, #tpu.memory_space<vmem>>, vector<128x128xf32>
      tpu.vector_store %arg6[%c0_10, %c0_11], %12 {strides = array<i32>} : memref<128x128xf32, #tpu.memory_space<vmem>>, vector<128x128xf32>,
    } else {
    }
    %c0 = arith.constant 0 : index
    %c0_1 = arith.constant 0 : index
    %3 = vector.load %arg6[%c0, %c0_1] : memref<128x128xf32, #tpu.memory_space<vmem>>, vector<128x128xf32>
    %c0_2 = arith.constant 0 : index
    %c0_3 = arith.constant 0 : index
    %4 = vector.load %arg2[%c0_2, %c0_3] : memref<128x128xbf16, #tpu.memory_space<vmem>>, vector<128x128xbf16>
    %c0_4 = arith.constant 0 : index
    %c0_5 = arith.constant 0 : index
    %5 = vector.load %arg3[%c0_4, %c0_5] : memref<128x128xbf16, #tpu.memory_space<vmem>>, vector<128x128xbf16>
    %cst = arith.constant dense<0.000000e+00> : vector<128x128xf32>
    %6 = tpu.matmul %4, %5, %cst {dimension_numbers = #tpu.dot_dimension_numbers<[1], [0], [0], [1], [0, 0, 1, 1], [], []>} : vector<128x128xbf16>, vector<128x128xbf16>, vector<128x128xf32> -> vector<128x128xf32>
    %7 = arith.addf %3, %6 : vector<128x128xf32>
    %c0_6 = arith.constant 0 : index
    %c0_7 = arith.constant 0 : index
    %8 = vector.load %arg6[%c0_6, %c0_7] : memref<128x128xf32, #tpu.memory_space<vmem>>, vector<128x128xf32>
    tpu.vector_store %arg6[%c0_6, %c0_7], %7 {strides = array<i32>} : memref<128x128xf32, #tpu.memory_space<vmem>>, vector<128x128xf32>,
    %c8_i32 = arith.constant 8 : i32
    %9 = arith.cmpi eq, %arg1, %c8_i32 : i32
    %10 = arith.extui %9 : i1 to i32
    %c0_i32_8 = arith.constant 0 : i32
    %11 = arith.cmpi ne, %10, %c0_i32_8 : i32
    scf.if %11 {
      %c0_9 = arith.constant 0 : index
      %c0_10 = arith.constant 0 : index
      %12 = vector.load %arg6[%c0_9, %c0_10] : memref<128x128xf32, #tpu.memory_space<vmem>>, vector<128x128xf32>
      %cst_11 = arith.constant dense<0.000000e+00> : vector<128xf32>
      %13 = vector.multi_reduction <add>, %12, %cst_11 [0] : vector<128x128xf32> to vector<128xf32>
      %14 = vector.shape_cast %13 : vector<128xf32> to vector<1x128xf32>
      %cst_12 = arith.constant 7.812500e-03 : f32
      %15 = vector.broadcast %cst_12 : f32 to vector<1x128xf32>
      %16 = arith.mulf %14, %15 : vector<1x128xf32>
      %17 = arith.mulf %12, %12 : vector<128x128xf32>
      %cst_13 = arith.constant dense<0.000000e+00> : vector<128xf32>
      %18 = vector.multi_reduction <add>, %17, %cst_13 [0] : vector<128x128xf32> to vector<128xf32>
      %19 = vector.shape_cast %18 : vector<128xf32> to vector<1x128xf32>
      %cst_14 = arith.constant 7.812500e-03 : f32
      %20 = vector.broadcast %cst_14 : f32 to vector<1x128xf32>
      %21 = arith.mulf %19, %20 : vector<1x128xf32>
      %22 = arith.mulf %16, %16 : vector<1x128xf32>
      %23 = arith.subf %21, %22 : vector<1x128xf32>
      %cst_15 = arith.constant 0.000000e+00 : f32
      %24 = vector.broadcast %cst_15 : f32 to vector<1x128xf32>
      %25 = arith.maximumf %23, %24 : vector<1x128xf32>
      %26 = vector.broadcast %16 : vector<1x128xf32> to vector<128x128xf32>
      %27 = arith.subf %12, %26 : vector<128x128xf32>
      %cst_16 = arith.constant 9.99999974E-6 : f32
      %28 = vector.broadcast %cst_16 : f32 to vector<1x128xf32>
      %29 = arith.addf %25, %28 : vector<1x128xf32>
      %30 = math.rsqrt %29 : vector<1x128xf32>
      %31 = vector.broadcast %30 : vector<1x128xf32> to vector<128x128xf32>
      %32 = arith.mulf %27, %31 : vector<128x128xf32>
      %c0_17 = arith.constant 0 : index
      %c0_18 = arith.constant 0 : index
      %33 = vector.load %arg4[%c0_17, %c0_18] : memref<128x128xbf16, #tpu.memory_space<vmem>>, vector<128x128xbf16>
      %34 = arith.extf %33 : vector<128x128xbf16> to vector<128x128xf32>
      %35 = arith.addf %32, %34 : vector<128x128xf32>
      %cst_19 = arith.constant 0.000000e+00 : f32
      %36 = vector.broadcast %cst_19 : f32 to vector<128x128xf32>
      %37 = arith.maximumf %35, %36 : vector<128x128xf32>
      %38 = arith.truncf %37 : vector<128x128xf32> to vector<128x128xbf16>
      %c0_20 = arith.constant 0 : index
      %c0_21 = arith.constant 0 : index
      %39 = vector.load %arg5[%c0_20, %c0_21] : memref<128x128xbf16, #tpu.memory_space<vmem>>, vector<128x128xbf16>
      tpu.vector_store %arg5[%c0_20, %c0_21], %38 {strides = array<i32>} : memref<128x128xbf16, #tpu.memory_space<vmem>>, vector<128x128xbf16>,
    } else {
    }
    return
  }
  func.func @transform_0(%arg0: i32, %arg1: i32) -> (i32, i32) {
    %c0_i32 = arith.constant 0 : i32
    %c0_i32_0 = arith.constant 0 : i32
    return %c0_i32, %arg1 : i32, i32
  }
  func.func @transform_1(%arg0: i32, %arg1: i32) -> (i32, i32) {
    %c0_i32 = arith.constant 0 : i32
    return %arg1, %arg0 : i32, i32
  }
  func.func @transform_2(%arg0: i32, %arg1: i32) -> (i32, i32) {
    %c0_i32 = arith.constant 0 : i32
    %c0_i32_0 = arith.constant 0 : i32
    return %c0_i32, %arg0 : i32, i32
  }
  func.func @transform_3(%arg0: i32, %arg1: i32) -> (i32, i32) {
    %c0_i32 = arith.constant 0 : i32
    %c0_i32_0 = arith.constant 0 : i32
    return %c0_i32, %arg0 : i32, i32
  }
}

module attributes {stable_mosaic.version = 11 : i64} {
  func.func @_conv_bn_kernel(%arg0: i32, %arg1: i32, %arg2: memref<32x128xbf16, #tpu.memory_space<vmem>>, %arg3: memref<128x128xbf16, #tpu.memory_space<vmem>>, %arg4: memref<32x128xbf16, #tpu.memory_space<vmem>>, %arg5: memref<32x128xf32, #tpu.memory_space<vmem>>) attributes {dimension_semantics = [#tpu.dimension_semantics<parallel>, #tpu.dimension_semantics<arbitrary>], iteration_bounds = array<i64: 1, 9>, scalar_prefetch = 0 : i64, scratch_operands = 1 : i64, tpu.core_type = #tpu.core_type<tc>, window_params = [{transform_indices = @transform_0, window_bounds = array<i64: 32, 128>}, {transform_indices = @transform_1, window_bounds = array<i64: 128, 128>}, {transform_indices = @transform_2, window_bounds = array<i64: 32, 128>}]} {
    %c0_i32 = arith.constant 0 : i32
    %0 = arith.cmpi eq, %arg1, %c0_i32 : i32
    %1 = arith.extui %0 : i1 to i32
    %c0_i32_0 = arith.constant 0 : i32
    %2 = arith.cmpi ne, %1, %c0_i32_0 : i32
    scf.if %2 {
      %cst_9 = arith.constant 0.000000e+00 : f32
      %12 = vector.broadcast %cst_9 : f32 to vector<32x128xf32>
      %c0_10 = arith.constant 0 : index
      %c0_11 = arith.constant 0 : index
      %13 = vector.load %arg5[%c0_10, %c0_11] : memref<32x128xf32, #tpu.memory_space<vmem>>, vector<32x128xf32>
      tpu.vector_store %arg5[%c0_10, %c0_11], %12 {strides = array<i32>} : memref<32x128xf32, #tpu.memory_space<vmem>>, vector<32x128xf32>,
    } else {
    }
    %c0 = arith.constant 0 : index
    %c0_1 = arith.constant 0 : index
    %3 = vector.load %arg5[%c0, %c0_1] : memref<32x128xf32, #tpu.memory_space<vmem>>, vector<32x128xf32>
    %c0_2 = arith.constant 0 : index
    %c0_3 = arith.constant 0 : index
    %4 = vector.load %arg2[%c0_2, %c0_3] : memref<32x128xbf16, #tpu.memory_space<vmem>>, vector<32x128xbf16>
    %c0_4 = arith.constant 0 : index
    %c0_5 = arith.constant 0 : index
    %5 = vector.load %arg3[%c0_4, %c0_5] : memref<128x128xbf16, #tpu.memory_space<vmem>>, vector<128x128xbf16>
    %cst = arith.constant dense<0.000000e+00> : vector<32x128xf32>
    %6 = tpu.matmul %4, %5, %cst {dimension_numbers = #tpu.dot_dimension_numbers<[1], [0], [0], [1], [0, 0, 1, 1], [], []>} : vector<32x128xbf16>, vector<128x128xbf16>, vector<32x128xf32> -> vector<32x128xf32>
    %7 = arith.addf %3, %6 : vector<32x128xf32>
    %c0_6 = arith.constant 0 : index
    %c0_7 = arith.constant 0 : index
    %8 = vector.load %arg5[%c0_6, %c0_7] : memref<32x128xf32, #tpu.memory_space<vmem>>, vector<32x128xf32>
    tpu.vector_store %arg5[%c0_6, %c0_7], %7 {strides = array<i32>} : memref<32x128xf32, #tpu.memory_space<vmem>>, vector<32x128xf32>,
    %c8_i32 = arith.constant 8 : i32
    %9 = arith.cmpi eq, %arg1, %c8_i32 : i32
    %10 = arith.extui %9 : i1 to i32
    %c0_i32_8 = arith.constant 0 : i32
    %11 = arith.cmpi ne, %10, %c0_i32_8 : i32
    scf.if %11 {
      %c0_9 = arith.constant 0 : index
      %c0_10 = arith.constant 0 : index
      %12 = vector.load %arg5[%c0_9, %c0_10] : memref<32x128xf32, #tpu.memory_space<vmem>>, vector<32x128xf32>
      %cst_11 = arith.constant dense<0.000000e+00> : vector<128xf32>
      %13 = vector.multi_reduction <add>, %12, %cst_11 [0] : vector<32x128xf32> to vector<128xf32>
      %14 = vector.shape_cast %13 : vector<128xf32> to vector<1x128xf32>
      %cst_12 = arith.constant 3.125000e-02 : f32
      %15 = vector.broadcast %cst_12 : f32 to vector<1x128xf32>
      %16 = arith.mulf %14, %15 : vector<1x128xf32>
      %17 = arith.mulf %12, %12 : vector<32x128xf32>
      %cst_13 = arith.constant dense<0.000000e+00> : vector<128xf32>
      %18 = vector.multi_reduction <add>, %17, %cst_13 [0] : vector<32x128xf32> to vector<128xf32>
      %19 = vector.shape_cast %18 : vector<128xf32> to vector<1x128xf32>
      %cst_14 = arith.constant 3.125000e-02 : f32
      %20 = vector.broadcast %cst_14 : f32 to vector<1x128xf32>
      %21 = arith.mulf %19, %20 : vector<1x128xf32>
      %22 = arith.mulf %16, %16 : vector<1x128xf32>
      %23 = arith.subf %21, %22 : vector<1x128xf32>
      %cst_15 = arith.constant 0.000000e+00 : f32
      %24 = vector.broadcast %cst_15 : f32 to vector<1x128xf32>
      %25 = arith.maximumf %23, %24 : vector<1x128xf32>
      %26 = vector.broadcast %16 : vector<1x128xf32> to vector<32x128xf32>
      %27 = arith.subf %12, %26 : vector<32x128xf32>
      %cst_16 = arith.constant 9.99999974E-6 : f32
      %28 = vector.broadcast %cst_16 : f32 to vector<1x128xf32>
      %29 = arith.addf %25, %28 : vector<1x128xf32>
      %30 = math.rsqrt %29 : vector<1x128xf32>
      %31 = vector.broadcast %30 : vector<1x128xf32> to vector<32x128xf32>
      %32 = arith.mulf %27, %31 : vector<32x128xf32>
      %cst_17 = arith.constant 0.000000e+00 : f32
      %33 = vector.broadcast %cst_17 : f32 to vector<32x128xf32>
      %34 = arith.maximumf %32, %33 : vector<32x128xf32>
      %35 = arith.truncf %34 : vector<32x128xf32> to vector<32x128xbf16>
      %c0_18 = arith.constant 0 : index
      %c0_19 = arith.constant 0 : index
      %36 = vector.load %arg4[%c0_18, %c0_19] : memref<32x128xbf16, #tpu.memory_space<vmem>>, vector<32x128xbf16>
      tpu.vector_store %arg4[%c0_18, %c0_19], %35 {strides = array<i32>} : memref<32x128xbf16, #tpu.memory_space<vmem>>, vector<32x128xbf16>,
    } else {
    }
    return
  }
  func.func @transform_0(%arg0: i32, %arg1: i32) -> (i32, i32) {
    %c0_i32 = arith.constant 0 : i32
    %c0_i32_0 = arith.constant 0 : i32
    return %c0_i32, %arg1 : i32, i32
  }
  func.func @transform_1(%arg0: i32, %arg1: i32) -> (i32, i32) {
    %c0_i32 = arith.constant 0 : i32
    return %arg1, %arg0 : i32, i32
  }
  func.func @transform_2(%arg0: i32, %arg1: i32) -> (i32, i32) {
    %c0_i32 = arith.constant 0 : i32
    %c0_i32_0 = arith.constant 0 : i32
    return %c0_i32, %arg0 : i32, i32
  }
}

module attributes {stable_mosaic.version = 11 : i64} {
  func.func @_conv_bn_kernel(%arg0: i32, %arg1: i32, %arg2: memref<32x128xbf16, #tpu.memory_space<vmem>>, %arg3: memref<128x128xbf16, #tpu.memory_space<vmem>>, %arg4: memref<32x128xbf16, #tpu.memory_space<vmem>>, %arg5: memref<32x128xbf16, #tpu.memory_space<vmem>>, %arg6: memref<32x128xf32, #tpu.memory_space<vmem>>) attributes {dimension_semantics = [#tpu.dimension_semantics<parallel>, #tpu.dimension_semantics<arbitrary>], iteration_bounds = array<i64: 1, 9>, scalar_prefetch = 0 : i64, scratch_operands = 1 : i64, tpu.core_type = #tpu.core_type<tc>, window_params = [{transform_indices = @transform_0, window_bounds = array<i64: 32, 128>}, {transform_indices = @transform_1, window_bounds = array<i64: 128, 128>}, {transform_indices = @transform_2, window_bounds = array<i64: 32, 128>}, {transform_indices = @transform_3, window_bounds = array<i64: 32, 128>}]} {
    %c0_i32 = arith.constant 0 : i32
    %0 = arith.cmpi eq, %arg1, %c0_i32 : i32
    %1 = arith.extui %0 : i1 to i32
    %c0_i32_0 = arith.constant 0 : i32
    %2 = arith.cmpi ne, %1, %c0_i32_0 : i32
    scf.if %2 {
      %cst_9 = arith.constant 0.000000e+00 : f32
      %12 = vector.broadcast %cst_9 : f32 to vector<32x128xf32>
      %c0_10 = arith.constant 0 : index
      %c0_11 = arith.constant 0 : index
      %13 = vector.load %arg6[%c0_10, %c0_11] : memref<32x128xf32, #tpu.memory_space<vmem>>, vector<32x128xf32>
      tpu.vector_store %arg6[%c0_10, %c0_11], %12 {strides = array<i32>} : memref<32x128xf32, #tpu.memory_space<vmem>>, vector<32x128xf32>,
    } else {
    }
    %c0 = arith.constant 0 : index
    %c0_1 = arith.constant 0 : index
    %3 = vector.load %arg6[%c0, %c0_1] : memref<32x128xf32, #tpu.memory_space<vmem>>, vector<32x128xf32>
    %c0_2 = arith.constant 0 : index
    %c0_3 = arith.constant 0 : index
    %4 = vector.load %arg2[%c0_2, %c0_3] : memref<32x128xbf16, #tpu.memory_space<vmem>>, vector<32x128xbf16>
    %c0_4 = arith.constant 0 : index
    %c0_5 = arith.constant 0 : index
    %5 = vector.load %arg3[%c0_4, %c0_5] : memref<128x128xbf16, #tpu.memory_space<vmem>>, vector<128x128xbf16>
    %cst = arith.constant dense<0.000000e+00> : vector<32x128xf32>
    %6 = tpu.matmul %4, %5, %cst {dimension_numbers = #tpu.dot_dimension_numbers<[1], [0], [0], [1], [0, 0, 1, 1], [], []>} : vector<32x128xbf16>, vector<128x128xbf16>, vector<32x128xf32> -> vector<32x128xf32>
    %7 = arith.addf %3, %6 : vector<32x128xf32>
    %c0_6 = arith.constant 0 : index
    %c0_7 = arith.constant 0 : index
    %8 = vector.load %arg6[%c0_6, %c0_7] : memref<32x128xf32, #tpu.memory_space<vmem>>, vector<32x128xf32>
    tpu.vector_store %arg6[%c0_6, %c0_7], %7 {strides = array<i32>} : memref<32x128xf32, #tpu.memory_space<vmem>>, vector<32x128xf32>,
    %c8_i32 = arith.constant 8 : i32
    %9 = arith.cmpi eq, %arg1, %c8_i32 : i32
    %10 = arith.extui %9 : i1 to i32
    %c0_i32_8 = arith.constant 0 : i32
    %11 = arith.cmpi ne, %10, %c0_i32_8 : i32
    scf.if %11 {
      %c0_9 = arith.constant 0 : index
      %c0_10 = arith.constant 0 : index
      %12 = vector.load %arg6[%c0_9, %c0_10] : memref<32x128xf32, #tpu.memory_space<vmem>>, vector<32x128xf32>
      %cst_11 = arith.constant dense<0.000000e+00> : vector<128xf32>
      %13 = vector.multi_reduction <add>, %12, %cst_11 [0] : vector<32x128xf32> to vector<128xf32>
      %14 = vector.shape_cast %13 : vector<128xf32> to vector<1x128xf32>
      %cst_12 = arith.constant 3.125000e-02 : f32
      %15 = vector.broadcast %cst_12 : f32 to vector<1x128xf32>
      %16 = arith.mulf %14, %15 : vector<1x128xf32>
      %17 = arith.mulf %12, %12 : vector<32x128xf32>
      %cst_13 = arith.constant dense<0.000000e+00> : vector<128xf32>
      %18 = vector.multi_reduction <add>, %17, %cst_13 [0] : vector<32x128xf32> to vector<128xf32>
      %19 = vector.shape_cast %18 : vector<128xf32> to vector<1x128xf32>
      %cst_14 = arith.constant 3.125000e-02 : f32
      %20 = vector.broadcast %cst_14 : f32 to vector<1x128xf32>
      %21 = arith.mulf %19, %20 : vector<1x128xf32>
      %22 = arith.mulf %16, %16 : vector<1x128xf32>
      %23 = arith.subf %21, %22 : vector<1x128xf32>
      %cst_15 = arith.constant 0.000000e+00 : f32
      %24 = vector.broadcast %cst_15 : f32 to vector<1x128xf32>
      %25 = arith.maximumf %23, %24 : vector<1x128xf32>
      %26 = vector.broadcast %16 : vector<1x128xf32> to vector<32x128xf32>
      %27 = arith.subf %12, %26 : vector<32x128xf32>
      %cst_16 = arith.constant 9.99999974E-6 : f32
      %28 = vector.broadcast %cst_16 : f32 to vector<1x128xf32>
      %29 = arith.addf %25, %28 : vector<1x128xf32>
      %30 = math.rsqrt %29 : vector<1x128xf32>
      %31 = vector.broadcast %30 : vector<1x128xf32> to vector<32x128xf32>
      %32 = arith.mulf %27, %31 : vector<32x128xf32>
      %c0_17 = arith.constant 0 : index
      %c0_18 = arith.constant 0 : index
      %33 = vector.load %arg4[%c0_17, %c0_18] : memref<32x128xbf16, #tpu.memory_space<vmem>>, vector<32x128xbf16>
      %34 = arith.extf %33 : vector<32x128xbf16> to vector<32x128xf32>
      %35 = arith.addf %32, %34 : vector<32x128xf32>
      %cst_19 = arith.constant 0.000000e+00 : f32
      %36 = vector.broadcast %cst_19 : f32 to vector<32x128xf32>
      %37 = arith.maximumf %35, %36 : vector<32x128xf32>
      %38 = arith.truncf %37 : vector<32x128xf32> to vector<32x128xbf16>
      %c0_20 = arith.constant 0 : index
      %c0_21 = arith.constant 0 : index
      %39 = vector.load %arg5[%c0_20, %c0_21] : memref<32x128xbf16, #tpu.memory_space<vmem>>, vector<32x128xbf16>
      tpu.vector_store %arg5[%c0_20, %c0_21], %38 {strides = array<i32>} : memref<32x128xbf16, #tpu.memory_space<vmem>>, vector<32x128xbf16>,
    } else {
    }
    return
  }
  func.func @transform_0(%arg0: i32, %arg1: i32) -> (i32, i32) {
    %c0_i32 = arith.constant 0 : i32
    %c0_i32_0 = arith.constant 0 : i32
    return %c0_i32, %arg1 : i32, i32
  }
  func.func @transform_1(%arg0: i32, %arg1: i32) -> (i32, i32) {
    %c0_i32 = arith.constant 0 : i32
    return %arg1, %arg0 : i32, i32
  }
  func.func @transform_2(%arg0: i32, %arg1: i32) -> (i32, i32) {
    %c0_i32 = arith.constant 0 : i32
    %c0_i32_0 = arith.constant 0 : i32
    return %c0_i32, %arg0 : i32, i32
  }
  func.func @transform_3(%arg0: i32, %arg1: i32) -> (i32, i32) {
    %c0_i32 = arith.constant 0 : i32
    %c0_i32_0 = arith.constant 0 : i32
    return %c0_i32, %arg0 : i32, i32
  }
}

module attributes {stable_mosaic.version = 11 : i64} {
  func.func @_conv_bn_kernel(%arg0: i32, %arg1: i32, %arg2: memref<32x128xbf16, #tpu.memory_space<vmem>>, %arg3: memref<128x128xbf16, #tpu.memory_space<vmem>>, %arg4: memref<32x128xbf16, #tpu.memory_space<vmem>>, %arg5: memref<32x128xf32, #tpu.memory_space<vmem>>) attributes {dimension_semantics = [#tpu.dimension_semantics<parallel>, #tpu.dimension_semantics<arbitrary>], iteration_bounds = array<i64: 1, 1>, scalar_prefetch = 0 : i64, scratch_operands = 1 : i64, tpu.core_type = #tpu.core_type<tc>, window_params = [{transform_indices = @transform_0, window_bounds = array<i64: 32, 128>}, {transform_indices = @transform_1, window_bounds = array<i64: 128, 128>}, {transform_indices = @transform_2, window_bounds = array<i64: 32, 128>}]} {
    %c0_i32 = arith.constant 0 : i32
    %0 = arith.cmpi eq, %arg1, %c0_i32 : i32
    %1 = arith.extui %0 : i1 to i32
    %c0_i32_0 = arith.constant 0 : i32
    %2 = arith.cmpi ne, %1, %c0_i32_0 : i32
    scf.if %2 {
      %cst_10 = arith.constant 0.000000e+00 : f32
      %12 = vector.broadcast %cst_10 : f32 to vector<32x128xf32>
      %c0_11 = arith.constant 0 : index
      %c0_12 = arith.constant 0 : index
      %13 = vector.load %arg5[%c0_11, %c0_12] : memref<32x128xf32, #tpu.memory_space<vmem>>, vector<32x128xf32>
      tpu.vector_store %arg5[%c0_11, %c0_12], %12 {strides = array<i32>} : memref<32x128xf32, #tpu.memory_space<vmem>>, vector<32x128xf32>,
    } else {
    }
    %c0 = arith.constant 0 : index
    %c0_1 = arith.constant 0 : index
    %3 = vector.load %arg5[%c0, %c0_1] : memref<32x128xf32, #tpu.memory_space<vmem>>, vector<32x128xf32>
    %c0_2 = arith.constant 0 : index
    %c0_3 = arith.constant 0 : index
    %4 = vector.load %arg2[%c0_2, %c0_3] : memref<32x128xbf16, #tpu.memory_space<vmem>>, vector<32x128xbf16>
    %c0_4 = arith.constant 0 : index
    %c0_5 = arith.constant 0 : index
    %5 = vector.load %arg3[%c0_4, %c0_5] : memref<128x128xbf16, #tpu.memory_space<vmem>>, vector<128x128xbf16>
    %cst = arith.constant dense<0.000000e+00> : vector<32x128xf32>
    %6 = tpu.matmul %4, %5, %cst {dimension_numbers = #tpu.dot_dimension_numbers<[1], [0], [0], [1], [0, 0, 1, 1], [], []>} : vector<32x128xbf16>, vector<128x128xbf16>, vector<32x128xf32> -> vector<32x128xf32>
    %7 = arith.addf %3, %6 : vector<32x128xf32>
    %c0_6 = arith.constant 0 : index
    %c0_7 = arith.constant 0 : index
    %8 = vector.load %arg5[%c0_6, %c0_7] : memref<32x128xf32, #tpu.memory_space<vmem>>, vector<32x128xf32>
    tpu.vector_store %arg5[%c0_6, %c0_7], %7 {strides = array<i32>} : memref<32x128xf32, #tpu.memory_space<vmem>>, vector<32x128xf32>,
    %c0_i32_8 = arith.constant 0 : i32
    %9 = arith.cmpi eq, %arg1, %c0_i32_8 : i32
    %10 = arith.extui %9 : i1 to i32
    %c0_i32_9 = arith.constant 0 : i32
    %11 = arith.cmpi ne, %10, %c0_i32_9 : i32
    scf.if %11 {
      %c0_10 = arith.constant 0 : index
      %c0_11 = arith.constant 0 : index
      %12 = vector.load %arg5[%c0_10, %c0_11] : memref<32x128xf32, #tpu.memory_space<vmem>>, vector<32x128xf32>
      %cst_12 = arith.constant dense<0.000000e+00> : vector<128xf32>
      %13 = vector.multi_reduction <add>, %12, %cst_12 [0] : vector<32x128xf32> to vector<128xf32>
      %14 = vector.shape_cast %13 : vector<128xf32> to vector<1x128xf32>
      %cst_13 = arith.constant 3.125000e-02 : f32
      %15 = vector.broadcast %cst_13 : f32 to vector<1x128xf32>
      %16 = arith.mulf %14, %15 : vector<1x128xf32>
      %17 = arith.mulf %12, %12 : vector<32x128xf32>
      %cst_14 = arith.constant dense<0.000000e+00> : vector<128xf32>
      %18 = vector.multi_reduction <add>, %17, %cst_14 [0] : vector<32x128xf32> to vector<128xf32>
      %19 = vector.shape_cast %18 : vector<128xf32> to vector<1x128xf32>
      %cst_15 = arith.constant 3.125000e-02 : f32
      %20 = vector.broadcast %cst_15 : f32 to vector<1x128xf32>
      %21 = arith.mulf %19, %20 : vector<1x128xf32>
      %22 = arith.mulf %16, %16 : vector<1x128xf32>
      %23 = arith.subf %21, %22 : vector<1x128xf32>
      %cst_16 = arith.constant 0.000000e+00 : f32
      %24 = vector.broadcast %cst_16 : f32 to vector<1x128xf32>
      %25 = arith.maximumf %23, %24 : vector<1x128xf32>
      %26 = vector.broadcast %16 : vector<1x128xf32> to vector<32x128xf32>
      %27 = arith.subf %12, %26 : vector<32x128xf32>
      %cst_17 = arith.constant 9.99999974E-6 : f32
      %28 = vector.broadcast %cst_17 : f32 to vector<1x128xf32>
      %29 = arith.addf %25, %28 : vector<1x128xf32>
      %30 = math.rsqrt %29 : vector<1x128xf32>
      %31 = vector.broadcast %30 : vector<1x128xf32> to vector<32x128xf32>
      %32 = arith.mulf %27, %31 : vector<32x128xf32>
      %33 = arith.truncf %32 : vector<32x128xf32> to vector<32x128xbf16>
      %c0_18 = arith.constant 0 : index
      %c0_19 = arith.constant 0 : index
      %34 = vector.load %arg4[%c0_18, %c0_19] : memref<32x128xbf16, #tpu.memory_space<vmem>>, vector<32x128xbf16>
      tpu.vector_store %arg4[%c0_18, %c0_19], %33 {strides = array<i32>} : memref<32x128xbf16, #tpu.memory_space<vmem>>, vector<32x128xbf16>,
    } else {
    }
    return
  }
  func.func @transform_0(%arg0: i32, %arg1: i32) -> (i32, i32) {
    %c0_i32 = arith.constant 0 : i32
    %c0_i32_0 = arith.constant 0 : i32
    return %c0_i32, %arg1 : i32, i32
  }
  func.func @transform_1(%arg0: i32, %arg1: i32) -> (i32, i32) {
    %c0_i32 = arith.constant 0 : i32
    return %arg1, %arg0 : i32, i32
  }
  func.func @transform_2(%arg0: i32, %arg1: i32) -> (i32, i32) {
    %c0_i32 = arith.constant 0 : i32
    %c0_i32_0 = arith.constant 0 : i32
    return %c0_i32, %arg0 : i32, i32
  }
}

module attributes {stable_mosaic.version = 11 : i64} {
  func.func @_conv_bn_kernel(%arg0: i32, %arg1: i32, %arg2: memref<8x128xbf16, #tpu.memory_space<vmem>>, %arg3: memref<128x256xbf16, #tpu.memory_space<vmem>>, %arg4: memref<8x256xbf16, #tpu.memory_space<vmem>>, %arg5: memref<8x256xf32, #tpu.memory_space<vmem>>) attributes {dimension_semantics = [#tpu.dimension_semantics<parallel>, #tpu.dimension_semantics<arbitrary>], iteration_bounds = array<i64: 1, 9>, scalar_prefetch = 0 : i64, scratch_operands = 1 : i64, tpu.core_type = #tpu.core_type<tc>, window_params = [{transform_indices = @transform_0, window_bounds = array<i64: 8, 128>}, {transform_indices = @transform_1, window_bounds = array<i64: 128, 256>}, {transform_indices = @transform_2, window_bounds = array<i64: 8, 256>}]} {
    %c0_i32 = arith.constant 0 : i32
    %0 = arith.cmpi eq, %arg1, %c0_i32 : i32
    %1 = arith.extui %0 : i1 to i32
    %c0_i32_0 = arith.constant 0 : i32
    %2 = arith.cmpi ne, %1, %c0_i32_0 : i32
    scf.if %2 {
      %cst_9 = arith.constant 0.000000e+00 : f32
      %12 = vector.broadcast %cst_9 : f32 to vector<8x256xf32>
      %c0_10 = arith.constant 0 : index
      %c0_11 = arith.constant 0 : index
      %13 = vector.load %arg5[%c0_10, %c0_11] : memref<8x256xf32, #tpu.memory_space<vmem>>, vector<8x256xf32>
      tpu.vector_store %arg5[%c0_10, %c0_11], %12 {strides = array<i32>} : memref<8x256xf32, #tpu.memory_space<vmem>>, vector<8x256xf32>,
    } else {
    }
    %c0 = arith.constant 0 : index
    %c0_1 = arith.constant 0 : index
    %3 = vector.load %arg5[%c0, %c0_1] : memref<8x256xf32, #tpu.memory_space<vmem>>, vector<8x256xf32>
    %c0_2 = arith.constant 0 : index
    %c0_3 = arith.constant 0 : index
    %4 = vector.load %arg2[%c0_2, %c0_3] : memref<8x128xbf16, #tpu.memory_space<vmem>>, vector<8x128xbf16>
    %c0_4 = arith.constant 0 : index
    %c0_5 = arith.constant 0 : index
    %5 = vector.load %arg3[%c0_4, %c0_5] : memref<128x256xbf16, #tpu.memory_space<vmem>>, vector<128x256xbf16>
    %cst = arith.constant dense<0.000000e+00> : vector<8x256xf32>
    %6 = tpu.matmul %4, %5, %cst {dimension_numbers = #tpu.dot_dimension_numbers<[1], [0], [0], [1], [0, 0, 1, 1], [], []>} : vector<8x128xbf16>, vector<128x256xbf16>, vector<8x256xf32> -> vector<8x256xf32>
    %7 = arith.addf %3, %6 : vector<8x256xf32>
    %c0_6 = arith.constant 0 : index
    %c0_7 = arith.constant 0 : index
    %8 = vector.load %arg5[%c0_6, %c0_7] : memref<8x256xf32, #tpu.memory_space<vmem>>, vector<8x256xf32>
    tpu.vector_store %arg5[%c0_6, %c0_7], %7 {strides = array<i32>} : memref<8x256xf32, #tpu.memory_space<vmem>>, vector<8x256xf32>,
    %c8_i32 = arith.constant 8 : i32
    %9 = arith.cmpi eq, %arg1, %c8_i32 : i32
    %10 = arith.extui %9 : i1 to i32
    %c0_i32_8 = arith.constant 0 : i32
    %11 = arith.cmpi ne, %10, %c0_i32_8 : i32
    scf.if %11 {
      %c0_9 = arith.constant 0 : index
      %c0_10 = arith.constant 0 : index
      %12 = vector.load %arg5[%c0_9, %c0_10] : memref<8x256xf32, #tpu.memory_space<vmem>>, vector<8x256xf32>
      %cst_11 = arith.constant dense<0.000000e+00> : vector<256xf32>
      %13 = vector.multi_reduction <add>, %12, %cst_11 [0] : vector<8x256xf32> to vector<256xf32>
      %14 = vector.shape_cast %13 : vector<256xf32> to vector<1x256xf32>
      %cst_12 = arith.constant 1.250000e-01 : f32
      %15 = vector.broadcast %cst_12 : f32 to vector<1x256xf32>
      %16 = arith.mulf %14, %15 : vector<1x256xf32>
      %17 = arith.mulf %12, %12 : vector<8x256xf32>
      %cst_13 = arith.constant dense<0.000000e+00> : vector<256xf32>
      %18 = vector.multi_reduction <add>, %17, %cst_13 [0] : vector<8x256xf32> to vector<256xf32>
      %19 = vector.shape_cast %18 : vector<256xf32> to vector<1x256xf32>
      %cst_14 = arith.constant 1.250000e-01 : f32
      %20 = vector.broadcast %cst_14 : f32 to vector<1x256xf32>
      %21 = arith.mulf %19, %20 : vector<1x256xf32>
      %22 = arith.mulf %16, %16 : vector<1x256xf32>
      %23 = arith.subf %21, %22 : vector<1x256xf32>
      %cst_15 = arith.constant 0.000000e+00 : f32
      %24 = vector.broadcast %cst_15 : f32 to vector<1x256xf32>
      %25 = arith.maximumf %23, %24 : vector<1x256xf32>
      %26 = vector.broadcast %16 : vector<1x256xf32> to vector<8x256xf32>
      %27 = arith.subf %12, %26 : vector<8x256xf32>
      %cst_16 = arith.constant 9.99999974E-6 : f32
      %28 = vector.broadcast %cst_16 : f32 to vector<1x256xf32>
      %29 = arith.addf %25, %28 : vector<1x256xf32>
      %30 = math.rsqrt %29 : vector<1x256xf32>
      %31 = vector.broadcast %30 : vector<1x256xf32> to vector<8x256xf32>
      %32 = arith.mulf %27, %31 : vector<8x256xf32>
      %cst_17 = arith.constant 0.000000e+00 : f32
      %33 = vector.broadcast %cst_17 : f32 to vector<8x256xf32>
      %34 = arith.maximumf %32, %33 : vector<8x256xf32>
      %35 = arith.truncf %34 : vector<8x256xf32> to vector<8x256xbf16>
      %c0_18 = arith.constant 0 : index
      %c0_19 = arith.constant 0 : index
      %36 = vector.load %arg4[%c0_18, %c0_19] : memref<8x256xbf16, #tpu.memory_space<vmem>>, vector<8x256xbf16>
      tpu.vector_store %arg4[%c0_18, %c0_19], %35 {strides = array<i32>} : memref<8x256xbf16, #tpu.memory_space<vmem>>, vector<8x256xbf16>,
    } else {
    }
    return
  }
  func.func @transform_0(%arg0: i32, %arg1: i32) -> (i32, i32) {
    %c0_i32 = arith.constant 0 : i32
    %c0_i32_0 = arith.constant 0 : i32
    return %c0_i32, %arg1 : i32, i32
  }
  func.func @transform_1(%arg0: i32, %arg1: i32) -> (i32, i32) {
    %c0_i32 = arith.constant 0 : i32
    return %arg1, %arg0 : i32, i32
  }
  func.func @transform_2(%arg0: i32, %arg1: i32) -> (i32, i32) {
    %c0_i32 = arith.constant 0 : i32
    %c0_i32_0 = arith.constant 0 : i32
    return %c0_i32, %arg0 : i32, i32
  }
}

module attributes {stable_mosaic.version = 11 : i64} {
  func.func @_conv_bn_kernel(%arg0: i32, %arg1: i32, %arg2: memref<8x256xbf16, #tpu.memory_space<vmem>>, %arg3: memref<256x256xbf16, #tpu.memory_space<vmem>>, %arg4: memref<8x256xbf16, #tpu.memory_space<vmem>>, %arg5: memref<8x256xbf16, #tpu.memory_space<vmem>>, %arg6: memref<8x256xf32, #tpu.memory_space<vmem>>) attributes {dimension_semantics = [#tpu.dimension_semantics<parallel>, #tpu.dimension_semantics<arbitrary>], iteration_bounds = array<i64: 1, 9>, scalar_prefetch = 0 : i64, scratch_operands = 1 : i64, tpu.core_type = #tpu.core_type<tc>, window_params = [{transform_indices = @transform_0, window_bounds = array<i64: 8, 256>}, {transform_indices = @transform_1, window_bounds = array<i64: 256, 256>}, {transform_indices = @transform_2, window_bounds = array<i64: 8, 256>}, {transform_indices = @transform_3, window_bounds = array<i64: 8, 256>}]} {
    %c0_i32 = arith.constant 0 : i32
    %0 = arith.cmpi eq, %arg1, %c0_i32 : i32
    %1 = arith.extui %0 : i1 to i32
    %c0_i32_0 = arith.constant 0 : i32
    %2 = arith.cmpi ne, %1, %c0_i32_0 : i32
    scf.if %2 {
      %cst_9 = arith.constant 0.000000e+00 : f32
      %12 = vector.broadcast %cst_9 : f32 to vector<8x256xf32>
      %c0_10 = arith.constant 0 : index
      %c0_11 = arith.constant 0 : index
      %13 = vector.load %arg6[%c0_10, %c0_11] : memref<8x256xf32, #tpu.memory_space<vmem>>, vector<8x256xf32>
      tpu.vector_store %arg6[%c0_10, %c0_11], %12 {strides = array<i32>} : memref<8x256xf32, #tpu.memory_space<vmem>>, vector<8x256xf32>,
    } else {
    }
    %c0 = arith.constant 0 : index
    %c0_1 = arith.constant 0 : index
    %3 = vector.load %arg6[%c0, %c0_1] : memref<8x256xf32, #tpu.memory_space<vmem>>, vector<8x256xf32>
    %c0_2 = arith.constant 0 : index
    %c0_3 = arith.constant 0 : index
    %4 = vector.load %arg2[%c0_2, %c0_3] : memref<8x256xbf16, #tpu.memory_space<vmem>>, vector<8x256xbf16>
    %c0_4 = arith.constant 0 : index
    %c0_5 = arith.constant 0 : index
    %5 = vector.load %arg3[%c0_4, %c0_5] : memref<256x256xbf16, #tpu.memory_space<vmem>>, vector<256x256xbf16>
    %cst = arith.constant dense<0.000000e+00> : vector<8x256xf32>
    %6 = tpu.matmul %4, %5, %cst {dimension_numbers = #tpu.dot_dimension_numbers<[1], [0], [0], [1], [0, 0, 1, 1], [], []>} : vector<8x256xbf16>, vector<256x256xbf16>, vector<8x256xf32> -> vector<8x256xf32>
    %7 = arith.addf %3, %6 : vector<8x256xf32>
    %c0_6 = arith.constant 0 : index
    %c0_7 = arith.constant 0 : index
    %8 = vector.load %arg6[%c0_6, %c0_7] : memref<8x256xf32, #tpu.memory_space<vmem>>, vector<8x256xf32>
    tpu.vector_store %arg6[%c0_6, %c0_7], %7 {strides = array<i32>} : memref<8x256xf32, #tpu.memory_space<vmem>>, vector<8x256xf32>,
    %c8_i32 = arith.constant 8 : i32
    %9 = arith.cmpi eq, %arg1, %c8_i32 : i32
    %10 = arith.extui %9 : i1 to i32
    %c0_i32_8 = arith.constant 0 : i32
    %11 = arith.cmpi ne, %10, %c0_i32_8 : i32
    scf.if %11 {
      %c0_9 = arith.constant 0 : index
      %c0_10 = arith.constant 0 : index
      %12 = vector.load %arg6[%c0_9, %c0_10] : memref<8x256xf32, #tpu.memory_space<vmem>>, vector<8x256xf32>
      %cst_11 = arith.constant dense<0.000000e+00> : vector<256xf32>
      %13 = vector.multi_reduction <add>, %12, %cst_11 [0] : vector<8x256xf32> to vector<256xf32>
      %14 = vector.shape_cast %13 : vector<256xf32> to vector<1x256xf32>
      %cst_12 = arith.constant 1.250000e-01 : f32
      %15 = vector.broadcast %cst_12 : f32 to vector<1x256xf32>
      %16 = arith.mulf %14, %15 : vector<1x256xf32>
      %17 = arith.mulf %12, %12 : vector<8x256xf32>
      %cst_13 = arith.constant dense<0.000000e+00> : vector<256xf32>
      %18 = vector.multi_reduction <add>, %17, %cst_13 [0] : vector<8x256xf32> to vector<256xf32>
      %19 = vector.shape_cast %18 : vector<256xf32> to vector<1x256xf32>
      %cst_14 = arith.constant 1.250000e-01 : f32
      %20 = vector.broadcast %cst_14 : f32 to vector<1x256xf32>
      %21 = arith.mulf %19, %20 : vector<1x256xf32>
      %22 = arith.mulf %16, %16 : vector<1x256xf32>
      %23 = arith.subf %21, %22 : vector<1x256xf32>
      %cst_15 = arith.constant 0.000000e+00 : f32
      %24 = vector.broadcast %cst_15 : f32 to vector<1x256xf32>
      %25 = arith.maximumf %23, %24 : vector<1x256xf32>
      %26 = vector.broadcast %16 : vector<1x256xf32> to vector<8x256xf32>
      %27 = arith.subf %12, %26 : vector<8x256xf32>
      %cst_16 = arith.constant 9.99999974E-6 : f32
      %28 = vector.broadcast %cst_16 : f32 to vector<1x256xf32>
      %29 = arith.addf %25, %28 : vector<1x256xf32>
      %30 = math.rsqrt %29 : vector<1x256xf32>
      %31 = vector.broadcast %30 : vector<1x256xf32> to vector<8x256xf32>
      %32 = arith.mulf %27, %31 : vector<8x256xf32>
      %c0_17 = arith.constant 0 : index
      %c0_18 = arith.constant 0 : index
      %33 = vector.load %arg4[%c0_17, %c0_18] : memref<8x256xbf16, #tpu.memory_space<vmem>>, vector<8x256xbf16>
      %34 = arith.extf %33 : vector<8x256xbf16> to vector<8x256xf32>
      %35 = arith.addf %32, %34 : vector<8x256xf32>
      %cst_19 = arith.constant 0.000000e+00 : f32
      %36 = vector.broadcast %cst_19 : f32 to vector<8x256xf32>
      %37 = arith.maximumf %35, %36 : vector<8x256xf32>
      %38 = arith.truncf %37 : vector<8x256xf32> to vector<8x256xbf16>
      %c0_20 = arith.constant 0 : index
      %c0_21 = arith.constant 0 : index
      %39 = vector.load %arg5[%c0_20, %c0_21] : memref<8x256xbf16, #tpu.memory_space<vmem>>, vector<8x256xbf16>
      tpu.vector_store %arg5[%c0_20, %c0_21], %38 {strides = array<i32>} : memref<8x256xbf16, #tpu.memory_space<vmem>>, vector<8x256xbf16>,
    } else {
    }
    return
  }
  func.func @transform_0(%arg0: i32, %arg1: i32) -> (i32, i32) {
    %c0_i32 = arith.constant 0 : i32
    %c0_i32_0 = arith.constant 0 : i32
    return %c0_i32, %arg1 : i32, i32
  }
  func.func @transform_1(%arg0: i32, %arg1: i32) -> (i32, i32) {
    %c0_i32 = arith.constant 0 : i32
    return %arg1, %arg0 : i32, i32
  }
  func.func @transform_2(%arg0: i32, %arg1: i32) -> (i32, i32) {
    %c0_i32 = arith.constant 0 : i32
    %c0_i32_0 = arith.constant 0 : i32
    return %c0_i32, %arg0 : i32, i32
  }
  func.func @transform_3(%arg0: i32, %arg1: i32) -> (i32, i32) {
    %c0_i32 = arith.constant 0 : i32
    %c0_i32_0 = arith.constant 0 : i32
    return %c0_i32, %arg0 : i32, i32
  }
}

module attributes {stable_mosaic.version = 11 : i64} {
  func.func @_conv_bn_kernel(%arg0: i32, %arg1: i32, %arg2: memref<8x128xbf16, #tpu.memory_space<vmem>>, %arg3: memref<128x256xbf16, #tpu.memory_space<vmem>>, %arg4: memref<8x256xbf16, #tpu.memory_space<vmem>>, %arg5: memref<8x256xf32, #tpu.memory_space<vmem>>) attributes {dimension_semantics = [#tpu.dimension_semantics<parallel>, #tpu.dimension_semantics<arbitrary>], iteration_bounds = array<i64: 1, 1>, scalar_prefetch = 0 : i64, scratch_operands = 1 : i64, tpu.core_type = #tpu.core_type<tc>, window_params = [{transform_indices = @transform_0, window_bounds = array<i64: 8, 128>}, {transform_indices = @transform_1, window_bounds = array<i64: 128, 256>}, {transform_indices = @transform_2, window_bounds = array<i64: 8, 256>}]} {
    %c0_i32 = arith.constant 0 : i32
    %0 = arith.cmpi eq, %arg1, %c0_i32 : i32
    %1 = arith.extui %0 : i1 to i32
    %c0_i32_0 = arith.constant 0 : i32
    %2 = arith.cmpi ne, %1, %c0_i32_0 : i32
    scf.if %2 {
      %cst_10 = arith.constant 0.000000e+00 : f32
      %12 = vector.broadcast %cst_10 : f32 to vector<8x256xf32>
      %c0_11 = arith.constant 0 : index
      %c0_12 = arith.constant 0 : index
      %13 = vector.load %arg5[%c0_11, %c0_12] : memref<8x256xf32, #tpu.memory_space<vmem>>, vector<8x256xf32>
      tpu.vector_store %arg5[%c0_11, %c0_12], %12 {strides = array<i32>} : memref<8x256xf32, #tpu.memory_space<vmem>>, vector<8x256xf32>,
    } else {
    }
    %c0 = arith.constant 0 : index
    %c0_1 = arith.constant 0 : index
    %3 = vector.load %arg5[%c0, %c0_1] : memref<8x256xf32, #tpu.memory_space<vmem>>, vector<8x256xf32>
    %c0_2 = arith.constant 0 : index
    %c0_3 = arith.constant 0 : index
    %4 = vector.load %arg2[%c0_2, %c0_3] : memref<8x128xbf16, #tpu.memory_space<vmem>>, vector<8x128xbf16>
    %c0_4 = arith.constant 0 : index
    %c0_5 = arith.constant 0 : index
    %5 = vector.load %arg3[%c0_4, %c0_5] : memref<128x256xbf16, #tpu.memory_space<vmem>>, vector<128x256xbf16>
    %cst = arith.constant dense<0.000000e+00> : vector<8x256xf32>
    %6 = tpu.matmul %4, %5, %cst {dimension_numbers = #tpu.dot_dimension_numbers<[1], [0], [0], [1], [0, 0, 1, 1], [], []>} : vector<8x128xbf16>, vector<128x256xbf16>, vector<8x256xf32> -> vector<8x256xf32>
    %7 = arith.addf %3, %6 : vector<8x256xf32>
    %c0_6 = arith.constant 0 : index
    %c0_7 = arith.constant 0 : index
    %8 = vector.load %arg5[%c0_6, %c0_7] : memref<8x256xf32, #tpu.memory_space<vmem>>, vector<8x256xf32>
    tpu.vector_store %arg5[%c0_6, %c0_7], %7 {strides = array<i32>} : memref<8x256xf32, #tpu.memory_space<vmem>>, vector<8x256xf32>,
    %c0_i32_8 = arith.constant 0 : i32
    %9 = arith.cmpi eq, %arg1, %c0_i32_8 : i32
    %10 = arith.extui %9 : i1 to i32
    %c0_i32_9 = arith.constant 0 : i32
    %11 = arith.cmpi ne, %10, %c0_i32_9 : i32
    scf.if %11 {
      %c0_10 = arith.constant 0 : index
      %c0_11 = arith.constant 0 : index
      %12 = vector.load %arg5[%c0_10, %c0_11] : memref<8x256xf32, #tpu.memory_space<vmem>>, vector<8x256xf32>
      %cst_12 = arith.constant dense<0.000000e+00> : vector<256xf32>
      %13 = vector.multi_reduction <add>, %12, %cst_12 [0] : vector<8x256xf32> to vector<256xf32>
      %14 = vector.shape_cast %13 : vector<256xf32> to vector<1x256xf32>
      %cst_13 = arith.constant 1.250000e-01 : f32
      %15 = vector.broadcast %cst_13 : f32 to vector<1x256xf32>
      %16 = arith.mulf %14, %15 : vector<1x256xf32>
      %17 = arith.mulf %12, %12 : vector<8x256xf32>
      %cst_14 = arith.constant dense<0.000000e+00> : vector<256xf32>
      %18 = vector.multi_reduction <add>, %17, %cst_14 [0] : vector<8x256xf32> to vector<256xf32>
      %19 = vector.shape_cast %18 : vector<256xf32> to vector<1x256xf32>
      %cst_15 = arith.constant 1.250000e-01 : f32
      %20 = vector.broadcast %cst_15 : f32 to vector<1x256xf32>
      %21 = arith.mulf %19, %20 : vector<1x256xf32>
      %22 = arith.mulf %16, %16 : vector<1x256xf32>
      %23 = arith.subf %21, %22 : vector<1x256xf32>
      %cst_16 = arith.constant 0.000000e+00 : f32
      %24 = vector.broadcast %cst_16 : f32 to vector<1x256xf32>
      %25 = arith.maximumf %23, %24 : vector<1x256xf32>
      %26 = vector.broadcast %16 : vector<1x256xf32> to vector<8x256xf32>
      %27 = arith.subf %12, %26 : vector<8x256xf32>
      %cst_17 = arith.constant 9.99999974E-6 : f32
      %28 = vector.broadcast %cst_17 : f32 to vector<1x256xf32>
      %29 = arith.addf %25, %28 : vector<1x256xf32>
      %30 = math.rsqrt %29 : vector<1x256xf32>
      %31 = vector.broadcast %30 : vector<1x256xf32> to vector<8x256xf32>
      %32 = arith.mulf %27, %31 : vector<8x256xf32>
      %33 = arith.truncf %32 : vector<8x256xf32> to vector<8x256xbf16>
      %c0_18 = arith.constant 0 : index
      %c0_19 = arith.constant 0 : index
      %34 = vector.load %arg4[%c0_18, %c0_19] : memref<8x256xbf16, #tpu.memory_space<vmem>>, vector<8x256xbf16>
      tpu.vector_store %arg4[%c0_18, %c0_19], %33 {strides = array<i32>} : memref<8x256xbf16, #tpu.memory_space<vmem>>, vector<8x256xbf16>,
    } else {
    }
    return
  }
  func.func @transform_0(%arg0: i32, %arg1: i32) -> (i32, i32) {
    %c0_i32 = arith.constant 0 : i32
    %c0_i32_0 = arith.constant 0 : i32
    return %c0_i32, %arg1 : i32, i32
  }
  func.func @transform_1(%arg0: i32, %arg1: i32) -> (i32, i32) {
    %c0_i32 = arith.constant 0 : i32
    return %arg1, %arg0 : i32, i32
  }
  func.func @transform_2(%arg0: i32, %arg1: i32) -> (i32, i32) {
    %c0_i32 = arith.constant 0 : i32
    %c0_i32_0 = arith.constant 0 : i32
    return %c0_i32, %arg0 : i32, i32
  }
}

module attributes {stable_mosaic.version = 11 : i64} {
  func.func @_conv_bn_kernel(%arg0: i32, %arg1: i32, %arg2: memref<8x256xbf16, #tpu.memory_space<vmem>>, %arg3: memref<256x256xbf16, #tpu.memory_space<vmem>>, %arg4: memref<8x256xbf16, #tpu.memory_space<vmem>>, %arg5: memref<8x256xf32, #tpu.memory_space<vmem>>) attributes {dimension_semantics = [#tpu.dimension_semantics<parallel>, #tpu.dimension_semantics<arbitrary>], iteration_bounds = array<i64: 2, 9>, scalar_prefetch = 0 : i64, scratch_operands = 1 : i64, tpu.core_type = #tpu.core_type<tc>, window_params = [{transform_indices = @transform_0, window_bounds = array<i64: 8, 256>}, {transform_indices = @transform_1, window_bounds = array<i64: 256, 256>}, {transform_indices = @transform_2, window_bounds = array<i64: 8, 256>}]} {
    %c0_i32 = arith.constant 0 : i32
    %0 = arith.cmpi eq, %arg1, %c0_i32 : i32
    %1 = arith.extui %0 : i1 to i32
    %c0_i32_0 = arith.constant 0 : i32
    %2 = arith.cmpi ne, %1, %c0_i32_0 : i32
    scf.if %2 {
      %cst_9 = arith.constant 0.000000e+00 : f32
      %12 = vector.broadcast %cst_9 : f32 to vector<8x256xf32>
      %c0_10 = arith.constant 0 : index
      %c0_11 = arith.constant 0 : index
      %13 = vector.load %arg5[%c0_10, %c0_11] : memref<8x256xf32, #tpu.memory_space<vmem>>, vector<8x256xf32>
      tpu.vector_store %arg5[%c0_10, %c0_11], %12 {strides = array<i32>} : memref<8x256xf32, #tpu.memory_space<vmem>>, vector<8x256xf32>,
    } else {
    }
    %c0 = arith.constant 0 : index
    %c0_1 = arith.constant 0 : index
    %3 = vector.load %arg5[%c0, %c0_1] : memref<8x256xf32, #tpu.memory_space<vmem>>, vector<8x256xf32>
    %c0_2 = arith.constant 0 : index
    %c0_3 = arith.constant 0 : index
    %4 = vector.load %arg2[%c0_2, %c0_3] : memref<8x256xbf16, #tpu.memory_space<vmem>>, vector<8x256xbf16>
    %c0_4 = arith.constant 0 : index
    %c0_5 = arith.constant 0 : index
    %5 = vector.load %arg3[%c0_4, %c0_5] : memref<256x256xbf16, #tpu.memory_space<vmem>>, vector<256x256xbf16>
    %cst = arith.constant dense<0.000000e+00> : vector<8x256xf32>
    %6 = tpu.matmul %4, %5, %cst {dimension_numbers = #tpu.dot_dimension_numbers<[1], [0], [0], [1], [0, 0, 1, 1], [], []>} : vector<8x256xbf16>, vector<256x256xbf16>, vector<8x256xf32> -> vector<8x256xf32>
    %7 = arith.addf %3, %6 : vector<8x256xf32>
    %c0_6 = arith.constant 0 : index
    %c0_7 = arith.constant 0 : index
    %8 = vector.load %arg5[%c0_6, %c0_7] : memref<8x256xf32, #tpu.memory_space<vmem>>, vector<8x256xf32>
    tpu.vector_store %arg5[%c0_6, %c0_7], %7 {strides = array<i32>} : memref<8x256xf32, #tpu.memory_space<vmem>>, vector<8x256xf32>,
    %c8_i32 = arith.constant 8 : i32
    %9 = arith.cmpi eq, %arg1, %c8_i32 : i32
    %10 = arith.extui %9 : i1 to i32
    %c0_i32_8 = arith.constant 0 : i32
    %11 = arith.cmpi ne, %10, %c0_i32_8 : i32
    scf.if %11 {
      %c0_9 = arith.constant 0 : index
      %c0_10 = arith.constant 0 : index
      %12 = vector.load %arg5[%c0_9, %c0_10] : memref<8x256xf32, #tpu.memory_space<vmem>>, vector<8x256xf32>
      %cst_11 = arith.constant dense<0.000000e+00> : vector<256xf32>
      %13 = vector.multi_reduction <add>, %12, %cst_11 [0] : vector<8x256xf32> to vector<256xf32>
      %14 = vector.shape_cast %13 : vector<256xf32> to vector<1x256xf32>
      %cst_12 = arith.constant 5.000000e-01 : f32
      %15 = vector.broadcast %cst_12 : f32 to vector<1x256xf32>
      %16 = arith.mulf %14, %15 : vector<1x256xf32>
      %17 = arith.mulf %12, %12 : vector<8x256xf32>
      %cst_13 = arith.constant dense<0.000000e+00> : vector<256xf32>
      %18 = vector.multi_reduction <add>, %17, %cst_13 [0] : vector<8x256xf32> to vector<256xf32>
      %19 = vector.shape_cast %18 : vector<256xf32> to vector<1x256xf32>
      %cst_14 = arith.constant 5.000000e-01 : f32
      %20 = vector.broadcast %cst_14 : f32 to vector<1x256xf32>
      %21 = arith.mulf %19, %20 : vector<1x256xf32>
      %22 = arith.mulf %16, %16 : vector<1x256xf32>
      %23 = arith.subf %21, %22 : vector<1x256xf32>
      %cst_15 = arith.constant 0.000000e+00 : f32
      %24 = vector.broadcast %cst_15 : f32 to vector<1x256xf32>
      %25 = arith.maximumf %23, %24 : vector<1x256xf32>
      %26 = vector.broadcast %16 : vector<1x256xf32> to vector<8x256xf32>
      %27 = arith.subf %12, %26 : vector<8x256xf32>
      %cst_16 = arith.constant 9.99999974E-6 : f32
      %28 = vector.broadcast %cst_16 : f32 to vector<1x256xf32>
      %29 = arith.addf %25, %28 : vector<1x256xf32>
      %30 = math.rsqrt %29 : vector<1x256xf32>
      %31 = vector.broadcast %30 : vector<1x256xf32> to vector<8x256xf32>
      %32 = arith.mulf %27, %31 : vector<8x256xf32>
      %cst_17 = arith.constant 0.000000e+00 : f32
      %33 = vector.broadcast %cst_17 : f32 to vector<8x256xf32>
      %34 = arith.maximumf %32, %33 : vector<8x256xf32>
      %35 = arith.truncf %34 : vector<8x256xf32> to vector<8x256xbf16>
      %c0_18 = arith.constant 0 : index
      %c0_19 = arith.constant 0 : index
      %36 = vector.load %arg4[%c0_18, %c0_19] : memref<8x256xbf16, #tpu.memory_space<vmem>>, vector<8x256xbf16>
      tpu.vector_store %arg4[%c0_18, %c0_19], %35 {strides = array<i32>} : memref<8x256xbf16, #tpu.memory_space<vmem>>, vector<8x256xbf16>,
    } else {
    }
    return
  }
  func.func @transform_0(%arg0: i32, %arg1: i32) -> (i32, i32) {
    %c0_i32 = arith.constant 0 : i32
    %c0_i32_0 = arith.constant 0 : i32
    return %c0_i32, %arg1 : i32, i32
  }
  func.func @transform_1(%arg0: i32, %arg1: i32) -> (i32, i32) {
    %c0_i32 = arith.constant 0 : i32
    return %arg1, %arg0 : i32, i32
  }
  func.func @transform_2(%arg0: i32, %arg1: i32) -> (i32, i32) {
    %c0_i32 = arith.constant 0 : i32
    %c0_i32_0 = arith.constant 0 : i32
    return %c0_i32, %arg0 : i32, i32
  }
}

module attributes {stable_mosaic.version = 11 : i64} {
  func.func @_conv_bn_kernel(%arg0: i32, %arg1: i32, %arg2: memref<8x256xbf16, #tpu.memory_space<vmem>>, %arg3: memref<256x256xbf16, #tpu.memory_space<vmem>>, %arg4: memref<8x256xbf16, #tpu.memory_space<vmem>>, %arg5: memref<8x256xf32, #tpu.memory_space<vmem>>) attributes {dimension_semantics = [#tpu.dimension_semantics<parallel>, #tpu.dimension_semantics<arbitrary>], iteration_bounds = array<i64: 2, 1>, scalar_prefetch = 0 : i64, scratch_operands = 1 : i64, tpu.core_type = #tpu.core_type<tc>, window_params = [{transform_indices = @transform_0, window_bounds = array<i64: 8, 256>}, {transform_indices = @transform_1, window_bounds = array<i64: 256, 256>}, {transform_indices = @transform_2, window_bounds = array<i64: 8, 256>}]} {
    %c0_i32 = arith.constant 0 : i32
    %0 = arith.cmpi eq, %arg1, %c0_i32 : i32
    %1 = arith.extui %0 : i1 to i32
    %c0_i32_0 = arith.constant 0 : i32
    %2 = arith.cmpi ne, %1, %c0_i32_0 : i32
    scf.if %2 {
      %cst_10 = arith.constant 0.000000e+00 : f32
      %12 = vector.broadcast %cst_10 : f32 to vector<8x256xf32>
      %c0_11 = arith.constant 0 : index
      %c0_12 = arith.constant 0 : index
      %13 = vector.load %arg5[%c0_11, %c0_12] : memref<8x256xf32, #tpu.memory_space<vmem>>, vector<8x256xf32>
      tpu.vector_store %arg5[%c0_11, %c0_12], %12 {strides = array<i32>} : memref<8x256xf32, #tpu.memory_space<vmem>>, vector<8x256xf32>,
    } else {
    }
    %c0 = arith.constant 0 : index
    %c0_1 = arith.constant 0 : index
    %3 = vector.load %arg5[%c0, %c0_1] : memref<8x256xf32, #tpu.memory_space<vmem>>, vector<8x256xf32>
    %c0_2 = arith.constant 0 : index
    %c0_3 = arith.constant 0 : index
    %4 = vector.load %arg2[%c0_2, %c0_3] : memref<8x256xbf16, #tpu.memory_space<vmem>>, vector<8x256xbf16>
    %c0_4 = arith.constant 0 : index
    %c0_5 = arith.constant 0 : index
    %5 = vector.load %arg3[%c0_4, %c0_5] : memref<256x256xbf16, #tpu.memory_space<vmem>>, vector<256x256xbf16>
    %cst = arith.constant dense<0.000000e+00> : vector<8x256xf32>
    %6 = tpu.matmul %4, %5, %cst {dimension_numbers = #tpu.dot_dimension_numbers<[1], [0], [0], [1], [0, 0, 1, 1], [], []>} : vector<8x256xbf16>, vector<256x256xbf16>, vector<8x256xf32> -> vector<8x256xf32>
    %7 = arith.addf %3, %6 : vector<8x256xf32>
    %c0_6 = arith.constant 0 : index
    %c0_7 = arith.constant 0 : index
    %8 = vector.load %arg5[%c0_6, %c0_7] : memref<8x256xf32, #tpu.memory_space<vmem>>, vector<8x256xf32>
    tpu.vector_store %arg5[%c0_6, %c0_7], %7 {strides = array<i32>} : memref<8x256xf32, #tpu.memory_space<vmem>>, vector<8x256xf32>,
    %c0_i32_8 = arith.constant 0 : i32
    %9 = arith.cmpi eq, %arg1, %c0_i32_8 : i32
    %10 = arith.extui %9 : i1 to i32
    %c0_i32_9 = arith.constant 0 : i32
    %11 = arith.cmpi ne, %10, %c0_i32_9 : i32
    scf.if %11 {
      %c0_10 = arith.constant 0 : index
      %c0_11 = arith.constant 0 : index
      %12 = vector.load %arg5[%c0_10, %c0_11] : memref<8x256xf32, #tpu.memory_space<vmem>>, vector<8x256xf32>
      %cst_12 = arith.constant dense<0.000000e+00> : vector<256xf32>
      %13 = vector.multi_reduction <add>, %12, %cst_12 [0] : vector<8x256xf32> to vector<256xf32>
      %14 = vector.shape_cast %13 : vector<256xf32> to vector<1x256xf32>
      %cst_13 = arith.constant 5.000000e-01 : f32
      %15 = vector.broadcast %cst_13 : f32 to vector<1x256xf32>
      %16 = arith.mulf %14, %15 : vector<1x256xf32>
      %17 = arith.mulf %12, %12 : vector<8x256xf32>
      %cst_14 = arith.constant dense<0.000000e+00> : vector<256xf32>
      %18 = vector.multi_reduction <add>, %17, %cst_14 [0] : vector<8x256xf32> to vector<256xf32>
      %19 = vector.shape_cast %18 : vector<256xf32> to vector<1x256xf32>
      %cst_15 = arith.constant 5.000000e-01 : f32
      %20 = vector.broadcast %cst_15 : f32 to vector<1x256xf32>
      %21 = arith.mulf %19, %20 : vector<1x256xf32>
      %22 = arith.mulf %16, %16 : vector<1x256xf32>
      %23 = arith.subf %21, %22 : vector<1x256xf32>
      %cst_16 = arith.constant 0.000000e+00 : f32
      %24 = vector.broadcast %cst_16 : f32 to vector<1x256xf32>
      %25 = arith.maximumf %23, %24 : vector<1x256xf32>
      %26 = vector.broadcast %16 : vector<1x256xf32> to vector<8x256xf32>
      %27 = arith.subf %12, %26 : vector<8x256xf32>
      %cst_17 = arith.constant 9.99999974E-6 : f32
      %28 = vector.broadcast %cst_17 : f32 to vector<1x256xf32>
      %29 = arith.addf %25, %28 : vector<1x256xf32>
      %30 = math.rsqrt %29 : vector<1x256xf32>
      %31 = vector.broadcast %30 : vector<1x256xf32> to vector<8x256xf32>
      %32 = arith.mulf %27, %31 : vector<8x256xf32>
      %33 = arith.truncf %32 : vector<8x256xf32> to vector<8x256xbf16>
      %c0_18 = arith.constant 0 : index
      %c0_19 = arith.constant 0 : index
      %34 = vector.load %arg4[%c0_18, %c0_19] : memref<8x256xbf16, #tpu.memory_space<vmem>>, vector<8x256xbf16>
      tpu.vector_store %arg4[%c0_18, %c0_19], %33 {strides = array<i32>} : memref<8x256xbf16, #tpu.memory_space<vmem>>, vector<8x256xbf16>,
    } else {
    }
    return
  }
  func.func @transform_0(%arg0: i32, %arg1: i32) -> (i32, i32) {
    %c0_i32 = arith.constant 0 : i32
    %c0_i32_0 = arith.constant 0 : i32
    return %c0_i32, %arg1 : i32, i32
  }
  func.func @transform_1(%arg0: i32, %arg1: i32) -> (i32, i32) {
    %c0_i32 = arith.constant 0 : i32
    return %arg1, %arg0 : i32, i32
  }
  func.func @transform_2(%arg0: i32, %arg1: i32) -> (i32, i32) {
    %c0_i32 = arith.constant 0 : i32
    %c0_i32_0 = arith.constant 0 : i32
    return %c0_i32, %arg0 : i32, i32
  }
}

module attributes {stable_mosaic.version = 11 : i64} {
  func.func @_conv_bn_kernel(%arg0: i32, %arg1: i32, %arg2: memref<8x512xbf16, #tpu.memory_space<vmem>>, %arg3: memref<512x256xbf16, #tpu.memory_space<vmem>>, %arg4: memref<8x256xbf16, #tpu.memory_space<vmem>>, %arg5: memref<8x256xbf16, #tpu.memory_space<vmem>>, %arg6: memref<8x256xf32, #tpu.memory_space<vmem>>) attributes {dimension_semantics = [#tpu.dimension_semantics<parallel>, #tpu.dimension_semantics<arbitrary>], iteration_bounds = array<i64: 2, 9>, scalar_prefetch = 0 : i64, scratch_operands = 1 : i64, tpu.core_type = #tpu.core_type<tc>, window_params = [{transform_indices = @transform_0, window_bounds = array<i64: 8, 512>}, {transform_indices = @transform_1, window_bounds = array<i64: 512, 256>}, {transform_indices = @transform_2, window_bounds = array<i64: 8, 256>}, {transform_indices = @transform_3, window_bounds = array<i64: 8, 256>}]} {
    %c0_i32 = arith.constant 0 : i32
    %0 = arith.cmpi eq, %arg1, %c0_i32 : i32
    %1 = arith.extui %0 : i1 to i32
    %c0_i32_0 = arith.constant 0 : i32
    %2 = arith.cmpi ne, %1, %c0_i32_0 : i32
    scf.if %2 {
      %cst_9 = arith.constant 0.000000e+00 : f32
      %12 = vector.broadcast %cst_9 : f32 to vector<8x256xf32>
      %c0_10 = arith.constant 0 : index
      %c0_11 = arith.constant 0 : index
      %13 = vector.load %arg6[%c0_10, %c0_11] : memref<8x256xf32, #tpu.memory_space<vmem>>, vector<8x256xf32>
      tpu.vector_store %arg6[%c0_10, %c0_11], %12 {strides = array<i32>} : memref<8x256xf32, #tpu.memory_space<vmem>>, vector<8x256xf32>,
    } else {
    }
    %c0 = arith.constant 0 : index
    %c0_1 = arith.constant 0 : index
    %3 = vector.load %arg6[%c0, %c0_1] : memref<8x256xf32, #tpu.memory_space<vmem>>, vector<8x256xf32>
    %c0_2 = arith.constant 0 : index
    %c0_3 = arith.constant 0 : index
    %4 = vector.load %arg2[%c0_2, %c0_3] : memref<8x512xbf16, #tpu.memory_space<vmem>>, vector<8x512xbf16>
    %c0_4 = arith.constant 0 : index
    %c0_5 = arith.constant 0 : index
    %5 = vector.load %arg3[%c0_4, %c0_5] : memref<512x256xbf16, #tpu.memory_space<vmem>>, vector<512x256xbf16>
    %cst = arith.constant dense<0.000000e+00> : vector<8x256xf32>
    %6 = tpu.matmul %4, %5, %cst {dimension_numbers = #tpu.dot_dimension_numbers<[1], [0], [0], [1], [0, 0, 1, 1], [], []>} : vector<8x512xbf16>, vector<512x256xbf16>, vector<8x256xf32> -> vector<8x256xf32>
    %7 = arith.addf %3, %6 : vector<8x256xf32>
    %c0_6 = arith.constant 0 : index
    %c0_7 = arith.constant 0 : index
    %8 = vector.load %arg6[%c0_6, %c0_7] : memref<8x256xf32, #tpu.memory_space<vmem>>, vector<8x256xf32>
    tpu.vector_store %arg6[%c0_6, %c0_7], %7 {strides = array<i32>} : memref<8x256xf32, #tpu.memory_space<vmem>>, vector<8x256xf32>,
    %c8_i32 = arith.constant 8 : i32
    %9 = arith.cmpi eq, %arg1, %c8_i32 : i32
    %10 = arith.extui %9 : i1 to i32
    %c0_i32_8 = arith.constant 0 : i32
    %11 = arith.cmpi ne, %10, %c0_i32_8 : i32
    scf.if %11 {
      %c0_9 = arith.constant 0 : index
      %c0_10 = arith.constant 0 : index
      %12 = vector.load %arg6[%c0_9, %c0_10] : memref<8x256xf32, #tpu.memory_space<vmem>>, vector<8x256xf32>
      %cst_11 = arith.constant dense<0.000000e+00> : vector<256xf32>
      %13 = vector.multi_reduction <add>, %12, %cst_11 [0] : vector<8x256xf32> to vector<256xf32>
      %14 = vector.shape_cast %13 : vector<256xf32> to vector<1x256xf32>
      %cst_12 = arith.constant 5.000000e-01 : f32
      %15 = vector.broadcast %cst_12 : f32 to vector<1x256xf32>
      %16 = arith.mulf %14, %15 : vector<1x256xf32>
      %17 = arith.mulf %12, %12 : vector<8x256xf32>
      %cst_13 = arith.constant dense<0.000000e+00> : vector<256xf32>
      %18 = vector.multi_reduction <add>, %17, %cst_13 [0] : vector<8x256xf32> to vector<256xf32>
      %19 = vector.shape_cast %18 : vector<256xf32> to vector<1x256xf32>
      %cst_14 = arith.constant 5.000000e-01 : f32
      %20 = vector.broadcast %cst_14 : f32 to vector<1x256xf32>
      %21 = arith.mulf %19, %20 : vector<1x256xf32>
      %22 = arith.mulf %16, %16 : vector<1x256xf32>
      %23 = arith.subf %21, %22 : vector<1x256xf32>
      %cst_15 = arith.constant 0.000000e+00 : f32
      %24 = vector.broadcast %cst_15 : f32 to vector<1x256xf32>
      %25 = arith.maximumf %23, %24 : vector<1x256xf32>
      %26 = vector.broadcast %16 : vector<1x256xf32> to vector<8x256xf32>
      %27 = arith.subf %12, %26 : vector<8x256xf32>
      %cst_16 = arith.constant 9.99999974E-6 : f32
      %28 = vector.broadcast %cst_16 : f32 to vector<1x256xf32>
      %29 = arith.addf %25, %28 : vector<1x256xf32>
      %30 = math.rsqrt %29 : vector<1x256xf32>
      %31 = vector.broadcast %30 : vector<1x256xf32> to vector<8x256xf32>
      %32 = arith.mulf %27, %31 : vector<8x256xf32>
      %c0_17 = arith.constant 0 : index
      %c0_18 = arith.constant 0 : index
      %33 = vector.load %arg4[%c0_17, %c0_18] : memref<8x256xbf16, #tpu.memory_space<vmem>>, vector<8x256xbf16>
      %34 = arith.extf %33 : vector<8x256xbf16> to vector<8x256xf32>
      %35 = arith.addf %32, %34 : vector<8x256xf32>
      %cst_19 = arith.constant 0.000000e+00 : f32
      %36 = vector.broadcast %cst_19 : f32 to vector<8x256xf32>
      %37 = arith.maximumf %35, %36 : vector<8x256xf32>
      %38 = arith.truncf %37 : vector<8x256xf32> to vector<8x256xbf16>
      %c0_20 = arith.constant 0 : index
      %c0_21 = arith.constant 0 : index
      %39 = vector.load %arg5[%c0_20, %c0_21] : memref<8x256xbf16, #tpu.memory_space<vmem>>, vector<8x256xbf16>
      tpu.vector_store %arg5[%c0_20, %c0_21], %38 {strides = array<i32>} : memref<8x256xbf16, #tpu.memory_space<vmem>>, vector<8x256xbf16>,
    } else {
    }
    return
  }
  func.func @transform_0(%arg0: i32, %arg1: i32) -> (i32, i32) {
    %c0_i32 = arith.constant 0 : i32
    %c0_i32_0 = arith.constant 0 : i32
    return %c0_i32, %arg1 : i32, i32
  }
  func.func @transform_1(%arg0: i32, %arg1: i32) -> (i32, i32) {
    %c0_i32 = arith.constant 0 : i32
    return %arg1, %arg0 : i32, i32
  }
  func.func @transform_2(%arg0: i32, %arg1: i32) -> (i32, i32) {
    %c0_i32 = arith.constant 0 : i32
    %c0_i32_0 = arith.constant 0 : i32
    return %c0_i32, %arg0 : i32, i32
  }
  func.func @transform_3(%arg0: i32, %arg1: i32) -> (i32, i32) {
    %c0_i32 = arith.constant 0 : i32
    %c0_i32_0 = arith.constant 0 : i32
    return %c0_i32, %arg0 : i32, i32
  }
}

module attributes {stable_mosaic.version = 11 : i64} {
  func.func @_linear_bias_kernel(%arg0: i32, %arg1: i32, %arg2: memref<8x512xbf16, #tpu.memory_space<vmem>>, %arg3: memref<512x128xbf16, #tpu.memory_space<vmem>>, %arg4: memref<1x128xf32, #tpu.memory_space<vmem>>, %arg5: memref<8x128xf32, #tpu.memory_space<vmem>>, %arg6: memref<8x128xf32, #tpu.memory_space<vmem>>) attributes {dimension_semantics = [#tpu.dimension_semantics<parallel>, #tpu.dimension_semantics<arbitrary>], iteration_bounds = array<i64: 1, 1>, scalar_prefetch = 0 : i64, scratch_operands = 1 : i64, tpu.core_type = #tpu.core_type<tc>, window_params = [{transform_indices = @transform_0, window_bounds = array<i64: 8, 512>}, {transform_indices = @transform_1, window_bounds = array<i64: 512, 128>}, {transform_indices = @transform_2, window_bounds = array<i64: 1, 128>}, {transform_indices = @transform_3, window_bounds = array<i64: 8, 128>}]} {
    %c0_i32 = arith.constant 0 : i32
    %0 = arith.cmpi eq, %arg1, %c0_i32 : i32
    %1 = arith.extui %0 : i1 to i32
    %c0_i32_0 = arith.constant 0 : i32
    %2 = arith.cmpi ne, %1, %c0_i32_0 : i32
    scf.if %2 {
      %cst_10 = arith.constant 0.000000e+00 : f32
      %12 = vector.broadcast %cst_10 : f32 to vector<8x128xf32>
      %c0_11 = arith.constant 0 : index
      %c0_12 = arith.constant 0 : index
      %13 = vector.load %arg6[%c0_11, %c0_12] : memref<8x128xf32, #tpu.memory_space<vmem>>, vector<8x128xf32>
      tpu.vector_store %arg6[%c0_11, %c0_12], %12 {strides = array<i32>} : memref<8x128xf32, #tpu.memory_space<vmem>>, vector<8x128xf32>,
    } else {
    }
    %c0 = arith.constant 0 : index
    %c0_1 = arith.constant 0 : index
    %3 = vector.load %arg6[%c0, %c0_1] : memref<8x128xf32, #tpu.memory_space<vmem>>, vector<8x128xf32>
    %c0_2 = arith.constant 0 : index
    %c0_3 = arith.constant 0 : index
    %4 = vector.load %arg2[%c0_2, %c0_3] : memref<8x512xbf16, #tpu.memory_space<vmem>>, vector<8x512xbf16>
    %c0_4 = arith.constant 0 : index
    %c0_5 = arith.constant 0 : index
    %5 = vector.load %arg3[%c0_4, %c0_5] : memref<512x128xbf16, #tpu.memory_space<vmem>>, vector<512x128xbf16>
    %cst = arith.constant dense<0.000000e+00> : vector<8x128xf32>
    %6 = tpu.matmul %4, %5, %cst {dimension_numbers = #tpu.dot_dimension_numbers<[1], [0], [0], [1], [0, 0, 1, 1], [], []>} : vector<8x512xbf16>, vector<512x128xbf16>, vector<8x128xf32> -> vector<8x128xf32>
    %7 = arith.addf %3, %6 : vector<8x128xf32>
    %c0_6 = arith.constant 0 : index
    %c0_7 = arith.constant 0 : index
    %8 = vector.load %arg6[%c0_6, %c0_7] : memref<8x128xf32, #tpu.memory_space<vmem>>, vector<8x128xf32>
    tpu.vector_store %arg6[%c0_6, %c0_7], %7 {strides = array<i32>} : memref<8x128xf32, #tpu.memory_space<vmem>>, vector<8x128xf32>,
    %c0_i32_8 = arith.constant 0 : i32
    %9 = arith.cmpi eq, %arg1, %c0_i32_8 : i32
    %10 = arith.extui %9 : i1 to i32
    %c0_i32_9 = arith.constant 0 : i32
    %11 = arith.cmpi ne, %10, %c0_i32_9 : i32
    scf.if %11 {
      %c0_10 = arith.constant 0 : index
      %c0_11 = arith.constant 0 : index
      %12 = vector.load %arg6[%c0_10, %c0_11] : memref<8x128xf32, #tpu.memory_space<vmem>>, vector<8x128xf32>
      %c0_12 = arith.constant 0 : index
      %c0_13 = arith.constant 0 : index
      %13 = vector.load %arg4[%c0_12, %c0_13] : memref<1x128xf32, #tpu.memory_space<vmem>>, vector<1x128xf32>
      %14 = vector.broadcast %13 : vector<1x128xf32> to vector<8x128xf32>
      %15 = arith.addf %12, %14 : vector<8x128xf32>
      %c0_14 = arith.constant 0 : index
      %c0_15 = arith.constant 0 : index
      %16 = vector.load %arg5[%c0_14, %c0_15] : memref<8x128xf32, #tpu.memory_space<vmem>>, vector<8x128xf32>
      tpu.vector_store %arg5[%c0_14, %c0_15], %15 {strides = array<i32>} : memref<8x128xf32, #tpu.memory_space<vmem>>, vector<8x128xf32>,
    } else {
    }
    return
  }
  func.func @transform_0(%arg0: i32, %arg1: i32) -> (i32, i32) {
    %c0_i32 = arith.constant 0 : i32
    %c0_i32_0 = arith.constant 0 : i32
    return %c0_i32, %arg1 : i32, i32
  }
  func.func @transform_1(%arg0: i32, %arg1: i32) -> (i32, i32) {
    %c0_i32 = arith.constant 0 : i32
    return %arg1, %arg0 : i32, i32
  }
  func.func @transform_2(%arg0: i32, %arg1: i32) -> (i32, i32) {
    %c0_i32 = arith.constant 0 : i32
    %c0_i32_0 = arith.constant 0 : i32
    return %c0_i32, %arg0 : i32, i32
  }
  func.func @transform_3(%arg0: i32, %arg1: i32) -> (i32, i32) {
    %c0_i32 = arith.constant 0 : i32
    %c0_i32_0 = arith.constant 0 : i32
    return %c0_i32, %arg0 : i32, i32
  }
}

</mosaic_0001>

<bundles_post_ra>
// kernel: _lambda_.15
= control target key start
LH: loop header
LB: loop body
LE: loop exit
PB: predicated region body
PF: predicated region fallthrough
CT: control target
= control target key end

     0   :  { %s885_s0 = inlined_call_operand.vmem [shape: bf16[128,128], index: 0, kind: input, shape index: {}]   ;;  %s886_s1 = inlined_call_operand.vmem [shape: bf16[128,128], index: 1, kind: input, shape index: {}]   ;;  %s887_s2 = inlined_call_operand.vmem [shape: bf16[128,128], index: 2, kind: input, shape index: {}]   ;;  %s888_s3 = inlined_call_operand.vmem [shape: bf16[128,128], index: 3, kind: input, shape index: {}]   ;;  %s889_s4 = inlined_call_operand.vmem [shape: bf16[128,128], index: 4, kind: input, shape index: {}]   ;;  %s890_s5 = inlined_call_operand.vmem [shape: bf16[128,128], index: 5, kind: input, shape index: {}]   ;;  %s891_s6 = inlined_call_operand.vmem [shape: bf16[128,128], index: 6, kind: input, shape index: {}]   ;;  %s892_s7 = inlined_call_operand.vmem [shape: bf16[128,128], index: 7, kind: input, shape index: {}]   ;;  %s893_s8 = inlined_call_operand.vmem [shape: bf16[128,128], index: 8, kind: input, shape index: {}]   ;;  %s894_s9 = inlined_call_operand.vmem [shape: bf16[128,128], index: 9, kind: output, shape index: {}]  }
   0x1   :  { %v32_v0 = vld [vmem:[%s885_s0] sm:$0xf]  ;;  %v33_v1 = vld [vmem:[%s885_s0 + $0x4] sm:$0xf]  ;;  %v34_v18 = vld [vmem:[%s885_s0 + $0x8] sm:$0xf] }
   0x2   :  { %v48_v2 = vld [vmem:[%s886_s1] sm:$0xf]  ;;  %v49_v3 = vld [vmem:[%s886_s1 + $0x4] sm:$0xf]  ;;  %v35_v19 = vld [vmem:[%s885_s0 + $0xc] sm:$0xf] }
   0x3   :  { %v64_v4 = vmax.bf16 %v48_v2, %v32_v0  ;;  %v80_v5 = vld [vmem:[%s887_s2] sm:$0xf]  ;;  %v81_v6 = vld [vmem:[%s887_s2 + $0x4] sm:$0xf]  ;;  %v65_v7 = vmax.bf16 %v49_v3, %v33_v1  ;;  %v50_v20 = vld [vmem:[%s886_s1 + $0x8] sm:$0xf] }
   0x4   :  { %v112_v8 = vld [vmem:[%s888_s3] sm:$0xf]  ;;  %v113_v10 = vld [vmem:[%s888_s3 + $0x4] sm:$0xf]  ;;  %v51_v22 = vld [vmem:[%s886_s1 + $0xc] sm:$0xf]  ;;  %v66_v23 = vmax.bf16 %v50_v20, %v34_v18 }
   0x5   :  { %v96_v9 = vmax.bf16 %v80_v5, %v64_v4  ;;  %v97_v11 = vmax.bf16 %v81_v6, %v65_v7  ;;  %v144_v12 = vld [vmem:[%s889_s4] sm:$0xf]  ;;  %v145_v14 = vld [vmem:[%s889_s4 + $0x4] sm:$0xf]  ;;  %v82_v24 = vld [vmem:[%s887_s2 + $0x8] sm:$0xf]  ;;  %v67_v28 = vmax.bf16 %v51_v22, %v35_v19 }
   0x6   :  { %v176_v15 = vld [vmem:[%s890_s5] sm:$0xf]  ;;  %v177_v16 = vld [vmem:[%s890_s5 + $0x4] sm:$0xf]  ;;  %v83_v25 = vld [vmem:[%s887_s2 + $0xc] sm:$0xf]  ;;  %v98_v33 = vmax.bf16 %v82_v24, %v66_v23 }
   0x7   :  { %v128_v13 = vmax.bf16 %v112_v8, %v96_v9  ;;  %v129_v17 = vmax.bf16 %v113_v10, %v97_v11  ;;  %v208_v27 = vld [vmem:[%s891_s6] sm:$0xf]  ;;  %v114_v29 = vld [vmem:[%s888_s3 + $0x8] sm:$0xf]  ;;  %v209_v31 = vld [vmem:[%s891_s6 + $0x4] sm:$0xf]  ;;  %v99_v38 = vmax.bf16 %v83_v25, %v67_v28 }
   0x8   :  { %v240_v32 = vld [vmem:[%s892_s7] sm:$0xf]  ;;  %v115_v34 = vld [vmem:[%s888_s3 + $0xc] sm:$0xf]  ;;  %v241_v36 = vld [vmem:[%s892_s7 + $0x4] sm:$0xf]  ;;  %v130_v42 = vmax.bf16 %v114_v29, %v98_v33 }
   0x9   :  { %v160_v21 = vmax.bf16 %v144_v12, %v128_v13  ;;  %v161_v26 = vmax.bf16 %v145_v14, %v129_v17  ;;  %v272_v37 = vld [vmem:[%s893_s8] sm:$0xf]  ;;  %v146_v39 = vld [vmem:[%s889_s4 + $0x8] sm:$0xf]  ;;  %v273_v41 = vld [vmem:[%s893_s8 + $0x4] sm:$0xf]  ;;  %v131_v47 = vmax.bf16 %v115_v34, %v99_v38 }
   0xa   :  { %v147_v43 = vld [vmem:[%s889_s4 + $0xc] sm:$0xf]  ;;  %v178_v44 = vld [vmem:[%s890_s5 + $0x8] sm:$0xf]  ;;  %v36_v48 = vld [vmem:[%s885_s0 + $0x10] sm:$0xf]  ;;  %v162_v52 = vmax.bf16 %v146_v39, %v130_v42 }
   0xb   :  { %v192_v30 = vmax.bf16 %v176_v15, %v160_v21  ;;  %v193_v35 = vmax.bf16 %v177_v16, %v161_v26  ;;  %v179_v45 = vld [vmem:[%s890_s5 + $0xc] sm:$0xf]  ;;  %v37_v49 = vld [vmem:[%s885_s0 + $0x14] sm:$0xf]  ;;  %v52_v50 = vld [vmem:[%s886_s1 + $0x10] sm:$0xf]  ;;  %v163_v58 = vmax.bf16 %v147_v43, %v131_v47 }
   0xc   :  { %v53_v53 = vld [vmem:[%s886_s1 + $0x14] sm:$0xf]  ;;  %v68_v54 = vmax.bf16 %v52_v50, %v36_v48  ;;  %v84_v55 = vld [vmem:[%s887_s2 + $0x10] sm:$0xf]  ;;  %v210_v59 = vld [vmem:[%s891_s6 + $0x8] sm:$0xf]  ;;  %v194_v63 = vmax.bf16 %v178_v44, %v162_v52 }
   0xd   :  { %v224_v40 = vmax.bf16 %v208_v27, %v192_v30  ;;  %v225_v46 = vmax.bf16 %v209_v31, %v193_v35  ;;  %v85_v56 = vld [vmem:[%s887_s2 + $0x14] sm:$0xf]  ;;  %v69_v60 = vmax.bf16 %v53_v53, %v37_v49  ;;  %v116_v61 = vld [vmem:[%s888_s3 + $0x10] sm:$0xf]  ;;  %v211_v0 = vld [vmem:[%s891_s6 + $0xc] sm:$0xf]  ;;  %v195_v5 = vmax.bf16 %v179_v45, %v163_v58 }
   0xe   :  { %v242_v1 = vld [vmem:[%s892_s7 + $0x8] sm:$0xf]  ;;  %v100_v2 = vmax.bf16 %v84_v55, %v68_v54  ;;  %v117_v3 = vld [vmem:[%s888_s3 + $0x14] sm:$0xf]  ;;  %v243_v6 = vld [vmem:[%s892_s7 + $0xc] sm:$0xf]  ;;  %v226_v10 = vmax.bf16 %v210_v59, %v194_v63 }
   0xf   :  { %v256_v51 = vmax.bf16 %v240_v32, %v224_v40  ;;  %v257_v57 = vmax.bf16 %v241_v36, %v225_v46  ;;  %v274_v7 = vld [vmem:[%s893_s8 + $0x8] sm:$0xf]  ;;  %v101_v8 = vmax.bf16 %v85_v56, %v69_v60  ;;  %v148_v9 = vld [vmem:[%s889_s4 + $0x10] sm:$0xf]  ;;  %v275_v11 = vld [vmem:[%s893_s8 + $0xc] sm:$0xf]  ;;  %v227_v17 = vmax.bf16 %v211_v0, %v195_v5 }
  0x10   :  { %v132_v12 = vmax.bf16 %v116_v61, %v100_v2  ;;  %v149_v13 = vld [vmem:[%s889_s4 + $0x14] sm:$0xf]  ;;  %v180_v14 = vld [vmem:[%s890_s5 + $0x10] sm:$0xf]  ;;  %v38_v19 = vld [vmem:[%s885_s0 + $0x18] sm:$0xf]  ;;  %v258_v22 = vmax.bf16 %v242_v1, %v226_v10 }
  0x11   :  { %v288_v62 = vmax.bf16 %v272_v37, %v256_v51  ;;  %v289_v4 = vmax.bf16 %v273_v41, %v257_v57  ;;  %v181_v15 = vld [vmem:[%s890_s5 + $0x14] sm:$0xf]  ;;  %v133_v18 = vmax.bf16 %v117_v3, %v101_v8  ;;  %v39_v20 = vld [vmem:[%s885_s0 + $0x1c] sm:$0xf]  ;;  %v54_v21 = vld [vmem:[%s886_s1 + $0x18] sm:$0xf]  ;;  %v259_v28 = vmax.bf16 %v243_v6, %v227_v17 }
  0x12   :  { %v164_v23 = vmax.bf16 %v148_v9, %v132_v12  ;;  %v55_v24 = vld [vmem:[%s886_s1 + $0x1c] sm:$0xf]  ;;  %v70_v25 = vmax.bf16 %v54_v21, %v38_v19  ;;  %v86_v26 = vld [vmem:[%s887_s2 + $0x18] sm:$0xf]  ;;  %v212_v30 = vld [vmem:[%s891_s6 + $0x10] sm:$0xf]  ;;  %v290_v33 = vmax.bf16 %v274_v7, %v258_v22 }
  0x13   :  { %v364_v16 = vcombine.low %v288_v62, %v289_v4  ;;  %v87_v27 = vld [vmem:[%s887_s2 + $0x1c] sm:$0xf]  ;;  %v165_v29 = vmax.bf16 %v149_v13, %v133_v18  ;;  %v71_v31 = vmax.bf16 %v55_v24, %v39_v20  ;;  %v118_v32 = vld [vmem:[%s888_s3 + $0x18] sm:$0xf]  ;;  %v213_v35 = vld [vmem:[%s891_s6 + $0x14] sm:$0xf]  ;;  %v291_v39 = vmax.bf16 %v275_v11, %v259_v28 }
  0x14   :  { %v196_v34 = vmax.bf16 %v180_v14, %v164_v23  ;;  %v244_v36 = vld [vmem:[%s892_s7 + $0x10] sm:$0xf]  ;;  %v102_v37 = vmax.bf16 %v86_v26, %v70_v25  ;;  %v119_v38 = vld [vmem:[%s888_s3 + $0x1c] sm:$0xf]  ;;  %v245_v41 = vld [vmem:[%s892_s7 + $0x14] sm:$0xf] }
  0x15   :  { %328 = vst [vmem:[%s894_s9] sm:$0xff] %v364_v16   ;;  %v197_v40 = vmax.bf16 %v181_v15, %v165_v29  ;;  %v276_v42 = vld [vmem:[%s893_s8 + $0x10] sm:$0xf]  ;;  %v103_v43 = vmax.bf16 %v87_v27, %v71_v31  ;;  %v150_v44 = vld [vmem:[%s889_s4 + $0x18] sm:$0xf]  ;;  %v277_v46 = vld [vmem:[%s893_s8 + $0x14] sm:$0xf]  ;;  %v365_v51 = vcombine.low %v290_v33, %v291_v39 }
  0x16   :  { %v228_v45 = vmax.bf16 %v212_v30, %v196_v34  ;;  %v134_v47 = vmax.bf16 %v118_v32, %v102_v37  ;;  %v151_v48 = vld [vmem:[%s889_s4 + $0x1c] sm:$0xf]  ;;  %v182_v49 = vld [vmem:[%s890_s5 + $0x18] sm:$0xf]  ;;  %v40_v54 = vld [vmem:[%s885_s0 + $0x20] sm:$0xf] }
  0x17   :  { %v183_v50 = vld [vmem:[%s890_s5 + $0x1c] sm:$0xf]  ;;  %v229_v52 = vmax.bf16 %v213_v35, %v197_v40  ;;  %v135_v53 = vmax.bf16 %v119_v38, %v103_v43  ;;  %v41_v55 = vld [vmem:[%s885_s0 + $0x24] sm:$0xf]  ;;  %v56_v56 = vld [vmem:[%s886_s1 + $0x20] sm:$0xf] }
  0x18   :  { %v260_v57 = vmax.bf16 %v244_v36, %v228_v45  ;;  %v166_v58 = vmax.bf16 %v150_v44, %v134_v47  ;;  %v57_v59 = vld [vmem:[%s886_s1 + $0x24] sm:$0xf]  ;;  %v72_v60 = vmax.bf16 %v56_v56, %v40_v54  ;;  %v88_v61 = vld [vmem:[%s887_s2 + $0x20] sm:$0xf]  ;;  %366 = vst [vmem:[%s894_s9 + $0x8] sm:$0xff] %v365_v51  }
  0x19   :  { %v89_v62 = vld [vmem:[%s887_s2 + $0x24] sm:$0xf]  ;;  %v261_v63 = vmax.bf16 %v245_v41, %v229_v52  ;;  %v167_v0 = vmax.bf16 %v151_v48, %v135_v53  ;;  %v214_v1 = vld [vmem:[%s891_s6 + $0x18] sm:$0xf]  ;;  %v73_v2 = vmax.bf16 %v57_v59, %v41_v55  ;;  %v120_v3 = vld [vmem:[%s888_s3 + $0x20] sm:$0xf] }
  0x1a   :  { %v292_v4 = vmax.bf16 %v276_v42, %v260_v57  ;;  %v198_v5 = vmax.bf16 %v182_v49, %v166_v58  ;;  %v215_v6 = vld [vmem:[%s891_s6 + $0x1c] sm:$0xf]  ;;  %v246_v7 = vld [vmem:[%s892_s7 + $0x18] sm:$0xf]  ;;  %v104_v8 = vmax.bf16 %v88_v61, %v72_v60  ;;  %v121_v9 = vld [vmem:[%s888_s3 + $0x24] sm:$0xf] }
  0x1b   :  { %v293_v10 = vmax.bf16 %v277_v46, %v261_v63  ;;  %v199_v11 = vmax.bf16 %v183_v50, %v167_v0  ;;  %v247_v12 = vld [vmem:[%s892_s7 + $0x1c] sm:$0xf]  ;;  %v278_v13 = vld [vmem:[%s893_s8 + $0x18] sm:$0xf]  ;;  %v105_v14 = vmax.bf16 %v89_v62, %v73_v2  ;;  %v152_v15 = vld [vmem:[%s889_s4 + $0x20] sm:$0xf] }
  0x1c   :  { %v230_v16 = vmax.bf16 %v214_v1, %v198_v5  ;;  %v279_v17 = vld [vmem:[%s893_s8 + $0x1c] sm:$0xf]  ;;  %v136_v18 = vmax.bf16 %v120_v3, %v104_v8  ;;  %v153_v19 = vld [vmem:[%s889_s4 + $0x24] sm:$0xf]  ;;  %v184_v20 = vld [vmem:[%s890_s5 + $0x20] sm:$0xf] }
  0x1d   :  { %v185_v21 = vld [vmem:[%s890_s5 + $0x24] sm:$0xf]  ;;  %v367_v22 = vcombine.low %v292_v4, %v293_v10  ;;  %v231_v23 = vmax.bf16 %v215_v6, %v199_v11  ;;  %v137_v24 = vmax.bf16 %v121_v9, %v105_v14  ;;  %v42_v25 = vld [vmem:[%s885_s0 + $0x28] sm:$0xf]  ;;  %v43_v26 = vld [vmem:[%s885_s0 + $0x2c] sm:$0xf] }
  0x1e   :  { %v58_v27 = vld [vmem:[%s886_s1 + $0x28] sm:$0xf]  ;;  %v262_v28 = vmax.bf16 %v246_v7, %v230_v16  ;;  %v168_v29 = vmax.bf16 %v152_v15, %v136_v18  ;;  %v59_v30 = vld [vmem:[%s886_s1 + $0x2c] sm:$0xf]  ;;  %v216_v36 = vld [vmem:[%s891_s6 + $0x20] sm:$0xf] }
  0x1f   :  { %v74_v31 = vmax.bf16 %v58_v27, %v42_v25  ;;  %v90_v32 = vld [vmem:[%s887_s2 + $0x28] sm:$0xf]  ;;  %v91_v33 = vld [vmem:[%s887_s2 + $0x2c] sm:$0xf]  ;;  %368 = vst [vmem:[%s894_s9 + $0x10] sm:$0xff] %v367_v22   ;;  %v263_v34 = vmax.bf16 %v247_v12, %v231_v23  ;;  %v169_v35 = vmax.bf16 %v153_v19, %v137_v24  ;;  %v75_v37 = vmax.bf16 %v59_v30, %v43_v26 }
  0x20   :  { %v122_v38 = vld [vmem:[%s888_s3 + $0x28] sm:$0xf]  ;;  %v294_v39 = vmax.bf16 %v278_v13, %v262_v28  ;;  %v200_v40 = vmax.bf16 %v184_v20, %v168_v29  ;;  %v217_v41 = vld [vmem:[%s891_s6 + $0x24] sm:$0xf]  ;;  %v248_v42 = vld [vmem:[%s892_s7 + $0x20] sm:$0xf] }
  0x21   :  { %v106_v43 = vmax.bf16 %v90_v32, %v74_v31  ;;  %v123_v44 = vld [vmem:[%s888_s3 + $0x2c] sm:$0xf]  ;;  %v295_v45 = vmax.bf16 %v279_v17, %v263_v34  ;;  %v201_v46 = vmax.bf16 %v185_v21, %v169_v35  ;;  %v249_v47 = vld [vmem:[%s892_s7 + $0x24] sm:$0xf]  ;;  %v280_v48 = vld [vmem:[%s893_s8 + $0x20] sm:$0xf]  ;;  %v107_v49 = vmax.bf16 %v91_v33, %v75_v37 }
  0x22   :  { %v154_v50 = vld [vmem:[%s889_s4 + $0x28] sm:$0xf]  ;;  %v232_v51 = vmax.bf16 %v216_v36, %v200_v40  ;;  %v281_v52 = vld [vmem:[%s893_s8 + $0x24] sm:$0xf]  ;;  %v155_v54 = vld [vmem:[%s889_s4 + $0x2c] sm:$0xf] }
  0x23   :  { %v138_v53 = vmax.bf16 %v122_v38, %v106_v43  ;;  %v186_v55 = vld [vmem:[%s890_s5 + $0x28] sm:$0xf]  ;;  %v187_v56 = vld [vmem:[%s890_s5 + $0x2c] sm:$0xf]  ;;  %v369_v57 = vcombine.low %v294_v39, %v295_v45  ;;  %v233_v58 = vmax.bf16 %v217_v41, %v201_v46  ;;  %v139_v59 = vmax.bf16 %v123_v44, %v107_v49  ;;  %v44_v60 = vld [vmem:[%s885_s0 + $0x30] sm:$0xf] }
  0x24   :  { %v45_v61 = vld [vmem:[%s885_s0 + $0x34] sm:$0xf]  ;;  %v60_v62 = vld [vmem:[%s886_s1 + $0x30] sm:$0xf]  ;;  %v264_v63 = vmax.bf16 %v248_v42, %v232_v51  ;;  %v218_v7 = vld [vmem:[%s891_s6 + $0x28] sm:$0xf] }
  0x25   :  { %v170_v0 = vmax.bf16 %v154_v50, %v138_v53  ;;  %v61_v1 = vld [vmem:[%s886_s1 + $0x34] sm:$0xf]  ;;  %v76_v2 = vmax.bf16 %v60_v62, %v44_v60  ;;  %v92_v3 = vld [vmem:[%s887_s2 + $0x30] sm:$0xf]  ;;  %370 = vst [vmem:[%s894_s9 + $0x18] sm:$0xff] %v369_v57   ;;  %v265_v5 = vmax.bf16 %v249_v47, %v233_v58  ;;  %v171_v6 = vmax.bf16 %v155_v54, %v139_v59 }
  0x26   :  { %v93_v4 = vld [vmem:[%s887_s2 + $0x34] sm:$0xf]  ;;  %v77_v8 = vmax.bf16 %v61_v1, %v45_v61  ;;  %v124_v9 = vld [vmem:[%s888_s3 + $0x30] sm:$0xf]  ;;  %v296_v10 = vmax.bf16 %v280_v48, %v264_v63  ;;  %v219_v12 = vld [vmem:[%s891_s6 + $0x2c] sm:$0xf] }
  0x27   :  { %v202_v11 = vmax.bf16 %v186_v55, %v170_v0  ;;  %v250_v13 = vld [vmem:[%s892_s7 + $0x28] sm:$0xf]  ;;  %v108_v14 = vmax.bf16 %v92_v3, %v76_v2  ;;  %v125_v15 = vld [vmem:[%s888_s3 + $0x34] sm:$0xf]  ;;  %v297_v16 = vmax.bf16 %v281_v52, %v265_v5  ;;  %v203_v17 = vmax.bf16 %v187_v56, %v171_v6  ;;  %v251_v18 = vld [vmem:[%s892_s7 + $0x2c] sm:$0xf] }
  0x28   :  { %v282_v19 = vld [vmem:[%s893_s8 + $0x28] sm:$0xf]  ;;  %v109_v20 = vmax.bf16 %v93_v4, %v77_v8  ;;  %v156_v21 = vld [vmem:[%s889_s4 + $0x30] sm:$0xf]  ;;  %v283_v23 = vld [vmem:[%s893_s8 + $0x2c] sm:$0xf] }
  0x29   :  { %v234_v22 = vmax.bf16 %v218_v7, %v202_v11  ;;  %v140_v24 = vmax.bf16 %v124_v9, %v108_v14  ;;  %v157_v25 = vld [vmem:[%s889_s4 + $0x34] sm:$0xf]  ;;  %v188_v26 = vld [vmem:[%s890_s5 + $0x30] sm:$0xf]  ;;  %v371_v28 = vcombine.low %v296_v10, %v297_v16  ;;  %v235_v29 = vmax.bf16 %v219_v12, %v203_v17  ;;  %v46_v31 = vld [vmem:[%s885_s0 + $0x38] sm:$0xf] }
  0x2a   :  { %v189_v27 = vld [vmem:[%s890_s5 + $0x34] sm:$0xf]  ;;  %v141_v30 = vmax.bf16 %v125_v15, %v109_v20  ;;  %v47_v32 = vld [vmem:[%s885_s0 + $0x3c] sm:$0xf]  ;;  %v62_v33 = vld [vmem:[%s886_s1 + $0x38] sm:$0xf] }
  0x2b   :  { %v266_v34 = vmax.bf16 %v250_v13, %v234_v22  ;;  %v172_v35 = vmax.bf16 %v156_v21, %v140_v24  ;;  %v63_v36 = vld [vmem:[%s886_s1 + $0x3c] sm:$0xf]  ;;  %v78_v37 = vmax.bf16 %v62_v33, %v46_v31  ;;  %v94_v38 = vld [vmem:[%s887_s2 + $0x38] sm:$0xf]  ;;  %372 = vst [vmem:[%s894_s9 + $0x20] sm:$0xff] %v371_v28   ;;  %v267_v40 = vmax.bf16 %v251_v18, %v235_v29 }
  0x2c   :  { %v95_v39 = vld [vmem:[%s887_s2 + $0x3c] sm:$0xf]  ;;  %v173_v41 = vmax.bf16 %v157_v25, %v141_v30  ;;  %v220_v42 = vld [vmem:[%s891_s6 + $0x30] sm:$0xf]  ;;  %v79_v43 = vmax.bf16 %v63_v36, %v47_v32  ;;  %v126_v44 = vld [vmem:[%s888_s3 + $0x38] sm:$0xf] }
  0x2d   :  { %v298_v45 = vmax.bf16 %v282_v19, %v266_v34  ;;  %v204_v46 = vmax.bf16 %v188_v26, %v172_v35  ;;  %v221_v47 = vld [vmem:[%s891_s6 + $0x34] sm:$0xf]  ;;  %v110_v48 = vmax.bf16 %v94_v38, %v78_v37  ;;  %v127_v49 = vld [vmem:[%s888_s3 + $0x3c] sm:$0xf]  ;;  %v299_v50 = vmax.bf16 %v283_v23, %v267_v40  ;;  %v252_v52 = vld [vmem:[%s892_s7 + $0x30] sm:$0xf] }
  0x2e   :  { %v205_v51 = vmax.bf16 %v189_v27, %v173_v41  ;;  %v111_v53 = vmax.bf16 %v95_v39, %v79_v43  ;;  %v158_v54 = vld [vmem:[%s889_s4 + $0x38] sm:$0xf]  ;;  %v253_v56 = vld [vmem:[%s892_s7 + $0x34] sm:$0xf]  ;;  %v159_v58 = vld [vmem:[%s889_s4 + $0x3c] sm:$0xf] }
  0x2f   :  { %v236_v55 = vmax.bf16 %v220_v42, %v204_v46  ;;  %v142_v57 = vmax.bf16 %v126_v44, %v110_v48  ;;  %v373_v59 = vcombine.low %v298_v45, %v299_v50  ;;  %v284_v61 = vld [vmem:[%s893_s8 + $0x30] sm:$0xf]  ;;  %v190_v63 = vld [vmem:[%s890_s5 + $0x38] sm:$0xf]  ;;  %v285_v1 = vld [vmem:[%s893_s8 + $0x34] sm:$0xf] }
  0x30   :  { %v237_v60 = vmax.bf16 %v221_v47, %v205_v51  ;;  %v143_v62 = vmax.bf16 %v127_v49, %v111_v53  ;;  %v191_v3 = vld [vmem:[%s890_s5 + $0x3c] sm:$0xf]  ;;  %v222_v6 = vld [vmem:[%s891_s6 + $0x38] sm:$0xf] }
  0x31   :  { %v268_v0 = vmax.bf16 %v252_v52, %v236_v55  ;;  %v174_v2 = vmax.bf16 %v158_v54, %v142_v57  ;;  %374 = vst [vmem:[%s894_s9 + $0x28] sm:$0xff] %v373_v59   ;;  %v223_v9 = vld [vmem:[%s891_s6 + $0x3c] sm:$0xf]  ;;  %v254_v12 = vld [vmem:[%s892_s7 + $0x38] sm:$0xf] }
  0x32   :  { %v269_v4 = vmax.bf16 %v253_v56, %v237_v60  ;;  %v175_v5 = vmax.bf16 %v159_v58, %v143_v62  ;;  %v255_v14 = vld [vmem:[%s892_s7 + $0x3c] sm:$0xf]  ;;  %v286_v17 = vld [vmem:[%s893_s8 + $0x38] sm:$0xf] }
  0x33   :  { %v300_v7 = vmax.bf16 %v284_v61, %v268_v0  ;;  %v206_v8 = vmax.bf16 %v190_v63, %v174_v2  ;;  %v287_v19 = vld [vmem:[%s893_s8 + $0x3c] sm:$0xf] }
  0x34   :  { %v301_v10 = vmax.bf16 %v285_v1, %v269_v4  ;;  %v207_v11 = vmax.bf16 %v191_v3, %v175_v5 }
  0x35   :  { %v238_v13 = vmax.bf16 %v222_v6, %v206_v8 }
  0x36   :  { %v375_v15 = vcombine.low %v300_v7, %v301_v10  ;;  %v239_v16 = vmax.bf16 %v223_v9, %v207_v11 }
  0x37   :  { %v270_v18 = vmax.bf16 %v254_v12, %v238_v13 }
  0x38   :  { %376 = vst [vmem:[%s894_s9 + $0x30] sm:$0xff] %v375_v15   ;;  %v271_v20 = vmax.bf16 %v255_v14, %v239_v16 }
  0x39   :  { %v302_v21 = vmax.bf16 %v286_v17, %v270_v18 }
  0x3a   :  { %v303_v22 = vmax.bf16 %v287_v19, %v271_v20 }
  0x3c   :  { %v377_v23 = vcombine.low %v302_v21, %v303_v22 }
  0x3e   :  { %378 = vst [vmem:[%s894_s9 + $0x38] sm:$0xff] %v377_v23  }

// kernel: _lambda_.16
= control target key start
LH: loop header
LB: loop body
LE: loop exit
PB: predicated region body
PF: predicated region fallthrough
CT: control target
= control target key end

     0   :  { %s1163_s9 = smov 0   ;;  %s1165_s10 = smov 0   ;;  %s1388_s0 = inlined_call_operand.vmem [shape: bf16[128,1152], index: 0, kind: input, shape index: {}]   ;;  %s1389_s1 = inlined_call_operand.vmem [shape: bf16[1152,128], index: 1, kind: input, shape index: {}]   ;;  %s1390_s2 = inlined_call_operand.vmem [shape: bf16[128,128], index: 2, kind: output, shape index: {}]  }
   0x1   :  { %s1167_s11 = smov 0   ;;  %s1169_s12 = smov 0  }
   0x2   :  { %s1171_s13 = smov 0  }
   0x3 LB: > { %s21_s14 = sadd.s32 1, %s1141_s12  ;;  %p38_p1 = scmp.ne.s32.totalorder %s1133_s10, %s1129_s9  ;;  %s1145_s13 = sphi %s1171_s13, %s12_s13   ;;  %s1141_s12 = sphi %s1169_s12, %s1394_s12   ;;  %s1137_s11 = sphi %s1167_s11, %s1393_s11   ;;  %s1133_s10 = sphi %s1165_s10, %s1392_s10   ;;  %s1129_s9 = sphi %s1163_s9, %s1391_s9  }
   0x4   : > { %p22_p0 = scmp.ge.s32.totalorder %s21_s14, 9  ;;  %p39_p2 = scmp.eq.s32.totalorder %s1145_s13, 0 }
   0x5   : > { %s31_s16 = sadd.s32 1, %s1133_s10  ;;  %p877_p5 = scmp.ge.s32.totalorder %s1145_s13, 9 }
   0x6   : > { %s1396_s14 = smov (%p22_p0, %s21_s14), 0  ;;  %p40_p3 = por %p39_p2, %p38_p1 }
   0x7   : > { %s28_s15 = ssub.s32 %s1141_s12, %s1396_s14  ;;  %118 = sbr.rel (%p877_p5) target bundleno = 28 (0x1c), region = 16 }
   0x8   : > { %p29_p4 = scmp.eq.s32.totalorder %s28_s15, 0 }
   0xa   : > { %s1198_s17 = scalar_select %p29_p4, %s1133_s10, %s31_s16  }
   0xe   : > { %121 = sbr.rel (!%p40_p3) target bundleno = 28 (0x1c), region = 20  ;;  %s123_s18 = sand.u32 (%p40_p3), 1, %s1133_s10  }
   0xf   : > { %s879_s19 = sshll.u32 (%p40_p3), %s1141_s12, 2  ;;  %s878_s20 = sshll.u32 (%p40_p3), %s123_s18, 6 }
  0x10   : > { %s1206_s23 = scalar_lea.vmem (%p40_p3), %s1388_s0, %s879_s19  ;;  %s125_s24 = scalar_lea.vmem (%p40_p3), [#allocation3], %s878_s20 }
  0x11   : > { %v143_v0 = vld [vmem:[%s1206_s23] sm:$0xf] (%p40_p3)  ;;  %v145_v1 = vld [vmem:[%s1206_s23 + $0x24] sm:$0xf] (%p40_p3)  ;;  %v147_v2 = vld [vmem:[%s1206_s23 + $0x48] sm:$0xf] (%p40_p3) }
  0x12   : > { %144 = vst [vmem:[%s125_s24] sm:$0xf] (%p40_p3), %v143_v0  ;;  %146 = vst [vmem:[%s125_s24 + $0x4] sm:$0xf] (%p40_p3), %v145_v1  ;;  %v149_v3 = vld [vmem:[%s1206_s23 + $0x6c] sm:$0xf] (%p40_p3) }
  0x13   : > { %v151_v4 = vld [vmem:[%s1206_s23 + $0x90] sm:$0xf] (%p40_p3)  ;;  %148 = vst [vmem:[%s125_s24 + $0x8] sm:$0xf] (%p40_p3), %v147_v2  ;;  %150 = vst [vmem:[%s125_s24 + $0xc] sm:$0xf] (%p40_p3), %v149_v3 }
  0x14   : > { %152 = vst [vmem:[%s125_s24 + $0x10] sm:$0xf] (%p40_p3), %v151_v4  ;;  %v153_v5 = vld [vmem:[%s1206_s23 + $0xb4] sm:$0xf] (%p40_p3)  ;;  %v155_v6 = vld [vmem:[%s1206_s23 + $0xd8] sm:$0xf] (%p40_p3) }
  0x15   : > { %v157_v7 = vld [vmem:[%s1206_s23 + $0xfc] sm:$0xf]  ;;  %154 = vst [vmem:[%s125_s24 + $0x14] sm:$0xf] %v153_v5  ;;  %156 = vst [vmem:[%s125_s24 + $0x18] sm:$0xf] %v155_v6 }
  0x16   : > { %158 = vst [vmem:[%s125_s24 + $0x1c] sm:$0xf] %v157_v7  ;;  %v159_v8 = vld [vmem:[%s1206_s23 + $0x120] sm:$0xf]  ;;  %v161_v9 = vld [vmem:[%s1206_s23 + $0x144] sm:$0xf] }
  0x17   : > { %v163_v10 = vld [vmem:[%s1206_s23 + $0x168] sm:$0xf]  ;;  %160 = vst [vmem:[%s125_s24 + $0x20] sm:$0xf] %v159_v8  ;;  %162 = vst [vmem:[%s125_s24 + $0x24] sm:$0xf] %v161_v9 }
  0x18   : > { %164 = vst [vmem:[%s125_s24 + $0x28] sm:$0xf] %v163_v10  ;;  %v165_v11 = vld [vmem:[%s1206_s23 + $0x18c] sm:$0xf]  ;;  %v167_v12 = vld [vmem:[%s1206_s23 + $0x1b0] sm:$0xf] }
  0x19   : > { %v169_v13 = vld [vmem:[%s1206_s23 + $0x1d4] sm:$0xf]  ;;  %166 = vst [vmem:[%s125_s24 + $0x2c] sm:$0xf] %v165_v11  ;;  %168 = vst [vmem:[%s125_s24 + $0x30] sm:$0xf] %v167_v12 }
  0x1a   : > { %170 = vst [vmem:[%s125_s24 + $0x34] sm:$0xf] %v169_v13  ;;  %v171_v14 = vld [vmem:[%s1206_s23 + $0x1f8] sm:$0xf]  ;;  %v173_v15 = vld [vmem:[%s1206_s23 + $0x21c] sm:$0xf] }
  0x1b   : > { %172 = vst [vmem:[%s125_s24 + $0x38] sm:$0xf] %v171_v14  ;;  %174 = vst [vmem:[%s125_s24 + $0x3c] sm:$0xf] %v173_v15 }
  0x1c PF: > { %p880_p6 = scmp.ge.s32.totalorder %s1145_s13, 1  ;;  %p240_p7 = scmp.lt.s32.totalorder %s1145_s13, 10 }
  0x1e   : > { %p241_p8 = pnand %p880_p6, %p240_p7 }
  0x1f   : > { %s247_s25 = sand.u32 (!%p241_p8), 1, %s1129_s9   ;;  %s882_s26 = sshll.u32 (!%p241_p8), %s1137_s11, 4 }
  0x20   : > { %244 = sbr.rel (%p241_p8) target bundleno = 384 (0x180), region = 65  ;;  %s881_s27 = sshll.u32 (!%p241_p8), %s247_s25, 6 }
  0x21   : > { %p276_p9 = scmp.lt.s32.totalorder (!%p241_p8), %s882_s26, 143  ;;  %s1233_s4 = scalar_lea.vmem (!%p241_p8), [#allocation3], %s881_s27 }
  0x22   : > { %p884_p10 = scmp.ne.s32.totalorder (!%p241_p8), %s1137_s11, 0 }
  0x27   : > { %s1398_s26 = smov (!%p276_p9, %s882_s26), 143  ;;  %292 = sbr.rel (%p884_p10) target bundleno = 49 (0x31), region = 73 }
  0x28   : > { %s883_s28 = sshll.u32 %s1398_s26, 2  ;;  %v1147_v16 = vmov (!%p884_p10), 0.0  }
  0x29   : > { %s1231_s3 = scalar_lea.vmem %s1389_s1, %s883_s28  ;;  %293 = vst [vmem:[#allocation2] sm:$0xff] (!%p884_p10), %v1147_v16  ;;  %294 = vst [vmem:[#allocation2 + $0x8] sm:$0xff] (!%p884_p10), %v1147_v16 }
  0x2a   : > { %295 = vst [vmem:[#allocation2 + $0x10] sm:$0xff] (!%p884_p10), %v1147_v16  ;;  %296 = vst [vmem:[#allocation2 + $0x18] sm:$0xff] (!%p884_p10), %v1147_v16 }
  0x2b   : > { %297 = vst [vmem:[#allocation2 + $0x20] sm:$0xff] (!%p884_p10), %v1147_v16  ;;  %298 = vst [vmem:[#allocation2 + $0x28] sm:$0xff] (!%p884_p10), %v1147_v16 }
  0x2c   : > { %299 = vst [vmem:[#allocation2 + $0x30] sm:$0xff] (!%p884_p10), %v1147_v16  ;;  %300 = vst [vmem:[#allocation2 + $0x38] sm:$0xff] (!%p884_p10), %v1147_v16 }
  0x2d   : > { %301 = vst [vmem:[#allocation2 + $0x40] sm:$0xff] (!%p884_p10), %v1147_v16  ;;  %302 = vst [vmem:[#allocation2 + $0x48] sm:$0xff] (!%p884_p10), %v1147_v16 }
  0x2e   : > { %303 = vst [vmem:[#allocation2 + $0x50] sm:$0xff] %v1147_v16  ;;  %304 = vst [vmem:[#allocation2 + $0x58] sm:$0xff] %v1147_v16 }
  0x2f   : > { %305 = vst [vmem:[#allocation2 + $0x60] sm:$0xff] %v1147_v16  ;;  %306 = vst [vmem:[#allocation2 + $0x68] sm:$0xff] %v1147_v16 }
  0x30   : > { %307 = vst [vmem:[#allocation2 + $0x70] sm:$0xff] %v1147_v16  ;;  %308 = vst [vmem:[#allocation2 + $0x78] sm:$0xff] %v1147_v16 }
  0x31 PF: > { %v1089_v17 = vld [vmem:[%s1231_s3] sm:$0xff]   ;;  %v1090_v18 = vld [vmem:[%s1231_s3 + $0x8] sm:$0xff]   ;;  %v1091_v19 = vld [vmem:[%s1231_s3 + $0x10] sm:$0xff]   ;;  %p901_p11 = scmp.ne.s32.totalorder %s1137_s11, 8 }
  0x32   : > { %1000 = vmatprep.subr.bf16.mxu0 %v1089_v17  ;;  %1032 = vmatprep.subr.bf16.mxu1 %v1089_v17  ;;  %v1092_v20 = vld [vmem:[%s1231_s3 + $0x18] sm:$0xff]   ;;  %v1097_v21 = vld [vmem:[%s1233_s4] sm:$0xff]   ;;  %v1094_v24 = vld [vmem:[%s1231_s3 + $0x28] sm:$0xff]  }
  0x33   : > { %1001 = vmatpush3.bf16.msra.mxu0 %v1089_v17  ;;  %1040 = vmatpush3.bf16.msra.mxu1 %v1089_v17  ;;  %v1098_v22 = vld [vmem:[%s1233_s4 + $0x20] sm:$0xff]   ;;  %v1095_v25 = vld [vmem:[%s1231_s3 + $0x30] sm:$0xff]   ;;  %v1096_v26 = vld [vmem:[%s1231_s3 + $0x38] sm:$0xff]  }
  0x34   : > { %1002 = vmatprep.subr.bf16.mxu0 %v1090_v18  ;;  %1033 = vmatprep.subr.bf16.mxu1 %v1090_v18  ;;  %v1093_v23 = vld [vmem:[%s1231_s3 + $0x20] sm:$0xff]   ;;  %v1099_v27 = vld [vmem:[%s1233_s4 + $0x8] sm:$0xff]   ;;  %v1101_v29 = vld [vmem:[%s1233_s4 + $0x10] sm:$0xff]  }
  0x35   : > { %1016 = vmatprep.mubr.bf16.mxu0 %v1097_v21  ;;  %1024 = vmatprep.mubr.bf16.mxu1 %v1098_v22  ;;  %v1100_v28 = vld [vmem:[%s1233_s4 + $0x28] sm:$0xff]   ;;  %v1102_v30 = vld [vmem:[%s1233_s4 + $0x30] sm:$0xff]   ;;  %v1103_v31 = vld [vmem:[%s1233_s4 + $0x18] sm:$0xff]  }
  0x36   : > { %v1104_v32 = vld [vmem:[%s1233_s4 + $0x38] sm:$0xff]   ;;  %v311_v33 = vld [vmem:[#allocation2 + $0x10] sm:$0xff]  ;;  %v309_v35 = vld [vmem:[#allocation2] sm:$0xff] }
  0x37   : > { %1003 = vmatpush3.bf16.msra.mxu0 %v1090_v18  ;;  %1041 = vmatpush3.bf16.msra.mxu1 %v1090_v18  ;;  %v319_v34 = vld [vmem:[#allocation2 + $0x50] sm:$0xff]  ;;  %v317_v36 = vld [vmem:[#allocation2 + $0x40] sm:$0xff]  ;;  %v312_v39 = vld [vmem:[#allocation2 + $0x18] sm:$0xff] }
  0x38   : > { %1004 = vmatprep.subr.bf16.mxu0 %v1091_v19  ;;  %1034 = vmatprep.subr.bf16.mxu1 %v1091_v19  ;;  %v320_v40 = vld [vmem:[#allocation2 + $0x58] sm:$0xff]  ;;  %v310_v45 = vld [vmem:[#allocation2 + $0x8] sm:$0xff]  ;;  %v315_v57 = vld [vmem:[#allocation2 + $0x30] sm:$0xff] }
  0x39   : > { %v318_v46 = vld [vmem:[#allocation2 + $0x48] sm:$0xff]  ;;  %v323_v58 = vld [vmem:[#allocation2 + $0x70] sm:$0xff]  ;;  %v313_v59 = vld [vmem:[#allocation2 + $0x20] sm:$0xff] }
  0x3a   : > { %v321_v60 = vld [vmem:[#allocation2 + $0x60] sm:$0xff]  ;;  %v316_v63 = vld [vmem:[#allocation2 + $0x38] sm:$0xff]  ;;  %v314_v5 = vld [vmem:[#allocation2 + $0x28] sm:$0xff] }
  0x3b   : > { %1005 = vmatpush3.bf16.msra.mxu0 %v1091_v19  ;;  %1042 = vmatpush3.bf16.msra.mxu1 %v1091_v19  ;;  %v324_v0 = vld [vmem:[#allocation2 + $0x78] sm:$0xff]  ;;  %v322_v6 = vld [vmem:[#allocation2 + $0x68] sm:$0xff] }
  0x3c   : > { %1006 = vmatprep.subr.bf16.mxu0 %v1092_v20  ;;  %1035 = vmatprep.subr.bf16.mxu1 %v1092_v20 }
  0x3f   : > { %1007 = vmatpush3.bf16.msra.mxu0 %v1092_v20  ;;  %1043 = vmatpush3.bf16.msra.mxu1 %v1092_v20 }
  0x40   : > { %1008 = vmatprep.subr.bf16.mxu0 %v1093_v23  ;;  %1036 = vmatprep.subr.bf16.mxu1 %v1093_v23 }
  0x43   : > { %1009 = vmatpush3.bf16.msra.mxu0 %v1093_v23  ;;  %1044 = vmatpush3.bf16.msra.mxu1 %v1093_v23 }
  0x44   : > { %1010 = vmatprep.subr.bf16.mxu0 %v1094_v24  ;;  %1037 = vmatprep.subr.bf16.mxu1 %v1094_v24 }
  0x47   : > { %1011 = vmatpush3.bf16.msra.mxu0 %v1094_v24  ;;  %1045 = vmatpush3.bf16.msra.mxu1 %v1094_v24 }
  0x48   : > { %1012 = vmatprep.subr.bf16.mxu0 %v1095_v25  ;;  %1038 = vmatprep.subr.bf16.mxu1 %v1095_v25 }
  0x4b   : > { %1013 = vmatpush3.bf16.msra.mxu0 %v1095_v25  ;;  %1046 = vmatpush3.bf16.msra.mxu1 %v1095_v25 }
  0x4c   : > { %1014 = vmatprep.subr.bf16.mxu0 %v1096_v26  ;;  %1039 = vmatprep.subr.bf16.mxu1 %v1096_v26 }
  0x4f   : > { %1015 = vmatpush3.bf16.msra.mxu0 %v1096_v26  ;;  %1047 = vmatpush3.bf16.msra.mxu1 %v1096_v26 }
  0x52   : > { %1017 = vmatmul.mubr.bf16.vlgmr.msra.gmra.mrb[0].mxu0 %v1099_v27  ;;  %1025 = vmatmul.mubr.bf16.vlgmr.msra.gmra.mrb[0].mxu1 %v1100_v28 }
  0x53   : > { %1020 = vmatprep.mubr.bf16.mxu0 %v1101_v29  ;;  %1028 = vmatprep.mubr.bf16.mxu1 %v1102_v30 }
  0x5a   : > { %1021 = vmatmul.mubr.bf16.gmra.mrb[4].mxu0 %v1103_v31  ;;  %1029 = vmatmul.mubr.bf16.gmra.mrb[4].mxu1 %v1104_v32 }
 0x125   : > { %v1018_v37 = vpop.f32.mrb[0].mxu0  ;;  %v1026_v38 = vpop.f32.mrb[0].mxu1 }
 0x126   : > { %v552_v41 = vadd.f32 %v1018_v37, %v311_v33  ;;  %v560_v42 = vadd.f32 %v1026_v38, %v319_v34  ;;  %v487_v43 = vpop.f32.mrb[1].mxu0  ;;  %v519_v44 = vpop.f32.mrb[1].mxu1 }
 0x127   : > { %v550_v47 = vadd.f32 %v487_v43, %v309_v35  ;;  %v558_v48 = vadd.f32 %v519_v44, %v317_v36  ;;  %v1019_v49 = vpop.f32.mrb[2].mxu0  ;;  %v1027_v50 = vpop.f32.mrb[2].mxu1 }
 0x128   : > { %568 = vst [vmem:[#allocation2 + $0x10] sm:$0xff] %v552_v41  ;;  %576 = vst [vmem:[#allocation2 + $0x50] sm:$0xff] %v560_v42  ;;  %v553_v51 = vadd.f32 %v1019_v49, %v312_v39  ;;  %v561_v52 = vadd.f32 %v1027_v50, %v320_v40  ;;  %v490_v53 = vpop.f32.mrb[3].mxu0  ;;  %v522_v54 = vpop.f32.mrb[3].mxu1 }
 0x129   : > { %566 = vst [vmem:[#allocation2] sm:$0xff] %v550_v47  ;;  %574 = vst [vmem:[#allocation2 + $0x40] sm:$0xff] %v558_v48  ;;  %v551_v55 = vadd.f32 %v490_v53, %v310_v45  ;;  %v559_v56 = vadd.f32 %v522_v54, %v318_v46 }
 0x12a   : > { %569 = vst [vmem:[#allocation2 + $0x18] sm:$0xff] %v553_v51  ;;  %577 = vst [vmem:[#allocation2 + $0x58] sm:$0xff] %v561_v52 }
 0x12b   : > { %567 = vst [vmem:[#allocation2 + $0x8] sm:$0xff] %v551_v55  ;;  %575 = vst [vmem:[#allocation2 + $0x48] sm:$0xff] %v559_v56 }
 0x12d   : > { %v1022_v61 = vpop.f32.mrb[4].mxu0  ;;  %v1030_v62 = vpop.f32.mrb[4].mxu1  ;;  %585 = sbr.rel (%p901_p11) target bundleno = 384 (0x180), region = 77 }
 0x12e   : > { %v556_v1 = vadd.f32 %v1022_v61, %v315_v57  ;;  %v564_v2 = vadd.f32 %v1030_v62, %v323_v58  ;;  %v503_v3 = vpop.f32.mrb[5].mxu0  ;;  %v535_v4 = vpop.f32.mrb[5].mxu1 }
 0x12f   : > { %v554_v7 = vadd.f32 %v503_v3, %v313_v59  ;;  %v562_v8 = vadd.f32 %v535_v4, %v321_v60  ;;  %v1023_v9 = vpop.f32.mrb[6].mxu0  ;;  %v1031_v10 = vpop.f32.mrb[6].mxu1  ;;  %v1257_v19 = vld [vmem:[#allocation2 + $0x10] sm:$0xff] (!%p901_p11) }
 0x130   : > { %572 = vst [vmem:[#allocation2 + $0x30] sm:$0xff] %v556_v1  ;;  %580 = vst [vmem:[#allocation2 + $0x70] sm:$0xff] %v564_v2  ;;  %v557_v11 = vadd.f32 %v1023_v9, %v316_v63  ;;  %v565_v12 = vadd.f32 %v1031_v10, %v324_v0  ;;  %v506_v13 = vpop.f32.mrb[7].mxu0  ;;  %v538_v14 = vpop.f32.mrb[7].mxu1  ;;  %v1253_v17 = vld [vmem:[#allocation2] sm:$0xff] (!%p901_p11)  ;;  %v626_v24 = vmul.f32 (!%p901_p11), %v1257_v19, %v1257_v19  ;;  %v1299_v49 = vld [vmem:[#allocation2 + $0x50] sm:$0xff] (!%p901_p11) }
 0x131   : > { %570 = vst [vmem:[#allocation2 + $0x20] sm:$0xff] %v554_v7  ;;  %578 = vst [vmem:[#allocation2 + $0x60] sm:$0xff] %v562_v8  ;;  %v555_v15 = vadd.f32 %v506_v13, %v314_v5  ;;  %v563_v16 = vadd.f32 %v538_v14, %v322_v6  ;;  %v1259_v20 = vld [vmem:[#allocation2 + $0x18] sm:$0xff] (!%p901_p11)  ;;  %v624_v22 = vmul.f32 (!%p901_p11), %v1253_v17, %v1253_v17  ;;  %v1289_v41 = vld [vmem:[#allocation2 + $0x40] sm:$0xff] (!%p901_p11) }
 0x132   : > { %573 = vst [vmem:[#allocation2 + $0x38] sm:$0xff] %v557_v11  ;;  %581 = vst [vmem:[#allocation2 + $0x78] sm:$0xff] %v565_v12  ;;  %v1255_v18 = vld [vmem:[#allocation2 + $0x8] sm:$0xff] (!%p901_p11)  ;;  %v627_v27 = vmul.f32 (!%p901_p11), %v1259_v20, %v1259_v20  ;;  %v632_v47 = vmul.f32 (!%p901_p11), %v1289_v41, %v1289_v41  ;;  %v1304_v53 = vld [vmem:[#allocation2 + $0x58] sm:$0xff] (!%p901_p11)  ;;  %v634_v55 = vmul.f32 (!%p901_p11), %v1299_v49, %v1299_v49 }
 0x133   : > { %571 = vst [vmem:[#allocation2 + $0x28] sm:$0xff] %v555_v15  ;;  %579 = vst [vmem:[#allocation2 + $0x68] sm:$0xff] %v563_v16  ;;  %v602_v21 = vadd.f32 (!%p901_p11), %v1255_v18, %v1253_v17  ;;  %v625_v23 = vmul.f32 (!%p901_p11), %v1255_v18, %v1255_v18  ;;  %v1294_v45 = vld [vmem:[#allocation2 + $0x48] sm:$0xff] (!%p901_p11)  ;;  %v635_v59 = vmul.f32 (!%p901_p11), %v1304_v53, %v1304_v53 }
 0x134   : > { %v633_v51 = vmul.f32 %v1294_v45, %v1294_v45 }
 0x135   : > { %v603_v26 = vadd.f32 %v602_v21, %v1257_v19  ;;  %v640_v28 = vadd.f32 %v625_v23, %v624_v22 }
 0x137   : > { %v604_v30 = vadd.f32 %v603_v26, %v1259_v20  ;;  %v641_v32 = vadd.f32 %v640_v28, %v626_v24  ;;  %v1279_v33 = vld [vmem:[#allocation2 + $0x30] sm:$0xff] }
 0x138   : > { %v1269_v25 = vld [vmem:[#allocation2 + $0x20] sm:$0xff]  ;;  %v630_v39 = vmul.f32 %v1279_v33, %v1279_v33  ;;  %v1319_v1 = vld [vmem:[#allocation2 + $0x70] sm:$0xff] }
 0x139   : > { %v628_v31 = vmul.f32 %v1269_v25, %v1269_v25  ;;  %v605_v34 = vadd.f32 %v604_v30, %v1269_v25  ;;  %v642_v36 = vadd.f32 %v641_v32, %v627_v27  ;;  %v1284_v37 = vld [vmem:[#allocation2 + $0x38] sm:$0xff]  ;;  %v1309_v57 = vld [vmem:[#allocation2 + $0x60] sm:$0xff]  ;;  %v638_v7 = vmul.f32 %v1319_v1, %v1319_v1 }
 0x13a   : > { %v1274_v29 = vld [vmem:[#allocation2 + $0x28] sm:$0xff]  ;;  %v631_v43 = vmul.f32 %v1284_v37, %v1284_v37  ;;  %v636_v63 = vmul.f32 %v1309_v57, %v1309_v57  ;;  %v1324_v5 = vld [vmem:[#allocation2 + $0x78] sm:$0xff] }
 0x13b   : > { %v629_v35 = vmul.f32 %v1274_v29, %v1274_v29  ;;  %v606_v38 = vadd.f32 %v605_v34, %v1274_v29  ;;  %v643_v40 = vadd.f32 %v642_v36, %v628_v31  ;;  %v1314_v61 = vld [vmem:[#allocation2 + $0x68] sm:$0xff]  ;;  %v639_v10 = vmul.f32 %v1324_v5, %v1324_v5 }
 0x13c   : > { %v637_v3 = vmul.f32 %v1314_v61, %v1314_v61 }
 0x13d   : > { %v607_v42 = vadd.f32 %v606_v38, %v1279_v33  ;;  %v644_v44 = vadd.f32 %v643_v40, %v629_v35 }
 0x13f   : > { %v608_v46 = vadd.f32 %v607_v42, %v1284_v37  ;;  %v645_v48 = vadd.f32 %v644_v44, %v630_v39 }
 0x141   : > { %v609_v50 = vadd.f32 %v608_v46, %v1289_v41  ;;  %v646_v52 = vadd.f32 %v645_v48, %v631_v43 }
 0x143   : > { %v610_v54 = vadd.f32 %v609_v50, %v1294_v45  ;;  %v647_v56 = vadd.f32 %v646_v52, %v632_v47 }
 0x145   : > { %v611_v58 = vadd.f32 %v610_v54, %v1299_v49  ;;  %v648_v60 = vadd.f32 %v647_v56, %v633_v51 }
 0x147   : > { %v612_v62 = vadd.f32 %v611_v58, %v1304_v53  ;;  %v649_v0 = vadd.f32 %v648_v60, %v634_v55 }
 0x149   : > { %v613_v2 = vadd.f32 %v612_v62, %v1309_v57  ;;  %v650_v4 = vadd.f32 %v649_v0, %v635_v59 }
 0x14b   : > { %v614_v6 = vadd.f32 %v613_v2, %v1314_v61  ;;  %v651_v8 = vadd.f32 %v650_v4, %v636_v63 }
 0x14d   : > { %v615_v9 = vadd.f32 %v614_v6, %v1319_v1  ;;  %v652_v11 = vadd.f32 %v651_v8, %v637_v3 }
 0x14f   : > { %v616_v12 = vadd.f32 %v615_v9, %v1324_v5  ;;  %v653_v13 = vadd.f32 %v652_v11, %v638_v7 }
 0x151   : > { %v617_v14 = vrot.slane %v616_v12, 4  ;;  %v654_v15 = vadd.f32 %v653_v13, %v639_v10 }
 0x153   : > { %v618_v16 = vadd.f32 %v617_v14, %v616_v12  ;;  %v655_v21 = vrot.slane %v654_v15, 4 }
 0x155   : > { %v619_v22 = vrot.slane %v618_v16, 2  ;;  %v656_v23 = vadd.f32 %v655_v21, %v654_v15 }
 0x157   : > { %v620_v24 = vadd.f32 %v619_v22, %v618_v16  ;;  %v657_v26 = vrot.slane %v656_v23, 2 }
 0x159   : > { %v621_v27 = vrot.slane %v620_v24, 1  ;;  %v658_v28 = vadd.f32 %v657_v26, %v656_v23 }
 0x15b   : > { %v622_v30 = vadd.f32 %v621_v27, %v620_v24  ;;  %v659_v31 = vrot.slane %v658_v28, 1 }
 0x15d   : > { %v623_v32 = vmul.f32 0.0078125, %v622_v30  ;;  %v660_v34 = vadd.f32 %v659_v31, %v658_v28 }
 0x15f   : > { %v662_v35 = vmul.f32 %v623_v32, %v623_v32  ;;  %v661_v36 = vmul.f32 0.0078125, %v660_v34  ;;  %v665_v42 = vsub.f32 %v1253_v17, %v623_v32  ;;  %v666_v43 = vsub.f32 %v1255_v18, %v623_v32 }
 0x160   : > { %v667_v44 = vsub.f32 %v1257_v19, %v623_v32  ;;  %v668_v46 = vsub.f32 %v1259_v20, %v623_v32  ;;  %v669_v47 = vsub.f32 %v1269_v25, %v623_v32  ;;  %v670_v48 = vsub.f32 %v1274_v29, %v623_v32 }
 0x161   : > { %v663_v38 = vsub.f32 %v661_v36, %v662_v35  ;;  %v671_v50 = vsub.f32 %v1279_v33, %v623_v32  ;;  %v672_v51 = vsub.f32 %v1284_v37, %v623_v32  ;;  %v673_v52 = vsub.f32 %v1289_v41, %v623_v32 }
 0x162   : > { %v674_v54 = vsub.f32 %v1294_v45, %v623_v32  ;;  %v675_v17 = vsub.f32 %v1299_v49, %v623_v32  ;;  %v676_v18 = vsub.f32 %v1304_v53, %v623_v32  ;;  %v677_v19 = vsub.f32 %v1309_v57, %v623_v32 }
 0x163   : > { %v664_v39 = vmax.f32 %v663_v38, 0.0  ;;  %v678_v20 = vsub.f32 %v1314_v61, %v623_v32  ;;  %v679_v25 = vsub.f32 %v1319_v1, %v623_v32  ;;  %v680_v29 = vsub.f32 %v1324_v5, %v623_v32 }
 0x165   : > { %v681_v40 = vadd.f32 1e-05, %v664_v39 }
 0x167   : > { %1105 = vrsqrt.f32 %v681_v40 }
 0x171   : > { %v1106_v55 = vpop.eup %1105 }
 0x172   : > { %v683_v33 = vmul.f32 %v1106_v55, %v665_v42  ;;  %v684_v56 = vmul.f32 %v1106_v55, %v666_v43  ;;  %v685_v37 = vmul.f32 %v1106_v55, %v667_v44  ;;  %v686_v58 = vmul.f32 %v1106_v55, %v668_v46 }
 0x173   : > { %v687_v41 = vmul.f32 %v1106_v55, %v669_v47  ;;  %v688_v59 = vmul.f32 %v1106_v55, %v670_v48  ;;  %v689_v45 = vmul.f32 %v1106_v55, %v671_v50  ;;  %v690_v60 = vmul.f32 %v1106_v55, %v672_v51 }
 0x174   : > { %v699_v49 = vmax.f32 %v683_v33, 0.0  ;;  %v700_v62 = vmax.f32 %v684_v56, 0.0  ;;  %v701_v53 = vmax.f32 %v685_v37, 0.0  ;;  %v702_v63 = vmax.f32 %v686_v58, 0.0 }
 0x175   : > { %v703_v0 = vmax.f32 %v687_v41, 0.0  ;;  %v704_v57 = vmax.f32 %v688_v59, 0.0  ;;  %v705_v2 = vmax.f32 %v689_v45, 0.0  ;;  %v706_v61 = vmax.f32 %v690_v60, 0.0 }
 0x176   : > { %v940_v3 = vpack.c.bf16 %v700_v62, %v699_v49  ;;  %v945_v1 = vpack.c.bf16 %v702_v63, %v701_v53  ;;  %v691_v4 = vmul.f32 %v1106_v55, %v673_v52  ;;  %v692_v5 = vmul.f32 %v1106_v55, %v674_v54 }
 0x177   : > { %v950_v6 = vpack.c.bf16 %v704_v57, %v703_v0  ;;  %v955_v7 = vpack.c.bf16 %v706_v61, %v705_v2  ;;  %v693_v8 = vmul.f32 %v1106_v55, %v675_v17  ;;  %v694_v9 = vmul.f32 %v1106_v55, %v676_v18 }
 0x178   : > { %941 = vst [vmem:[%s1390_s2] sm:$0xff] %v940_v3   ;;  %977 = vst [vmem:[%s1390_s2 + $0x8] sm:$0xff] %v945_v1   ;;  %v707_v10 = vmax.f32 %v691_v4, 0.0  ;;  %v708_v11 = vmax.f32 %v692_v5, 0.0  ;;  %v695_v12 = vmul.f32 %v1106_v55, %v677_v19  ;;  %v696_v13 = vmul.f32 %v1106_v55, %v678_v20 }
 0x179   : > { %978 = vst [vmem:[%s1390_s2 + $0x10] sm:$0xff] %v950_v6   ;;  %979 = vst [vmem:[%s1390_s2 + $0x18] sm:$0xff] %v955_v7   ;;  %v709_v14 = vmax.f32 %v693_v8, 0.0  ;;  %v710_v15 = vmax.f32 %v694_v9, 0.0  ;;  %v697_v16 = vmul.f32 %v1106_v55, %v679_v25  ;;  %v698_v21 = vmul.f32 %v1106_v55, %v680_v29 }
 0x17a   : > { %v960_v22 = vpack.c.bf16 %v708_v11, %v707_v10  ;;  %v711_v23 = vmax.f32 %v695_v12, 0.0  ;;  %v712_v24 = vmax.f32 %v696_v13, 0.0 }
 0x17b   : > { %v965_v26 = vpack.c.bf16 %v710_v15, %v709_v14  ;;  %v713_v27 = vmax.f32 %v697_v16, 0.0  ;;  %v714_v28 = vmax.f32 %v698_v21, 0.0 }
 0x17c   : > { %980 = vst [vmem:[%s1390_s2 + $0x20] sm:$0xff] %v960_v22   ;;  %v970_v30 = vpack.c.bf16 %v712_v24, %v711_v23 }
 0x17d   : > { %981 = vst [vmem:[%s1390_s2 + $0x28] sm:$0xff] %v965_v26   ;;  %v975_v31 = vpack.c.bf16 %v714_v28, %v713_v27 }
 0x17e   : > { %982 = vst [vmem:[%s1390_s2 + $0x30] sm:$0xff] %v970_v30  }
 0x17f   : > { %983 = vst [vmem:[%s1390_s2 + $0x38] sm:$0xff] %v975_v31  }
 0x180 PF: > { %s12_s13 = sadd.s32 1, %s1145_s13   ;;  %s1391_s9 = smov %s1133_s10 }
 0x181   : > { %p9_p12 = scmp.ge.s32.totalorder %s12_s13, 11   ;;  %s1392_s10 = smov %s1198_s17 }
 0x182   : > { %s1393_s11 = smov %s1141_s12  ;;  %s1394_s12 = smov %s1396_s14 }
 0x183   :  { %11 = sbr.rel (!%p9_p12) target bundleno = 3 (0x3), region = 115 }

// kernel: _lambda_.14
= control target key start
LH: loop header
LB: loop body
LE: loop exit
PB: predicated region body
PF: predicated region fallthrough
CT: control target
= control target key end

     0   :  { %v2411_v0 = vmov 0   ;;  %s3707_s1 = inlined_call_operand.vmem [shape: bf16[256,128], index: 1, kind: input, shape index: {}]   ;;  %s3708_s0 = inlined_call_operand.vmem [shape: bf16[512,256], index: 0, kind: input, shape index: {}]   ;;  %s3709_s2 = inlined_call_operand.vmem [shape: bf16[512,128], index: 2, kind: output, shape index: {}]  }
   0x1   :  { %656 = vmatprep.subr.bf16.mxu0 %v2411_v0  ;;  %v2297_v1 = vld [vmem:[%s3707_s1] sm:$0xff]   ;;  %2264 = vmatprep.subr.bf16.mxu1 %v2411_v0  ;;  %v2298_v2 = vld [vmem:[%s3707_s1 + $0x8] sm:$0xff]   ;;  %v2299_v3 = vld [vmem:[%s3707_s1 + $0x10] sm:$0xff]  }
   0x2   :  { %657 = vmatpush1.bf16.msra.mxu0 %v2297_v1  ;;  %2280 = vmatpush1.bf16.msra.mxu1 %v2297_v1  ;;  %v2300_v4 = vld [vmem:[%s3707_s1 + $0x18] sm:$0xff]   ;;  %v2301_v5 = vld [vmem:[%s3707_s1 + $0x20] sm:$0xff]   ;;  %v2302_v7 = vld [vmem:[%s3707_s1 + $0x28] sm:$0xff]  }
   0x3   :  { %658 = vmatprep.subr.bf16.mxu0 %v2411_v0  ;;  %2265 = vmatprep.subr.bf16.mxu1 %v2411_v0  ;;  %v2315_v6 = vld [vmem:[%s3708_s0 + $0x4] ss:$8 sps:$4 sm:$0xff]   ;;  %v2303_v8 = vld [vmem:[%s3707_s1 + $0x30] sm:$0xff]   ;;  %v2304_v9 = vld [vmem:[%s3707_s1 + $0x38] sm:$0xff]  }
   0x4   :  { %688 = vmatprep.mubr.bf16.mxu0 %v2315_v6  ;;  %v2339_v10 = vld [vmem:[%s3708_s0 + $0x104] ss:$8 sps:$4 sm:$0xff]   ;;  %v2307_v13 = vld [vmem:[%s3707_s1 + $0x50] sm:$0xff]   ;;  %v2308_v14 = vld [vmem:[%s3707_s1 + $0x58] sm:$0xff]  }
   0x5   :  { %816 = vmatprep.mubr.bf16.mxu1 %v2339_v10  ;;  %v2305_v11 = vld [vmem:[%s3707_s1 + $0x40] sm:$0xff]   ;;  %v2306_v12 = vld [vmem:[%s3707_s1 + $0x48] sm:$0xff]   ;;  %v2311_v17 = vld [vmem:[%s3707_s1 + $0x70] sm:$0xff]  }
   0x6   :  { %659 = vmatpush1.bf16.msra.mxu0 %v2298_v2  ;;  %2281 = vmatpush1.bf16.msra.mxu1 %v2298_v2  ;;  %v2309_v15 = vld [vmem:[%s3707_s1 + $0x60] sm:$0xff]   ;;  %v2310_v16 = vld [vmem:[%s3707_s1 + $0x68] sm:$0xff]   ;;  %v2312_v18 = vld [vmem:[%s3707_s1 + $0x78] sm:$0xff]  }
   0x7   :  { %660 = vmatprep.subr.bf16.mxu0 %v2411_v0  ;;  %2266 = vmatprep.subr.bf16.mxu1 %v2411_v0  ;;  %v2313_v19 = vld [vmem:[%s3708_s0] ss:$8 sps:$4 sm:$0xff]   ;;  %v2316_v21 = vld [vmem:[%s3708_s0 + $0x14] ss:$8 sps:$4 sm:$0xff]   ;;  %v2318_v23 = vld [vmem:[%s3708_s0 + $0x10] ss:$8 sps:$4 sm:$0xff]  }
   0x8   :  { %v2337_v20 = vld [vmem:[%s3708_s0 + $0x100] ss:$8 sps:$4 sm:$0xff]   ;;  %v2343_v22 = vld [vmem:[%s3708_s0 + $0x114] ss:$8 sps:$4 sm:$0xff]   ;;  %v2345_v24 = vld [vmem:[%s3708_s0 + $0x110] ss:$8 sps:$4 sm:$0xff]  }
   0x9   :  { %v2319_v25 = vld [vmem:[%s3708_s0 + $0x24] ss:$8 sps:$4 sm:$0xff]   ;;  %v2321_v27 = vld [vmem:[%s3708_s0 + $0x20] ss:$8 sps:$4 sm:$0xff]   ;;  %v2322_v29 = vld [vmem:[%s3708_s0 + $0x34] ss:$8 sps:$4 sm:$0xff]  }
   0xa   :  { %661 = vmatpush1.bf16.msra.mxu0 %v2299_v3  ;;  %2282 = vmatpush1.bf16.msra.mxu1 %v2299_v3  ;;  %v2349_v26 = vld [vmem:[%s3708_s0 + $0x124] ss:$8 sps:$4 sm:$0xff]   ;;  %v2351_v28 = vld [vmem:[%s3708_s0 + $0x120] ss:$8 sps:$4 sm:$0xff]   ;;  %v2355_v30 = vld [vmem:[%s3708_s0 + $0x134] ss:$8 sps:$4 sm:$0xff]  }
   0xb   :  { %662 = vmatprep.subr.bf16.mxu0 %v2411_v0  ;;  %2267 = vmatprep.subr.bf16.mxu1 %v2411_v0  ;;  %v2324_v31 = vld [vmem:[%s3708_s0 + $0x30] ss:$8 sps:$4 sm:$0xff]   ;;  %v2325_v33 = vld [vmem:[%s3708_s0 + $0x44] ss:$8 sps:$4 sm:$0xff]   ;;  %v2327_v35 = vld [vmem:[%s3708_s0 + $0x40] ss:$8 sps:$4 sm:$0xff]  }
   0xc   :  { %v2357_v32 = vld [vmem:[%s3708_s0 + $0x130] ss:$8 sps:$4 sm:$0xff]   ;;  %v2361_v34 = vld [vmem:[%s3708_s0 + $0x144] ss:$8 sps:$4 sm:$0xff]   ;;  %v2363_v36 = vld [vmem:[%s3708_s0 + $0x140] ss:$8 sps:$4 sm:$0xff]  }
   0xd   :  { %v2328_v37 = vld [vmem:[%s3708_s0 + $0x54] ss:$8 sps:$4 sm:$0xff]   ;;  %v2330_v39 = vld [vmem:[%s3708_s0 + $0x50] ss:$8 sps:$4 sm:$0xff]   ;;  %v2331_v41 = vld [vmem:[%s3708_s0 + $0x64] ss:$8 sps:$4 sm:$0xff]  }
   0xe   :  { %663 = vmatpush1.bf16.msra.mxu0 %v2300_v4  ;;  %2283 = vmatpush1.bf16.msra.mxu1 %v2300_v4  ;;  %v2367_v38 = vld [vmem:[%s3708_s0 + $0x154] ss:$8 sps:$4 sm:$0xff]   ;;  %v2369_v40 = vld [vmem:[%s3708_s0 + $0x150] ss:$8 sps:$4 sm:$0xff]   ;;  %v2373_v42 = vld [vmem:[%s3708_s0 + $0x164] ss:$8 sps:$4 sm:$0xff]  }
   0xf   :  { %664 = vmatprep.subr.bf16.mxu0 %v2411_v0  ;;  %2268 = vmatprep.subr.bf16.mxu1 %v2411_v0  ;;  %v2333_v43 = vld [vmem:[%s3708_s0 + $0x60] ss:$8 sps:$4 sm:$0xff]   ;;  %v2334_v45 = vld [vmem:[%s3708_s0 + $0x74] ss:$8 sps:$4 sm:$0xff]   ;;  %v2336_v47 = vld [vmem:[%s3708_s0 + $0x70] ss:$8 sps:$4 sm:$0xff]  }
  0x10   :  { %v2375_v44 = vld [vmem:[%s3708_s0 + $0x160] ss:$8 sps:$4 sm:$0xff]   ;;  %v2379_v46 = vld [vmem:[%s3708_s0 + $0x174] ss:$8 sps:$4 sm:$0xff]   ;;  %v2381_v48 = vld [vmem:[%s3708_s0 + $0x170] ss:$8 sps:$4 sm:$0xff]  }
  0x11   :  { %v2340_v49 = vld [vmem:[%s3708_s0 + $0x84] ss:$8 sps:$4 sm:$0xff]   ;;  %v2342_v51 = vld [vmem:[%s3708_s0 + $0x80] ss:$8 sps:$4 sm:$0xff]   ;;  %v2346_v53 = vld [vmem:[%s3708_s0 + $0x94] ss:$8 sps:$4 sm:$0xff]  }
  0x12   :  { %665 = vmatpush1.bf16.msra.mxu0 %v2301_v5  ;;  %2284 = vmatpush1.bf16.msra.mxu1 %v2301_v5  ;;  %v2385_v50 = vld [vmem:[%s3708_s0 + $0x184] ss:$8 sps:$4 sm:$0xff]   ;;  %v2387_v52 = vld [vmem:[%s3708_s0 + $0x180] ss:$8 sps:$4 sm:$0xff]   ;;  %v2388_v54 = vld [vmem:[%s3708_s0 + $0x194] ss:$8 sps:$4 sm:$0xff]  }
  0x13   :  { %666 = vmatprep.subr.bf16.mxu0 %v2411_v0  ;;  %2269 = vmatprep.subr.bf16.mxu1 %v2411_v0  ;;  %v2348_v55 = vld [vmem:[%s3708_s0 + $0x90] ss:$8 sps:$4 sm:$0xff]   ;;  %v2352_v57 = vld [vmem:[%s3708_s0 + $0xa4] ss:$8 sps:$4 sm:$0xff]   ;;  %v2354_v59 = vld [vmem:[%s3708_s0 + $0xa0] ss:$8 sps:$4 sm:$0xff]  }
  0x14   :  { %v2390_v56 = vld [vmem:[%s3708_s0 + $0x190] ss:$8 sps:$4 sm:$0xff]   ;;  %v2391_v58 = vld [vmem:[%s3708_s0 + $0x1a4] ss:$8 sps:$4 sm:$0xff]   ;;  %v2393_v60 = vld [vmem:[%s3708_s0 + $0x1a0] ss:$8 sps:$4 sm:$0xff]  }
  0x15   :  { %v2358_v61 = vld [vmem:[%s3708_s0 + $0xb4] ss:$8 sps:$4 sm:$0xff]   ;;  %v2360_v63 = vld [vmem:[%s3708_s0 + $0xb0] ss:$8 sps:$4 sm:$0xff]   ;;  %v2364_v1 = vld [vmem:[%s3708_s0 + $0xc4] ss:$8 sps:$4 sm:$0xff]  }
  0x16   :  { %667 = vmatpush1.bf16.msra.mxu0 %v2302_v7  ;;  %2285 = vmatpush1.bf16.msra.mxu1 %v2302_v7  ;;  %v2394_v62 = vld [vmem:[%s3708_s0 + $0x1b4] ss:$8 sps:$4 sm:$0xff]   ;;  %v2397_v2 = vld [vmem:[%s3708_s0 + $0x1c4] ss:$8 sps:$4 sm:$0xff]   ;;  %v2366_v3 = vld [vmem:[%s3708_s0 + $0xc0] ss:$8 sps:$4 sm:$0xff]  }
  0x17   :  { %668 = vmatprep.subr.bf16.mxu0 %v2411_v0  ;;  %2270 = vmatprep.subr.bf16.mxu1 %v2411_v0  ;;  %v2399_v4 = vld [vmem:[%s3708_s0 + $0x1c0] ss:$8 sps:$4 sm:$0xff]   ;;  %v2370_v5 = vld [vmem:[%s3708_s0 + $0xd4] ss:$8 sps:$4 sm:$0xff]   ;;  %v2372_v7 = vld [vmem:[%s3708_s0 + $0xd0] ss:$8 sps:$4 sm:$0xff]  }
  0x18   :  { %v2400_v6 = vld [vmem:[%s3708_s0 + $0x1d4] ss:$8 sps:$4 sm:$0xff]   ;;  %v2403_v10 = vld [vmem:[%s3708_s0 + $0x1e4] ss:$8 sps:$4 sm:$0xff]  }
  0x1a   :  { %669 = vmatpush1.bf16.msra.mxu0 %v2303_v8  ;;  %2286 = vmatpush1.bf16.msra.mxu1 %v2303_v8  ;;  %v2402_v8 = vld [vmem:[%s3708_s0 + $0x1d0] ss:$8 sps:$4 sm:$0xff]  }
  0x1b   :  { %670 = vmatprep.subr.bf16.mxu0 %v2411_v0  ;;  %2271 = vmatprep.subr.bf16.mxu1 %v2411_v0 }
  0x1e   :  { %671 = vmatpush1.bf16.msra.mxu0 %v2304_v9  ;;  %2287 = vmatpush1.bf16.msra.mxu1 %v2304_v9  ;;  %v2376_v9 = vld [vmem:[%s3708_s0 + $0xe4] ss:$8 sps:$4 sm:$0xff]  }
  0x1f   :  { %672 = vmatprep.subr.bf16.mxu0 %v2411_v0  ;;  %2272 = vmatprep.subr.bf16.mxu1 %v2411_v0 }
  0x22   :  { %673 = vmatpush1.bf16.msra.mxu0 %v2305_v11  ;;  %2288 = vmatpush1.bf16.msra.mxu1 %v2305_v11  ;;  %v2378_v11 = vld [vmem:[%s3708_s0 + $0xe0] ss:$8 sps:$4 sm:$0xff]  }
  0x23   :  { %674 = vmatprep.subr.bf16.mxu0 %v2411_v0  ;;  %2273 = vmatprep.subr.bf16.mxu1 %v2411_v0 }
  0x26   :  { %675 = vmatpush1.bf16.msra.mxu0 %v2306_v12  ;;  %2289 = vmatpush1.bf16.msra.mxu1 %v2306_v12  ;;  %v2405_v12 = vld [vmem:[%s3708_s0 + $0x1e0] ss:$8 sps:$4 sm:$0xff]  }
  0x27   :  { %676 = vmatprep.subr.bf16.mxu0 %v2411_v0  ;;  %2274 = vmatprep.subr.bf16.mxu1 %v2411_v0 }
  0x2a   :  { %677 = vmatpush1.bf16.msra.mxu0 %v2307_v13  ;;  %2290 = vmatpush1.bf16.msra.mxu1 %v2307_v13  ;;  %v2382_v13 = vld [vmem:[%s3708_s0 + $0xf4] ss:$8 sps:$4 sm:$0xff]  }
  0x2b   :  { %678 = vmatprep.subr.bf16.mxu0 %v2411_v0  ;;  %2275 = vmatprep.subr.bf16.mxu1 %v2411_v0 }
  0x2e   :  { %679 = vmatpush1.bf16.msra.mxu0 %v2308_v14  ;;  %2291 = vmatpush1.bf16.msra.mxu1 %v2308_v14  ;;  %v2406_v14 = vld [vmem:[%s3708_s0 + $0x1f4] ss:$8 sps:$4 sm:$0xff]  }
  0x2f   :  { %680 = vmatprep.subr.bf16.mxu0 %v2411_v0  ;;  %2276 = vmatprep.subr.bf16.mxu1 %v2411_v0 }
  0x32   :  { %681 = vmatpush1.bf16.msra.mxu0 %v2309_v15  ;;  %2292 = vmatpush1.bf16.msra.mxu1 %v2309_v15  ;;  %v2384_v15 = vld [vmem:[%s3708_s0 + $0xf0] ss:$8 sps:$4 sm:$0xff]  }
  0x33   :  { %682 = vmatprep.subr.bf16.mxu0 %v2411_v0  ;;  %2277 = vmatprep.subr.bf16.mxu1 %v2411_v0 }
  0x36   :  { %683 = vmatpush1.bf16.msra.mxu0 %v2310_v16  ;;  %2293 = vmatpush1.bf16.msra.mxu1 %v2310_v16  ;;  %v2408_v16 = vld [vmem:[%s3708_s0 + $0x1f0] ss:$8 sps:$4 sm:$0xff]  }
  0x37   :  { %684 = vmatprep.subr.bf16.mxu0 %v2411_v0  ;;  %2278 = vmatprep.subr.bf16.mxu1 %v2411_v0 }
  0x3a   :  { %685 = vmatpush1.bf16.msra.mxu0 %v2311_v17  ;;  %2294 = vmatpush1.bf16.msra.mxu1 %v2311_v17 }
  0x3b   :  { %686 = vmatprep.subr.bf16.mxu0 %v2411_v0  ;;  %2279 = vmatprep.subr.bf16.mxu1 %v2411_v0  ;;  %v2396_v0 = vld [vmem:[%s3708_s0 + $0x1b0] ss:$8 sps:$4 sm:$0xff]  }
  0x3e   :  { %687 = vmatpush1.bf16.msra.mxu0 %v2312_v18  ;;  %2295 = vmatpush1.bf16.msra.mxu1 %v2312_v18 }
  0x41   :  { %689 = vmatmul.mubr.bf16.vlgmr.msra.gmra.mrb[0].mxu0 %v2313_v19  ;;  %817 = vmatmul.mubr.bf16.vlgmr.msra.gmra.mrb[0].mxu1 %v2337_v20 }
  0x42   :  { %696 = vmatprep.mubr.bf16.mxu0 %v2316_v21  ;;  %824 = vmatprep.mubr.bf16.mxu1 %v2343_v22 }
  0x49   :  { %697 = vmatmul.mubr.bf16.gmra.mrb[4].mxu0 %v2318_v23  ;;  %825 = vmatmul.mubr.bf16.gmra.mrb[4].mxu1 %v2345_v24 }
  0x4a   :  { %704 = vmatprep.mubr.bf16.mxu0 %v2319_v25  ;;  %832 = vmatprep.mubr.bf16.mxu1 %v2349_v26 }
  0x51   :  { %705 = vmatmul.mubr.bf16.gmra.mrb[8].mxu0 %v2321_v27  ;;  %833 = vmatmul.mubr.bf16.gmra.mrb[8].mxu1 %v2351_v28 }
  0x52   :  { %712 = vmatprep.mubr.bf16.mxu0 %v2322_v29  ;;  %840 = vmatprep.mubr.bf16.mxu1 %v2355_v30 }
  0x59   :  { %713 = vmatmul.mubr.bf16.gmra.mrb[12].mxu0 %v2324_v31  ;;  %841 = vmatmul.mubr.bf16.gmra.mrb[12].mxu1 %v2357_v32 }
  0x5a   :  { %720 = vmatprep.mubr.bf16.mxu0 %v2325_v33  ;;  %848 = vmatprep.mubr.bf16.mxu1 %v2361_v34 }
  0x61   :  { %721 = vmatmul.mubr.bf16.gmra.mrb[16].mxu0 %v2327_v35  ;;  %849 = vmatmul.mubr.bf16.gmra.mrb[16].mxu1 %v2363_v36 }
  0x62   :  { %728 = vmatprep.mubr.bf16.mxu0 %v2328_v37  ;;  %856 = vmatprep.mubr.bf16.mxu1 %v2367_v38 }
  0x69   :  { %729 = vmatmul.mubr.bf16.gmra.mrb[20].mxu0 %v2330_v39  ;;  %857 = vmatmul.mubr.bf16.gmra.mrb[20].mxu1 %v2369_v40 }
  0x6a   :  { %736 = vmatprep.mubr.bf16.mxu0 %v2331_v41  ;;  %864 = vmatprep.mubr.bf16.mxu1 %v2373_v42 }
  0x71   :  { %737 = vmatmul.mubr.bf16.gmra.mrb[24].mxu0 %v2333_v43  ;;  %865 = vmatmul.mubr.bf16.gmra.mrb[24].mxu1 %v2375_v44 }
  0x72   :  { %744 = vmatprep.mubr.bf16.mxu0 %v2334_v45  ;;  %872 = vmatprep.mubr.bf16.mxu1 %v2379_v46 }
  0x79   :  { %745 = vmatmul.mubr.bf16.gmra.mrb[28].mxu0 %v2336_v47  ;;  %873 = vmatmul.mubr.bf16.gmra.mrb[28].mxu1 %v2381_v48 }
  0x7a   :  { %752 = vmatprep.mubr.bf16.mxu0 %v2340_v49  ;;  %880 = vmatprep.mubr.bf16.mxu1 %v2385_v50 }
  0x81   :  { %753 = vmatmul.mubr.bf16.gmra.mrb[32].mxu0 %v2342_v51  ;;  %881 = vmatmul.mubr.bf16.gmra.mrb[32].mxu1 %v2387_v52 }
  0x82   :  { %760 = vmatprep.mubr.bf16.mxu0 %v2346_v53  ;;  %888 = vmatprep.mubr.bf16.mxu1 %v2388_v54 }
  0x89   :  { %761 = vmatmul.mubr.bf16.gmra.mrb[36].mxu0 %v2348_v55  ;;  %889 = vmatmul.mubr.bf16.gmra.mrb[36].mxu1 %v2390_v56 }
  0x8a   :  { %768 = vmatprep.mubr.bf16.mxu0 %v2352_v57  ;;  %896 = vmatprep.mubr.bf16.mxu1 %v2391_v58 }
  0x91   :  { %769 = vmatmul.mubr.bf16.gmra.mrb[40].mxu0 %v2354_v59  ;;  %897 = vmatmul.mubr.bf16.gmra.mrb[40].mxu1 %v2393_v60 }
  0x92   :  { %776 = vmatprep.mubr.bf16.mxu0 %v2358_v61  ;;  %904 = vmatprep.mubr.bf16.mxu1 %v2394_v62 }
  0x99   :  { %777 = vmatmul.mubr.bf16.gmra.mrb[44].mxu0 %v2360_v63  ;;  %905 = vmatmul.mubr.bf16.gmra.mrb[44].mxu1 %v2396_v0 }
  0x9a   :  { %784 = vmatprep.mubr.bf16.mxu0 %v2364_v1  ;;  %912 = vmatprep.mubr.bf16.mxu1 %v2397_v2 }
  0xa1   :  { %785 = vmatmul.mubr.bf16.gmra.mrb[48].mxu0 %v2366_v3  ;;  %913 = vmatmul.mubr.bf16.gmra.mrb[48].mxu1 %v2399_v4 }
  0xa2   :  { %792 = vmatprep.mubr.bf16.mxu0 %v2370_v5  ;;  %920 = vmatprep.mubr.bf16.mxu1 %v2400_v6 }
  0xa9   :  { %793 = vmatmul.mubr.bf16.gmra.mrb[52].mxu0 %v2372_v7  ;;  %921 = vmatmul.mubr.bf16.gmra.mrb[52].mxu1 %v2402_v8 }
  0xaa   :  { %800 = vmatprep.mubr.bf16.mxu0 %v2376_v9  ;;  %928 = vmatprep.mubr.bf16.mxu1 %v2403_v10 }
  0xb1   :  { %801 = vmatmul.mubr.bf16.gmra.mrb[56].mxu0 %v2378_v11  ;;  %929 = vmatmul.mubr.bf16.gmra.mrb[56].mxu1 %v2405_v12 }
  0xb2   :  { %808 = vmatprep.mubr.bf16.mxu0 %v2382_v13  ;;  %936 = vmatprep.mubr.bf16.mxu1 %v2406_v14 }
  0xb9   :  { %809 = vmatmul.mubr.bf16.gmra.mrb[60].mxu0 %v2384_v15  ;;  %937 = vmatmul.mubr.bf16.gmra.mrb[60].mxu1 %v2408_v16 }
 0x114   :  { %v2699_v17 = vpop.f32.mrb[0].mxu0  ;;  %v2701_v18 = vpop.f32.mrb[0].mxu1 }
 0x115   :  { %v692_v19 = vpop.f32.mrb[1].mxu0  ;;  %v820_v20 = vpop.f32.mrb[1].mxu1  ;;  %v1210_v23 = vmul.f32 %v2699_v17, %v2699_v17 }
 0x116   :  { %v2703_v21 = vpop.f32.mrb[2].mxu0  ;;  %v2705_v22 = vpop.f32.mrb[2].mxu1 }
 0x117   :  { %v1140_v24 = vadd.f32 %v2703_v21, %v2699_v17  ;;  %v1211_v25 = vmul.f32 %v2703_v21, %v2703_v21  ;;  %v695_v26 = vpop.f32.mrb[3].mxu0  ;;  %v823_v27 = vpop.f32.mrb[3].mxu1 }
 0x119   :  { %v1274_v28 = vadd.f32 %v1211_v25, %v1210_v23 }
 0x11c   :  { %v2713_v29 = vpop.f32.mrb[4].mxu0  ;;  %v2715_v30 = vpop.f32.mrb[4].mxu1 }
 0x11d   :  { %v1141_v31 = vadd.f32 %v1140_v24, %v2713_v29  ;;  %v1212_v32 = vmul.f32 %v2713_v29, %v2713_v29  ;;  %v700_v33 = vpop.f32.mrb[5].mxu0  ;;  %v828_v34 = vpop.f32.mrb[5].mxu1 }
 0x11e   :  { %v2720_v35 = vpop.f32.mrb[6].mxu0  ;;  %v2722_v36 = vpop.f32.mrb[6].mxu1 }
 0x11f   :  { %v1275_v37 = vadd.f32 %v1274_v28, %v1212_v32  ;;  %v1142_v38 = vadd.f32 %v1141_v31, %v2720_v35  ;;  %v1213_v39 = vmul.f32 %v2720_v35, %v2720_v35  ;;  %v703_v40 = vpop.f32.mrb[7].mxu0  ;;  %v831_v41 = vpop.f32.mrb[7].mxu1 }
 0x121   :  { %v1276_v42 = vadd.f32 %v1275_v37, %v1213_v39 }
 0x124   :  { %v2727_v43 = vpop.f32.mrb[8].mxu0  ;;  %v2729_v44 = vpop.f32.mrb[8].mxu1 }
 0x125   :  { %v1143_v45 = vadd.f32 %v1142_v38, %v2727_v43  ;;  %v1214_v46 = vmul.f32 %v2727_v43, %v2727_v43  ;;  %v708_v47 = vpop.f32.mrb[9].mxu0  ;;  %v836_v48 = vpop.f32.mrb[9].mxu1 }
 0x126   :  { %v2734_v49 = vpop.f32.mrb[10].mxu0  ;;  %v2736_v50 = vpop.f32.mrb[10].mxu1 }
 0x127   :  { %v1277_v51 = vadd.f32 %v1276_v42, %v1214_v46  ;;  %v1144_v52 = vadd.f32 %v1143_v45, %v2734_v49  ;;  %v1215_v53 = vmul.f32 %v2734_v49, %v2734_v49  ;;  %v711_v54 = vpop.f32.mrb[11].mxu0  ;;  %v839_v55 = vpop.f32.mrb[11].mxu1 }
 0x129   :  { %v1278_v56 = vadd.f32 %v1277_v51, %v1215_v53 }
 0x12c   :  { %v2741_v57 = vpop.f32.mrb[12].mxu0  ;;  %v2743_v58 = vpop.f32.mrb[12].mxu1 }
 0x12d   :  { %v1145_v59 = vadd.f32 %v1144_v52, %v2741_v57  ;;  %v1216_v60 = vmul.f32 %v2741_v57, %v2741_v57  ;;  %v716_v61 = vpop.f32.mrb[13].mxu0  ;;  %v844_v62 = vpop.f32.mrb[13].mxu1 }
 0x12e   :  { %v2748_v63 = vpop.f32.mrb[14].mxu0  ;;  %v2750_v0 = vpop.f32.mrb[14].mxu1 }
 0x12f   :  { %v1279_v1 = vadd.f32 %v1278_v56, %v1216_v60  ;;  %v1146_v2 = vadd.f32 %v1145_v59, %v2748_v63  ;;  %v1217_v3 = vmul.f32 %v2748_v63, %v2748_v63  ;;  %v719_v4 = vpop.f32.mrb[15].mxu0  ;;  %v847_v5 = vpop.f32.mrb[15].mxu1 }
 0x131   :  { %v1280_v6 = vadd.f32 %v1279_v1, %v1217_v3 }
 0x134   :  { %v2755_v7 = vpop.f32.mrb[16].mxu0  ;;  %v2757_v8 = vpop.f32.mrb[16].mxu1 }
 0x135   :  { %v1147_v9 = vadd.f32 %v1146_v2, %v2755_v7  ;;  %v1218_v10 = vmul.f32 %v2755_v7, %v2755_v7  ;;  %v724_v11 = vpop.f32.mrb[17].mxu0  ;;  %v852_v12 = vpop.f32.mrb[17].mxu1 }
 0x136   :  { %v2762_v13 = vpop.f32.mrb[18].mxu0  ;;  %v2764_v14 = vpop.f32.mrb[18].mxu1 }
 0x137   :  { %v1281_v15 = vadd.f32 %v1280_v6, %v1218_v10  ;;  %v1148_v16 = vadd.f32 %v1147_v9, %v2762_v13  ;;  %v1219_v19 = vmul.f32 %v2762_v13, %v2762_v13  ;;  %v727_v20 = vpop.f32.mrb[19].mxu0  ;;  %v855_v23 = vpop.f32.mrb[19].mxu1 }
 0x139   :  { %v1282_v24 = vadd.f32 %v1281_v15, %v1219_v19 }
 0x13c   :  { %v2769_v25 = vpop.f32.mrb[20].mxu0  ;;  %v2771_v26 = vpop.f32.mrb[20].mxu1 }
 0x13d   :  { %v1149_v27 = vadd.f32 %v1148_v16, %v2769_v25  ;;  %v1220_v28 = vmul.f32 %v2769_v25, %v2769_v25  ;;  %v732_v31 = vpop.f32.mrb[21].mxu0  ;;  %v860_v32 = vpop.f32.mrb[21].mxu1 }
 0x13e   :  { %v2776_v33 = vpop.f32.mrb[22].mxu0  ;;  %v2778_v34 = vpop.f32.mrb[22].mxu1 }
 0x13f   :  { %v1283_v37 = vadd.f32 %v1282_v24, %v1220_v28  ;;  %v1150_v38 = vadd.f32 %v1149_v27, %v2776_v33  ;;  %v1221_v39 = vmul.f32 %v2776_v33, %v2776_v33  ;;  %v735_v40 = vpop.f32.mrb[23].mxu0  ;;  %v863_v41 = vpop.f32.mrb[23].mxu1 }
 0x141   :  { %v1284_v42 = vadd.f32 %v1283_v37, %v1221_v39 }
 0x144   :  { %v2783_v45 = vpop.f32.mrb[24].mxu0  ;;  %v2785_v46 = vpop.f32.mrb[24].mxu1 }
 0x145   :  { %v1151_v47 = vadd.f32 %v1150_v38, %v2783_v45  ;;  %v1222_v48 = vmul.f32 %v2783_v45, %v2783_v45  ;;  %v740_v51 = vpop.f32.mrb[25].mxu0  ;;  %v868_v52 = vpop.f32.mrb[25].mxu1 }
 0x146   :  { %v2790_v53 = vpop.f32.mrb[26].mxu0  ;;  %v2792_v54 = vpop.f32.mrb[26].mxu1 }
 0x147   :  { %v1285_v55 = vadd.f32 %v1284_v42, %v1222_v48  ;;  %v1152_v56 = vadd.f32 %v1151_v47, %v2790_v53  ;;  %v1223_v59 = vmul.f32 %v2790_v53, %v2790_v53  ;;  %v743_v60 = vpop.f32.mrb[27].mxu0  ;;  %v871_v61 = vpop.f32.mrb[27].mxu1 }
 0x149   :  { %v1286_v62 = vadd.f32 %v1285_v55, %v1223_v59 }
 0x14c   :  { %v2797_v1 = vpop.f32.mrb[28].mxu0  ;;  %v2799_v2 = vpop.f32.mrb[28].mxu1 }
 0x14d   :  { %v1153_v3 = vadd.f32 %v1152_v56, %v2797_v1  ;;  %v1224_v4 = vmul.f32 %v2797_v1, %v2797_v1  ;;  %v748_v5 = vpop.f32.mrb[29].mxu0  ;;  %v876_v6 = vpop.f32.mrb[29].mxu1 }
 0x14e   :  { %v2804_v9 = vpop.f32.mrb[30].mxu0  ;;  %v2806_v10 = vpop.f32.mrb[30].mxu1 }
 0x14f   :  { %v1287_v11 = vadd.f32 %v1286_v62, %v1224_v4  ;;  %v1154_v12 = vadd.f32 %v1153_v3, %v2804_v9  ;;  %v1225_v15 = vmul.f32 %v2804_v9, %v2804_v9  ;;  %v751_v16 = vpop.f32.mrb[31].mxu0  ;;  %v879_v19 = vpop.f32.mrb[31].mxu1 }
 0x151   :  { %v1288_v20 = vadd.f32 %v1287_v11, %v1225_v15 }
 0x154   :  { %v2811_v23 = vpop.f32.mrb[32].mxu0  ;;  %v2813_v24 = vpop.f32.mrb[32].mxu1 }
 0x155   :  { %v1155_v27 = vadd.f32 %v1154_v12, %v2811_v23  ;;  %v1226_v28 = vmul.f32 %v2811_v23, %v2811_v23  ;;  %v756_v31 = vpop.f32.mrb[33].mxu0  ;;  %v884_v32 = vpop.f32.mrb[33].mxu1 }
 0x156   :  { %v2818_v37 = vpop.f32.mrb[34].mxu0  ;;  %v2820_v38 = vpop.f32.mrb[34].mxu1 }
 0x157   :  { %3761 = vst [vmem:[#allocation3_spill] sm:$0xff] %v2818_v37  ;;  %v1289_v39 = vadd.f32 %v1288_v20, %v1226_v28  ;;  %v1156_v40 = vadd.f32 %v1155_v27, %v2818_v37  ;;  %v1227_v41 = vmul.f32 %v2818_v37, %v2818_v37  ;;  %v759_v42 = vpop.f32.mrb[35].mxu0  ;;  %v887_v47 = vpop.f32.mrb[35].mxu1 }
 0x159   :  { %v1290_v48 = vadd.f32 %v1289_v39, %v1227_v41 }
 0x15c   :  { %v2825_v51 = vpop.f32.mrb[36].mxu0  ;;  %v2827_v52 = vpop.f32.mrb[36].mxu1 }
 0x15d   :  { %3762 = vst [vmem:[#allocation4_spill] sm:$0xff] %v2825_v51  ;;  %3763 = vst [vmem:[#allocation5_spill] sm:$0xff] %v2827_v52  ;;  %v1157_v55 = vadd.f32 %v1156_v40, %v2825_v51  ;;  %v1228_v56 = vmul.f32 %v2825_v51, %v2825_v51  ;;  %v764_v59 = vpop.f32.mrb[37].mxu0  ;;  %v892_v60 = vpop.f32.mrb[37].mxu1 }
 0x15e   :  { %v2832_v61 = vpop.f32.mrb[38].mxu0  ;;  %v2834_v62 = vpop.f32.mrb[38].mxu1 }
 0x15f   :  { %3764 = vst [vmem:[#allocation6_spill] sm:$0xff] %v2832_v61  ;;  %3765 = vst [vmem:[#allocation7_spill] sm:$0xff] %v2834_v62  ;;  %v1291_v3 = vadd.f32 %v1290_v48, %v1228_v56  ;;  %v1158_v4 = vadd.f32 %v1157_v55, %v2832_v61  ;;  %v1229_v5 = vmul.f32 %v2832_v61, %v2832_v61  ;;  %v767_v6 = vpop.f32.mrb[39].mxu0  ;;  %v895_v11 = vpop.f32.mrb[39].mxu1 }
 0x161   :  { %v1292_v12 = vadd.f32 %v1291_v3, %v1229_v5 }
 0x164   :  { %v2839_v15 = vpop.f32.mrb[40].mxu0  ;;  %v2841_v16 = vpop.f32.mrb[40].mxu1 }
 0x165   :  { %3766 = vst [vmem:[#allocation8_spill] sm:$0xff] %v2839_v15  ;;  %3767 = vst [vmem:[#allocation9_spill] sm:$0xff] %v2841_v16  ;;  %v1159_v19 = vadd.f32 %v1158_v4, %v2839_v15  ;;  %v1230_v20 = vmul.f32 %v2839_v15, %v2839_v15  ;;  %v772_v27 = vpop.f32.mrb[41].mxu0  ;;  %v900_v28 = vpop.f32.mrb[41].mxu1 }
 0x166   :  { %v2846_v31 = vpop.f32.mrb[42].mxu0  ;;  %v2848_v32 = vpop.f32.mrb[42].mxu1 }
 0x167   :  { %3768 = vst [vmem:[#allocation10_spill] sm:$0xff] %v2846_v31  ;;  %3769 = vst [vmem:[#allocation11_spill] sm:$0xff] %v2848_v32  ;;  %v1293_v39 = vadd.f32 %v1292_v12, %v1230_v20  ;;  %v1160_v40 = vadd.f32 %v1159_v19, %v2846_v31  ;;  %v1231_v41 = vmul.f32 %v2846_v31, %v2846_v31  ;;  %v775_v42 = vpop.f32.mrb[43].mxu0  ;;  %v903_v47 = vpop.f32.mrb[43].mxu1 }
 0x169   :  { %v1294_v48 = vadd.f32 %v1293_v39, %v1231_v41 }
 0x16c   :  { %v2853_v55 = vpop.f32.mrb[44].mxu0  ;;  %v2855_v56 = vpop.f32.mrb[44].mxu1 }
 0x16d   :  { %3770 = vst [vmem:[#allocation12_spill] sm:$0xff] %v2853_v55  ;;  %3771 = vst [vmem:[#allocation13_spill] sm:$0xff] %v2855_v56  ;;  %v1161_v59 = vadd.f32 %v1160_v40, %v2853_v55  ;;  %v1232_v60 = vmul.f32 %v2853_v55, %v2853_v55  ;;  %v780_v3 = vpop.f32.mrb[45].mxu0  ;;  %v908_v4 = vpop.f32.mrb[45].mxu1 }
 0x16e   :  { %v2860_v5 = vpop.f32.mrb[46].mxu0  ;;  %v2862_v6 = vpop.f32.mrb[46].mxu1 }
 0x16f   :  { %3772 = vst [vmem:[#allocation14_spill] sm:$0xff] %v2860_v5  ;;  %v1295_v11 = vadd.f32 %v1294_v48, %v1232_v60  ;;  %v1162_v12 = vadd.f32 %v1161_v59, %v2860_v5  ;;  %v1233_v19 = vmul.f32 %v2860_v5, %v2860_v5  ;;  %v783_v20 = vpop.f32.mrb[47].mxu0  ;;  %v911_v27 = vpop.f32.mrb[47].mxu1 }
 0x171   :  { %v1296_v28 = vadd.f32 %v1295_v11, %v1233_v19 }
 0x174   :  { %v2867_v39 = vpop.f32.mrb[48].mxu0  ;;  %v2869_v40 = vpop.f32.mrb[48].mxu1 }
 0x175   :  { %3773 = vst [vmem:[#allocation15_spill] sm:$0xff] %v2867_v39  ;;  %3774 = vst [vmem:[#allocation16_spill] sm:$0xff] %v2869_v40  ;;  %v1163_v41 = vadd.f32 %v1162_v12, %v2867_v39  ;;  %v1234_v42 = vmul.f32 %v2867_v39, %v2867_v39  ;;  %v788_v47 = vpop.f32.mrb[49].mxu0  ;;  %v916_v3 = vpop.f32.mrb[49].mxu1 }
 0x176   :  { %v2874_v48 = vpop.f32.mrb[50].mxu0  ;;  %v2876_v59 = vpop.f32.mrb[50].mxu1 }
 0x177   :  { %3775 = vst [vmem:[#allocation17_spill] sm:$0xff] %v2874_v48  ;;  %3776 = vst [vmem:[#allocation18_spill] sm:$0xff] %v2876_v59  ;;  %v1297_v60 = vadd.f32 %v1296_v28, %v1234_v42  ;;  %v1164_v4 = vadd.f32 %v1163_v41, %v2874_v48  ;;  %v1235_v11 = vmul.f32 %v2874_v48, %v2874_v48  ;;  %v791_v19 = vpop.f32.mrb[51].mxu0  ;;  %v919_v20 = vpop.f32.mrb[51].mxu1 }
 0x179   :  { %v1298_v27 = vadd.f32 %v1297_v60, %v1235_v11 }
 0x17c   :  { %v2881_v5 = vpop.f32.mrb[52].mxu0  ;;  %v2883_v12 = vpop.f32.mrb[52].mxu1 }
 0x17d   :  { %3777 = vst [vmem:[#allocation19_spill] sm:$0xff] %v2881_v5  ;;  %3778 = vst [vmem:[#allocation20_spill] sm:$0xff] %v2883_v12  ;;  %v1165_v47 = vadd.f32 %v1164_v4, %v2881_v5  ;;  %v1236_v3 = vmul.f32 %v2881_v5, %v2881_v5  ;;  %v796_v39 = vpop.f32.mrb[53].mxu0  ;;  %v924_v55 = vpop.f32.mrb[53].mxu1 }
 0x17e   :  { %v2888_v28 = vpop.f32.mrb[54].mxu0  ;;  %v2890_v41 = vpop.f32.mrb[54].mxu1 }
 0x17f   :  { %3779 = vst [vmem:[#allocation21_spill] sm:$0xff] %v2888_v28  ;;  %3780 = vst [vmem:[#allocation22_spill] sm:$0xff] %v2890_v41  ;;  %v1299_v42 = vadd.f32 %v1298_v27, %v1236_v3  ;;  %v1166_v19 = vadd.f32 %v1165_v47, %v2888_v28  ;;  %v1237_v60 = vmul.f32 %v2888_v28, %v2888_v28  ;;  %v799_v11 = vpop.f32.mrb[55].mxu0  ;;  %v927_v20 = vpop.f32.mrb[55].mxu1 }
 0x181   :  { %v1300_v48 = vadd.f32 %v1299_v42, %v1237_v60 }
 0x184   :  { %v2895_v31 = vpop.f32.mrb[56].mxu0  ;;  %v2897_v4 = vpop.f32.mrb[56].mxu1 }
 0x185   :  { %3781 = vst [vmem:[#allocation23_spill] sm:$0xff] %v2895_v31  ;;  %3782 = vst [vmem:[#allocation24_spill] sm:$0xff] %v2897_v4  ;;  %v1167_v39 = vadd.f32 %v1166_v19, %v2895_v31  ;;  %v1238_v55 = vmul.f32 %v2895_v31, %v2895_v31  ;;  %v804_v5 = vpop.f32.mrb[57].mxu0  ;;  %v932_v15 = vpop.f32.mrb[57].mxu1 }
 0x186   :  { %v2902_v27 = vpop.f32.mrb[58].mxu0  ;;  %v2904_v47 = vpop.f32.mrb[58].mxu1 }
 0x187   :  { %3783 = vst [vmem:[#allocation25_spill] sm:$0xff] %v2902_v27  ;;  %3784 = vst [vmem:[#allocation26_spill] sm:$0xff] %v2904_v47  ;;  %v1301_v3 = vadd.f32 %v1300_v48, %v1238_v55  ;;  %v1168_v11 = vadd.f32 %v1167_v39, %v2902_v27  ;;  %v1239_v42 = vmul.f32 %v2902_v27, %v2902_v27  ;;  %v807_v60 = vpop.f32.mrb[59].mxu0  ;;  %v935_v20 = vpop.f32.mrb[59].mxu1 }
 0x189   :  { %v1302_v28 = vadd.f32 %v1301_v3, %v1239_v42 }
 0x18c   :  { %v2909_v61 = vpop.f32.mrb[60].mxu0  ;;  %v2911_v19 = vpop.f32.mrb[60].mxu1 }
 0x18d   :  { %3785 = vst [vmem:[#allocation27_spill] sm:$0xff] %v2909_v61  ;;  %v1169_v5 = vadd.f32 %v1168_v11, %v2909_v61  ;;  %v1240_v15 = vmul.f32 %v2909_v61, %v2909_v61  ;;  %v812_v31 = vpop.f32.mrb[61].mxu0  ;;  %v940_v51 = vpop.f32.mrb[61].mxu1  ;;  %v1242_v11 = vmul.f32 %v2701_v18, %v2701_v18 }
 0x18e   :  { %v2916_v48 = vpop.f32.mrb[62].mxu0  ;;  %v2918_v39 = vpop.f32.mrb[62].mxu1  ;;  %v1243_v51 = vmul.f32 %v2705_v22, %v2705_v22 }
 0x18f   :  { %3786 = vst [vmem:[#allocation28_spill] sm:$0xff] %v2916_v48  ;;  %v1303_v55 = vadd.f32 %v1302_v28, %v1240_v15  ;;  %v1170_v60 = vadd.f32 %v1169_v5, %v2916_v48  ;;  %v1241_v3 = vmul.f32 %v2916_v48, %v2916_v48  ;;  %v815_v42 = vpop.f32.mrb[63].mxu0  ;;  %v943_v20 = vpop.f32.mrb[63].mxu1  ;;  %v1244_v28 = vmul.f32 %v2715_v30, %v2715_v30 }
 0x190   :  { %v1245_v42 = vmul.f32 %v2722_v36, %v2722_v36 }
 0x191   :  { %v1171_v27 = vadd.f32 %v1170_v60, %v2701_v18  ;;  %v1304_v61 = vadd.f32 %v1303_v55, %v1241_v3  ;;  %v1246_v55 = vmul.f32 %v2729_v44, %v2729_v44 }
 0x193   :  { %v1172_v31 = vadd.f32 %v1171_v27, %v2705_v22  ;;  %v1305_v37 = vadd.f32 %v1304_v61, %v1242_v11  ;;  %v1247_v61 = vmul.f32 %v2736_v50, %v2736_v50 }
 0x195   :  { %v1173_v5 = vadd.f32 %v1172_v31, %v2715_v30  ;;  %v1306_v15 = vadd.f32 %v1305_v37, %v1243_v51  ;;  %v1248_v37 = vmul.f32 %v2743_v58, %v2743_v58 }
 0x197   :  { %v1174_v20 = vadd.f32 %v1173_v5, %v2722_v36  ;;  %v1307_v48 = vadd.f32 %v1306_v15, %v1244_v28  ;;  %v1249_v28 = vmul.f32 %v2750_v0, %v2750_v0 }
 0x199   :  { %v1175_v60 = vadd.f32 %v1174_v20, %v2729_v44  ;;  %v1308_v3 = vadd.f32 %v1307_v48, %v1245_v42  ;;  %v1250_v48 = vmul.f32 %v2757_v8, %v2757_v8 }
 0x19b   :  { %v1176_v27 = vadd.f32 %v1175_v60, %v2736_v50  ;;  %v1309_v11 = vadd.f32 %v1308_v3, %v1246_v55  ;;  %v1251_v55 = vmul.f32 %v2764_v14, %v2764_v14 }
 0x19d   :  { %v1177_v51 = vadd.f32 %v1176_v27, %v2743_v58  ;;  %v1310_v31 = vadd.f32 %v1309_v11, %v1247_v61  ;;  %v1252_v61 = vmul.f32 %v2771_v26, %v2771_v26 }
 0x19f   :  { %v1178_v5 = vadd.f32 %v1177_v51, %v2750_v0  ;;  %v1311_v15 = vadd.f32 %v1310_v31, %v1248_v37  ;;  %v1253_v37 = vmul.f32 %v2778_v34, %v2778_v34 }
 0x1a1   :  { %v1312_v42 = vadd.f32 %v1311_v15, %v1249_v28  ;;  %v1179_v20 = vadd.f32 %v1178_v5, %v2757_v8  ;;  %v1254_v28 = vmul.f32 %v2785_v46, %v2785_v46 }
 0x1a3   :  { %v1180_v60 = vadd.f32 %v1179_v20, %v2764_v14  ;;  %v1313_v3 = vadd.f32 %v1312_v42, %v1250_v48  ;;  %v1255_v48 = vmul.f32 %v2792_v54, %v2792_v54 }
 0x1a5   :  { %v1181_v27 = vadd.f32 %v1180_v60, %v2771_v26  ;;  %v1314_v11 = vadd.f32 %v1313_v3, %v1251_v55  ;;  %v1256_v55 = vmul.f32 %v2799_v2, %v2799_v2 }
 0x1a7   :  { %v1182_v51 = vadd.f32 %v1181_v27, %v2778_v34  ;;  %v1315_v31 = vadd.f32 %v1314_v11, %v1252_v61  ;;  %v1257_v61 = vmul.f32 %v2806_v10, %v2806_v10 }
 0x1a9   :  { %v1183_v5 = vadd.f32 %v1182_v51, %v2785_v46  ;;  %v1316_v15 = vadd.f32 %v1315_v31, %v1253_v37  ;;  %v1258_v51 = vmul.f32 %v2813_v24, %v2813_v24 }
 0x1ab   :  { %v1184_v42 = vadd.f32 %v1183_v5, %v2792_v54  ;;  %v1317_v20 = vadd.f32 %v1316_v15, %v1254_v28  ;;  %v1259_v15 = vmul.f32 %v2820_v38, %v2820_v38 }
 0x1ad   :  { %v1185_v60 = vadd.f32 %v1184_v42, %v2799_v2  ;;  %v1318_v3 = vadd.f32 %v1317_v20, %v1255_v48  ;;  %v1260_v20 = vmul.f32 %v2827_v52, %v2827_v52 }
 0x1af   :  { %v1186_v27 = vadd.f32 %v1185_v60, %v2806_v10  ;;  %v1319_v11 = vadd.f32 %v1318_v3, %v1256_v55  ;;  %v1261_v3 = vmul.f32 %v2834_v62, %v2834_v62 }
 0x1b1   :  { %v1187_v37 = vadd.f32 %v1186_v27, %v2813_v24  ;;  %v1320_v31 = vadd.f32 %v1319_v11, %v1257_v61  ;;  %v1262_v11 = vmul.f32 %v2841_v16, %v2841_v16 }
 0x1b3   :  { %v1321_v5 = vadd.f32 %v1320_v31, %v1258_v51  ;;  %v1188_v28 = vadd.f32 %v1187_v37, %v2820_v38  ;;  %v1263_v31 = vmul.f32 %v2848_v32, %v2848_v32 }
 0x1b5   :  { %v1322_v42 = vadd.f32 %v1321_v5, %v1259_v15  ;;  %v1189_v48 = vadd.f32 %v1188_v28, %v2827_v52  ;;  %v1264_v15 = vmul.f32 %v2855_v56, %v2855_v56 }
 0x1b7   :  { %v1323_v60 = vadd.f32 %v1322_v42, %v1260_v20  ;;  %v1190_v55 = vadd.f32 %v1189_v48, %v2834_v62  ;;  %v1265_v20 = vmul.f32 %v2862_v6, %v2862_v6 }
 0x1b9   :  { %v1324_v27 = vadd.f32 %v1323_v60, %v1261_v3  ;;  %v1191_v61 = vadd.f32 %v1190_v55, %v2841_v16  ;;  %v1266_v3 = vmul.f32 %v2869_v40, %v2869_v40 }
 0x1bb   :  { %v1325_v37 = vadd.f32 %v1324_v27, %v1262_v11  ;;  %v1192_v51 = vadd.f32 %v1191_v61, %v2848_v32  ;;  %v1267_v11 = vmul.f32 %v2876_v59, %v2876_v59 }
 0x1bd   :  { %v1326_v5 = vadd.f32 %v1325_v37, %v1263_v31  ;;  %v1193_v28 = vadd.f32 %v1192_v51, %v2855_v56  ;;  %v1268_v31 = vmul.f32 %v2883_v12, %v2883_v12 }
 0x1bf   :  { %v1327_v42 = vadd.f32 %v1326_v5, %v1264_v15  ;;  %v1194_v48 = vadd.f32 %v1193_v28, %v2862_v6  ;;  %v1269_v15 = vmul.f32 %v2890_v41, %v2890_v41 }
 0x1c1   :  { %v1328_v60 = vadd.f32 %v1327_v42, %v1265_v20  ;;  %v1195_v55 = vadd.f32 %v1194_v48, %v2869_v40  ;;  %v1270_v20 = vmul.f32 %v2897_v4, %v2897_v4 }
 0x1c3   :  { %v1329_v27 = vadd.f32 %v1328_v60, %v1266_v3  ;;  %v1196_v61 = vadd.f32 %v1195_v55, %v2876_v59  ;;  %v1271_v3 = vmul.f32 %v2904_v47, %v2904_v47 }
 0x1c5   :  { %v1330_v37 = vadd.f32 %v1329_v27, %v1267_v11  ;;  %v1197_v51 = vadd.f32 %v1196_v61, %v2883_v12  ;;  %v1272_v27 = vmul.f32 %v2911_v19, %v2911_v19 }
 0x1c7   :  { %v1331_v5 = vadd.f32 %v1330_v37, %v1268_v31  ;;  %v1198_v28 = vadd.f32 %v1197_v51, %v2890_v41  ;;  %v1273_v31 = vmul.f32 %v2918_v39, %v2918_v39 }
 0x1c9   :  { %v1332_v42 = vadd.f32 %v1331_v5, %v1269_v15  ;;  %v1199_v48 = vadd.f32 %v1198_v28, %v2897_v4 }
 0x1cb   :  { %v1333_v60 = vadd.f32 %v1332_v42, %v1270_v20  ;;  %v1200_v55 = vadd.f32 %v1199_v48, %v2904_v47 }
 0x1cd   :  { %v1334_v61 = vadd.f32 %v1333_v60, %v1271_v3  ;;  %v1201_v11 = vadd.f32 %v1200_v55, %v2911_v19 }
 0x1cf   :  { %v1335_v37 = vadd.f32 %v1334_v61, %v1272_v27  ;;  %v1202_v51 = vadd.f32 %v1201_v11, %v2918_v39 }
 0x1d1   :  { %v1203_v5 = vrot.slane %v1202_v51, 4  ;;  %v1336_v28 = vadd.f32 %v1335_v37, %v1273_v31  ;;  %v3797_v31 = vld [vmem:[#allocation21_spill] sm:$0xff]  ;;  %v3806_v37 = vld [vmem:[#allocation26_spill] sm:$0xff] }
 0x1d3   :  { %v1204_v15 = vadd.f32 %v1203_v5, %v1202_v51  ;;  %v1337_v42 = vrot.slane %v1336_v28, 4  ;;  %v3795_v5 = vld [vmem:[#allocation17_spill] sm:$0xff]  ;;  %v3805_v51 = vld [vmem:[#allocation24_spill] sm:$0xff] }
 0x1d5   :  { %v1205_v48 = vrot.slane %v1204_v15, 2  ;;  %v1338_v20 = vadd.f32 %v1337_v42, %v1336_v28  ;;  %v3788_v42 = vld [vmem:[#allocation4_spill] sm:$0xff]  ;;  %v3804_v28 = vld [vmem:[#allocation22_spill] sm:$0xff] }
 0x1d7   :  { %v1206_v4 = vadd.f32 %v1205_v48, %v1204_v15  ;;  %v1339_v47 = vrot.slane %v1338_v20, 2  ;;  %v3787_v15 = vld [vmem:[#allocation3_spill] sm:$0xff] }
 0x1d8   :  { %v3796_v48 = vld [vmem:[#allocation19_spill] sm:$0xff] }
 0x1d9   :  { %v1207_v41 = vrot.slane %v1206_v4, 1  ;;  %v1340_v12 = vadd.f32 %v1339_v47, %v1338_v20  ;;  %v3798_v47 = vld [vmem:[#allocation23_spill] sm:$0xff] }
 0x1db   :  { %v1208_v59 = vadd.f32 %v1207_v41, %v1206_v4  ;;  %v1341_v60 = vrot.slane %v1340_v12, 1  ;;  %v3801_v41 = vld [vmem:[#allocation28_spill] sm:$0xff] }
 0x1dd   :  { %v3019_v3 = vmul.f32 0.001953125, %v1208_v59  ;;  %v1342_v55 = vadd.f32 %v1341_v60, %v1340_v12  ;;  %v3790_v60 = vld [vmem:[#allocation8_spill] sm:$0xff]  ;;  %v3799_v12 = vld [vmem:[#allocation25_spill] sm:$0xff]  ;;  %v3800_v59 = vld [vmem:[#allocation27_spill] sm:$0xff] }
 0x1df   :  { %v1343_v27 = vmul.f32 0.001953125, %v1342_v55  ;;  %v1344_v61 = vmul.f32 %v3019_v3, %v3019_v3  ;;  %v3791_v55 = vld [vmem:[#allocation10_spill] sm:$0xff]  ;;  %v3807_v62 = vsub.f32 %v2699_v17, %v3019_v3  ;;  %v3809_v32 = vsub.f32 %v2703_v21, %v3019_v3 }
 0x1e0   :  { %v3811_v11 = vsub.f32 %v2713_v29, %v3019_v3 }
 0x1e1   :  { %v1345_v4 = vsub.f32 %v1343_v27, %v1344_v61  ;;  %v3802_v27 = vld [vmem:[#allocation18_spill] sm:$0xff]  ;;  %v3803_v61 = vld [vmem:[#allocation20_spill] sm:$0xff] }
 0x1e3   :  { %v1346_v20 = vmax.f32 %v1345_v4, 0.0  ;;  %v3789_v4 = vld [vmem:[#allocation6_spill] sm:$0xff] }
 0x1e5   :  { %v1411_v40 = vadd.f32 1e-05, %v1346_v20 }
 0x1e7   :  { %2409 = vrsqrt.f32 %v1411_v40  ;;  %v3813_v40 = vsub.f32 %v2720_v35, %v3019_v3 }
 0x1f1   :  { %v3151_v52 = vpop.eup %2409 }
 0x1f2   :  { %v3157_v16 = vmul.f32 %v3151_v52, %v3807_v62  ;;  %v3163_v56 = vmul.f32 %v3151_v52, %v3809_v32  ;;  %v3169_v20 = vmul.f32 %v3151_v52, %v3811_v11  ;;  %v3175_v17 = vmul.f32 %v3151_v52, %v3813_v40 }
 0x1f3   :  { %v3815_v62 = vsub.f32 %v2727_v43, %v3019_v3  ;;  %v3817_v32 = vsub.f32 %v2734_v49, %v3019_v3  ;;  %v3818_v11 = vsub.f32 %v2741_v57, %v3019_v3  ;;  %v3819_v40 = vsub.f32 %v2748_v63, %v3019_v3 }
 0x1f4   :  { %3808 = vst [vmem:[#allocation3_spill] sm:$0xff] %v3157_v16  ;;  %3810 = vst [vmem:[#allocation4_spill] sm:$0xff] %v3163_v56 }
 0x1f5   :  { %3812 = vst [vmem:[#allocation6_spill] sm:$0xff] %v3169_v20  ;;  %3814 = vst [vmem:[#allocation8_spill] sm:$0xff] %v3175_v17  ;;  %v3181_v21 = vmul.f32 %v3151_v52, %v3815_v62  ;;  %v3187_v29 = vmul.f32 %v3151_v52, %v3817_v32  ;;  %v3193_v35 = vmul.f32 %v3151_v52, %v3818_v11 }
 0x1f6   :  { %v3199_v43 = vmul.f32 %v3151_v52, %v3819_v40  ;;  %v3820_v62 = vsub.f32 %v2755_v7, %v3019_v3  ;;  %v3821_v32 = vsub.f32 %v2762_v13, %v3019_v3  ;;  %v3822_v11 = vsub.f32 %v2769_v25, %v3019_v3 }
 0x1f7   :  { %3816 = vst [vmem:[#allocation17_spill] sm:$0xff] %v3181_v21  ;;  %v3823_v40 = vsub.f32 %v2776_v33, %v3019_v3 }
 0x1f8   :  { %v3205_v49 = vmul.f32 %v3151_v52, %v3820_v62  ;;  %v3211_v57 = vmul.f32 %v3151_v52, %v3821_v32  ;;  %v3217_v63 = vmul.f32 %v3151_v52, %v3822_v11  ;;  %v3824_v62 = vsub.f32 %v2783_v45, %v3019_v3 }
 0x1f9   :  { %v3223_v7 = vmul.f32 %v3151_v52, %v3823_v40  ;;  %v3825_v32 = vsub.f32 %v2790_v53, %v3019_v3  ;;  %v3826_v11 = vsub.f32 %v2797_v1, %v3019_v3  ;;  %v3827_v40 = vsub.f32 %v2804_v9, %v3019_v3 }
 0x1fa   :  { %v3229_v13 = vmul.f32 %v3151_v52, %v3824_v62  ;;  %v3828_v62 = vsub.f32 %v2811_v23, %v3019_v3 }
 0x1fb   :  { %v3235_v25 = vmul.f32 %v3151_v52, %v3825_v32  ;;  %v3241_v33 = vmul.f32 %v3151_v52, %v3826_v11  ;;  %v3247_v45 = vmul.f32 %v3151_v52, %v3827_v40  ;;  %v3829_v32 = vsub.f32 %v3787_v15, %v3019_v3 }
 0x1fc   :  { %v3253_v53 = vmul.f32 %v3151_v52, %v3828_v62  ;;  %v3830_v11 = vsub.f32 %v3788_v42, %v3019_v3  ;;  %v3832_v40 = vsub.f32 %v3789_v4, %v3019_v3  ;;  %v3834_v62 = vsub.f32 %v3790_v60, %v3019_v3 }
 0x1fd   :  { %v3259_v1 = vmul.f32 %v3151_v52, %v3829_v32  ;;  %v3836_v32 = vmov %v3791_v55 }
 0x1fe   :  { %v3265_v9 = vmul.f32 %v3151_v52, %v3830_v11  ;;  %v3271_v23 = vmul.f32 %v3151_v52, %v3832_v40  ;;  %v3277_v15 = vmul.f32 %v3151_v52, %v3834_v62  ;;  %v3837_v55 = vsub.f32 %v3836_v32, %v3019_v3  ;;  %v3838_v11 = vld [vmem:[#allocation12_spill] sm:$0xff]  ;;  %v3840_v40 = vld [vmem:[#allocation14_spill] sm:$0xff]  ;;  %v3842_v62 = vld [vmem:[#allocation15_spill] sm:$0xff] }
 0x200   :  { %3831 = vst [vmem:[#allocation19_spill] sm:$0xff] %v3265_v9  ;;  %3833 = vst [vmem:[#allocation21_spill] sm:$0xff] %v3271_v23  ;;  %v3283_v42 = vmul.f32 %v3151_v52, %v3837_v55  ;;  %v3839_v9 = vsub.f32 %v3838_v11, %v3019_v3  ;;  %v3841_v23 = vsub.f32 %v3840_v40, %v3019_v3 }
 0x201   :  { %3835 = vst [vmem:[#allocation23_spill] sm:$0xff] %v3277_v15  ;;  %v3843_v15 = vsub.f32 %v3842_v62, %v3019_v3  ;;  %v3844_v55 = vsub.f32 %v3795_v5, %v3019_v3 }
 0x202   :  { %v3289_v4 = vmul.f32 %v3151_v52, %v3839_v9  ;;  %v3295_v60 = vmul.f32 %v3151_v52, %v3841_v23  ;;  %v3845_v9 = vsub.f32 %v3796_v48, %v3019_v3  ;;  %v3846_v23 = vsub.f32 %v3797_v31, %v3019_v3 }
 0x203   :  { %v3301_v32 = vmul.f32 %v3151_v52, %v3843_v15  ;;  %v3307_v11 = vmul.f32 %v3151_v52, %v3844_v55  ;;  %v3847_v15 = vsub.f32 %v3798_v47, %v3019_v3  ;;  %v3848_v55 = vsub.f32 %v3799_v12, %v3019_v3 }
 0x204   :  { %v3313_v40 = vmul.f32 %v3151_v52, %v3845_v9  ;;  %v3319_v62 = vmul.f32 %v3151_v52, %v3846_v23  ;;  %v3849_v9 = vsub.f32 %v3800_v59, %v3019_v3  ;;  %v3850_v23 = vsub.f32 %v3801_v41, %v3019_v3 }
 0x205   :  { %v3325_v5 = vmul.f32 %v3151_v52, %v3847_v15  ;;  %v3331_v48 = vmul.f32 %v3151_v52, %v3848_v55  ;;  %v3851_v15 = vsub.f32 %v2701_v18, %v3019_v3  ;;  %v3852_v55 = vsub.f32 %v2705_v22, %v3019_v3 }
 0x206   :  { %v3337_v31 = vmul.f32 %v3151_v52, %v3849_v9  ;;  %v3343_v47 = vmul.f32 %v3151_v52, %v3850_v23  ;;  %v3853_v9 = vsub.f32 %v2715_v30, %v3019_v3  ;;  %v3854_v23 = vsub.f32 %v2722_v36, %v3019_v3 }
 0x207   :  { %v3349_v12 = vmul.f32 %v3151_v52, %v3851_v15  ;;  %v3355_v59 = vmul.f32 %v3151_v52, %v3852_v55  ;;  %v3855_v15 = vsub.f32 %v2729_v44, %v3019_v3  ;;  %v3856_v55 = vsub.f32 %v2736_v50, %v3019_v3 }
 0x208   :  { %v3361_v41 = vmul.f32 %v3151_v52, %v3853_v9  ;;  %v3367_v18 = vmul.f32 %v3151_v52, %v3854_v23  ;;  %v3857_v9 = vsub.f32 %v2743_v58, %v3019_v3  ;;  %v3858_v23 = vsub.f32 %v2750_v0, %v3019_v3  ;;  %v3902_v21 = vld [vmem:[#allocation23_spill] sm:$0xff] }
 0x209   :  { %v3373_v22 = vmul.f32 %v3151_v52, %v3855_v15  ;;  %v3379_v30 = vmul.f32 %v3151_v52, %v3856_v55  ;;  %v3859_v15 = vsub.f32 %v2757_v8, %v3019_v3  ;;  %v3860_v55 = vsub.f32 %v2764_v14, %v3019_v3 }
 0x20a   :  { %v3385_v36 = vmul.f32 %v3151_v52, %v3857_v9  ;;  %v3391_v44 = vmul.f32 %v3151_v52, %v3858_v23  ;;  %v3861_v9 = vsub.f32 %v2771_v26, %v3019_v3  ;;  %v3862_v23 = vsub.f32 %v2778_v34, %v3019_v3 }
 0x20b   :  { %v3397_v50 = vmul.f32 %v3151_v52, %v3859_v15  ;;  %v3403_v58 = vmul.f32 %v3151_v52, %v3860_v55  ;;  %v3863_v15 = vsub.f32 %v2785_v46, %v3019_v3  ;;  %v3864_v55 = vsub.f32 %v2792_v54, %v3019_v3 }
 0x20c   :  { %v3409_v0 = vmul.f32 %v3151_v52, %v3861_v9  ;;  %v3415_v8 = vmul.f32 %v3151_v52, %v3862_v23  ;;  %v3865_v9 = vsub.f32 %v2799_v2, %v3019_v3  ;;  %v3867_v23 = vsub.f32 %v2806_v10, %v3019_v3 }
 0x20d   :  { %v3421_v14 = vmul.f32 %v3151_v52, %v3863_v15  ;;  %v3427_v26 = vmul.f32 %v3151_v52, %v3864_v55  ;;  %v3869_v15 = vsub.f32 %v2813_v24, %v3019_v3  ;;  %v3871_v55 = vsub.f32 %v2820_v38, %v3019_v3 }
 0x20e   :  { %v3433_v34 = vmul.f32 %v3151_v52, %v3865_v9  ;;  %v3439_v46 = vmul.f32 %v3151_v52, %v3867_v23  ;;  %v3873_v9 = vld [vmem:[#allocation5_spill] sm:$0xff]  ;;  %v3876_v23 = vld [vmem:[#allocation7_spill] sm:$0xff] }
 0x20f   :  { %v3445_v54 = vmul.f32 %v3151_v52, %v3869_v15  ;;  %v3451_v2 = vmul.f32 %v3151_v52, %v3871_v55  ;;  %v3878_v15 = vld [vmem:[#allocation9_spill] sm:$0xff]  ;;  %v3881_v55 = vld [vmem:[#allocation11_spill] sm:$0xff] }
 0x210   :  { %3866 = vst [vmem:[#allocation25_spill] sm:$0xff] %v3433_v34  ;;  %3868 = vst [vmem:[#allocation27_spill] sm:$0xff] %v3439_v46  ;;  %v3874_v34 = vsub.f32 %v3873_v9, %v3019_v3  ;;  %v3877_v46 = vsub.f32 %v3876_v23, %v3019_v3 }
 0x211   :  { %3870 = vst [vmem:[#allocation28_spill] sm:$0xff] %v3445_v54  ;;  %3872 = vst [vmem:[#allocation18_spill] sm:$0xff] %v3451_v2  ;;  %v3879_v54 = vsub.f32 %v3878_v15, %v3019_v3  ;;  %v3882_v2 = vsub.f32 %v3881_v55, %v3019_v3 }
 0x212   :  { %v3457_v10 = vmul.f32 %v3151_v52, %v3874_v34  ;;  %v3463_v24 = vmul.f32 %v3151_v52, %v3877_v46  ;;  %v3883_v34 = vld [vmem:[#allocation13_spill] sm:$0xff]  ;;  %v3885_v46 = vsub.f32 %v2862_v6, %v3019_v3 }
 0x213   :  { %v3469_v38 = vmul.f32 %v3151_v52, %v3879_v54  ;;  %v3475_v9 = vmul.f32 %v3151_v52, %v3882_v2  ;;  %v3886_v54 = vld [vmem:[#allocation16_spill] sm:$0xff]  ;;  %v3888_v2 = vsub.f32 %v3802_v27, %v3019_v3 }
 0x214   :  { %3875 = vst [vmem:[#allocation20_spill] sm:$0xff] %v3457_v10  ;;  %v3884_v10 = vsub.f32 %v3883_v34, %v3019_v3  ;;  %v3487_v15 = vmul.f32 %v3151_v52, %v3885_v46  ;;  %v3890_v46 = vsub.f32 %v3804_v28, %v3019_v3 }
 0x215   :  { %3880 = vst [vmem:[#allocation22_spill] sm:$0xff] %v3469_v38  ;;  %v3887_v38 = vsub.f32 %v3886_v54, %v3019_v3  ;;  %v3499_v34 = vmul.f32 %v3151_v52, %v3888_v2  ;;  %v3894_v2 = vsub.f32 %v3806_v37, %v3019_v3  ;;  %v1489_v37 = vmax.f32 %v3229_v13, 0.0 }
 0x216   :  { %v3481_v23 = vmul.f32 %v3151_v52, %v3884_v10  ;;  %v3889_v10 = vsub.f32 %v3803_v61, %v3019_v3  ;;  %v3511_v54 = vmul.f32 %v3151_v52, %v3890_v46  ;;  %v3898_v46 = vsub.f32 %v2918_v39, %v3019_v3 }
 0x217   :  { %v3493_v55 = vmul.f32 %v3151_v52, %v3887_v38  ;;  %v3892_v38 = vsub.f32 %v3805_v51, %v3019_v3  ;;  %v3523_v61 = vmul.f32 %v3151_v52, %v3894_v2  ;;  %v1485_v39 = vmax.f32 %v3205_v49, 0.0  ;;  %v3903_v17 = vld [vmem:[#allocation25_spill] sm:$0xff]  ;;  %v3904_v20 = vld [vmem:[#allocation27_spill] sm:$0xff] }
 0x218   :  { %v3505_v6 = vmul.f32 %v3151_v52, %v3889_v10  ;;  %3891 = vst [vmem:[#allocation24_spill] sm:$0xff] %v3511_v54  ;;  %v3896_v10 = vsub.f32 %v2911_v19, %v3019_v3  ;;  %v3535_v51 = vmul.f32 %v3151_v52, %v3898_v46  ;;  %v1482_v19 = vmax.f32 %v3187_v29, 0.0  ;;  %v3905_v56 = vld [vmem:[#allocation28_spill] sm:$0xff]  ;;  %v3906_v16 = vld [vmem:[#allocation18_spill] sm:$0xff] }
 0x219   :  { %v3517_v27 = vmul.f32 %v3151_v52, %v3892_v38  ;;  %3895 = vst [vmem:[#allocation10_spill] sm:$0xff] %v3523_v61  ;;  %v1487_v3 = vmax.f32 %v3217_v63, 0.0  ;;  %v1488_v46 = vmax.f32 %v3223_v7, 0.0  ;;  %v1490_v2 = vmax.f32 %v3235_v25, 0.0  ;;  %v3901_v38 = vld [vmem:[#allocation21_spill] sm:$0xff] }
 0x21a   :  { %v3529_v28 = vmul.f32 %v3151_v52, %v3896_v10  ;;  %3899 = vst [vmem:[#allocation14_spill] sm:$0xff] %v3535_v51  ;;  %v1483_v10 = vmax.f32 %v3193_v35, 0.0  ;;  %v1486_v52 = vmax.f32 %v3211_v57, 0.0  ;;  %v1491_v61 = vmax.f32 %v3241_v33, 0.0 }
 0x21b   :  { %3893 = vst [vmem:[#allocation26_spill] sm:$0xff] %v3517_v27  ;;  %v1492_v29 = vmax.f32 %v3247_v45, 0.0  ;;  %v1493_v35 = vmax.f32 %v3253_v53, 0.0  ;;  %v3900_v27 = vld [vmem:[#allocation19_spill] sm:$0xff]  ;;  %v1496_v57 = vmax.f32 %v3901_v38, 0.0  ;;  %v1497_v63 = vmax.f32 %v3902_v21, 0.0 }
 0x21c   :  { %3897 = vst [vmem:[#allocation12_spill] sm:$0xff] %v3529_v28  ;;  %v1484_v28 = vmax.f32 %v3199_v43, 0.0  ;;  %v1494_v43 = vmax.f32 %v3259_v1, 0.0  ;;  %v1495_v49 = vmax.f32 %v3900_v27, 0.0  ;;  %v1498_v7 = vmax.f32 %v3283_v42, 0.0  ;;  %v3907_v51 = vld [vmem:[#allocation20_spill] sm:$0xff] }
 0x21d   :  { %v1499_v13 = vmax.f32 %v3289_v4, 0.0  ;;  %v1500_v25 = vmax.f32 %v3295_v60, 0.0  ;;  %v1501_v33 = vmax.f32 %v3301_v32, 0.0  ;;  %v1502_v45 = vmax.f32 %v3307_v11, 0.0  ;;  %v3908_v54 = vld [vmem:[#allocation22_spill] sm:$0xff] }
 0x21e   :  { %v1503_v53 = vmax.f32 %v3313_v40, 0.0  ;;  %v1504_v1 = vmax.f32 %v3319_v62, 0.0  ;;  %v1505_v27 = vmax.f32 %v3325_v5, 0.0  ;;  %v1506_v38 = vmax.f32 %v3331_v48, 0.0 }
 0x21f   :  { %v1507_v21 = vmax.f32 %v3337_v31, 0.0  ;;  %v1508_v42 = vmax.f32 %v3343_v47, 0.0  ;;  %v1509_v4 = vmax.f32 %v3349_v12, 0.0  ;;  %v1510_v60 = vmax.f32 %v3355_v59, 0.0 }
 0x220   :  { %v1511_v32 = vmax.f32 %v3361_v41, 0.0  ;;  %v1512_v11 = vmax.f32 %v3367_v18, 0.0  ;;  %v1513_v40 = vmax.f32 %v3373_v22, 0.0  ;;  %v1514_v62 = vmax.f32 %v3379_v30, 0.0 }
 0x221   :  { %v1515_v5 = vmax.f32 %v3385_v36, 0.0  ;;  %v1516_v48 = vmax.f32 %v3391_v44, 0.0  ;;  %v1517_v31 = vmax.f32 %v3397_v50, 0.0  ;;  %v1518_v47 = vmax.f32 %v3403_v58, 0.0 }
 0x222   :  { %v1519_v12 = vmax.f32 %v3409_v0, 0.0  ;;  %v1520_v59 = vmax.f32 %v3415_v8, 0.0  ;;  %v1521_v41 = vmax.f32 %v3421_v14, 0.0  ;;  %v1522_v18 = vmax.f32 %v3427_v26, 0.0 }
 0x223   :  { %v1523_v22 = vmax.f32 %v3903_v17, 0.0  ;;  %v1524_v30 = vmax.f32 %v3904_v20, 0.0  ;;  %v1525_v36 = vmax.f32 %v3905_v56, 0.0  ;;  %v1526_v44 = vmax.f32 %v3906_v16, 0.0  ;;  %v3909_v16 = vld [vmem:[#allocation24_spill] sm:$0xff] }
 0x224   :  { %v1527_v50 = vmax.f32 %v3907_v51, 0.0  ;;  %v1528_v58 = vmax.f32 %v3463_v24, 0.0  ;;  %v1529_v0 = vmax.f32 %v3908_v54, 0.0  ;;  %v1530_v8 = vmax.f32 %v3475_v9, 0.0  ;;  %v3910_v24 = vld [vmem:[#allocation26_spill] sm:$0xff] }
 0x225   :  { %v1531_v14 = vmax.f32 %v3481_v23, 0.0  ;;  %v1532_v26 = vmax.f32 %v3487_v15, 0.0  ;;  %v1533_v17 = vmax.f32 %v3493_v55, 0.0  ;;  %v1534_v20 = vmax.f32 %v3499_v34, 0.0  ;;  %v3911_v9 = vld [vmem:[#allocation10_spill] sm:$0xff]  ;;  %v3912_v15 = vld [vmem:[#allocation12_spill] sm:$0xff] }
 0x226   :  { %v1535_v56 = vmax.f32 %v3505_v6, 0.0  ;;  %v1536_v51 = vmax.f32 %v3909_v16, 0.0  ;;  %v1537_v54 = vmax.f32 %v3910_v24, 0.0  ;;  %v1538_v23 = vmax.f32 %v3911_v9, 0.0  ;;  %v3913_v34 = vld [vmem:[#allocation14_spill] sm:$0xff]  ;;  %v3914_v16 = vld [vmem:[#allocation3_spill] sm:$0xff] }
 0x227   :  { %v1539_v55 = vmax.f32 %v3912_v15, 0.0  ;;  %v1540_v6 = vmax.f32 %v3913_v34, 0.0  ;;  %v3915_v24 = vmax.f32 %v3914_v16, 0.0  ;;  %v3916_v9 = vld [vmem:[#allocation4_spill] sm:$0xff]  ;;  %v3918_v16 = vld [vmem:[#allocation6_spill] sm:$0xff] }
 0x228   :  { %v3917_v15 = vmax.f32 %v3916_v9, 0.0  ;;  %v3919_v9 = vmax.f32 %v3918_v16, 0.0 }
 0x22a   :  { %v2076_v34 = vpack.c.bf16 %v3917_v15, %v3915_v24  ;;  %v3920_v15 = vld [vmem:[#allocation8_spill] sm:$0xff] }
 0x22b   :  { %v3921_v24 = vmax.f32 %v3920_v15, 0.0  ;;  %v3922_v15 = vld [vmem:[#allocation17_spill] sm:$0xff] }
 0x22c   :  { %2077 = vst [vmem:[%s3709_s2] sm:$0xff] %v2076_v34  }
 0x22d   :  { %v2081_v16 = vpack.c.bf16 %v3921_v24, %v3919_v9  ;;  %v3923_v9 = vmax.f32 %v3922_v15, 0.0  ;;  %v2091_v15 = vpack.c.bf16 %v1484_v28, %v1483_v10  ;;  %v2106_v10 = vpack.c.bf16 %v1490_v2, %v1489_v37 }
 0x22e   :  { %v2111_v28 = vpack.c.bf16 %v1492_v29, %v1491_v61  ;;  %v2126_v37 = vpack.c.bf16 %v1498_v7, %v1497_v63  ;;  %v2131_v61 = vpack.c.bf16 %v1500_v25, %v1499_v13  ;;  %v2136_v2 = vpack.c.bf16 %v1502_v45, %v1501_v33 }
 0x22f   :  { %v2086_v24 = vpack.c.bf16 %v1482_v19, %v3923_v9  ;;  %v2096_v9 = vpack.c.bf16 %v1486_v52, %v1485_v39  ;;  %v2101_v19 = vpack.c.bf16 %v1488_v46, %v1487_v3  ;;  %2233 = vst [vmem:[%s3709_s2 + $0x8] sm:$0xff] %v2081_v16   ;;  %2235 = vst [vmem:[%s3709_s2 + $0x18] sm:$0xff] %v2091_v15  }
 0x230   :  { %v2116_v39 = vpack.c.bf16 %v1494_v43, %v1493_v35  ;;  %v2121_v52 = vpack.c.bf16 %v1496_v57, %v1495_v49  ;;  %2238 = vst [vmem:[%s3709_s2 + $0x30] sm:$0xff] %v2106_v10   ;;  %2239 = vst [vmem:[%s3709_s2 + $0x38] sm:$0xff] %v2111_v28   ;;  %v2141_v3 = vpack.c.bf16 %v1504_v1, %v1503_v53 }
 0x231   :  { %2234 = vst [vmem:[%s3709_s2 + $0x10] sm:$0xff] %v2086_v24   ;;  %2236 = vst [vmem:[%s3709_s2 + $0x20] sm:$0xff] %v2096_v9   ;;  %v2146_v46 = vpack.c.bf16 %v1506_v38, %v1505_v27  ;;  %v2151_v29 = vpack.c.bf16 %v1508_v42, %v1507_v21  ;;  %v2156_v35 = vpack.c.bf16 %v1510_v60, %v1509_v4 }
 0x232   :  { %2237 = vst [vmem:[%s3709_s2 + $0x28] sm:$0xff] %v2101_v19   ;;  %2240 = vst [vmem:[%s3709_s2 + $0x40] sm:$0xff] %v2116_v39   ;;  %v2161_v43 = vpack.c.bf16 %v1512_v11, %v1511_v32  ;;  %v2166_v49 = vpack.c.bf16 %v1514_v62, %v1513_v40  ;;  %v2171_v57 = vpack.c.bf16 %v1516_v48, %v1515_v5 }
 0x233   :  { %2241 = vst [vmem:[%s3709_s2 + $0x48] sm:$0xff] %v2121_v52   ;;  %2242 = vst [vmem:[%s3709_s2 + $0x50] sm:$0xff] %v2126_v37   ;;  %v2176_v63 = vpack.c.bf16 %v1518_v47, %v1517_v31  ;;  %v2181_v7 = vpack.c.bf16 %v1520_v59, %v1519_v12  ;;  %v2186_v13 = vpack.c.bf16 %v1522_v18, %v1521_v41 }
 0x234   :  { %2243 = vst [vmem:[%s3709_s2 + $0x58] sm:$0xff] %v2131_v61   ;;  %2244 = vst [vmem:[%s3709_s2 + $0x60] sm:$0xff] %v2136_v2   ;;  %v2191_v25 = vpack.c.bf16 %v1524_v30, %v1523_v22  ;;  %v2196_v33 = vpack.c.bf16 %v1526_v44, %v1525_v36  ;;  %v2201_v45 = vpack.c.bf16 %v1528_v58, %v1527_v50 }
 0x235   :  { %2245 = vst [vmem:[%s3709_s2 + $0x68] sm:$0xff] %v2141_v3   ;;  %2246 = vst [vmem:[%s3709_s2 + $0x70] sm:$0xff] %v2146_v46   ;;  %v2206_v53 = vpack.c.bf16 %v1530_v8, %v1529_v0  ;;  %v2211_v1 = vpack.c.bf16 %v1532_v26, %v1531_v14  ;;  %v2216_v27 = vpack.c.bf16 %v1534_v20, %v1533_v17 }
 0x236   :  { %2247 = vst [vmem:[%s3709_s2 + $0x78] sm:$0xff] %v2151_v29   ;;  %2248 = vst [vmem:[%s3709_s2 + $0x80] sm:$0xff] %v2156_v35   ;;  %v2221_v38 = vpack.c.bf16 %v1536_v51, %v1535_v56  ;;  %v2226_v21 = vpack.c.bf16 %v1538_v23, %v1537_v54  ;;  %v2231_v42 = vpack.c.bf16 %v1540_v6, %v1539_v55 }
 0x237   :  { %2249 = vst [vmem:[%s3709_s2 + $0x88] sm:$0xff] %v2161_v43   ;;  %2250 = vst [vmem:[%s3709_s2 + $0x90] sm:$0xff] %v2166_v49  }
 0x238   :  { %2251 = vst [vmem:[%s3709_s2 + $0x98] sm:$0xff] %v2171_v57   ;;  %2252 = vst [vmem:[%s3709_s2 + $0xa0] sm:$0xff] %v2176_v63  }
 0x239   :  { %2253 = vst [vmem:[%s3709_s2 + $0xa8] sm:$0xff] %v2181_v7   ;;  %2254 = vst [vmem:[%s3709_s2 + $0xb0] sm:$0xff] %v2186_v13  }
 0x23a   :  { %2255 = vst [vmem:[%s3709_s2 + $0xb8] sm:$0xff] %v2191_v25   ;;  %2256 = vst [vmem:[%s3709_s2 + $0xc0] sm:$0xff] %v2196_v33  }
 0x23b   :  { %2257 = vst [vmem:[%s3709_s2 + $0xc8] sm:$0xff] %v2201_v45   ;;  %2258 = vst [vmem:[%s3709_s2 + $0xd0] sm:$0xff] %v2206_v53  }
 0x23c   :  { %2259 = vst [vmem:[%s3709_s2 + $0xd8] sm:$0xff] %v2211_v1   ;;  %2260 = vst [vmem:[%s3709_s2 + $0xe0] sm:$0xff] %v2216_v27  }
 0x23d   :  { %2261 = vst [vmem:[%s3709_s2 + $0xe8] sm:$0xff] %v2221_v38   ;;  %2262 = vst [vmem:[%s3709_s2 + $0xf0] sm:$0xff] %v2226_v21  }
 0x23e   :  { %2263 = vst [vmem:[%s3709_s2 + $0xf8] sm:$0xff] %v2231_v42  }

// kernel: _lambda_.17
= control target key start
LH: loop header
LB: loop body
LE: loop exit
PB: predicated region body
PF: predicated region fallthrough
CT: control target
= control target key end

     0   :  { %s1315_s12 = smov 0   ;;  %s1317_s13 = smov 0   ;;  %s1612_s0 = inlined_call_operand.vmem [shape: bf16[128,1152], index: 0, kind: input, shape index: {}]   ;;  %s1613_s1 = inlined_call_operand.vmem [shape: bf16[1152,128], index: 1, kind: input, shape index: {}]   ;;  %s1614_s2 = inlined_call_operand.vmem [shape: bf16[128,128], index: 2, kind: input, shape index: {}]   ;;  %s1615_s3 = inlined_call_operand.vmem [shape: bf16[128,128], index: 3, kind: output, shape index: {}]  }
   0x1   :  { %s1319_s14 = smov 0   ;;  %s1321_s15 = smov 0  }
   0x2   :  { %s1323_s16 = smov 0  }
   0x3 LB: > { %s22_s17 = sadd.s32 1, %s1288_s15  ;;  %p39_p1 = scmp.ne.s32.totalorder %s1280_s13, %s1276_s12  ;;  %s1292_s16 = sphi %s1323_s16, %s13_s16   ;;  %s1288_s15 = sphi %s1321_s15, %s1619_s15   ;;  %s1284_s14 = sphi %s1319_s14, %s1618_s14   ;;  %s1280_s13 = sphi %s1317_s13, %s1617_s13   ;;  %s1276_s12 = sphi %s1315_s12, %s1616_s12  }
   0x4   : > { %p23_p0 = scmp.ge.s32.totalorder %s22_s17, 9  ;;  %p40_p2 = scmp.eq.s32.totalorder %s1292_s16, 0 }
   0x5   : > { %s32_s19 = sadd.s32 1, %s1280_s13  ;;  %p985_p5 = scmp.ge.s32.totalorder %s1292_s16, 9 }
   0x6   : > { %s1621_s17 = smov (%p23_p0, %s22_s17), 0  ;;  %p41_p3 = por %p40_p2, %p39_p1 }
   0x7   : > { %s29_s18 = ssub.s32 %s1288_s15, %s1621_s17  ;;  %152 = sbr.rel (%p985_p5) target bundleno = 28 (0x1c), region = 20 }
   0x8   : > { %p30_p4 = scmp.eq.s32.totalorder %s29_s18, 0 }
   0xa   : > { %s1350_s20 = scalar_select %p30_p4, %s1280_s13, %s32_s19  }
   0xe   : > { %155 = sbr.rel (!%p41_p3) target bundleno = 28 (0x1c), region = 24  ;;  %s157_s21 = sand.u32 (%p41_p3), 1, %s1280_s13  }
   0xf   : > { %s987_s22 = sshll.u32 (%p41_p3), %s1288_s15, 2  ;;  %s986_s23 = sshll.u32 (%p41_p3), %s157_s21, 6 }
  0x10   : > { %s1358_s26 = scalar_lea.vmem (%p41_p3), %s1612_s0, %s987_s22  ;;  %s159_s27 = scalar_lea.vmem (%p41_p3), [#allocation3], %s986_s23 }
  0x11   : > { %v177_v0 = vld [vmem:[%s1358_s26] sm:$0xf] (%p41_p3)  ;;  %v179_v1 = vld [vmem:[%s1358_s26 + $0x24] sm:$0xf] (%p41_p3)  ;;  %v181_v2 = vld [vmem:[%s1358_s26 + $0x48] sm:$0xf] (%p41_p3) }
  0x12   : > { %178 = vst [vmem:[%s159_s27] sm:$0xf] (%p41_p3), %v177_v0  ;;  %180 = vst [vmem:[%s159_s27 + $0x4] sm:$0xf] (%p41_p3), %v179_v1  ;;  %v183_v3 = vld [vmem:[%s1358_s26 + $0x6c] sm:$0xf] (%p41_p3) }
  0x13   : > { %v185_v4 = vld [vmem:[%s1358_s26 + $0x90] sm:$0xf] (%p41_p3)  ;;  %182 = vst [vmem:[%s159_s27 + $0x8] sm:$0xf] (%p41_p3), %v181_v2  ;;  %184 = vst [vmem:[%s159_s27 + $0xc] sm:$0xf] (%p41_p3), %v183_v3 }
  0x14   : > { %186 = vst [vmem:[%s159_s27 + $0x10] sm:$0xf] (%p41_p3), %v185_v4  ;;  %v187_v5 = vld [vmem:[%s1358_s26 + $0xb4] sm:$0xf] (%p41_p3)  ;;  %v189_v6 = vld [vmem:[%s1358_s26 + $0xd8] sm:$0xf] (%p41_p3) }
  0x15   : > { %v191_v7 = vld [vmem:[%s1358_s26 + $0xfc] sm:$0xf]  ;;  %188 = vst [vmem:[%s159_s27 + $0x14] sm:$0xf] %v187_v5  ;;  %190 = vst [vmem:[%s159_s27 + $0x18] sm:$0xf] %v189_v6 }
  0x16   : > { %192 = vst [vmem:[%s159_s27 + $0x1c] sm:$0xf] %v191_v7  ;;  %v193_v8 = vld [vmem:[%s1358_s26 + $0x120] sm:$0xf]  ;;  %v195_v9 = vld [vmem:[%s1358_s26 + $0x144] sm:$0xf] }
  0x17   : > { %v197_v10 = vld [vmem:[%s1358_s26 + $0x168] sm:$0xf]  ;;  %194 = vst [vmem:[%s159_s27 + $0x20] sm:$0xf] %v193_v8  ;;  %196 = vst [vmem:[%s159_s27 + $0x24] sm:$0xf] %v195_v9 }
  0x18   : > { %198 = vst [vmem:[%s159_s27 + $0x28] sm:$0xf] %v197_v10  ;;  %v199_v11 = vld [vmem:[%s1358_s26 + $0x18c] sm:$0xf]  ;;  %v201_v12 = vld [vmem:[%s1358_s26 + $0x1b0] sm:$0xf] }
  0x19   : > { %v203_v13 = vld [vmem:[%s1358_s26 + $0x1d4] sm:$0xf]  ;;  %200 = vst [vmem:[%s159_s27 + $0x2c] sm:$0xf] %v199_v11  ;;  %202 = vst [vmem:[%s159_s27 + $0x30] sm:$0xf] %v201_v12 }
  0x1a   : > { %204 = vst [vmem:[%s159_s27 + $0x34] sm:$0xf] %v203_v13  ;;  %v205_v14 = vld [vmem:[%s1358_s26 + $0x1f8] sm:$0xf]  ;;  %v207_v15 = vld [vmem:[%s1358_s26 + $0x21c] sm:$0xf] }
  0x1b   : > { %206 = vst [vmem:[%s159_s27 + $0x38] sm:$0xf] %v205_v14  ;;  %208 = vst [vmem:[%s159_s27 + $0x3c] sm:$0xf] %v207_v15 }
  0x1c PF: > { %p988_p6 = scmp.ge.s32.totalorder %s1292_s16, 1  ;;  %p274_p7 = scmp.lt.s32.totalorder %s1292_s16, 10 }
  0x1e   : > { %p275_p8 = pnand %p988_p6, %p274_p7 }
  0x1f   : > { %s281_s28 = sand.u32 (!%p275_p8), 1, %s1276_s12   ;;  %s990_s29 = sshll.u32 (!%p275_p8), %s1284_s14, 4 }
  0x20   : > { %278 = sbr.rel (%p275_p8) target bundleno = 389 (0x185), region = 69  ;;  %s989_s30 = sshll.u32 (!%p275_p8), %s281_s28, 6 }
  0x21   : > { %p316_p9 = scmp.lt.s32.totalorder (!%p275_p8), %s990_s29, 143  ;;  %s1385_s8 = scalar_lea.vmem (!%p275_p8), [#allocation3], %s989_s30 }
  0x22   : > { %p992_p10 = scmp.ne.s32.totalorder (!%p275_p8), %s1284_s14, 0 }
  0x27   : > { %s1623_s29 = smov (!%p316_p9, %s990_s29), 143  ;;  %336 = sbr.rel (%p992_p10) target bundleno = 49 (0x31), region = 77 }
  0x28   : > { %s991_s4 = sshll.u32 %s1623_s29, 2  ;;  %v1294_v16 = vmov (!%p992_p10), 0.0  }
  0x29   : > { %s1383_s7 = scalar_lea.vmem %s1613_s1, %s991_s4  ;;  %337 = vst [vmem:[#allocation2] sm:$0xff] (!%p992_p10), %v1294_v16  ;;  %338 = vst [vmem:[#allocation2 + $0x8] sm:$0xff] (!%p992_p10), %v1294_v16 }
  0x2a   : > { %339 = vst [vmem:[#allocation2 + $0x10] sm:$0xff] (!%p992_p10), %v1294_v16  ;;  %340 = vst [vmem:[#allocation2 + $0x18] sm:$0xff] (!%p992_p10), %v1294_v16 }
  0x2b   : > { %341 = vst [vmem:[#allocation2 + $0x20] sm:$0xff] (!%p992_p10), %v1294_v16  ;;  %342 = vst [vmem:[#allocation2 + $0x28] sm:$0xff] (!%p992_p10), %v1294_v16 }
  0x2c   : > { %343 = vst [vmem:[#allocation2 + $0x30] sm:$0xff] (!%p992_p10), %v1294_v16  ;;  %344 = vst [vmem:[#allocation2 + $0x38] sm:$0xff] (!%p992_p10), %v1294_v16 }
  0x2d   : > { %345 = vst [vmem:[#allocation2 + $0x40] sm:$0xff] (!%p992_p10), %v1294_v16  ;;  %346 = vst [vmem:[#allocation2 + $0x48] sm:$0xff] (!%p992_p10), %v1294_v16 }
  0x2e   : > { %347 = vst [vmem:[#allocation2 + $0x50] sm:$0xff] %v1294_v16  ;;  %348 = vst [vmem:[#allocation2 + $0x58] sm:$0xff] %v1294_v16 }
  0x2f   : > { %349 = vst [vmem:[#allocation2 + $0x60] sm:$0xff] %v1294_v16  ;;  %350 = vst [vmem:[#allocation2 + $0x68] sm:$0xff] %v1294_v16 }
  0x30   : > { %351 = vst [vmem:[#allocation2 + $0x70] sm:$0xff] %v1294_v16  ;;  %352 = vst [vmem:[#allocation2 + $0x78] sm:$0xff] %v1294_v16 }
  0x31 PF: > { %v1236_v17 = vld [vmem:[%s1383_s7] sm:$0xff]   ;;  %v1237_v18 = vld [vmem:[%s1383_s7 + $0x8] sm:$0xff]   ;;  %v1238_v19 = vld [vmem:[%s1383_s7 + $0x10] sm:$0xff]   ;;  %p1009_p11 = scmp.ne.s32.totalorder %s1284_s14, 8 }
  0x32   : > { %1147 = vmatprep.subr.bf16.mxu0 %v1236_v17  ;;  %1179 = vmatprep.subr.bf16.mxu1 %v1236_v17  ;;  %v1239_v20 = vld [vmem:[%s1383_s7 + $0x18] sm:$0xff]   ;;  %v1244_v21 = vld [vmem:[%s1385_s8] sm:$0xff]   ;;  %v1241_v24 = vld [vmem:[%s1383_s7 + $0x28] sm:$0xff]  }
  0x33   : > { %1148 = vmatpush3.bf16.msra.mxu0 %v1236_v17  ;;  %1187 = vmatpush3.bf16.msra.mxu1 %v1236_v17  ;;  %v1245_v22 = vld [vmem:[%s1385_s8 + $0x20] sm:$0xff]   ;;  %v1242_v25 = vld [vmem:[%s1383_s7 + $0x30] sm:$0xff]   ;;  %v1243_v26 = vld [vmem:[%s1383_s7 + $0x38] sm:$0xff]  }
  0x34   : > { %1149 = vmatprep.subr.bf16.mxu0 %v1237_v18  ;;  %1180 = vmatprep.subr.bf16.mxu1 %v1237_v18  ;;  %v1240_v23 = vld [vmem:[%s1383_s7 + $0x20] sm:$0xff]   ;;  %v1246_v27 = vld [vmem:[%s1385_s8 + $0x8] sm:$0xff]   ;;  %v1248_v29 = vld [vmem:[%s1385_s8 + $0x10] sm:$0xff]  }
  0x35   : > { %1163 = vmatprep.mubr.bf16.mxu0 %v1244_v21  ;;  %1171 = vmatprep.mubr.bf16.mxu1 %v1245_v22  ;;  %v1247_v28 = vld [vmem:[%s1385_s8 + $0x28] sm:$0xff]   ;;  %v1249_v30 = vld [vmem:[%s1385_s8 + $0x30] sm:$0xff]   ;;  %v1250_v31 = vld [vmem:[%s1385_s8 + $0x18] sm:$0xff]  }
  0x36   : > { %v1251_v32 = vld [vmem:[%s1385_s8 + $0x38] sm:$0xff]   ;;  %v355_v33 = vld [vmem:[#allocation2 + $0x10] sm:$0xff]  ;;  %v353_v35 = vld [vmem:[#allocation2] sm:$0xff] }
  0x37   : > { %1150 = vmatpush3.bf16.msra.mxu0 %v1237_v18  ;;  %1188 = vmatpush3.bf16.msra.mxu1 %v1237_v18  ;;  %v363_v34 = vld [vmem:[#allocation2 + $0x50] sm:$0xff]  ;;  %v361_v36 = vld [vmem:[#allocation2 + $0x40] sm:$0xff]  ;;  %v356_v39 = vld [vmem:[#allocation2 + $0x18] sm:$0xff] }
  0x38   : > { %1151 = vmatprep.subr.bf16.mxu0 %v1238_v19  ;;  %1181 = vmatprep.subr.bf16.mxu1 %v1238_v19  ;;  %v364_v40 = vld [vmem:[#allocation2 + $0x58] sm:$0xff]  ;;  %v354_v45 = vld [vmem:[#allocation2 + $0x8] sm:$0xff]  ;;  %v359_v57 = vld [vmem:[#allocation2 + $0x30] sm:$0xff] }
  0x39   : > { %v362_v46 = vld [vmem:[#allocation2 + $0x48] sm:$0xff]  ;;  %v367_v58 = vld [vmem:[#allocation2 + $0x70] sm:$0xff]  ;;  %v357_v59 = vld [vmem:[#allocation2 + $0x20] sm:$0xff] }
  0x3a   : > { %v365_v60 = vld [vmem:[#allocation2 + $0x60] sm:$0xff]  ;;  %v360_v63 = vld [vmem:[#allocation2 + $0x38] sm:$0xff]  ;;  %v358_v5 = vld [vmem:[#allocation2 + $0x28] sm:$0xff] }
  0x3b   : > { %1152 = vmatpush3.bf16.msra.mxu0 %v1238_v19  ;;  %1189 = vmatpush3.bf16.msra.mxu1 %v1238_v19  ;;  %v368_v0 = vld [vmem:[#allocation2 + $0x78] sm:$0xff]  ;;  %v366_v6 = vld [vmem:[#allocation2 + $0x68] sm:$0xff] }
  0x3c   : > { %1153 = vmatprep.subr.bf16.mxu0 %v1239_v20  ;;  %1182 = vmatprep.subr.bf16.mxu1 %v1239_v20 }
  0x3f   : > { %1154 = vmatpush3.bf16.msra.mxu0 %v1239_v20  ;;  %1190 = vmatpush3.bf16.msra.mxu1 %v1239_v20 }
  0x40   : > { %1155 = vmatprep.subr.bf16.mxu0 %v1240_v23  ;;  %1183 = vmatprep.subr.bf16.mxu1 %v1240_v23 }
  0x43   : > { %1156 = vmatpush3.bf16.msra.mxu0 %v1240_v23  ;;  %1191 = vmatpush3.bf16.msra.mxu1 %v1240_v23 }
  0x44   : > { %1157 = vmatprep.subr.bf16.mxu0 %v1241_v24  ;;  %1184 = vmatprep.subr.bf16.mxu1 %v1241_v24 }
  0x47   : > { %1158 = vmatpush3.bf16.msra.mxu0 %v1241_v24  ;;  %1192 = vmatpush3.bf16.msra.mxu1 %v1241_v24 }
  0x48   : > { %1159 = vmatprep.subr.bf16.mxu0 %v1242_v25  ;;  %1185 = vmatprep.subr.bf16.mxu1 %v1242_v25 }
  0x4b   : > { %1160 = vmatpush3.bf16.msra.mxu0 %v1242_v25  ;;  %1193 = vmatpush3.bf16.msra.mxu1 %v1242_v25 }
  0x4c   : > { %1161 = vmatprep.subr.bf16.mxu0 %v1243_v26  ;;  %1186 = vmatprep.subr.bf16.mxu1 %v1243_v26 }
  0x4f   : > { %1162 = vmatpush3.bf16.msra.mxu0 %v1243_v26  ;;  %1194 = vmatpush3.bf16.msra.mxu1 %v1243_v26 }
  0x52   : > { %1164 = vmatmul.mubr.bf16.vlgmr.msra.gmra.mrb[0].mxu0 %v1246_v27  ;;  %1172 = vmatmul.mubr.bf16.vlgmr.msra.gmra.mrb[0].mxu1 %v1247_v28 }
  0x53   : > { %1167 = vmatprep.mubr.bf16.mxu0 %v1248_v29  ;;  %1175 = vmatprep.mubr.bf16.mxu1 %v1249_v30 }
  0x5a   : > { %1168 = vmatmul.mubr.bf16.gmra.mrb[4].mxu0 %v1250_v31  ;;  %1176 = vmatmul.mubr.bf16.gmra.mrb[4].mxu1 %v1251_v32 }
 0x125   : > { %v1165_v37 = vpop.f32.mrb[0].mxu0  ;;  %v1173_v38 = vpop.f32.mrb[0].mxu1 }
 0x126   : > { %v596_v41 = vadd.f32 %v1165_v37, %v355_v33  ;;  %v604_v42 = vadd.f32 %v1173_v38, %v363_v34  ;;  %v531_v43 = vpop.f32.mrb[1].mxu0  ;;  %v563_v44 = vpop.f32.mrb[1].mxu1 }
 0x127   : > { %v594_v47 = vadd.f32 %v531_v43, %v353_v35  ;;  %v602_v48 = vadd.f32 %v563_v44, %v361_v36  ;;  %v1166_v49 = vpop.f32.mrb[2].mxu0  ;;  %v1174_v50 = vpop.f32.mrb[2].mxu1 }
 0x128   : > { %612 = vst [vmem:[#allocation2 + $0x10] sm:$0xff] %v596_v41  ;;  %620 = vst [vmem:[#allocation2 + $0x50] sm:$0xff] %v604_v42  ;;  %v597_v51 = vadd.f32 %v1166_v49, %v356_v39  ;;  %v605_v52 = vadd.f32 %v1174_v50, %v364_v40  ;;  %v534_v53 = vpop.f32.mrb[3].mxu0  ;;  %v566_v54 = vpop.f32.mrb[3].mxu1 }
 0x129   : > { %610 = vst [vmem:[#allocation2] sm:$0xff] %v594_v47  ;;  %618 = vst [vmem:[#allocation2 + $0x40] sm:$0xff] %v602_v48  ;;  %v595_v55 = vadd.f32 %v534_v53, %v354_v45  ;;  %v603_v56 = vadd.f32 %v566_v54, %v362_v46 }
 0x12a   : > { %613 = vst [vmem:[#allocation2 + $0x18] sm:$0xff] %v597_v51  ;;  %621 = vst [vmem:[#allocation2 + $0x58] sm:$0xff] %v605_v52 }
 0x12b   : > { %611 = vst [vmem:[#allocation2 + $0x8] sm:$0xff] %v595_v55  ;;  %619 = vst [vmem:[#allocation2 + $0x48] sm:$0xff] %v603_v56 }
 0x12d   : > { %v1169_v61 = vpop.f32.mrb[4].mxu0  ;;  %v1177_v62 = vpop.f32.mrb[4].mxu1  ;;  %629 = sbr.rel (%p1009_p11) target bundleno = 389 (0x185), region = 81 }
 0x12e   : > { %v600_v1 = vadd.f32 %v1169_v61, %v359_v57  ;;  %v608_v2 = vadd.f32 %v1177_v62, %v367_v58  ;;  %v547_v3 = vpop.f32.mrb[5].mxu0  ;;  %v579_v4 = vpop.f32.mrb[5].mxu1 }
 0x12f   : > { %v598_v7 = vadd.f32 %v547_v3, %v357_v59  ;;  %v606_v8 = vadd.f32 %v579_v4, %v365_v60  ;;  %v1170_v9 = vpop.f32.mrb[6].mxu0  ;;  %v1178_v10 = vpop.f32.mrb[6].mxu1  ;;  %v1409_v19 = vld [vmem:[#allocation2 + $0x10] sm:$0xff] (!%p1009_p11) }
 0x130   : > { %616 = vst [vmem:[#allocation2 + $0x30] sm:$0xff] %v600_v1  ;;  %624 = vst [vmem:[#allocation2 + $0x70] sm:$0xff] %v608_v2  ;;  %v601_v11 = vadd.f32 %v1170_v9, %v360_v63  ;;  %v609_v12 = vadd.f32 %v1178_v10, %v368_v0  ;;  %v550_v13 = vpop.f32.mrb[7].mxu0  ;;  %v582_v14 = vpop.f32.mrb[7].mxu1  ;;  %v1405_v17 = vld [vmem:[#allocation2] sm:$0xff] (!%p1009_p11)  ;;  %v670_v24 = vmul.f32 (!%p1009_p11), %v1409_v19, %v1409_v19  ;;  %v1451_v49 = vld [vmem:[#allocation2 + $0x50] sm:$0xff] (!%p1009_p11) }
 0x131   : > { %614 = vst [vmem:[#allocation2 + $0x20] sm:$0xff] %v598_v7  ;;  %622 = vst [vmem:[#allocation2 + $0x60] sm:$0xff] %v606_v8  ;;  %v599_v15 = vadd.f32 %v550_v13, %v358_v5  ;;  %v607_v16 = vadd.f32 %v582_v14, %v366_v6  ;;  %v1411_v20 = vld [vmem:[#allocation2 + $0x18] sm:$0xff] (!%p1009_p11)  ;;  %v668_v22 = vmul.f32 (!%p1009_p11), %v1405_v17, %v1405_v17  ;;  %v1441_v41 = vld [vmem:[#allocation2 + $0x40] sm:$0xff] (!%p1009_p11) }
 0x132   : > { %617 = vst [vmem:[#allocation2 + $0x38] sm:$0xff] %v601_v11  ;;  %625 = vst [vmem:[#allocation2 + $0x78] sm:$0xff] %v609_v12  ;;  %v1407_v18 = vld [vmem:[#allocation2 + $0x8] sm:$0xff] (!%p1009_p11)  ;;  %v671_v27 = vmul.f32 (!%p1009_p11), %v1411_v20, %v1411_v20  ;;  %v676_v47 = vmul.f32 (!%p1009_p11), %v1441_v41, %v1441_v41  ;;  %v1456_v53 = vld [vmem:[#allocation2 + $0x58] sm:$0xff] (!%p1009_p11)  ;;  %v678_v55 = vmul.f32 (!%p1009_p11), %v1451_v49, %v1451_v49 }
 0x133   : > { %615 = vst [vmem:[#allocation2 + $0x28] sm:$0xff] %v599_v15  ;;  %623 = vst [vmem:[#allocation2 + $0x68] sm:$0xff] %v607_v16  ;;  %v646_v21 = vadd.f32 (!%p1009_p11), %v1407_v18, %v1405_v17  ;;  %v669_v23 = vmul.f32 (!%p1009_p11), %v1407_v18, %v1407_v18  ;;  %v1446_v45 = vld [vmem:[#allocation2 + $0x48] sm:$0xff] (!%p1009_p11)  ;;  %v679_v59 = vmul.f32 (!%p1009_p11), %v1456_v53, %v1456_v53 }
 0x134   : > { %v677_v51 = vmul.f32 %v1446_v45, %v1446_v45 }
 0x135   : > { %v647_v26 = vadd.f32 %v646_v21, %v1409_v19  ;;  %v684_v28 = vadd.f32 %v669_v23, %v668_v22 }
 0x137   : > { %v648_v30 = vadd.f32 %v647_v26, %v1411_v20  ;;  %v685_v32 = vadd.f32 %v684_v28, %v670_v24  ;;  %v1431_v33 = vld [vmem:[#allocation2 + $0x30] sm:$0xff] }
 0x138   : > { %v1421_v25 = vld [vmem:[#allocation2 + $0x20] sm:$0xff]  ;;  %v674_v39 = vmul.f32 %v1431_v33, %v1431_v33  ;;  %v1471_v1 = vld [vmem:[#allocation2 + $0x70] sm:$0xff] }
 0x139   : > { %v672_v31 = vmul.f32 %v1421_v25, %v1421_v25  ;;  %v649_v34 = vadd.f32 %v648_v30, %v1421_v25  ;;  %v686_v36 = vadd.f32 %v685_v32, %v671_v27  ;;  %v1436_v37 = vld [vmem:[#allocation2 + $0x38] sm:$0xff]  ;;  %v1461_v57 = vld [vmem:[#allocation2 + $0x60] sm:$0xff]  ;;  %v682_v7 = vmul.f32 %v1471_v1, %v1471_v1 }
 0x13a   : > { %v1426_v29 = vld [vmem:[#allocation2 + $0x28] sm:$0xff]  ;;  %v675_v43 = vmul.f32 %v1436_v37, %v1436_v37  ;;  %v680_v63 = vmul.f32 %v1461_v57, %v1461_v57  ;;  %v1476_v5 = vld [vmem:[#allocation2 + $0x78] sm:$0xff] }
 0x13b   : > { %v673_v35 = vmul.f32 %v1426_v29, %v1426_v29  ;;  %v650_v38 = vadd.f32 %v649_v34, %v1426_v29  ;;  %v687_v40 = vadd.f32 %v686_v36, %v672_v31  ;;  %v1466_v61 = vld [vmem:[#allocation2 + $0x68] sm:$0xff]  ;;  %v683_v10 = vmul.f32 %v1476_v5, %v1476_v5 }
 0x13c   : > { %v681_v3 = vmul.f32 %v1466_v61, %v1466_v61 }
 0x13d   : > { %v651_v42 = vadd.f32 %v650_v38, %v1431_v33  ;;  %v688_v44 = vadd.f32 %v687_v40, %v673_v35 }
 0x13f   : > { %v652_v46 = vadd.f32 %v651_v42, %v1436_v37  ;;  %v689_v48 = vadd.f32 %v688_v44, %v674_v39  ;;  %v1046_v42 = vld [vmem:[%s1614_s2] sm:$0xff]   ;;  %v1118_v44 = vld [vmem:[%s1614_s2 + $0x10] sm:$0xff]  }
 0x141   : > { %v653_v50 = vadd.f32 %v652_v46, %v1441_v41  ;;  %v690_v52 = vadd.f32 %v689_v48, %v675_v43  ;;  %v1117_v43 = vld [vmem:[%s1614_s2 + $0x8] sm:$0xff]   ;;  %v1119_v46 = vld [vmem:[%s1614_s2 + $0x18] sm:$0xff]  }
 0x142   : > { %v1509_v48 = vld [vmem:[%s1614_s2 + $0x28] sm:$0xff]  }
 0x143   : > { %v654_v54 = vadd.f32 %v653_v50, %v1446_v45  ;;  %v691_v56 = vadd.f32 %v690_v52, %v676_v47  ;;  %v1504_v47 = vld [vmem:[%s1614_s2 + $0x20] sm:$0xff]   ;;  %v1047_v50 = vunpack.c.l.bf16 %v1046_v42  ;;  %v1051_v52 = vunpack.c.l.bf16 %v1117_v43 }
 0x145   : > { %v655_v58 = vadd.f32 %v654_v54, %v1451_v49  ;;  %v692_v60 = vadd.f32 %v691_v56, %v677_v51  ;;  %v1048_v51 = vunpack.c.h.bf16 %v1046_v42  ;;  %v1052_v54 = vunpack.c.h.bf16 %v1117_v43  ;;  %v1519_v56 = vld [vmem:[%s1614_s2 + $0x38] sm:$0xff]  }
 0x147   : > { %v656_v62 = vadd.f32 %v655_v58, %v1456_v53  ;;  %v693_v0 = vadd.f32 %v692_v60, %v678_v55  ;;  %v1514_v55 = vld [vmem:[%s1614_s2 + $0x30] sm:$0xff]   ;;  %v1055_v58 = vunpack.c.l.bf16 %v1118_v44  ;;  %v1059_v60 = vunpack.c.l.bf16 %v1119_v46 }
 0x149   : > { %v657_v2 = vadd.f32 %v656_v62, %v1461_v57  ;;  %v694_v4 = vadd.f32 %v693_v0, %v679_v59  ;;  %v1056_v59 = vunpack.c.h.bf16 %v1118_v44  ;;  %v1060_v62 = vunpack.c.h.bf16 %v1119_v46 }
 0x14a   : > { %v1064_v0 = vunpack.c.h.bf16 %v1504_v47 }
 0x14b   : > { %v658_v6 = vadd.f32 %v657_v2, %v1466_v61  ;;  %v695_v8 = vadd.f32 %v694_v4, %v680_v63  ;;  %v1063_v63 = vunpack.c.l.bf16 %v1504_v47  ;;  %v1067_v2 = vunpack.c.l.bf16 %v1509_v48 }
 0x14c   : > { %v1071_v4 = vunpack.c.l.bf16 %v1514_v55 }
 0x14d   : > { %v659_v9 = vadd.f32 %v658_v6, %v1471_v1  ;;  %v696_v11 = vadd.f32 %v695_v8, %v681_v3  ;;  %v1068_v3 = vunpack.c.h.bf16 %v1509_v48  ;;  %v1072_v6 = vunpack.c.h.bf16 %v1514_v55 }
 0x14e   : > { %v1076_v8 = vunpack.c.h.bf16 %v1519_v56 }
 0x14f   : > { %v660_v12 = vadd.f32 %v659_v9, %v1476_v5  ;;  %v697_v13 = vadd.f32 %v696_v11, %v682_v7  ;;  %v1075_v7 = vunpack.c.l.bf16 %v1519_v56 }
 0x151   : > { %v661_v14 = vrot.slane %v660_v12, 4  ;;  %v698_v15 = vadd.f32 %v697_v13, %v683_v10 }
 0x153   : > { %v662_v16 = vadd.f32 %v661_v14, %v660_v12  ;;  %v699_v21 = vrot.slane %v698_v15, 4 }
 0x155   : > { %v663_v22 = vrot.slane %v662_v16, 2  ;;  %v700_v23 = vadd.f32 %v699_v21, %v698_v15 }
 0x157   : > { %v664_v24 = vadd.f32 %v663_v22, %v662_v16  ;;  %v701_v26 = vrot.slane %v700_v23, 2 }
 0x159   : > { %v665_v27 = vrot.slane %v664_v24, 1  ;;  %v702_v28 = vadd.f32 %v701_v26, %v700_v23 }
 0x15b   : > { %v666_v30 = vadd.f32 %v665_v27, %v664_v24  ;;  %v703_v31 = vrot.slane %v702_v28, 1 }
 0x15d   : > { %v1485_v32 = vmul.f32 0.0078125, %v666_v30  ;;  %v704_v34 = vadd.f32 %v703_v31, %v702_v28 }
 0x15f   : > { %v706_v35 = vmul.f32 %v1485_v32, %v1485_v32  ;;  %v705_v36 = vmul.f32 0.0078125, %v704_v34  ;;  %v709_v9 = vsub.f32 %v1405_v17, %v1485_v32  ;;  %v710_v10 = vsub.f32 %v1407_v18, %v1485_v32 }
 0x160   : > { %v711_v11 = vsub.f32 %v1409_v19, %v1485_v32  ;;  %v712_v12 = vsub.f32 %v1411_v20, %v1485_v32  ;;  %v713_v13 = vsub.f32 %v1421_v25, %v1485_v32  ;;  %v714_v14 = vsub.f32 %v1426_v29, %v1485_v32 }
 0x161   : > { %v707_v38 = vsub.f32 %v705_v36, %v706_v35  ;;  %v715_v15 = vsub.f32 %v1431_v33, %v1485_v32  ;;  %v716_v17 = vsub.f32 %v1436_v37, %v1485_v32  ;;  %v717_v18 = vsub.f32 %v1441_v41, %v1485_v32 }
 0x162   : > { %v718_v19 = vsub.f32 %v1446_v45, %v1485_v32  ;;  %v719_v20 = vsub.f32 %v1451_v49, %v1485_v32  ;;  %v720_v25 = vsub.f32 %v1456_v53, %v1485_v32  ;;  %v721_v29 = vsub.f32 %v1461_v57, %v1485_v32 }
 0x163   : > { %v708_v39 = vmax.f32 %v707_v38, 0.0  ;;  %v722_v33 = vsub.f32 %v1466_v61, %v1485_v32  ;;  %v723_v37 = vsub.f32 %v1471_v1, %v1485_v32  ;;  %v724_v41 = vsub.f32 %v1476_v5, %v1485_v32 }
 0x165   : > { %v725_v40 = vadd.f32 1e-05, %v708_v39 }
 0x167   : > { %1252 = vrsqrt.f32 %v725_v40 }
 0x171   : > { %v1253_v16 = vpop.eup %1252 }
 0x172   : > { %v727_v45 = vmul.f32 %v1253_v16, %v709_v9  ;;  %v728_v21 = vmul.f32 %v1253_v16, %v710_v10  ;;  %v729_v22 = vmul.f32 %v1253_v16, %v711_v11  ;;  %v730_v49 = vmul.f32 %v1253_v16, %v712_v12 }
 0x173   : > { %v731_v23 = vmul.f32 %v1253_v16, %v713_v13  ;;  %v732_v24 = vmul.f32 %v1253_v16, %v714_v14  ;;  %v733_v53 = vmul.f32 %v1253_v16, %v715_v15  ;;  %v734_v26 = vmul.f32 %v1253_v16, %v716_v17 }
 0x174   : > { %v775_v27 = vadd.f32 %v1047_v50, %v727_v45  ;;  %v776_v28 = vadd.f32 %v1048_v51, %v728_v21  ;;  %v777_v57 = vadd.f32 %v1051_v52, %v729_v22  ;;  %v778_v30 = vadd.f32 %v1052_v54, %v730_v49 }
 0x175   : > { %v779_v31 = vadd.f32 %v1055_v58, %v731_v23  ;;  %v780_v61 = vadd.f32 %v1056_v59, %v732_v24  ;;  %v781_v34 = vadd.f32 %v1059_v60, %v733_v53  ;;  %v782_v35 = vadd.f32 %v1060_v62, %v734_v26 }
 0x176   : > { %v791_v1 = vmax.f32 %v775_v27, 0.0  ;;  %v792_v36 = vmax.f32 %v776_v28, 0.0  ;;  %v793_v38 = vmax.f32 %v777_v57, 0.0  ;;  %v794_v5 = vmax.f32 %v778_v30, 0.0 }
 0x177   : > { %v795_v32 = vmax.f32 %v779_v31, 0.0  ;;  %v796_v39 = vmax.f32 %v780_v61, 0.0  ;;  %v797_v40 = vmax.f32 %v781_v34, 0.0  ;;  %v798_v42 = vmax.f32 %v782_v35, 0.0 }
 0x178   : > { %v1080_v43 = vpack.c.bf16 %v792_v36, %v791_v1  ;;  %v1085_v44 = vpack.c.bf16 %v794_v5, %v793_v38  ;;  %v735_v46 = vmul.f32 %v1253_v16, %v717_v18  ;;  %v736_v47 = vmul.f32 %v1253_v16, %v718_v19 }
 0x179   : > { %v1090_v50 = vpack.c.bf16 %v796_v39, %v795_v32  ;;  %v1095_v51 = vpack.c.bf16 %v798_v42, %v797_v40  ;;  %v737_v52 = vmul.f32 %v1253_v16, %v719_v20  ;;  %v738_v54 = vmul.f32 %v1253_v16, %v720_v25 }
 0x17a   : > { %1081 = vst [vmem:[%s1615_s3] sm:$0xff] %v1080_v43   ;;  %1124 = vst [vmem:[%s1615_s3 + $0x8] sm:$0xff] %v1085_v44   ;;  %v783_v58 = vadd.f32 %v1063_v63, %v735_v46  ;;  %v784_v59 = vadd.f32 %v1064_v0, %v736_v47  ;;  %v739_v60 = vmul.f32 %v1253_v16, %v721_v29 }
 0x17b   : > { %v740_v62 = vmul.f32 %v1253_v16, %v722_v33  ;;  %1125 = vst [vmem:[%s1615_s3 + $0x10] sm:$0xff] %v1090_v50   ;;  %1126 = vst [vmem:[%s1615_s3 + $0x18] sm:$0xff] %v1095_v51   ;;  %v785_v9 = vadd.f32 %v1067_v2, %v737_v52  ;;  %v786_v10 = vadd.f32 %v1068_v3, %v738_v54 }
 0x17c   : > { %v741_v11 = vmul.f32 %v1253_v16, %v723_v37  ;;  %v742_v12 = vmul.f32 %v1253_v16, %v724_v41  ;;  %v799_v63 = vmax.f32 %v783_v58, 0.0  ;;  %v800_v0 = vmax.f32 %v784_v59, 0.0 }
 0x17d   : > { %v787_v13 = vadd.f32 %v1071_v4, %v739_v60  ;;  %v788_v14 = vadd.f32 %v1072_v6, %v740_v62  ;;  %v801_v15 = vmax.f32 %v785_v9, 0.0  ;;  %v802_v17 = vmax.f32 %v786_v10, 0.0 }
 0x17e   : > { %v789_v18 = vadd.f32 %v1075_v7, %v741_v11  ;;  %v790_v2 = vadd.f32 %v1076_v8, %v742_v12  ;;  %v1100_v48 = vpack.c.bf16 %v800_v0, %v799_v63 }
 0x17f   : > { %v803_v3 = vmax.f32 %v787_v13, 0.0  ;;  %v804_v19 = vmax.f32 %v788_v14, 0.0  ;;  %v1105_v20 = vpack.c.bf16 %v802_v17, %v801_v15 }
 0x180   : > { %v805_v25 = vmax.f32 %v789_v18, 0.0  ;;  %v806_v16 = vmax.f32 %v790_v2, 0.0  ;;  %1127 = vst [vmem:[%s1615_s3 + $0x20] sm:$0xff] %v1100_v48  }
 0x181   : > { %v1110_v55 = vpack.c.bf16 %v804_v19, %v803_v3  ;;  %1128 = vst [vmem:[%s1615_s3 + $0x28] sm:$0xff] %v1105_v20  }
 0x182   : > { %v1115_v4 = vpack.c.bf16 %v806_v16, %v805_v25 }
 0x183   : > { %1129 = vst [vmem:[%s1615_s3 + $0x30] sm:$0xff] %v1110_v55  }
 0x184   : > { %1130 = vst [vmem:[%s1615_s3 + $0x38] sm:$0xff] %v1115_v4  }
 0x185 PF: > { %s13_s16 = sadd.s32 1, %s1292_s16   ;;  %s1616_s12 = smov %s1280_s13 }
 0x186   : > { %p10_p12 = scmp.ge.s32.totalorder %s13_s16, 11   ;;  %s1617_s13 = smov %s1350_s20 }
 0x187   : > { %s1618_s14 = smov %s1288_s15  ;;  %s1619_s15 = smov %s1621_s17 }
 0x188   :  { %12 = sbr.rel (!%p10_p12) target bundleno = 3 (0x3), region = 122 }

// kernel: _lambda_.20
= control target key start
LH: loop header
LB: loop body
LE: loop exit
PB: predicated region body
PF: predicated region fallthrough
CT: control target
= control target key end

     0   :  { %s807_s12 = smov 0   ;;  %s809_s13 = smov 0   ;;  %s903_s0 = inlined_call_operand.vmem [shape: bf16[32,1152], index: 0, kind: input, shape index: {}]   ;;  %s904_s1 = inlined_call_operand.vmem [shape: bf16[1152,128], index: 1, kind: input, shape index: {}]   ;;  %s905_s2 = inlined_call_operand.vmem [shape: bf16[32,128], index: 2, kind: input, shape index: {}]   ;;  %s906_s3 = inlined_call_operand.vmem [shape: bf16[32,128], index: 3, kind: output, shape index: {}]  }
   0x1   :  { %s811_s14 = smov 0   ;;  %s813_s15 = smov 0  }
   0x2   :  { %s815_s16 = smov 0  }
   0x3 LB: > { %s22_s17 = sadd.s32 1, %s780_s15  ;;  %p39_p1 = scmp.ne.s32.totalorder %s772_s13, %s768_s12  ;;  %s784_s16 = sphi %s815_s16, %s13_s16   ;;  %s780_s15 = sphi %s813_s15, %s910_s15   ;;  %s776_s14 = sphi %s811_s14, %s909_s14   ;;  %s772_s13 = sphi %s809_s13, %s908_s13   ;;  %s768_s12 = sphi %s807_s12, %s907_s12  }
   0x4   : > { %p23_p0 = scmp.ge.s32.totalorder %s22_s17, 9  ;;  %p40_p2 = scmp.eq.s32.totalorder %s784_s16, 0 }
   0x5   : > { %s32_s19 = sadd.s32 1, %s772_s13  ;;  %p613_p5 = scmp.ge.s32.totalorder %s784_s16, 9 }
   0x6   : > { %s912_s17 = smov (%p23_p0, %s22_s17), 0  ;;  %p41_p3 = por %p40_p2, %p39_p1 }
   0x7   : > { %s29_s18 = ssub.s32 %s780_s15, %s912_s17  ;;  %152 = sbr.rel (%p613_p5) target bundleno = 21 (0x15), region = 20 }
   0x8   : > { %p30_p4 = scmp.eq.s32.totalorder %s29_s18, 0 }
   0xa   : > { %s842_s20 = scalar_select %p30_p4, %s772_s13, %s32_s19  }
   0xe   : > { %155 = sbr.rel (!%p41_p3) target bundleno = 21 (0x15), region = 24  ;;  %s157_s21 = sand.u32 (%p41_p3), 1, %s772_s13  }
   0xf   : > { %s615_s22 = sshll.u32 (%p41_p3), %s780_s15, 2  ;;  %s614_s23 = sshll.u32 (%p41_p3), %s157_s21, 4 }
  0x10   : > { %s161_s26 = scalar_lea.vmem (%p41_p3), %s903_s0, %s615_s22  ;;  %s159_s27 = scalar_lea.vmem (%p41_p3), [#allocation3], %s614_s23 }
  0x11   : > { %v177_v0 = vld [vmem:[%s161_s26] sm:$0xf] (%p41_p3)  ;;  %v179_v1 = vld [vmem:[%s161_s26 + $0x24] sm:$0xf] (%p41_p3)  ;;  %v181_v2 = vld [vmem:[%s161_s26 + $0x48] sm:$0xf] (%p41_p3) }
  0x12   : > { %178 = vst [vmem:[%s159_s27] sm:$0xf] (%p41_p3), %v177_v0  ;;  %180 = vst [vmem:[%s159_s27 + $0x4] sm:$0xf] (%p41_p3), %v179_v1  ;;  %v183_v3 = vld [vmem:[%s161_s26 + $0x6c] sm:$0xf] (%p41_p3) }
  0x13   : > { %182 = vst [vmem:[%s159_s27 + $0x8] sm:$0xf] (%p41_p3), %v181_v2  ;;  %184 = vst [vmem:[%s159_s27 + $0xc] sm:$0xf] (%p41_p3), %v183_v3 }
  0x15 PF: > { %p616_p6 = scmp.ge.s32.totalorder %s784_s16, 1  ;;  %p226_p7 = scmp.lt.s32.totalorder %s784_s16, 10 }
  0x17   : > { %p227_p8 = pnand %p616_p6, %p226_p7 }
  0x18   : > { %s233_s28 = sand.u32 (!%p227_p8), 1, %s768_s12   ;;  %s618_s29 = sshll.u32 (!%p227_p8), %s776_s14, 4 }
  0x19   : > { %230 = sbr.rel (%p227_p8) target bundleno = 345 (0x159), region = 69  ;;  %s854_s30 = sshll.u32 (!%p227_p8), %s233_s28, 4 }
  0x1a   : > { %p268_p9 = scmp.lt.s32.totalorder (!%p227_p8), %s618_s29, 143  ;;  %s235_s8 = scalar_lea.vmem (!%p227_p8), [#allocation3], %s854_s30 }
  0x1b   : > { %p620_p10 = scmp.ne.s32.totalorder (!%p227_p8), %s776_s14, 0 }
  0x20   : > { %s914_s29 = smov (!%p268_p9, %s618_s29), 143  ;;  %288 = sbr.rel (%p620_p10) target bundleno = 39 (0x27), region = 77 }
  0x21   : > { %s619_s4 = sshll.u32 %s914_s29, 2  ;;  %v786_v4 = vmov (!%p620_p10), 0.0  }
  0x22   : > { %s859_s7 = scalar_lea.vmem %s904_s1, %s619_s4  ;;  %289 = vst [vmem:[#allocation2] sm:$0xff] (!%p620_p10), %v786_v4  ;;  %290 = vst [vmem:[#allocation2 + $0x8] sm:$0xff] (!%p620_p10), %v786_v4 }
  0x23   : > { %291 = vst [vmem:[#allocation2 + $0x10] sm:$0xff] (!%p620_p10), %v786_v4  ;;  %292 = vst [vmem:[#allocation2 + $0x18] sm:$0xff] (!%p620_p10), %v786_v4 }
  0x27 PF: > { %v734_v5 = vld [vmem:[%s859_s7] sm:$0xff]   ;;  %v735_v6 = vld [vmem:[%s859_s7 + $0x8] sm:$0xff]   ;;  %v736_v7 = vld [vmem:[%s859_s7 + $0x10] sm:$0xff]   ;;  %p631_p11 = scmp.ne.s32.totalorder %s776_s14, 8 }
  0x28   : > { %673 = vmatprep.subr.bf16.mxu0 %v734_v5  ;;  %v737_v8 = vld [vmem:[%s859_s7 + $0x18] sm:$0xff]   ;;  %v742_v9 = vld [vmem:[%s235_s8] sm:$0xff]   ;;  %v739_v11 = vld [vmem:[%s859_s7 + $0x28] sm:$0xff]  }
  0x29   : > { %674 = vmatpush3.bf16.msra.mxu0 %v734_v5  ;;  %689 = vmatprep.mubr.bf16.mxu0 %v742_v9  ;;  %v738_v10 = vld [vmem:[%s859_s7 + $0x20] sm:$0xff]   ;;  %v740_v12 = vld [vmem:[%s859_s7 + $0x30] sm:$0xff]   ;;  %v741_v13 = vld [vmem:[%s859_s7 + $0x38] sm:$0xff]  }
  0x2a   : > { %675 = vmatprep.subr.bf16.mxu0 %v735_v6  ;;  %v743_v14 = vld [vmem:[%s235_s8 + $0x8] sm:$0xff]   ;;  %v295_v15 = vld [vmem:[#allocation2 + $0x10] sm:$0xff]  ;;  %v293_v16 = vld [vmem:[#allocation2] sm:$0xff] }
  0x2b   : > { %v296_v18 = vld [vmem:[#allocation2 + $0x18] sm:$0xff]  ;;  %v294_v21 = vld [vmem:[#allocation2 + $0x8] sm:$0xff]  ;;  %v644_v59 = vld [vmem:[%s905_s2] sm:$0xff] (!%p631_p11)  }
  0x2c   : > { %v661_v60 = vld [vmem:[%s905_s2 + $0x8] sm:$0xff] (!%p631_p11)   ;;  %v645_v1 = vunpack.c.l.bf16 (!%p631_p11), %v644_v59  ;;  %v646_v2 = vunpack.c.h.bf16 (!%p631_p11), %v644_v59 }
  0x2d   : > { %676 = vmatpush3.bf16.msra.mxu0 %v735_v6  ;;  %v649_v3 = vunpack.c.l.bf16 (!%p631_p11), %v661_v60  ;;  %v650_v4 = vunpack.c.h.bf16 (!%p631_p11), %v661_v60 }
  0x2e   : > { %677 = vmatprep.subr.bf16.mxu0 %v736_v7 }
  0x31   : > { %678 = vmatpush3.bf16.msra.mxu0 %v736_v7 }
  0x32   : > { %679 = vmatprep.subr.bf16.mxu0 %v737_v8 }
  0x35   : > { %680 = vmatpush3.bf16.msra.mxu0 %v737_v8 }
  0x36   : > { %681 = vmatprep.subr.bf16.mxu0 %v738_v10 }
  0x39   : > { %682 = vmatpush3.bf16.msra.mxu0 %v738_v10 }
  0x3a   : > { %683 = vmatprep.subr.bf16.mxu0 %v739_v11 }
  0x3d   : > { %684 = vmatpush3.bf16.msra.mxu0 %v739_v11 }
  0x3e   : > { %685 = vmatprep.subr.bf16.mxu0 %v740_v12 }
  0x41   : > { %686 = vmatpush3.bf16.msra.mxu0 %v740_v12 }
  0x42   : > { %687 = vmatprep.subr.bf16.mxu0 %v741_v13 }
  0x45   : > { %688 = vmatpush3.bf16.msra.mxu0 %v741_v13 }
  0x48   : > { %690 = vmatmul.mubr.bf16.vlgmr.msra.gmra.mrb[0].mxu0 %v743_v14 }
 0x11b   : > { %v691_v17 = vpop.f32.mrb[0].mxu0  ;;  %437 = sbr.rel (%p631_p11) target bundleno = 345 (0x159), region = 81 }
 0x11c   : > { %v428_v19 = vadd.f32 %v691_v17, %v295_v15  ;;  %v411_v20 = vpop.f32.mrb[1].mxu0 }
 0x11d   : > { %v426_v22 = vadd.f32 %v411_v20, %v293_v16  ;;  %v692_v23 = vpop.f32.mrb[2].mxu0 }
 0x11e   : > { %432 = vst [vmem:[#allocation2 + $0x10] sm:$0xff] %v428_v19  ;;  %v429_v24 = vadd.f32 %v692_v23, %v296_v18  ;;  %v414_v25 = vpop.f32.mrb[3].mxu0 }
 0x11f   : > { %430 = vst [vmem:[#allocation2] sm:$0xff] %v426_v22  ;;  %v427_v26 = vadd.f32 %v414_v25, %v294_v21 }
 0x120   : > { %433 = vst [vmem:[#allocation2 + $0x18] sm:$0xff] %v429_v24 }
 0x121   : > { %431 = vst [vmem:[#allocation2 + $0x8] sm:$0xff] %v427_v26 }
 0x125   : > { %v440_v29 = vld [vmem:[#allocation2 + $0x10] sm:$0xff] }
 0x126   : > { %v438_v27 = vld [vmem:[#allocation2] sm:$0xff]  ;;  %v454_v34 = vmul.f32 %v440_v29, %v440_v29 }
 0x127   : > { %v441_v30 = vld [vmem:[#allocation2 + $0x18] sm:$0xff]  ;;  %v452_v32 = vmul.f32 %v438_v27, %v438_v27 }
 0x128   : > { %v439_v28 = vld [vmem:[#allocation2 + $0x8] sm:$0xff]  ;;  %v455_v36 = vmul.f32 %v441_v30, %v441_v30 }
 0x129   : > { %v442_v31 = vadd.f32 %v439_v28, %v438_v27  ;;  %v453_v33 = vmul.f32 %v439_v28, %v439_v28 }
 0x12b   : > { %v443_v35 = vadd.f32 %v442_v31, %v440_v29  ;;  %v456_v37 = vadd.f32 %v453_v33, %v452_v32 }
 0x12d   : > { %v444_v38 = vadd.f32 %v443_v35, %v441_v30  ;;  %v457_v39 = vadd.f32 %v456_v37, %v454_v34 }
 0x12f   : > { %v445_v40 = vrot.slane %v444_v38, 4  ;;  %v458_v41 = vadd.f32 %v457_v39, %v455_v36 }
 0x131   : > { %v446_v42 = vadd.f32 %v445_v40, %v444_v38  ;;  %v459_v43 = vrot.slane %v458_v41, 4 }
 0x133   : > { %v447_v44 = vrot.slane %v446_v42, 2  ;;  %v460_v45 = vadd.f32 %v459_v43, %v458_v41 }
 0x135   : > { %v448_v46 = vadd.f32 %v447_v44, %v446_v42  ;;  %v461_v47 = vrot.slane %v460_v45, 2 }
 0x137   : > { %v449_v48 = vrot.slane %v448_v46, 1  ;;  %v462_v49 = vadd.f32 %v461_v47, %v460_v45 }
 0x139   : > { %v450_v50 = vadd.f32 %v449_v48, %v448_v46  ;;  %v463_v51 = vrot.slane %v462_v49, 1 }
 0x13b   : > { %v451_v52 = vmul.f32 0.03125, %v450_v50  ;;  %v464_v53 = vadd.f32 %v463_v51, %v462_v49 }
 0x13d   : > { %v465_v54 = vmul.f32 0.03125, %v464_v53  ;;  %v466_v55 = vmul.f32 %v451_v52, %v451_v52  ;;  %v469_v61 = vsub.f32 %v438_v27, %v451_v52  ;;  %v470_v62 = vsub.f32 %v439_v28, %v451_v52 }
 0x13e   : > { %v471_v63 = vsub.f32 %v440_v29, %v451_v52  ;;  %v472_v0 = vsub.f32 %v441_v30, %v451_v52 }
 0x13f   : > { %v467_v56 = vsub.f32 %v465_v54, %v466_v55 }
 0x141   : > { %v468_v57 = vmax.f32 %v467_v56, 0.0 }
 0x143   : > { %v473_v58 = vadd.f32 1e-05, %v468_v57 }
 0x145   : > { %744 = vrsqrt.f32 %v473_v58 }
 0x14f   : > { %v745_v5 = vpop.eup %744 }
 0x150   : > { %v475_v6 = vmul.f32 %v745_v5, %v469_v61  ;;  %v476_v7 = vmul.f32 %v745_v5, %v470_v62  ;;  %v477_v8 = vmul.f32 %v745_v5, %v471_v63  ;;  %v478_v9 = vmul.f32 %v745_v5, %v472_v0 }
 0x152   : > { %v487_v10 = vadd.f32 %v645_v1, %v475_v6  ;;  %v488_v11 = vadd.f32 %v646_v2, %v476_v7  ;;  %v489_v12 = vadd.f32 %v649_v3, %v477_v8  ;;  %v490_v13 = vadd.f32 %v650_v4, %v478_v9 }
 0x154   : > { %v491_v14 = vmax.f32 %v487_v10, 0.0  ;;  %v492_v15 = vmax.f32 %v488_v11, 0.0  ;;  %v493_v16 = vmax.f32 %v489_v12, 0.0  ;;  %v494_v17 = vmax.f32 %v490_v13, 0.0 }
 0x156   : > { %v654_v18 = vpack.c.bf16 %v492_v15, %v491_v14  ;;  %v659_v19 = vpack.c.bf16 %v494_v17, %v493_v16 }
 0x158   : > { %655 = vst [vmem:[%s906_s3] sm:$0xff] %v654_v18   ;;  %662 = vst [vmem:[%s906_s3 + $0x8] sm:$0xff] %v659_v19  }
 0x159 PF: > { %s13_s16 = sadd.s32 1, %s784_s16   ;;  %s907_s12 = smov %s772_s13 }
 0x15a   : > { %p10_p12 = scmp.ge.s32.totalorder %s13_s16, 11   ;;  %s908_s13 = smov %s842_s20 }
 0x15b   : > { %s909_s14 = smov %s780_s15  ;;  %s910_s15 = smov %s912_s17 }
 0x15c   :  { %12 = sbr.rel (!%p10_p12) target bundleno = 3 (0x3), region = 122 }

// kernel: _lambda_.18
= control target key start
LH: loop header
LB: loop body
LE: loop exit
PB: predicated region body
PF: predicated region fallthrough
CT: control target
= control target key end

     0   :  { %s721_s9 = smov 0   ;;  %s723_s10 = smov 0   ;;  %s811_s0 = inlined_call_operand.vmem [shape: bf16[32,1152], index: 0, kind: input, shape index: {}]   ;;  %s812_s1 = inlined_call_operand.vmem [shape: bf16[1152,128], index: 1, kind: input, shape index: {}]   ;;  %s813_s2 = inlined_call_operand.vmem [shape: bf16[32,128], index: 2, kind: output, shape index: {}]  }
   0x1   :  { %s725_s11 = smov 0   ;;  %s727_s12 = smov 0  }
   0x2   :  { %s729_s13 = smov 0  }
   0x3 LB: > { %s21_s14 = sadd.s32 1, %s699_s12  ;;  %p38_p1 = scmp.ne.s32.totalorder %s691_s10, %s687_s9  ;;  %s703_s13 = sphi %s729_s13, %s12_s13   ;;  %s699_s12 = sphi %s727_s12, %s817_s12   ;;  %s695_s11 = sphi %s725_s11, %s816_s11   ;;  %s691_s10 = sphi %s723_s10, %s815_s10   ;;  %s687_s9 = sphi %s721_s9, %s814_s9  }
   0x4   : > { %p22_p0 = scmp.ge.s32.totalorder %s21_s14, 9  ;;  %p39_p2 = scmp.eq.s32.totalorder %s703_s13, 0 }
   0x5   : > { %s31_s16 = sadd.s32 1, %s691_s10  ;;  %p541_p5 = scmp.ge.s32.totalorder %s703_s13, 9 }
   0x6   : > { %s819_s14 = smov (%p22_p0, %s21_s14), 0  ;;  %p40_p3 = por %p39_p2, %p38_p1 }
   0x7   : > { %s28_s15 = ssub.s32 %s699_s12, %s819_s14  ;;  %118 = sbr.rel (%p541_p5) target bundleno = 21 (0x15), region = 16 }
   0x8   : > { %p29_p4 = scmp.eq.s32.totalorder %s28_s15, 0 }
   0xa   : > { %s756_s17 = scalar_select %p29_p4, %s691_s10, %s31_s16  }
   0xe   : > { %121 = sbr.rel (!%p40_p3) target bundleno = 21 (0x15), region = 20  ;;  %s123_s18 = sand.u32 (%p40_p3), 1, %s691_s10  }
   0xf   : > { %s543_s19 = sshll.u32 (%p40_p3), %s699_s12, 2  ;;  %s542_s20 = sshll.u32 (%p40_p3), %s123_s18, 4 }
  0x10   : > { %s127_s23 = scalar_lea.vmem (%p40_p3), %s811_s0, %s543_s19  ;;  %s125_s24 = scalar_lea.vmem (%p40_p3), [#allocation3], %s542_s20 }
  0x11   : > { %v143_v0 = vld [vmem:[%s127_s23] sm:$0xf] (%p40_p3)  ;;  %v145_v1 = vld [vmem:[%s127_s23 + $0x24] sm:$0xf] (%p40_p3)  ;;  %v147_v2 = vld [vmem:[%s127_s23 + $0x48] sm:$0xf] (%p40_p3) }
  0x12   : > { %144 = vst [vmem:[%s125_s24] sm:$0xf] (%p40_p3), %v143_v0  ;;  %146 = vst [vmem:[%s125_s24 + $0x4] sm:$0xf] (%p40_p3), %v145_v1  ;;  %v149_v3 = vld [vmem:[%s127_s23 + $0x6c] sm:$0xf] (%p40_p3) }
  0x13   : > { %148 = vst [vmem:[%s125_s24 + $0x8] sm:$0xf] (%p40_p3), %v147_v2  ;;  %150 = vst [vmem:[%s125_s24 + $0xc] sm:$0xf] (%p40_p3), %v149_v3 }
  0x15 PF: > { %p544_p6 = scmp.ge.s32.totalorder %s703_s13, 1  ;;  %p192_p7 = scmp.lt.s32.totalorder %s703_s13, 10 }
  0x17   : > { %p193_p8 = pnand %p544_p6, %p192_p7 }
  0x18   : > { %s199_s25 = sand.u32 (!%p193_p8), 1, %s687_s9   ;;  %s546_s26 = sshll.u32 (!%p193_p8), %s695_s11, 4 }
  0x19   : > { %196 = sbr.rel (%p193_p8) target bundleno = 343 (0x157), region = 65  ;;  %s768_s27 = sshll.u32 (!%p193_p8), %s199_s25, 4 }
  0x1a   : > { %p228_p9 = scmp.lt.s32.totalorder (!%p193_p8), %s546_s26, 143  ;;  %s201_s4 = scalar_lea.vmem (!%p193_p8), [#allocation3], %s768_s27 }
  0x1b   : > { %p548_p10 = scmp.ne.s32.totalorder (!%p193_p8), %s695_s11, 0 }
  0x20   : > { %s821_s26 = smov (!%p228_p9, %s546_s26), 143  ;;  %244 = sbr.rel (%p548_p10) target bundleno = 39 (0x27), region = 73 }
  0x21   : > { %s547_s28 = sshll.u32 %s821_s26, 2  ;;  %v705_v4 = vmov (!%p548_p10), 0.0  }
  0x22   : > { %s773_s3 = scalar_lea.vmem %s812_s1, %s547_s28  ;;  %245 = vst [vmem:[#allocation2] sm:$0xff] (!%p548_p10), %v705_v4  ;;  %246 = vst [vmem:[#allocation2 + $0x8] sm:$0xff] (!%p548_p10), %v705_v4 }
  0x23   : > { %247 = vst [vmem:[#allocation2 + $0x10] sm:$0xff] (!%p548_p10), %v705_v4  ;;  %248 = vst [vmem:[#allocation2 + $0x18] sm:$0xff] (!%p548_p10), %v705_v4 }
  0x27 PF: > { %v653_v5 = vld [vmem:[%s773_s3] sm:$0xff]   ;;  %v654_v6 = vld [vmem:[%s773_s3 + $0x8] sm:$0xff]   ;;  %v655_v7 = vld [vmem:[%s773_s3 + $0x10] sm:$0xff]   ;;  %p559_p11 = scmp.ne.s32.totalorder %s695_s11, 8 }
  0x28   : > { %592 = vmatprep.subr.bf16.mxu0 %v653_v5  ;;  %v656_v8 = vld [vmem:[%s773_s3 + $0x18] sm:$0xff]   ;;  %v661_v9 = vld [vmem:[%s201_s4] sm:$0xff]   ;;  %v658_v11 = vld [vmem:[%s773_s3 + $0x28] sm:$0xff]  }
  0x29   : > { %593 = vmatpush3.bf16.msra.mxu0 %v653_v5  ;;  %608 = vmatprep.mubr.bf16.mxu0 %v661_v9  ;;  %v657_v10 = vld [vmem:[%s773_s3 + $0x20] sm:$0xff]   ;;  %v659_v12 = vld [vmem:[%s773_s3 + $0x30] sm:$0xff]   ;;  %v660_v13 = vld [vmem:[%s773_s3 + $0x38] sm:$0xff]  }
  0x2a   : > { %594 = vmatprep.subr.bf16.mxu0 %v654_v6  ;;  %v662_v14 = vld [vmem:[%s201_s4 + $0x8] sm:$0xff]   ;;  %v251_v15 = vld [vmem:[#allocation2 + $0x10] sm:$0xff]  ;;  %v249_v16 = vld [vmem:[#allocation2] sm:$0xff] }
  0x2b   : > { %v252_v18 = vld [vmem:[#allocation2 + $0x18] sm:$0xff]  ;;  %v250_v21 = vld [vmem:[#allocation2 + $0x8] sm:$0xff] }
  0x2d   : > { %595 = vmatpush3.bf16.msra.mxu0 %v654_v6 }
  0x2e   : > { %596 = vmatprep.subr.bf16.mxu0 %v655_v7 }
  0x31   : > { %597 = vmatpush3.bf16.msra.mxu0 %v655_v7 }
  0x32   : > { %598 = vmatprep.subr.bf16.mxu0 %v656_v8 }
  0x35   : > { %599 = vmatpush3.bf16.msra.mxu0 %v656_v8 }
  0x36   : > { %600 = vmatprep.subr.bf16.mxu0 %v657_v10 }
  0x39   : > { %601 = vmatpush3.bf16.msra.mxu0 %v657_v10 }
  0x3a   : > { %602 = vmatprep.subr.bf16.mxu0 %v658_v11 }
  0x3d   : > { %603 = vmatpush3.bf16.msra.mxu0 %v658_v11 }
  0x3e   : > { %604 = vmatprep.subr.bf16.mxu0 %v659_v12 }
  0x41   : > { %605 = vmatpush3.bf16.msra.mxu0 %v659_v12 }
  0x42   : > { %606 = vmatprep.subr.bf16.mxu0 %v660_v13 }
  0x45   : > { %607 = vmatpush3.bf16.msra.mxu0 %v660_v13 }
  0x48   : > { %609 = vmatmul.mubr.bf16.vlgmr.msra.gmra.mrb[0].mxu0 %v662_v14 }
 0x11b   : > { %v610_v17 = vpop.f32.mrb[0].mxu0  ;;  %393 = sbr.rel (%p559_p11) target bundleno = 343 (0x157), region = 77 }
 0x11c   : > { %v384_v19 = vadd.f32 %v610_v17, %v251_v15  ;;  %v367_v20 = vpop.f32.mrb[1].mxu0 }
 0x11d   : > { %v382_v22 = vadd.f32 %v367_v20, %v249_v16  ;;  %v611_v23 = vpop.f32.mrb[2].mxu0 }
 0x11e   : > { %388 = vst [vmem:[#allocation2 + $0x10] sm:$0xff] %v384_v19  ;;  %v385_v24 = vadd.f32 %v611_v23, %v252_v18  ;;  %v370_v25 = vpop.f32.mrb[3].mxu0 }
 0x11f   : > { %386 = vst [vmem:[#allocation2] sm:$0xff] %v382_v22  ;;  %v383_v26 = vadd.f32 %v370_v25, %v250_v21 }
 0x120   : > { %389 = vst [vmem:[#allocation2 + $0x18] sm:$0xff] %v385_v24 }
 0x121   : > { %387 = vst [vmem:[#allocation2 + $0x8] sm:$0xff] %v383_v26 }
 0x125   : > { %v396_v29 = vld [vmem:[#allocation2 + $0x10] sm:$0xff] }
 0x126   : > { %v394_v27 = vld [vmem:[#allocation2] sm:$0xff]  ;;  %v410_v34 = vmul.f32 %v396_v29, %v396_v29 }
 0x127   : > { %v397_v30 = vld [vmem:[#allocation2 + $0x18] sm:$0xff]  ;;  %v408_v32 = vmul.f32 %v394_v27, %v394_v27 }
 0x128   : > { %v395_v28 = vld [vmem:[#allocation2 + $0x8] sm:$0xff]  ;;  %v411_v36 = vmul.f32 %v397_v30, %v397_v30 }
 0x129   : > { %v398_v31 = vadd.f32 %v395_v28, %v394_v27  ;;  %v409_v33 = vmul.f32 %v395_v28, %v395_v28 }
 0x12b   : > { %v399_v35 = vadd.f32 %v398_v31, %v396_v29  ;;  %v412_v37 = vadd.f32 %v409_v33, %v408_v32 }
 0x12d   : > { %v400_v38 = vadd.f32 %v399_v35, %v397_v30  ;;  %v413_v39 = vadd.f32 %v412_v37, %v410_v34 }
 0x12f   : > { %v401_v40 = vrot.slane %v400_v38, 4  ;;  %v414_v41 = vadd.f32 %v413_v39, %v411_v36 }
 0x131   : > { %v402_v42 = vadd.f32 %v401_v40, %v400_v38  ;;  %v415_v43 = vrot.slane %v414_v41, 4 }
 0x133   : > { %v403_v44 = vrot.slane %v402_v42, 2  ;;  %v416_v45 = vadd.f32 %v415_v43, %v414_v41 }
 0x135   : > { %v404_v46 = vadd.f32 %v403_v44, %v402_v42  ;;  %v417_v47 = vrot.slane %v416_v45, 2 }
 0x137   : > { %v405_v48 = vrot.slane %v404_v46, 1  ;;  %v418_v49 = vadd.f32 %v417_v47, %v416_v45 }
 0x139   : > { %v406_v50 = vadd.f32 %v405_v48, %v404_v46  ;;  %v419_v51 = vrot.slane %v418_v49, 1 }
 0x13b   : > { %v407_v52 = vmul.f32 0.03125, %v406_v50  ;;  %v420_v53 = vadd.f32 %v419_v51, %v418_v49 }
 0x13d   : > { %v421_v54 = vmul.f32 0.03125, %v420_v53  ;;  %v422_v55 = vmul.f32 %v407_v52, %v407_v52  ;;  %v425_v59 = vsub.f32 %v394_v27, %v407_v52  ;;  %v426_v60 = vsub.f32 %v395_v28, %v407_v52 }
 0x13e   : > { %v427_v61 = vsub.f32 %v396_v29, %v407_v52  ;;  %v428_v62 = vsub.f32 %v397_v30, %v407_v52 }
 0x13f   : > { %v423_v56 = vsub.f32 %v421_v54, %v422_v55 }
 0x141   : > { %v424_v57 = vmax.f32 %v423_v56, 0.0 }
 0x143   : > { %v429_v58 = vadd.f32 1e-05, %v424_v57 }
 0x145   : > { %663 = vrsqrt.f32 %v429_v58 }
 0x14f   : > { %v664_v63 = vpop.eup %663 }
 0x150   : > { %v431_v0 = vmul.f32 %v664_v63, %v425_v59  ;;  %v432_v1 = vmul.f32 %v664_v63, %v426_v60  ;;  %v433_v2 = vmul.f32 %v664_v63, %v427_v61  ;;  %v434_v3 = vmul.f32 %v664_v63, %v428_v62 }
 0x152   : > { %v435_v4 = vmax.f32 %v431_v0, 0.0  ;;  %v436_v5 = vmax.f32 %v432_v1, 0.0  ;;  %v437_v6 = vmax.f32 %v433_v2, 0.0  ;;  %v438_v7 = vmax.f32 %v434_v3, 0.0 }
 0x154   : > { %v574_v8 = vpack.c.bf16 %v436_v5, %v435_v4  ;;  %v579_v9 = vpack.c.bf16 %v438_v7, %v437_v6 }
 0x156   : > { %575 = vst [vmem:[%s813_s2] sm:$0xff] %v574_v8   ;;  %581 = vst [vmem:[%s813_s2 + $0x8] sm:$0xff] %v579_v9  }
 0x157 PF: > { %s12_s13 = sadd.s32 1, %s703_s13   ;;  %s814_s9 = smov %s691_s10 }
 0x158   : > { %p9_p12 = scmp.ge.s32.totalorder %s12_s13, 11   ;;  %s815_s10 = smov %s756_s17 }
 0x159   : > { %s816_s11 = smov %s699_s12  ;;  %s817_s12 = smov %s819_s14 }
 0x15a   :  { %11 = sbr.rel (!%p9_p12) target bundleno = 3 (0x3), region = 115 }

// kernel: _lambda_.19
= control target key start
LH: loop header
LB: loop body
LE: loop exit
PB: predicated region body
PF: predicated region fallthrough
CT: control target
= control target key end

     0   :  { %s351_s1 = inlined_call_operand.vmem [shape: bf16[128,128], index: 1, kind: input, shape index: {}]   ;;  %s352_s0 = inlined_call_operand.vmem [shape: bf16[32,128], index: 0, kind: input, shape index: {}]   ;;  %s353_s2 = inlined_call_operand.vmem [shape: bf16[32,128], index: 2, kind: output, shape index: {}]  }
   0x1   :  { %v288_v0 = vld [vmem:[%s351_s1] sm:$0xff]   ;;  %v289_v1 = vld [vmem:[%s351_s1 + $0x8] sm:$0xff]   ;;  %v290_v2 = vld [vmem:[%s351_s1 + $0x10] sm:$0xff]  }
   0x2   :  { %268 = vmatprep.subr.bf16.mxu0 %v288_v0  ;;  %v291_v3 = vld [vmem:[%s351_s1 + $0x18] sm:$0xff]   ;;  %v296_v4 = vld [vmem:[%s352_s0] sm:$0xff]   ;;  %v293_v6 = vld [vmem:[%s351_s1 + $0x28] sm:$0xff]  }
   0x3   :  { %269 = vmatpush3.bf16.msra.mxu0 %v288_v0  ;;  %284 = vmatprep.mubr.bf16.mxu0 %v296_v4  ;;  %v292_v5 = vld [vmem:[%s351_s1 + $0x20] sm:$0xff]   ;;  %v294_v7 = vld [vmem:[%s351_s1 + $0x30] sm:$0xff]   ;;  %v295_v8 = vld [vmem:[%s351_s1 + $0x38] sm:$0xff]  }
   0x4   :  { %270 = vmatprep.subr.bf16.mxu0 %v289_v1  ;;  %v297_v9 = vld [vmem:[%s352_s0 + $0x8] sm:$0xff]  }
   0x7   :  { %271 = vmatpush3.bf16.msra.mxu0 %v289_v1 }
   0x8   :  { %272 = vmatprep.subr.bf16.mxu0 %v290_v2 }
   0xb   :  { %273 = vmatpush3.bf16.msra.mxu0 %v290_v2 }
   0xc   :  { %274 = vmatprep.subr.bf16.mxu0 %v291_v3 }
   0xf   :  { %275 = vmatpush3.bf16.msra.mxu0 %v291_v3 }
  0x10   :  { %276 = vmatprep.subr.bf16.mxu0 %v292_v5 }
  0x13   :  { %277 = vmatpush3.bf16.msra.mxu0 %v292_v5 }
  0x14   :  { %278 = vmatprep.subr.bf16.mxu0 %v293_v6 }
  0x17   :  { %279 = vmatpush3.bf16.msra.mxu0 %v293_v6 }
  0x18   :  { %280 = vmatprep.subr.bf16.mxu0 %v294_v7 }
  0x1b   :  { %281 = vmatpush3.bf16.msra.mxu0 %v294_v7 }
  0x1c   :  { %282 = vmatprep.subr.bf16.mxu0 %v295_v8 }
  0x1f   :  { %283 = vmatpush3.bf16.msra.mxu0 %v295_v8 }
  0x22   :  { %285 = vmatmul.mubr.bf16.vlgmr.msra.gmra.mrb[0].mxu0 %v297_v9 }
  0xf5   :  { %v286_v10 = vpop.f32.mrb[0].mxu0 }
  0xf6   :  { %v138_v11 = vpop.f32.mrb[1].mxu0  ;;  %v180_v17 = vmul.f32 %v286_v10, %v286_v10 }
  0xf7   :  { %v287_v12 = vpop.f32.mrb[2].mxu0  ;;  %v178_v14 = vmul.f32 %v138_v11, %v138_v11 }
  0xf8   :  { %v141_v13 = vpop.f32.mrb[3].mxu0  ;;  %v181_v20 = vmul.f32 %v287_v12, %v287_v12 }
  0xf9   :  { %v168_v15 = vadd.f32 %v141_v13, %v138_v11  ;;  %v179_v16 = vmul.f32 %v141_v13, %v141_v13 }
  0xfb   :  { %v169_v18 = vadd.f32 %v286_v10, %v168_v15  ;;  %v182_v19 = vadd.f32 %v179_v16, %v178_v14 }
  0xfd   :  { %v170_v21 = vadd.f32 %v287_v12, %v169_v18  ;;  %v183_v22 = vadd.f32 %v182_v19, %v180_v17 }
  0xff   :  { %v171_v23 = vrot.slane %v170_v21, 4  ;;  %v184_v24 = vadd.f32 %v183_v22, %v181_v20 }
 0x101   :  { %v172_v25 = vadd.f32 %v171_v23, %v170_v21  ;;  %v185_v26 = vrot.slane %v184_v24, 4 }
 0x103   :  { %v173_v27 = vrot.slane %v172_v25, 2  ;;  %v186_v28 = vadd.f32 %v185_v26, %v184_v24 }
 0x105   :  { %v174_v29 = vadd.f32 %v173_v27, %v172_v25  ;;  %v187_v30 = vrot.slane %v186_v28, 2 }
 0x107   :  { %v175_v31 = vrot.slane %v174_v29, 1  ;;  %v188_v32 = vadd.f32 %v187_v30, %v186_v28 }
 0x109   :  { %v176_v33 = vadd.f32 %v175_v31, %v174_v29  ;;  %v189_v34 = vrot.slane %v188_v32, 1 }
 0x10b   :  { %v177_v35 = vmul.f32 0.03125, %v176_v33  ;;  %v190_v36 = vadd.f32 %v189_v34, %v188_v32 }
 0x10d   :  { %v191_v37 = vmul.f32 0.03125, %v190_v36  ;;  %v192_v38 = vmul.f32 %v177_v35, %v177_v35  ;;  %v195_v39 = vsub.f32 %v138_v11, %v177_v35  ;;  %v196_v40 = vsub.f32 %v141_v13, %v177_v35 }
 0x10e   :  { %v197_v41 = vsub.f32 %v286_v10, %v177_v35  ;;  %v198_v42 = vsub.f32 %v287_v12, %v177_v35 }
 0x10f   :  { %v193_v43 = vsub.f32 %v191_v37, %v192_v38 }
 0x111   :  { %v194_v44 = vmax.f32 %v193_v43, 0.0 }
 0x113   :  { %v199_v45 = vadd.f32 1e-05, %v194_v44 }
 0x115   :  { %298 = vrsqrt.f32 %v199_v45 }
 0x11f   :  { %v299_v46 = vpop.eup %298 }
 0x120   :  { %v201_v47 = vmul.f32 %v299_v46, %v195_v39  ;;  %v202_v48 = vmul.f32 %v299_v46, %v196_v40  ;;  %v203_v49 = vmul.f32 %v299_v46, %v197_v41  ;;  %v204_v50 = vmul.f32 %v299_v46, %v198_v42 }
 0x122   :  { %v250_v51 = vpack.c.bf16 %v202_v48, %v201_v47  ;;  %v255_v52 = vpack.c.bf16 %v204_v50, %v203_v49 }
 0x124   :  { %251 = vst [vmem:[%s353_s2] sm:$0xff] %v250_v51   ;;  %257 = vst [vmem:[%s353_s2 + $0x8] sm:$0xff] %v255_v52  }

// kernel: _lambda_.21
= control target key start
LH: loop header
LB: loop body
LE: loop exit
PB: predicated region body
PF: predicated region fallthrough
CT: control target
= control target key end

     0   :  { %s615_s9 = smov 0   ;;  %s617_s10 = smov 0   ;;  %s679_s0 = inlined_call_operand.vmem [shape: bf16[8,1152], index: 0, kind: input, shape index: {}]   ;;  %s680_s1 = inlined_call_operand.vmem [shape: bf16[1152,256], index: 1, kind: input, shape index: {}]   ;;  %s681_s2 = inlined_call_operand.vmem [shape: bf16[8,256], index: 2, kind: output, shape index: {}]  }
   0x1   :  { %s619_s11 = smov 0  }
   0x2 LB: > { %s21_s12 = sadd.s32 1, %s592_s10  ;;  %p490_p0 = scmp.ge.s32.totalorder %s596_s11, 1  ;;  %s596_s11 = sphi %s619_s11, %s12_s11   ;;  %s592_s10 = sphi %s617_s10, %s683_s10   ;;  %s588_s9 = sphi %s615_s9, %s682_s9  }
   0x3   : > { %p22_p1 = scmp.ge.s32.totalorder %s21_s12, 9  ;;  %p142_p2 = scmp.lt.s32.totalorder %s596_s11, 10 }
   0x5   : > { %s685_s12 = smov (%p22_p1, %s21_s12), 0  ;;  %p143_p3 = pnand %p490_p0, %p142_p2 }
   0x6   : > { %p173_p4 = scmp.lt.s32.totalorder (!%p143_p3), %s588_s9, 8  ;;  %s492_s13 = sshll.u32 (!%p143_p3), %s588_s9, 4 }
   0x7   : > { %146 = sbr.rel (%p143_p3) target bundleno = 318 (0x13e), region = 28  ;;  %p179_p5 = scmp.lt.s32.totalorder (!%p143_p3), %s492_s13, 143 }
   0x8   : > { %p495_p6 = scmp.ne.s32.totalorder (!%p143_p3), %s588_s9, 0 }
   0xe   : > { %s174_s14 = scalar_select %p173_p4, %s588_s9, 8 }
   0xf   : > { %s687_s13 = smov (!%p179_p5, %s492_s13), 143  ;;  %199 = sbr.rel (%p495_p6) target bundleno = 22 (0x16), region = 32 }
  0x10   : > { %s491_s15 = sshll.u32 %s174_s14, 2  ;;  %s518_s19 = sshll.u32 %s687_s13, 3  ;;  %v598_v0 = vmov (!%p495_p6), 0.0  }
  0x11   : > { %s641_s18 = scalar_lea.vmem %s679_s0, %s491_s15  ;;  %s646_s22 = scalar_lea.vmem %s680_s1, %s518_s19  ;;  %200 = vst [vmem:[#allocation2] sm:$0xff] (!%p495_p6), %v598_v0  ;;  %201 = vst [vmem:[#allocation2 + $0x8] sm:$0xff] (!%p495_p6), %v598_v0 }
  0x16 PF: > { %v546_v1 = vld [vmem:[%s646_s22 + $0x4] ss:$8 sps:$4 sm:$0xff]   ;;  %v548_v2 = vld [vmem:[%s646_s22] ss:$8 sps:$4 sm:$0xff]   ;;  %v599_v3 = vmov 0   ;;  %p512_p7 = scmp.ne.s32.totalorder %s588_s9, 8 }
  0x17   : > { %333 = vmatprep.mubr.bf16.mxu0 %v599_v3  ;;  %301 = vmatprep.subr.bf16.mxu0 %v546_v1  ;;  %v549_v4 = vld [vmem:[%s646_s22 + $0x14] ss:$8 sps:$4 sm:$0xff]   ;;  %v551_v5 = vld [vmem:[%s646_s22 + $0x10] ss:$8 sps:$4 sm:$0xff]   ;;  %v552_v6 = vld [vmem:[%s646_s22 + $0x24] ss:$8 sps:$4 sm:$0xff]  }
  0x18   : > { %302 = vmatpush1.bf16.msra.mxu0 %v548_v2  ;;  %v554_v7 = vld [vmem:[%s646_s22 + $0x20] ss:$8 sps:$4 sm:$0xff]   ;;  %v555_v8 = vld [vmem:[%s646_s22 + $0x34] ss:$8 sps:$4 sm:$0xff]   ;;  %v557_v9 = vld [vmem:[%s646_s22 + $0x30] ss:$8 sps:$4 sm:$0xff]  }
  0x19   : > { %303 = vmatprep.subr.bf16.mxu0 %v549_v4  ;;  %v558_v10 = vld [vmem:[%s646_s22 + $0x44] ss:$8 sps:$4 sm:$0xff]   ;;  %v560_v11 = vld [vmem:[%s646_s22 + $0x40] ss:$8 sps:$4 sm:$0xff]   ;;  %v561_v12 = vld [vmem:[%s646_s22 + $0x54] ss:$8 sps:$4 sm:$0xff]  }
  0x1a   : > { %v563_v13 = vld [vmem:[%s646_s22 + $0x50] ss:$8 sps:$4 sm:$0xff]   ;;  %v564_v14 = vld [vmem:[%s646_s22 + $0x64] ss:$8 sps:$4 sm:$0xff]   ;;  %v566_v15 = vld [vmem:[%s646_s22 + $0x60] ss:$8 sps:$4 sm:$0xff]  }
  0x1b   : > { %v567_v16 = vld [vmem:[%s646_s22 + $0x74] ss:$8 sps:$4 sm:$0xff]   ;;  %v569_v17 = vld [vmem:[%s646_s22 + $0x70] ss:$8 sps:$4 sm:$0xff]   ;;  %v204_v18 = vld [vmem:[%s641_s18] sm:$0xf] }
  0x1c   : > { %304 = vmatpush1.bf16.msra.mxu0 %v551_v5  ;;  %v202_v19 = vld [vmem:[#allocation2] sm:$0xff]  ;;  %v203_v20 = vld [vmem:[#allocation2 + $0x8] sm:$0xff] }
  0x1d   : > { %305 = vmatprep.subr.bf16.mxu0 %v552_v6 }
  0x20   : > { %306 = vmatpush1.bf16.msra.mxu0 %v554_v7 }
  0x21   : > { %307 = vmatprep.subr.bf16.mxu0 %v555_v8 }
  0x24   : > { %308 = vmatpush1.bf16.msra.mxu0 %v557_v9 }
  0x25   : > { %309 = vmatprep.subr.bf16.mxu0 %v558_v10 }
  0x28   : > { %310 = vmatpush1.bf16.msra.mxu0 %v560_v11 }
  0x29   : > { %311 = vmatprep.subr.bf16.mxu0 %v561_v12 }
  0x2c   : > { %312 = vmatpush1.bf16.msra.mxu0 %v563_v13 }
  0x2d   : > { %313 = vmatprep.subr.bf16.mxu0 %v564_v14 }
  0x30   : > { %314 = vmatpush1.bf16.msra.mxu0 %v566_v15 }
  0x31   : > { %315 = vmatprep.subr.bf16.mxu0 %v567_v16 }
  0x34   : > { %316 = vmatpush1.bf16.msra.mxu0 %v569_v17 }
  0x37   : > { %334 = vmatmul.mubr.bf16.vlgmr.msra.gmra.mrb[0].mxu0 %v204_v18 }
 0x108   : > { %349 = sbr.rel (%p512_p7) target bundleno = 318 (0x13e), region = 36 }
 0x10a   : > { %v335_v21 = vpop.f32.mrb[0].mxu0 }
 0x10b   : > { %v342_v22 = vadd.f32 %v335_v21, %v202_v19  ;;  %v337_v23 = vpop.f32.mrb[1].mxu0 }
 0x10c   : > { %v343_v24 = vadd.f32 %v337_v23, %v203_v20  ;;  %v339_v25 = vpop.f32.mrb[2].mxu0 }
 0x10d   : > { %344 = vst [vmem:[#allocation2] sm:$0xff] %v342_v22  ;;  %v340_v26 = vpop.f32.mrb[3].mxu0 }
 0x10e   : > { %345 = vst [vmem:[#allocation2 + $0x8] sm:$0xff] %v343_v24 }
 0x114   : > { %v350_v27 = vld [vmem:[#allocation2] sm:$0xff] }
 0x115   : > { %v351_v28 = vld [vmem:[#allocation2 + $0x8] sm:$0xff]  ;;  %v352_v29 = vrot.slane %v350_v27, 4  ;;  %v366_v31 = vmul.f32 %v350_v27, %v350_v27 }
 0x116   : > { %v358_v30 = vrot.slane %v351_v28, 4  ;;  %v367_v32 = vmul.f32 %v351_v28, %v351_v28 }
 0x117   : > { %v353_v33 = vadd.f32 %v352_v29, %v350_v27  ;;  %v368_v35 = vrot.slane %v366_v31, 4 }
 0x118   : > { %v359_v34 = vadd.f32 %v358_v30, %v351_v28  ;;  %v374_v36 = vrot.slane %v367_v32, 4 }
 0x119   : > { %v354_v37 = vrot.slane %v353_v33, 2  ;;  %v369_v39 = vadd.f32 %v368_v35, %v366_v31 }
 0x11a   : > { %v360_v38 = vrot.slane %v359_v34, 2  ;;  %v375_v40 = vadd.f32 %v374_v36, %v367_v32 }
 0x11b   : > { %v355_v41 = vadd.f32 %v354_v37, %v353_v33  ;;  %v370_v43 = vrot.slane %v369_v39, 2 }
 0x11c   : > { %v361_v42 = vadd.f32 %v360_v38, %v359_v34  ;;  %v376_v44 = vrot.slane %v375_v40, 2 }
 0x11d   : > { %v356_v45 = vrot.slane %v355_v41, 1  ;;  %v371_v47 = vadd.f32 %v370_v43, %v369_v39 }
 0x11e   : > { %v362_v46 = vrot.slane %v361_v42, 1  ;;  %v377_v48 = vadd.f32 %v376_v44, %v375_v40 }
 0x11f   : > { %v357_v49 = vadd.f32 %v356_v45, %v355_v41  ;;  %v372_v51 = vrot.slane %v371_v47, 1 }
 0x120   : > { %v363_v50 = vadd.f32 %v362_v46, %v361_v42  ;;  %v378_v52 = vrot.slane %v377_v48, 1 }
 0x121   : > { %v364_v53 = vmul.f32 0.125, %v357_v49  ;;  %v373_v55 = vadd.f32 %v372_v51, %v371_v47 }
 0x122   : > { %v365_v54 = vmul.f32 0.125, %v363_v50  ;;  %v379_v56 = vadd.f32 %v378_v52, %v377_v48 }
 0x123   : > { %v380_v57 = vmul.f32 0.125, %v373_v55  ;;  %v382_v59 = vmul.f32 %v364_v53, %v364_v53  ;;  %v388_v3 = vsub.f32 %v350_v27, %v364_v53 }
 0x124   : > { %v381_v58 = vmul.f32 0.125, %v379_v56  ;;  %v383_v60 = vmul.f32 %v365_v54, %v365_v54  ;;  %v389_v4 = vsub.f32 %v351_v28, %v365_v54 }
 0x125   : > { %v384_v61 = vsub.f32 %v380_v57, %v382_v59 }
 0x126   : > { %v385_v62 = vsub.f32 %v381_v58, %v383_v60 }
 0x127   : > { %v386_v63 = vmax.f32 %v384_v61, 0.0 }
 0x128   : > { %v387_v0 = vmax.f32 %v385_v62, 0.0 }
 0x129   : > { %v390_v1 = vadd.f32 1e-05, %v386_v63 }
 0x12a   : > { %v391_v2 = vadd.f32 1e-05, %v387_v0 }
 0x12b   : > { %570 = vrsqrt.f32 %v390_v1 }
 0x12c   : > { %572 = vrsqrt.f32 %v391_v2 }
 0x135   : > { %v571_v5 = vpop.eup %570 }
 0x136   : > { %v573_v6 = vpop.eup %572  ;;  %v394_v7 = vmul.f32 %v571_v5, %v388_v3 }
 0x137   : > { %v395_v8 = vmul.f32 %v573_v6, %v389_v4 }
 0x138   : > { %v396_v9 = vmax.f32 %v394_v7, 0.0 }
 0x139   : > { %v397_v10 = vmax.f32 %v395_v8, 0.0 }
 0x13b   : > { %v519_v11 = vpack.c.bf16 %v397_v10, %v396_v9 }
 0x13d   : > { %406 = vst [vmem:[%s681_s2] sm:$0xff] %v519_v11 }
 0x13e PF: > { %s12_s11 = sadd.s32 1, %s596_s11   ;;  %s682_s9 = smov %s592_s10 }
 0x13f   : > { %p9_p8 = scmp.ge.s32.totalorder %s12_s11, 11   ;;  %s683_s10 = smov %s685_s12 }
 0x141   :  { %11 = sbr.rel (!%p9_p8) target bundleno = 2 (0x2), region = 69 }

// kernel: _lambda_.23
= control target key start
LH: loop header
LB: loop body
LE: loop exit
PB: predicated region body
PF: predicated region fallthrough
CT: control target
= control target key end

     0   :  { %s840_s12 = smov 0   ;;  %s842_s13 = smov 0   ;;  %s922_s0 = inlined_call_operand.vmem [shape: bf16[8,2304], index: 0, kind: input, shape index: {}]   ;;  %s923_s1 = inlined_call_operand.vmem [shape: bf16[2304,256], index: 1, kind: input, shape index: {}]   ;;  %s924_s2 = inlined_call_operand.vmem [shape: bf16[8,256], index: 2, kind: input, shape index: {}]   ;;  %s925_s3 = inlined_call_operand.vmem [shape: bf16[8,256], index: 3, kind: output, shape index: {}]  }
   0x1   :  { %s844_s14 = smov 0  }
   0x2 LB: > { %s22_s15 = sadd.s32 1, %s813_s13  ;;  %p667_p0 = scmp.ge.s32.totalorder %s817_s14, 1  ;;  %s817_s14 = sphi %s844_s14, %s13_s14   ;;  %s813_s13 = sphi %s842_s13, %s927_s13   ;;  %s809_s12 = sphi %s840_s12, %s926_s12  }
   0x3   : > { %p23_p1 = scmp.ge.s32.totalorder %s22_s15, 9  ;;  %p180_p2 = scmp.lt.s32.totalorder %s817_s14, 10 }
   0x5   : > { %s929_s15 = smov (%p23_p1, %s22_s15), 0  ;;  %p181_p3 = pnand %p667_p0, %p180_p2 }
   0x6   : > { %s668_s16 = sshll.u32 (!%p181_p3), %s809_s12, 1  ;;  %s670_s17 = sshll.u32 (!%p181_p3), %s809_s12, 5 }
   0x7   : > { %184 = sbr.rel (%p181_p3) target bundleno = 354 (0x162), region = 32  ;;  %p220_p4 = scmp.lt.s32.totalorder (!%p181_p3), %s668_s16, 17 }
   0x8   : > { %p227_p5 = scmp.lt.s32.totalorder (!%p181_p3), %s670_s17, 287  ;;  %p673_p6 = scmp.ne.s32.totalorder (!%p181_p3), %s809_s12, 0 }
   0xe   : > { %s931_s16 = smov (!%p220_p4, %s668_s16), 17  ;;  %s933_s17 = smov (!%p227_p5, %s670_s17), 287 }
   0xf   : > { %s669_s18 = sshll.u32 %s931_s16, 2  ;;  %s714_s22 = sshll.u32 %s933_s17, 3  ;;  %v819_v0 = vmov (!%p673_p6), 0.0  }
  0x10   : > { %s865_s21 = scalar_lea.vmem %s922_s0, %s669_s18  ;;  %s870_s25 = scalar_lea.vmem %s923_s1, %s714_s22  ;;  %253 = vst [vmem:[#allocation2] sm:$0xff] (!%p673_p6), %v819_v0  ;;  %254 = vst [vmem:[#allocation2 + $0x8] sm:$0xff] (!%p673_p6), %v819_v0 }
  0x11   : > { %252 = sbr.rel (%p673_p6) target bundleno = 24 (0x18), region = 36 }
  0x18 PF: > { %v741_v1 = vld [vmem:[%s870_s25 + $0x4] ss:$8 sps:$4 sm:$0xff]   ;;  %v743_v2 = vld [vmem:[%s870_s25] ss:$8 sps:$4 sm:$0xff]   ;;  %v744_v3 = vld [vmem:[%s870_s25 + $0x14] ss:$8 sps:$4 sm:$0xff]  }
  0x19   : > { %457 = vmatprep.subr.bf16.mxu0 %v741_v1  ;;  %v746_v4 = vld [vmem:[%s870_s25 + $0x10] ss:$8 sps:$4 sm:$0xff]   ;;  %v747_v5 = vld [vmem:[%s870_s25 + $0x24] ss:$8 sps:$4 sm:$0xff]   ;;  %v749_v6 = vld [vmem:[%s870_s25 + $0x20] ss:$8 sps:$4 sm:$0xff]  }
  0x1a   : > { %458 = vmatpush1.bf16.msra.mxu0 %v743_v2  ;;  %v750_v7 = vld [vmem:[%s870_s25 + $0x34] ss:$8 sps:$4 sm:$0xff]   ;;  %v752_v8 = vld [vmem:[%s870_s25 + $0x30] ss:$8 sps:$4 sm:$0xff]   ;;  %v753_v9 = vld [vmem:[%s870_s25 + $0x44] ss:$8 sps:$4 sm:$0xff]  }
  0x1b   : > { %459 = vmatprep.subr.bf16.mxu0 %v744_v3  ;;  %v755_v10 = vld [vmem:[%s870_s25 + $0x40] ss:$8 sps:$4 sm:$0xff]   ;;  %v756_v11 = vld [vmem:[%s870_s25 + $0x54] ss:$8 sps:$4 sm:$0xff]   ;;  %v758_v12 = vld [vmem:[%s870_s25 + $0x50] ss:$8 sps:$4 sm:$0xff]  }
  0x1c   : > { %v759_v13 = vld [vmem:[%s870_s25 + $0x64] ss:$8 sps:$4 sm:$0xff]   ;;  %v761_v16 = vld [vmem:[%s870_s25 + $0x60] ss:$8 sps:$4 sm:$0xff]   ;;  %v762_v17 = vld [vmem:[%s870_s25 + $0x74] ss:$8 sps:$4 sm:$0xff]  }
  0x1d   : > { %v257_v14 = vld [vmem:[%s865_s21] sm:$0xff]  ;;  %v764_v18 = vld [vmem:[%s870_s25 + $0x70] ss:$8 sps:$4 sm:$0xff]   ;;  %v768_v21 = vld [vmem:[%s870_s25 + $0x94] ss:$8 sps:$4 sm:$0xff]   ;;  %p708_p7 = scmp.ne.s32.totalorder %s809_s12, 8 }
  0x1e   : > { %460 = vmatpush1.bf16.msra.mxu0 %v746_v4  ;;  %v675_v15 = vcombine.high %v257_v14, %v257_v14  ;;  %v765_v19 = vld [vmem:[%s870_s25 + $0x84] ss:$8 sps:$4 sm:$0xff]   ;;  %v767_v20 = vld [vmem:[%s870_s25 + $0x80] ss:$8 sps:$4 sm:$0xff]   ;;  %v770_v22 = vld [vmem:[%s870_s25 + $0x90] ss:$8 sps:$4 sm:$0xff]   ;;  %v674_v35 = vcombine.low %v257_v14, %v257_v14 }
  0x1f   : > { %461 = vmatprep.subr.bf16.mxu0 %v747_v5  ;;  %v771_v23 = vld [vmem:[%s870_s25 + $0xa4] ss:$8 sps:$4 sm:$0xff]   ;;  %v773_v24 = vld [vmem:[%s870_s25 + $0xa0] ss:$8 sps:$4 sm:$0xff]   ;;  %v774_v25 = vld [vmem:[%s870_s25 + $0xb4] ss:$8 sps:$4 sm:$0xff]  }
  0x20   : > { %489 = vmatprep.mubr.bf16.mxu0 %v675_v15  ;;  %v776_v26 = vld [vmem:[%s870_s25 + $0xb0] ss:$8 sps:$4 sm:$0xff]   ;;  %v777_v27 = vld [vmem:[%s870_s25 + $0xc4] ss:$8 sps:$4 sm:$0xff]   ;;  %v779_v28 = vld [vmem:[%s870_s25 + $0xc0] ss:$8 sps:$4 sm:$0xff]  }
  0x21   : > { %v780_v29 = vld [vmem:[%s870_s25 + $0xd4] ss:$8 sps:$4 sm:$0xff]   ;;  %v782_v30 = vld [vmem:[%s870_s25 + $0xd0] ss:$8 sps:$4 sm:$0xff]   ;;  %v783_v31 = vld [vmem:[%s870_s25 + $0xe4] ss:$8 sps:$4 sm:$0xff]  }
  0x22   : > { %462 = vmatpush1.bf16.msra.mxu0 %v749_v6  ;;  %v785_v32 = vld [vmem:[%s870_s25 + $0xe0] ss:$8 sps:$4 sm:$0xff]   ;;  %v786_v33 = vld [vmem:[%s870_s25 + $0xf4] ss:$8 sps:$4 sm:$0xff]   ;;  %v788_v34 = vld [vmem:[%s870_s25 + $0xf0] ss:$8 sps:$4 sm:$0xff]  }
  0x23   : > { %463 = vmatprep.subr.bf16.mxu0 %v750_v7  ;;  %v255_v36 = vld [vmem:[#allocation2] sm:$0xff]  ;;  %v256_v37 = vld [vmem:[#allocation2 + $0x8] sm:$0xff] }
  0x26   : > { %464 = vmatpush1.bf16.msra.mxu0 %v752_v8 }
  0x27   : > { %465 = vmatprep.subr.bf16.mxu0 %v753_v9 }
  0x2a   : > { %466 = vmatpush1.bf16.msra.mxu0 %v755_v10 }
  0x2b   : > { %467 = vmatprep.subr.bf16.mxu0 %v756_v11 }
  0x2e   : > { %468 = vmatpush1.bf16.msra.mxu0 %v758_v12 }
  0x2f   : > { %469 = vmatprep.subr.bf16.mxu0 %v759_v13 }
  0x32   : > { %470 = vmatpush1.bf16.msra.mxu0 %v761_v16 }
  0x33   : > { %471 = vmatprep.subr.bf16.mxu0 %v762_v17 }
  0x36   : > { %472 = vmatpush1.bf16.msra.mxu0 %v764_v18 }
  0x37   : > { %473 = vmatprep.subr.bf16.mxu0 %v765_v19 }
  0x3a   : > { %474 = vmatpush1.bf16.msra.mxu0 %v767_v20  ;;  %v552_v20 = vld [vmem:[%s924_s2] sm:$0xff] (!%p708_p7) }
  0x3b   : > { %475 = vmatprep.subr.bf16.mxu0 %v768_v21 }
  0x3e   : > { %476 = vmatpush1.bf16.msra.mxu0 %v770_v22 }
  0x3f   : > { %477 = vmatprep.subr.bf16.mxu0 %v771_v23  ;;  %v553_v23 = vunpack.c.l.bf16 (!%p708_p7), %v552_v20 }
  0x42   : > { %478 = vmatpush1.bf16.msra.mxu0 %v773_v24 }
  0x43   : > { %479 = vmatprep.subr.bf16.mxu0 %v774_v25  ;;  %v554_v25 = vunpack.c.h.bf16 (!%p708_p7), %v552_v20 }
  0x46   : > { %480 = vmatpush1.bf16.msra.mxu0 %v776_v26 }
  0x47   : > { %481 = vmatprep.subr.bf16.mxu0 %v777_v27 }
  0x4a   : > { %482 = vmatpush1.bf16.msra.mxu0 %v779_v28 }
  0x4b   : > { %483 = vmatprep.subr.bf16.mxu0 %v780_v29 }
  0x4e   : > { %484 = vmatpush1.bf16.msra.mxu0 %v782_v30 }
  0x4f   : > { %485 = vmatprep.subr.bf16.mxu0 %v783_v31 }
  0x52   : > { %486 = vmatpush1.bf16.msra.mxu0 %v785_v32 }
  0x53   : > { %487 = vmatprep.subr.bf16.mxu0 %v786_v33 }
  0x56   : > { %488 = vmatpush1.bf16.msra.mxu0 %v788_v34 }
  0x59   : > { %490 = vmatmul.mubr.bf16.vlgmr.msra.gmra.mrb[0].mxu0 %v674_v35 }
 0x12a   : > { %505 = sbr.rel (%p708_p7) target bundleno = 354 (0x162), region = 40 }
 0x12c   : > { %v491_v38 = vpop.f32.mrb[0].mxu0 }
 0x12d   : > { %v498_v39 = vadd.f32 %v491_v38, %v255_v36  ;;  %v493_v40 = vpop.f32.mrb[1].mxu0 }
 0x12e   : > { %v499_v41 = vadd.f32 %v493_v40, %v256_v37  ;;  %v495_v42 = vpop.f32.mrb[2].mxu0 }
 0x12f   : > { %500 = vst [vmem:[#allocation2] sm:$0xff] %v498_v39  ;;  %v496_v43 = vpop.f32.mrb[3].mxu0 }
 0x130   : > { %501 = vst [vmem:[#allocation2 + $0x8] sm:$0xff] %v499_v41 }
 0x136   : > { %v506_v44 = vld [vmem:[#allocation2] sm:$0xff] }
 0x137   : > { %v507_v45 = vld [vmem:[#allocation2 + $0x8] sm:$0xff]  ;;  %v508_v46 = vrot.slane %v506_v44, 4  ;;  %v522_v48 = vmul.f32 %v506_v44, %v506_v44 }
 0x138   : > { %v514_v47 = vrot.slane %v507_v45, 4  ;;  %v523_v49 = vmul.f32 %v507_v45, %v507_v45 }
 0x139   : > { %v509_v50 = vadd.f32 %v508_v46, %v506_v44  ;;  %v524_v52 = vrot.slane %v522_v48, 4 }
 0x13a   : > { %v515_v51 = vadd.f32 %v514_v47, %v507_v45  ;;  %v530_v53 = vrot.slane %v523_v49, 4 }
 0x13b   : > { %v510_v54 = vrot.slane %v509_v50, 2  ;;  %v525_v56 = vadd.f32 %v524_v52, %v522_v48 }
 0x13c   : > { %v516_v55 = vrot.slane %v515_v51, 2  ;;  %v531_v57 = vadd.f32 %v530_v53, %v523_v49 }
 0x13d   : > { %v511_v58 = vadd.f32 %v510_v54, %v509_v50  ;;  %v526_v60 = vrot.slane %v525_v56, 2 }
 0x13e   : > { %v517_v59 = vadd.f32 %v516_v55, %v515_v51  ;;  %v532_v61 = vrot.slane %v531_v57, 2 }
 0x13f   : > { %v512_v62 = vrot.slane %v511_v58, 1  ;;  %v527_v0 = vadd.f32 %v526_v60, %v525_v56 }
 0x140   : > { %v518_v63 = vrot.slane %v517_v59, 1  ;;  %v533_v1 = vadd.f32 %v532_v61, %v531_v57 }
 0x141   : > { %v513_v2 = vadd.f32 %v512_v62, %v511_v58  ;;  %v528_v4 = vrot.slane %v527_v0, 1 }
 0x142   : > { %v519_v3 = vadd.f32 %v518_v63, %v517_v59  ;;  %v534_v5 = vrot.slane %v533_v1, 1 }
 0x143   : > { %v520_v6 = vmul.f32 0.125, %v513_v2  ;;  %v529_v8 = vadd.f32 %v528_v4, %v527_v0 }
 0x144   : > { %v521_v7 = vmul.f32 0.125, %v519_v3  ;;  %v535_v9 = vadd.f32 %v534_v5, %v533_v1 }
 0x145   : > { %v536_v10 = vmul.f32 0.125, %v529_v8  ;;  %v538_v12 = vmul.f32 %v520_v6, %v520_v6  ;;  %v544_v21 = vsub.f32 %v506_v44, %v520_v6 }
 0x146   : > { %v537_v11 = vmul.f32 0.125, %v535_v9  ;;  %v539_v13 = vmul.f32 %v521_v7, %v521_v7  ;;  %v545_v22 = vsub.f32 %v507_v45, %v521_v7 }
 0x147   : > { %v540_v14 = vsub.f32 %v536_v10, %v538_v12 }
 0x148   : > { %v541_v15 = vsub.f32 %v537_v11, %v539_v13 }
 0x149   : > { %v542_v16 = vmax.f32 %v540_v14, 0.0 }
 0x14a   : > { %v543_v17 = vmax.f32 %v541_v15, 0.0 }
 0x14b   : > { %v546_v18 = vadd.f32 1e-05, %v542_v16 }
 0x14c   : > { %v547_v19 = vadd.f32 1e-05, %v543_v17 }
 0x14d   : > { %791 = vrsqrt.f32 %v546_v18 }
 0x14e   : > { %793 = vrsqrt.f32 %v547_v19 }
 0x157   : > { %v792_v24 = vpop.eup %791 }
 0x158   : > { %v794_v26 = vpop.eup %793  ;;  %v550_v27 = vmul.f32 %v792_v24, %v544_v21 }
 0x159   : > { %v551_v28 = vmul.f32 %v794_v26, %v545_v22 }
 0x15a   : > { %v555_v29 = vadd.f32 %v553_v23, %v550_v27 }
 0x15b   : > { %v556_v30 = vadd.f32 %v554_v25, %v551_v28 }
 0x15c   : > { %v557_v31 = vmax.f32 %v555_v29, 0.0 }
 0x15d   : > { %v558_v32 = vmax.f32 %v556_v30, 0.0 }
 0x15f   : > { %v715_v33 = vpack.c.bf16 %v558_v32, %v557_v31 }
 0x161   : > { %567 = vst [vmem:[%s925_s3] sm:$0xff] %v715_v33 }
 0x162 PF: > { %s13_s14 = sadd.s32 1, %s817_s14   ;;  %s926_s12 = smov %s813_s13 }
 0x163   : > { %p10_p8 = scmp.ge.s32.totalorder %s13_s14, 11   ;;  %s927_s13 = smov %s929_s15 }
 0x165   :  { %12 = sbr.rel (!%p10_p8) target bundleno = 2 (0x2), region = 76 }

// kernel: _lambda_.22
= control target key start
LH: loop header
LB: loop body
LE: loop exit
PB: predicated region body
PF: predicated region fallthrough
CT: control target
= control target key end

     0   :  { %v271_v1 = vmov 0   ;;  %s341_s1 = inlined_call_operand.vmem [shape: bf16[128,256], index: 1, kind: input, shape index: {}]   ;;  %s342_s0 = inlined_call_operand.vmem [shape: bf16[8,128], index: 0, kind: input, shape index: {}]   ;;  %s343_s2 = inlined_call_operand.vmem [shape: bf16[8,256], index: 2, kind: output, shape index: {}]  }
   0x1   :  { %v243_v0 = vld [vmem:[%s341_s1 + $0x4] ss:$8 sps:$4 sm:$0xff]   ;;  %149 = vmatprep.mubr.bf16.mxu0 %v271_v1  ;;  %v245_v2 = vld [vmem:[%s341_s1] ss:$8 sps:$4 sm:$0xff]   ;;  %v246_v3 = vld [vmem:[%s341_s1 + $0x14] ss:$8 sps:$4 sm:$0xff]  }
   0x2   :  { %117 = vmatprep.subr.bf16.mxu0 %v243_v0  ;;  %v248_v4 = vld [vmem:[%s341_s1 + $0x10] ss:$8 sps:$4 sm:$0xff]   ;;  %v249_v5 = vld [vmem:[%s341_s1 + $0x24] ss:$8 sps:$4 sm:$0xff]   ;;  %v251_v6 = vld [vmem:[%s341_s1 + $0x20] ss:$8 sps:$4 sm:$0xff]  }
   0x3   :  { %118 = vmatpush1.bf16.msra.mxu0 %v245_v2  ;;  %v252_v7 = vld [vmem:[%s341_s1 + $0x34] ss:$8 sps:$4 sm:$0xff]   ;;  %v254_v8 = vld [vmem:[%s341_s1 + $0x30] ss:$8 sps:$4 sm:$0xff]   ;;  %v255_v9 = vld [vmem:[%s341_s1 + $0x44] ss:$8 sps:$4 sm:$0xff]  }
   0x4   :  { %119 = vmatprep.subr.bf16.mxu0 %v246_v3  ;;  %v257_v10 = vld [vmem:[%s341_s1 + $0x40] ss:$8 sps:$4 sm:$0xff]   ;;  %v258_v11 = vld [vmem:[%s341_s1 + $0x54] ss:$8 sps:$4 sm:$0xff]   ;;  %v260_v12 = vld [vmem:[%s341_s1 + $0x50] ss:$8 sps:$4 sm:$0xff]  }
   0x5   :  { %v261_v13 = vld [vmem:[%s341_s1 + $0x64] ss:$8 sps:$4 sm:$0xff]   ;;  %v263_v14 = vld [vmem:[%s341_s1 + $0x60] ss:$8 sps:$4 sm:$0xff]   ;;  %v264_v15 = vld [vmem:[%s341_s1 + $0x74] ss:$8 sps:$4 sm:$0xff]  }
   0x6   :  { %v266_v16 = vld [vmem:[%s341_s1 + $0x70] ss:$8 sps:$4 sm:$0xff]   ;;  %v20_v17 = vld [vmem:[%s342_s0] sm:$0xf] }
   0x7   :  { %120 = vmatpush1.bf16.msra.mxu0 %v248_v4 }
   0x8   :  { %121 = vmatprep.subr.bf16.mxu0 %v249_v5 }
   0xb   :  { %122 = vmatpush1.bf16.msra.mxu0 %v251_v6 }
   0xc   :  { %123 = vmatprep.subr.bf16.mxu0 %v252_v7 }
   0xf   :  { %124 = vmatpush1.bf16.msra.mxu0 %v254_v8 }
  0x10   :  { %125 = vmatprep.subr.bf16.mxu0 %v255_v9 }
  0x13   :  { %126 = vmatpush1.bf16.msra.mxu0 %v257_v10 }
  0x14   :  { %127 = vmatprep.subr.bf16.mxu0 %v258_v11 }
  0x17   :  { %128 = vmatpush1.bf16.msra.mxu0 %v260_v12 }
  0x18   :  { %129 = vmatprep.subr.bf16.mxu0 %v261_v13 }
  0x1b   :  { %130 = vmatpush1.bf16.msra.mxu0 %v263_v14 }
  0x1c   :  { %131 = vmatprep.subr.bf16.mxu0 %v264_v15 }
  0x1f   :  { %132 = vmatpush1.bf16.msra.mxu0 %v266_v16 }
  0x22   :  { %150 = vmatmul.mubr.bf16.vlgmr.msra.gmra.mrb[0].mxu0 %v20_v17 }
  0xf5   :  { %v151_v18 = vpop.f32.mrb[0].mxu0 }
  0xf6   :  { %v167_v19 = vrot.slane %v151_v18, 4  ;;  %v181_v20 = vmul.f32 %v151_v18, %v151_v18  ;;  %v153_v21 = vpop.f32.mrb[1].mxu0 }
  0xf7   :  { %v173_v22 = vrot.slane %v153_v21, 4  ;;  %v182_v23 = vmul.f32 %v153_v21, %v153_v21  ;;  %v155_v24 = vpop.f32.mrb[2].mxu0 }
  0xf8   :  { %v168_v25 = vadd.f32 %v167_v19, %v151_v18  ;;  %v183_v26 = vrot.slane %v181_v20, 4  ;;  %v156_v27 = vpop.f32.mrb[3].mxu0 }
  0xf9   :  { %v174_v28 = vadd.f32 %v173_v22, %v153_v21  ;;  %v189_v29 = vrot.slane %v182_v23, 4 }
  0xfa   :  { %v169_v30 = vrot.slane %v168_v25, 2  ;;  %v184_v31 = vadd.f32 %v183_v26, %v181_v20 }
  0xfb   :  { %v175_v32 = vrot.slane %v174_v28, 2  ;;  %v190_v33 = vadd.f32 %v189_v29, %v182_v23 }
  0xfc   :  { %v170_v34 = vadd.f32 %v169_v30, %v168_v25  ;;  %v185_v35 = vrot.slane %v184_v31, 2 }
  0xfd   :  { %v176_v36 = vadd.f32 %v175_v32, %v174_v28  ;;  %v191_v37 = vrot.slane %v190_v33, 2 }
  0xfe   :  { %v171_v38 = vrot.slane %v170_v34, 1  ;;  %v186_v39 = vadd.f32 %v185_v35, %v184_v31 }
  0xff   :  { %v177_v40 = vrot.slane %v176_v36, 1  ;;  %v192_v41 = vadd.f32 %v191_v37, %v190_v33 }
 0x100   :  { %v172_v42 = vadd.f32 %v171_v38, %v170_v34  ;;  %v187_v43 = vrot.slane %v186_v39, 1 }
 0x101   :  { %v178_v44 = vadd.f32 %v177_v40, %v176_v36  ;;  %v193_v45 = vrot.slane %v192_v41, 1 }
 0x102   :  { %v179_v46 = vmul.f32 0.125, %v172_v42  ;;  %v188_v47 = vadd.f32 %v187_v43, %v186_v39 }
 0x103   :  { %v180_v48 = vmul.f32 0.125, %v178_v44  ;;  %v194_v49 = vadd.f32 %v193_v45, %v192_v41 }
 0x104   :  { %v195_v50 = vmul.f32 0.125, %v188_v47  ;;  %v197_v51 = vmul.f32 %v179_v46, %v179_v46  ;;  %v203_v60 = vsub.f32 %v151_v18, %v179_v46 }
 0x105   :  { %v196_v52 = vmul.f32 0.125, %v194_v49  ;;  %v198_v53 = vmul.f32 %v180_v48, %v180_v48  ;;  %v204_v62 = vsub.f32 %v153_v21, %v180_v48 }
 0x106   :  { %v199_v54 = vsub.f32 %v195_v50, %v197_v51 }
 0x107   :  { %v200_v55 = vsub.f32 %v196_v52, %v198_v53 }
 0x108   :  { %v201_v56 = vmax.f32 %v199_v54, 0.0 }
 0x109   :  { %v202_v57 = vmax.f32 %v200_v55, 0.0 }
 0x10a   :  { %v205_v58 = vadd.f32 1e-05, %v201_v56 }
 0x10b   :  { %v206_v59 = vadd.f32 1e-05, %v202_v57 }
 0x10c   :  { %267 = vrsqrt.f32 %v205_v58 }
 0x10d   :  { %269 = vrsqrt.f32 %v206_v59 }
 0x116   :  { %v268_v61 = vpop.eup %267 }
 0x117   :  { %v270_v63 = vpop.eup %269  ;;  %v209_v0 = vmul.f32 %v268_v61, %v203_v60 }
 0x118   :  { %v210_v1 = vmul.f32 %v270_v63, %v204_v62 }
 0x11a   :  { %v241_v2 = vpack.c.bf16 %v210_v1, %v209_v0 }
 0x11c   :  { %219 = vst [vmem:[%s343_s2] sm:$0xff] %v241_v2 }

// kernel: _lambda_.24
= control target key start
LH: loop header
LB: loop body
LE: loop exit
PB: predicated region body
PF: predicated region fallthrough
CT: control target
= control target key end

     0   :  { %s987_s9 = smov 0   ;;  %s989_s10 = smov 0   ;;  %s1189_s0 = inlined_call_operand.vmem [shape: bf16[8,2304], index: 0, kind: input, shape index: {}]   ;;  %s1190_s1 = inlined_call_operand.vmem [shape: bf16[2304,512], index: 1, kind: input, shape index: {}]   ;;  %s1191_s2 = inlined_call_operand.vmem [shape: bf16[8,512], index: 2, kind: output, shape index: {}]  }
   0x1   :  { %s991_s11 = smov 0   ;;  %s993_s12 = smov 0  }
   0x2   :  { %s995_s13 = smov 0   ;;  %s997_s14 = smov 0  }
   0x3   :  { %s999_s15 = smov 0  }
   0x4 LB: > { %s21_s16 = sadd.s32 1, %s961_s13  ;;  %s24_s17 = sadd.s32 1, %s965_s14  ;;  %s969_s15 = sphi %s999_s15, %s12_s15   ;;  %s965_s14 = sphi %s997_s14, %s1197_s14   ;;  %s961_s13 = sphi %s995_s13, %s1196_s13   ;;  %s957_s12 = sphi %s993_s12, %s1195_s12   ;;  %s953_s11 = sphi %s991_s11, %s1194_s11   ;;  %s949_s10 = sphi %s989_s10, %s1193_s10   ;;  %s945_s9 = sphi %s987_s9, %s1192_s9  }
   0x5   : > { %p22_p0 = scmp.ge.s32.totalorder %s21_s16, 9  ;;  %p66_p1 = scmp.ne.s32.totalorder %s949_s10, %s945_s9 }
   0x6   : > { %p67_p2 = scmp.eq.s32.totalorder %s969_s15, 0  ;;  %s59_s21 = sadd.s32 1, %s949_s10 }
   0x7   : > { %s1199_s16 = smov (%p22_p0, %s21_s16), 0  ;;  %s1201_s17 = smov (!%p22_p0, %s24_s17), %s965_s14 }
   0x8   : > { %p68_p3 = por %p67_p2, %p66_p1  ;;  %p26_p4 = scmp.ge.s32.totalorder %s1201_s17, 2 }
   0x9   : > { %s54_s18 = ssub.s32 %s961_s13, %s1199_s16  ;;  %p751_p6 = scmp.ge.s32.totalorder %s969_s15, 18 }
   0xa   : > { %s1203_s17 = smov (%p26_p4, %s1201_s17), 0 }
   0xb   : > { %s55_s19 = ssub.s32 %s965_s14, %s1203_s17  ;;  %118 = sbr.rel (%p751_p6) target bundleno = 41 (0x29), region = 16 }
   0xc   : > { %s56_s20 = sor.u32 %s55_s19, %s54_s18 }
   0xd   : > { %p57_p5 = scmp.eq.s32.totalorder %s56_s20, 0 }
   0xf   : > { %s1038_s22 = scalar_select %p57_p5, %s949_s10, %s59_s21  }
  0x12   : > { %130 = sbr.rel (!%p68_p3) target bundleno = 41 (0x29), region = 24  ;;  %s132_s23 = sand.u32 (%p68_p3), 1, %s949_s10  }
  0x13   : > { %s754_s24 = sshll.u32 (%p68_p3), %s965_s14, 1  ;;  %s752_s25 = sshll.u32 (%p68_p3), %s132_s23, 8 }
  0x14   : > { %s802_s26 = sshll.u32 (%p68_p3), %s961_s13, 7  ;;  %s1052_s4 = scalar_lea.vmem (%p68_p3), [#allocation3], %s752_s25 }
  0x15   : > { %s138_s27 = sadd.s32 (%p68_p3), %s802_s26, %s754_s24 }
  0x16   : > { %s756_s28 = sshll.u32 (%p68_p3), %s138_s27, 2 }
  0x17   : > { %s1047_s3 = scalar_lea.vmem (%p68_p3), %s1190_s1, %s756_s28 }
  0x18   : > { %v230_v0 = vld [vmem:[%s1047_s3] sm:$0xff] (%p68_p3)  ;;  %v232_v1 = vld [vmem:[%s1047_s3 + $0x10] sm:$0xff] (%p68_p3) }
  0x19   : > { %v234_v2 = vld [vmem:[%s1047_s3 + $0x20] sm:$0xff]  ;;  %231 = vst [vmem:[%s1052_s4] sm:$0xff] %v230_v0  ;;  %233 = vst [vmem:[%s1052_s4 + $0x8] sm:$0xff] %v232_v1  ;;  %v236_v3 = vld [vmem:[%s1047_s3 + $0x30] sm:$0xff] }
  0x1a   : > { %235 = vst [vmem:[%s1052_s4 + $0x10] sm:$0xff] %v234_v2  ;;  %v238_v4 = vld [vmem:[%s1047_s3 + $0x40] sm:$0xff]  ;;  %v240_v5 = vld [vmem:[%s1047_s3 + $0x50] sm:$0xff]  ;;  %237 = vst [vmem:[%s1052_s4 + $0x18] sm:$0xff] %v236_v3 }
  0x1b   : > { %239 = vst [vmem:[%s1052_s4 + $0x20] sm:$0xff] %v238_v4  ;;  %241 = vst [vmem:[%s1052_s4 + $0x28] sm:$0xff] %v240_v5  ;;  %v242_v6 = vld [vmem:[%s1047_s3 + $0x60] sm:$0xff]  ;;  %v244_v7 = vld [vmem:[%s1047_s3 + $0x70] sm:$0xff] }
  0x1c   : > { %v246_v8 = vld [vmem:[%s1047_s3 + $0x80] sm:$0xff]  ;;  %243 = vst [vmem:[%s1052_s4 + $0x30] sm:$0xff] %v242_v6  ;;  %245 = vst [vmem:[%s1052_s4 + $0x38] sm:$0xff] %v244_v7  ;;  %v248_v9 = vld [vmem:[%s1047_s3 + $0x90] sm:$0xff] }
  0x1d   : > { %247 = vst [vmem:[%s1052_s4 + $0x40] sm:$0xff] %v246_v8  ;;  %v250_v10 = vld [vmem:[%s1047_s3 + $0xa0] sm:$0xff]  ;;  %v252_v11 = vld [vmem:[%s1047_s3 + $0xb0] sm:$0xff]  ;;  %249 = vst [vmem:[%s1052_s4 + $0x48] sm:$0xff] %v248_v9 }
  0x1e   : > { %251 = vst [vmem:[%s1052_s4 + $0x50] sm:$0xff] %v250_v10  ;;  %253 = vst [vmem:[%s1052_s4 + $0x58] sm:$0xff] %v252_v11  ;;  %v254_v12 = vld [vmem:[%s1047_s3 + $0xc0] sm:$0xff]  ;;  %v256_v13 = vld [vmem:[%s1047_s3 + $0xd0] sm:$0xff] }
  0x1f   : > { %v258_v14 = vld [vmem:[%s1047_s3 + $0xe0] sm:$0xff]  ;;  %255 = vst [vmem:[%s1052_s4 + $0x60] sm:$0xff] %v254_v12  ;;  %257 = vst [vmem:[%s1052_s4 + $0x68] sm:$0xff] %v256_v13  ;;  %v260_v15 = vld [vmem:[%s1047_s3 + $0xf0] sm:$0xff] }
  0x20   : > { %259 = vst [vmem:[%s1052_s4 + $0x70] sm:$0xff] %v258_v14  ;;  %v262_v16 = vld [vmem:[%s1047_s3 + $0x100] sm:$0xff]  ;;  %v264_v17 = vld [vmem:[%s1047_s3 + $0x110] sm:$0xff]  ;;  %261 = vst [vmem:[%s1052_s4 + $0x78] sm:$0xff] %v260_v15 }
  0x21   : > { %263 = vst [vmem:[%s1052_s4 + $0x80] sm:$0xff] %v262_v16  ;;  %265 = vst [vmem:[%s1052_s4 + $0x88] sm:$0xff] %v264_v17  ;;  %v266_v18 = vld [vmem:[%s1047_s3 + $0x120] sm:$0xff]  ;;  %v268_v19 = vld [vmem:[%s1047_s3 + $0x130] sm:$0xff] }
  0x22   : > { %v270_v20 = vld [vmem:[%s1047_s3 + $0x140] sm:$0xff]  ;;  %267 = vst [vmem:[%s1052_s4 + $0x90] sm:$0xff] %v266_v18  ;;  %269 = vst [vmem:[%s1052_s4 + $0x98] sm:$0xff] %v268_v19  ;;  %v272_v21 = vld [vmem:[%s1047_s3 + $0x150] sm:$0xff] }
  0x23   : > { %271 = vst [vmem:[%s1052_s4 + $0xa0] sm:$0xff] %v270_v20  ;;  %v274_v22 = vld [vmem:[%s1047_s3 + $0x160] sm:$0xff]  ;;  %v276_v23 = vld [vmem:[%s1047_s3 + $0x170] sm:$0xff]  ;;  %273 = vst [vmem:[%s1052_s4 + $0xa8] sm:$0xff] %v272_v21 }
  0x24   : > { %275 = vst [vmem:[%s1052_s4 + $0xb0] sm:$0xff] %v274_v22  ;;  %277 = vst [vmem:[%s1052_s4 + $0xb8] sm:$0xff] %v276_v23  ;;  %v278_v24 = vld [vmem:[%s1047_s3 + $0x180] sm:$0xff]  ;;  %v280_v25 = vld [vmem:[%s1047_s3 + $0x190] sm:$0xff] }
  0x25   : > { %v282_v26 = vld [vmem:[%s1047_s3 + $0x1a0] sm:$0xff]  ;;  %279 = vst [vmem:[%s1052_s4 + $0xc0] sm:$0xff] %v278_v24  ;;  %281 = vst [vmem:[%s1052_s4 + $0xc8] sm:$0xff] %v280_v25  ;;  %v284_v27 = vld [vmem:[%s1047_s3 + $0x1b0] sm:$0xff] }
  0x26   : > { %283 = vst [vmem:[%s1052_s4 + $0xd0] sm:$0xff] %v282_v26  ;;  %v286_v28 = vld [vmem:[%s1047_s3 + $0x1c0] sm:$0xff]  ;;  %v288_v29 = vld [vmem:[%s1047_s3 + $0x1d0] sm:$0xff]  ;;  %285 = vst [vmem:[%s1052_s4 + $0xd8] sm:$0xff] %v284_v27 }
  0x27   : > { %287 = vst [vmem:[%s1052_s4 + $0xe0] sm:$0xff] %v286_v28  ;;  %289 = vst [vmem:[%s1052_s4 + $0xe8] sm:$0xff] %v288_v29  ;;  %v290_v30 = vld [vmem:[%s1047_s3 + $0x1e0] sm:$0xff]  ;;  %v292_v31 = vld [vmem:[%s1047_s3 + $0x1f0] sm:$0xff] }
  0x28   : > { %291 = vst [vmem:[%s1052_s4 + $0xf0] sm:$0xff] %v290_v30  ;;  %293 = vst [vmem:[%s1052_s4 + $0xf8] sm:$0xff] %v292_v31 }
  0x29 PF: > { %p757_p7 = scmp.ge.s32.totalorder %s969_s15, 1  ;;  %p298_p8 = scmp.lt.s32.totalorder %s969_s15, 19 }
  0x2b   : > { %p299_p9 = pnand %p757_p7, %p298_p8 }
  0x2c   : > { %s305_s5 = sand.u32 (!%p299_p9), 1, %s945_s9   ;;  %s759_s6 = sshll.u32 (!%p299_p9), %s953_s11, 1 }
  0x2d   : > { %302 = sbr.rel (%p299_p9) target bundleno = 390 (0x186), region = 62  ;;  %s758_s7 = sshll.u32 (!%p299_p9), %s305_s5, 8 }
  0x2e   : > { %p332_p10 = scmp.lt.s32.totalorder (!%p299_p9), %s759_s6, 17  ;;  %s761_s8 = sshll.u32 (!%p299_p9), %s957_s12, 1 }
  0x2f   : > { %p340_p11 = scmp.lt.s32.totalorder (!%p299_p9), %s761_s8, 3  ;;  %s1130_s9 = scalar_lea.vmem (!%p299_p9), [#allocation3], %s758_s7 }
  0x30   : > { %p763_p12 = scmp.ne.s32.totalorder (!%p299_p9), %s953_s11, 0 }
  0x34   : > { %s1205_s6 = smov (!%p332_p10, %s759_s6), 17  ;;  %s1207_s8 = smov (!%p340_p11, %s761_s8), 3 }
  0x35   : > { %s760_s18 = sshll.u32 %s1205_s6, 2  ;;  %s762_s23 = sshll.u32 %s1207_s8, 2  ;;  %v971_v32 = vmov (!%p763_p12), 0.0  }
  0x36   : > { %s1123_s21 = scalar_lea.vmem %s1189_s0, %s760_s18  ;;  %s1128_s26 = scalar_lea.vmem %s1191_s2, %s762_s23  ;;  %349 = vst [vmem:[#allocation2] sm:$0xff] (!%p763_p12), %v971_v32  ;;  %350 = vst [vmem:[#allocation2 + $0x8] sm:$0xff] (!%p763_p12), %v971_v32 }
  0x37   : > { %348 = sbr.rel (%p763_p12) target bundleno = 62 (0x3e), region = 70 }
  0x3e PF: > { %v861_v33 = vld [vmem:[%s1130_s9 + $0x4] ss:$8 sps:$4 sm:$0xff]   ;;  %v863_v34 = vld [vmem:[%s1130_s9] ss:$8 sps:$4 sm:$0xff]   ;;  %v864_v35 = vld [vmem:[%s1130_s9 + $0x14] ss:$8 sps:$4 sm:$0xff]  }
  0x3f   : > { %553 = vmatprep.subr.bf16.mxu0 %v861_v33  ;;  %v866_v36 = vld [vmem:[%s1130_s9 + $0x10] ss:$8 sps:$4 sm:$0xff]   ;;  %v867_v37 = vld [vmem:[%s1130_s9 + $0x24] ss:$8 sps:$4 sm:$0xff]   ;;  %v869_v38 = vld [vmem:[%s1130_s9 + $0x20] ss:$8 sps:$4 sm:$0xff]  }
  0x40   : > { %554 = vmatpush1.bf16.msra.mxu0 %v863_v34  ;;  %v870_v39 = vld [vmem:[%s1130_s9 + $0x34] ss:$8 sps:$4 sm:$0xff]   ;;  %v872_v40 = vld [vmem:[%s1130_s9 + $0x30] ss:$8 sps:$4 sm:$0xff]   ;;  %v873_v41 = vld [vmem:[%s1130_s9 + $0x44] ss:$8 sps:$4 sm:$0xff]  }
  0x41   : > { %555 = vmatprep.subr.bf16.mxu0 %v864_v35  ;;  %v875_v42 = vld [vmem:[%s1130_s9 + $0x40] ss:$8 sps:$4 sm:$0xff]   ;;  %v876_v43 = vld [vmem:[%s1130_s9 + $0x54] ss:$8 sps:$4 sm:$0xff]   ;;  %v878_v44 = vld [vmem:[%s1130_s9 + $0x50] ss:$8 sps:$4 sm:$0xff]  }
  0x42   : > { %v879_v45 = vld [vmem:[%s1130_s9 + $0x64] ss:$8 sps:$4 sm:$0xff]   ;;  %v353_v46 = vld [vmem:[%s1123_s21] sm:$0xff]  ;;  %v881_v48 = vld [vmem:[%s1130_s9 + $0x60] ss:$8 sps:$4 sm:$0xff]   ;;  %p798_p13 = scmp.ne.s32.totalorder %s953_s11, 8 }
  0x43   : > { %v765_v47 = vcombine.high %v353_v46, %v353_v46  ;;  %v882_v49 = vld [vmem:[%s1130_s9 + $0x74] ss:$8 sps:$4 sm:$0xff]   ;;  %v884_v50 = vld [vmem:[%s1130_s9 + $0x70] ss:$8 sps:$4 sm:$0xff]   ;;  %v885_v51 = vld [vmem:[%s1130_s9 + $0x84] ss:$8 sps:$4 sm:$0xff]   ;;  %v764_v3 = vcombine.low %v353_v46, %v353_v46 }
  0x44   : > { %556 = vmatpush1.bf16.msra.mxu0 %v866_v36  ;;  %v887_v52 = vld [vmem:[%s1130_s9 + $0x80] ss:$8 sps:$4 sm:$0xff]   ;;  %v888_v53 = vld [vmem:[%s1130_s9 + $0x94] ss:$8 sps:$4 sm:$0xff]   ;;  %v890_v54 = vld [vmem:[%s1130_s9 + $0x90] ss:$8 sps:$4 sm:$0xff]  }
  0x45   : > { %557 = vmatprep.subr.bf16.mxu0 %v867_v37  ;;  %585 = vmatprep.mubr.bf16.mxu0 %v765_v47  ;;  %v891_v55 = vld [vmem:[%s1130_s9 + $0xa4] ss:$8 sps:$4 sm:$0xff]   ;;  %v893_v56 = vld [vmem:[%s1130_s9 + $0xa0] ss:$8 sps:$4 sm:$0xff]   ;;  %v894_v57 = vld [vmem:[%s1130_s9 + $0xb4] ss:$8 sps:$4 sm:$0xff]  }
  0x46   : > { %v896_v58 = vld [vmem:[%s1130_s9 + $0xb0] ss:$8 sps:$4 sm:$0xff]   ;;  %v897_v59 = vld [vmem:[%s1130_s9 + $0xc4] ss:$8 sps:$4 sm:$0xff]   ;;  %v899_v60 = vld [vmem:[%s1130_s9 + $0xc0] ss:$8 sps:$4 sm:$0xff]  }
  0x47   : > { %v900_v61 = vld [vmem:[%s1130_s9 + $0xd4] ss:$8 sps:$4 sm:$0xff]   ;;  %v902_v62 = vld [vmem:[%s1130_s9 + $0xd0] ss:$8 sps:$4 sm:$0xff]   ;;  %v903_v63 = vld [vmem:[%s1130_s9 + $0xe4] ss:$8 sps:$4 sm:$0xff]  }
  0x48   : > { %558 = vmatpush1.bf16.msra.mxu0 %v869_v38  ;;  %v905_v0 = vld [vmem:[%s1130_s9 + $0xe0] ss:$8 sps:$4 sm:$0xff]   ;;  %v906_v1 = vld [vmem:[%s1130_s9 + $0xf4] ss:$8 sps:$4 sm:$0xff]   ;;  %v908_v2 = vld [vmem:[%s1130_s9 + $0xf0] ss:$8 sps:$4 sm:$0xff]  }
  0x49   : > { %559 = vmatprep.subr.bf16.mxu0 %v870_v39  ;;  %v351_v4 = vld [vmem:[#allocation2] sm:$0xff]  ;;  %v352_v5 = vld [vmem:[#allocation2 + $0x8] sm:$0xff] }
  0x4c   : > { %560 = vmatpush1.bf16.msra.mxu0 %v872_v40 }
  0x4d   : > { %561 = vmatprep.subr.bf16.mxu0 %v873_v41 }
  0x50   : > { %562 = vmatpush1.bf16.msra.mxu0 %v875_v42 }
  0x51   : > { %563 = vmatprep.subr.bf16.mxu0 %v876_v43 }
  0x54   : > { %564 = vmatpush1.bf16.msra.mxu0 %v878_v44 }
  0x55   : > { %565 = vmatprep.subr.bf16.mxu0 %v879_v45 }
  0x58   : > { %566 = vmatpush1.bf16.msra.mxu0 %v881_v48 }
  0x59   : > { %567 = vmatprep.subr.bf16.mxu0 %v882_v49 }
  0x5c   : > { %568 = vmatpush1.bf16.msra.mxu0 %v884_v50 }
  0x5d   : > { %569 = vmatprep.subr.bf16.mxu0 %v885_v51 }
  0x60   : > { %570 = vmatpush1.bf16.msra.mxu0 %v887_v52 }
  0x61   : > { %571 = vmatprep.subr.bf16.mxu0 %v888_v53 }
  0x64   : > { %572 = vmatpush1.bf16.msra.mxu0 %v890_v54 }
  0x65   : > { %573 = vmatprep.subr.bf16.mxu0 %v891_v55 }
  0x68   : > { %574 = vmatpush1.bf16.msra.mxu0 %v893_v56 }
  0x69   : > { %575 = vmatprep.subr.bf16.mxu0 %v894_v57 }
  0x6c   : > { %576 = vmatpush1.bf16.msra.mxu0 %v896_v58 }
  0x6d   : > { %577 = vmatprep.subr.bf16.mxu0 %v897_v59 }
  0x70   : > { %578 = vmatpush1.bf16.msra.mxu0 %v899_v60 }
  0x71   : > { %579 = vmatprep.subr.bf16.mxu0 %v900_v61 }
  0x74   : > { %580 = vmatpush1.bf16.msra.mxu0 %v902_v62 }
  0x75   : > { %581 = vmatprep.subr.bf16.mxu0 %v903_v63 }
  0x78   : > { %582 = vmatpush1.bf16.msra.mxu0 %v905_v0 }
  0x79   : > { %583 = vmatprep.subr.bf16.mxu0 %v906_v1 }
  0x7c   : > { %584 = vmatpush1.bf16.msra.mxu0 %v908_v2 }
  0x7f   : > { %586 = vmatmul.mubr.bf16.vlgmr.msra.gmra.mrb[0].mxu0 %v764_v3 }
 0x150   : > { %601 = sbr.rel (%p798_p13) target bundleno = 390 (0x186), region = 74 }
 0x152   : > { %v587_v6 = vpop.f32.mrb[0].mxu0 }
 0x153   : > { %v594_v7 = vadd.f32 %v587_v6, %v351_v4  ;;  %v589_v8 = vpop.f32.mrb[1].mxu0 }
 0x154   : > { %v595_v9 = vadd.f32 %v589_v8, %v352_v5  ;;  %v591_v10 = vpop.f32.mrb[2].mxu0 }
 0x155   : > { %596 = vst [vmem:[#allocation2] sm:$0xff] %v594_v7  ;;  %v592_v11 = vpop.f32.mrb[3].mxu0 }
 0x156   : > { %597 = vst [vmem:[#allocation2 + $0x8] sm:$0xff] %v595_v9 }
 0x15c   : > { %v602_v12 = vld [vmem:[#allocation2] sm:$0xff] }
 0x15d   : > { %v603_v13 = vld [vmem:[#allocation2 + $0x8] sm:$0xff]  ;;  %v604_v14 = vrot.slane %v602_v12, 4  ;;  %v618_v16 = vmul.f32 %v602_v12, %v602_v12 }
 0x15e   : > { %v610_v15 = vrot.slane %v603_v13, 4  ;;  %v619_v17 = vmul.f32 %v603_v13, %v603_v13 }
 0x15f   : > { %v605_v18 = vadd.f32 %v604_v14, %v602_v12  ;;  %v620_v20 = vrot.slane %v618_v16, 4 }
 0x160   : > { %v611_v19 = vadd.f32 %v610_v15, %v603_v13  ;;  %v626_v21 = vrot.slane %v619_v17, 4 }
 0x161   : > { %v606_v22 = vrot.slane %v605_v18, 2  ;;  %v621_v24 = vadd.f32 %v620_v20, %v618_v16 }
 0x162   : > { %v612_v23 = vrot.slane %v611_v19, 2  ;;  %v627_v25 = vadd.f32 %v626_v21, %v619_v17 }
 0x163   : > { %v607_v26 = vadd.f32 %v606_v22, %v605_v18  ;;  %v622_v28 = vrot.slane %v621_v24, 2 }
 0x164   : > { %v613_v27 = vadd.f32 %v612_v23, %v611_v19  ;;  %v628_v29 = vrot.slane %v627_v25, 2 }
 0x165   : > { %v608_v30 = vrot.slane %v607_v26, 1  ;;  %v623_v32 = vadd.f32 %v622_v28, %v621_v24 }
 0x166   : > { %v614_v31 = vrot.slane %v613_v27, 1  ;;  %v629_v33 = vadd.f32 %v628_v29, %v627_v25 }
 0x167   : > { %v609_v34 = vadd.f32 %v608_v30, %v607_v26  ;;  %v624_v36 = vrot.slane %v623_v32, 1 }
 0x168   : > { %v615_v35 = vadd.f32 %v614_v31, %v613_v27  ;;  %v630_v37 = vrot.slane %v629_v33, 1 }
 0x169   : > { %v616_v38 = vmul.f32 0.5, %v609_v34  ;;  %v625_v40 = vadd.f32 %v624_v36, %v623_v32 }
 0x16a   : > { %v617_v39 = vmul.f32 0.5, %v615_v35  ;;  %v631_v41 = vadd.f32 %v630_v37, %v629_v33 }
 0x16b   : > { %v632_v42 = vmul.f32 0.5, %v625_v40  ;;  %v634_v44 = vmul.f32 %v616_v38, %v616_v38  ;;  %v640_v52 = vsub.f32 %v602_v12, %v616_v38 }
 0x16c   : > { %v633_v43 = vmul.f32 0.5, %v631_v41  ;;  %v635_v45 = vmul.f32 %v617_v39, %v617_v39  ;;  %v641_v53 = vsub.f32 %v603_v13, %v617_v39 }
 0x16d   : > { %v636_v46 = vsub.f32 %v632_v42, %v634_v44 }
 0x16e   : > { %v637_v47 = vsub.f32 %v633_v43, %v635_v45 }
 0x16f   : > { %v638_v48 = vmax.f32 %v636_v46, 0.0 }
 0x170   : > { %v639_v49 = vmax.f32 %v637_v47, 0.0 }
 0x171   : > { %v642_v50 = vadd.f32 1e-05, %v638_v48 }
 0x172   : > { %v643_v51 = vadd.f32 1e-05, %v639_v49 }
 0x173   : > { %911 = vrsqrt.f32 %v642_v50 }
 0x174   : > { %913 = vrsqrt.f32 %v643_v51 }
 0x17d   : > { %v912_v54 = vpop.eup %911 }
 0x17e   : > { %v914_v55 = vpop.eup %913  ;;  %v646_v56 = vmul.f32 %v912_v54, %v640_v52 }
 0x17f   : > { %v647_v57 = vmul.f32 %v914_v55, %v641_v53 }
 0x180   : > { %v648_v58 = vmax.f32 %v646_v56, 0.0 }
 0x181   : > { %v649_v59 = vmax.f32 %v647_v57, 0.0 }
 0x183   : > { %v803_v60 = vpack.c.bf16 %v649_v59, %v648_v58 }
 0x185   : > { %658 = vst [vmem:[%s1128_s26] sm:$0xff] %v803_v60 }
 0x186 PF: > { %s12_s15 = sadd.s32 1, %s969_s15   ;;  %s1192_s9 = smov %s949_s10 }
 0x187   : > { %p9_p0 = scmp.ge.s32.totalorder %s12_s15, 20   ;;  %s1193_s10 = smov %s1038_s22 }
 0x188   : > { %s1194_s11 = smov %s961_s13  ;;  %s1195_s12 = smov %s965_s14 }
 0x189   : > { %s1196_s13 = smov %s1199_s16  ;;  %s1197_s14 = smov %s1203_s17 }
 0x18a   :  { %11 = sbr.rel (!%p9_p0) target bundleno = 4 (0x4), region = 112 }

// kernel: _lambda_.25
= control target key start
LH: loop header
LB: loop body
LE: loop exit
PB: predicated region body
PF: predicated region fallthrough
CT: control target
= control target key end

     0   :  { %s945_s9 = smov 0   ;;  %s947_s10 = smov 0   ;;  %s1121_s0 = inlined_call_operand.vmem [shape: bf16[8,256], index: 0, kind: input, shape index: {}]   ;;  %s1122_s1 = inlined_call_operand.vmem [shape: bf16[256,512], index: 1, kind: input, shape index: {}]   ;;  %s1123_s2 = inlined_call_operand.vmem [shape: bf16[8,512], index: 2, kind: output, shape index: {}]  }
   0x1   :  { %s949_s11 = smov 0   ;;  %s951_s12 = smov 0  }
   0x2   :  { %s953_s13 = smov 0  }
   0x3 LB: > { %s24_s14 = sadd.s32 1, %s924_s12  ;;  %p66_p1 = scmp.ne.s32.totalorder %s916_s10, %s912_s9  ;;  %s928_s13 = sphi %s953_s13, %s12_s13   ;;  %s924_s12 = sphi %s951_s12, %s1127_s12   ;;  %s920_s11 = sphi %s949_s11, %s1126_s11   ;;  %s916_s10 = sphi %s947_s10, %s1125_s10   ;;  %s912_s9 = sphi %s945_s9, %s1124_s9  }
   0x4   : > { %p26_p0 = scmp.ge.s32.totalorder %s24_s14, 2  ;;  %p67_p2 = scmp.eq.s32.totalorder %s928_s13, 0 }
   0x5   : > { %s59_s16 = sadd.s32 1, %s916_s10  ;;  %p749_p5 = scmp.ge.s32.totalorder %s928_s13, 2 }
   0x6   : > { %s1129_s14 = smov (%p26_p0, %s24_s14), 0  ;;  %p68_p3 = por %p67_p2, %p66_p1 }
   0x7   : > { %s55_s15 = ssub.s32 %s924_s12, %s1129_s14  ;;  %127 = sbr.rel (%p749_p5) target bundleno = 34 (0x22), region = 20 }
   0x8   : > { %p57_p4 = scmp.eq.s32.totalorder %s55_s15, 0 }
   0xa   : > { %s980_s17 = scalar_select %p57_p4, %s916_s10, %s59_s16  }
   0xe   : > { %130 = sbr.rel (!%p68_p3) target bundleno = 34 (0x22), region = 24  ;;  %s132_s18 = sand.u32 (%p68_p3), 1, %s916_s10  }
   0xf   : > { %s794_s19 = sshll.u32 (%p68_p3), %s924_s12, 3  ;;  %s750_s20 = sshll.u32 (%p68_p3), %s132_s18, 8 }
  0x10   : > { %s988_s23 = scalar_lea.vmem (%p68_p3), %s1122_s1, %s794_s19  ;;  %s993_s24 = scalar_lea.vmem (%p68_p3), [#allocation3], %s750_s20 }
  0x11   : > { %v230_v0 = vld [vmem:[%s988_s23] sm:$0xff] (%p68_p3)  ;;  %v232_v1 = vld [vmem:[%s988_s23 + $0x10] sm:$0xff] (%p68_p3) }
  0x12   : > { %v234_v2 = vld [vmem:[%s988_s23 + $0x20] sm:$0xff] (%p68_p3)  ;;  %231 = vst [vmem:[%s993_s24] sm:$0xff] (%p68_p3), %v230_v0  ;;  %233 = vst [vmem:[%s993_s24 + $0x8] sm:$0xff] (%p68_p3), %v232_v1  ;;  %v236_v3 = vld [vmem:[%s988_s23 + $0x30] sm:$0xff] (%p68_p3) }
  0x13   : > { %235 = vst [vmem:[%s993_s24 + $0x10] sm:$0xff] (%p68_p3), %v234_v2  ;;  %v238_v4 = vld [vmem:[%s988_s23 + $0x40] sm:$0xff] (%p68_p3)  ;;  %v240_v5 = vld [vmem:[%s988_s23 + $0x50] sm:$0xff] (%p68_p3)  ;;  %237 = vst [vmem:[%s993_s24 + $0x18] sm:$0xff] (%p68_p3), %v236_v3 }
  0x14   : > { %239 = vst [vmem:[%s993_s24 + $0x20] sm:$0xff] (%p68_p3), %v238_v4  ;;  %241 = vst [vmem:[%s993_s24 + $0x28] sm:$0xff] (%p68_p3), %v240_v5  ;;  %v242_v6 = vld [vmem:[%s988_s23 + $0x60] sm:$0xff] (%p68_p3)  ;;  %v244_v7 = vld [vmem:[%s988_s23 + $0x70] sm:$0xff] (%p68_p3) }
  0x15   : > { %v246_v8 = vld [vmem:[%s988_s23 + $0x80] sm:$0xff]  ;;  %243 = vst [vmem:[%s993_s24 + $0x30] sm:$0xff] %v242_v6  ;;  %245 = vst [vmem:[%s993_s24 + $0x38] sm:$0xff] %v244_v7  ;;  %v248_v9 = vld [vmem:[%s988_s23 + $0x90] sm:$0xff] }
  0x16   : > { %247 = vst [vmem:[%s993_s24 + $0x40] sm:$0xff] %v246_v8  ;;  %v250_v10 = vld [vmem:[%s988_s23 + $0xa0] sm:$0xff]  ;;  %v252_v11 = vld [vmem:[%s988_s23 + $0xb0] sm:$0xff]  ;;  %249 = vst [vmem:[%s993_s24 + $0x48] sm:$0xff] %v248_v9 }
  0x17   : > { %251 = vst [vmem:[%s993_s24 + $0x50] sm:$0xff] %v250_v10  ;;  %253 = vst [vmem:[%s993_s24 + $0x58] sm:$0xff] %v252_v11  ;;  %v254_v12 = vld [vmem:[%s988_s23 + $0xc0] sm:$0xff]  ;;  %v256_v13 = vld [vmem:[%s988_s23 + $0xd0] sm:$0xff] }
  0x18   : > { %v258_v14 = vld [vmem:[%s988_s23 + $0xe0] sm:$0xff]  ;;  %255 = vst [vmem:[%s993_s24 + $0x60] sm:$0xff] %v254_v12  ;;  %257 = vst [vmem:[%s993_s24 + $0x68] sm:$0xff] %v256_v13  ;;  %v260_v15 = vld [vmem:[%s988_s23 + $0xf0] sm:$0xff] }
  0x19   : > { %259 = vst [vmem:[%s993_s24 + $0x70] sm:$0xff] %v258_v14  ;;  %v262_v16 = vld [vmem:[%s988_s23 + $0x100] sm:$0xff]  ;;  %v264_v17 = vld [vmem:[%s988_s23 + $0x110] sm:$0xff]  ;;  %261 = vst [vmem:[%s993_s24 + $0x78] sm:$0xff] %v260_v15 }
  0x1a   : > { %263 = vst [vmem:[%s993_s24 + $0x80] sm:$0xff] %v262_v16  ;;  %265 = vst [vmem:[%s993_s24 + $0x88] sm:$0xff] %v264_v17  ;;  %v266_v18 = vld [vmem:[%s988_s23 + $0x120] sm:$0xff]  ;;  %v268_v19 = vld [vmem:[%s988_s23 + $0x130] sm:$0xff] }
  0x1b   : > { %v270_v20 = vld [vmem:[%s988_s23 + $0x140] sm:$0xff]  ;;  %267 = vst [vmem:[%s993_s24 + $0x90] sm:$0xff] %v266_v18  ;;  %269 = vst [vmem:[%s993_s24 + $0x98] sm:$0xff] %v268_v19  ;;  %v272_v21 = vld [vmem:[%s988_s23 + $0x150] sm:$0xff] }
  0x1c   : > { %271 = vst [vmem:[%s993_s24 + $0xa0] sm:$0xff] %v270_v20  ;;  %v274_v22 = vld [vmem:[%s988_s23 + $0x160] sm:$0xff]  ;;  %v276_v23 = vld [vmem:[%s988_s23 + $0x170] sm:$0xff]  ;;  %273 = vst [vmem:[%s993_s24 + $0xa8] sm:$0xff] %v272_v21 }
  0x1d   : > { %275 = vst [vmem:[%s993_s24 + $0xb0] sm:$0xff] %v274_v22  ;;  %277 = vst [vmem:[%s993_s24 + $0xb8] sm:$0xff] %v276_v23  ;;  %v278_v24 = vld [vmem:[%s988_s23 + $0x180] sm:$0xff]  ;;  %v280_v25 = vld [vmem:[%s988_s23 + $0x190] sm:$0xff] }
  0x1e   : > { %v282_v26 = vld [vmem:[%s988_s23 + $0x1a0] sm:$0xff]  ;;  %279 = vst [vmem:[%s993_s24 + $0xc0] sm:$0xff] %v278_v24  ;;  %281 = vst [vmem:[%s993_s24 + $0xc8] sm:$0xff] %v280_v25  ;;  %v284_v27 = vld [vmem:[%s988_s23 + $0x1b0] sm:$0xff] }
  0x1f   : > { %283 = vst [vmem:[%s993_s24 + $0xd0] sm:$0xff] %v282_v26  ;;  %v286_v28 = vld [vmem:[%s988_s23 + $0x1c0] sm:$0xff]  ;;  %v288_v29 = vld [vmem:[%s988_s23 + $0x1d0] sm:$0xff]  ;;  %285 = vst [vmem:[%s993_s24 + $0xd8] sm:$0xff] %v284_v27 }
  0x20   : > { %287 = vst [vmem:[%s993_s24 + $0xe0] sm:$0xff] %v286_v28  ;;  %289 = vst [vmem:[%s993_s24 + $0xe8] sm:$0xff] %v288_v29  ;;  %v290_v30 = vld [vmem:[%s988_s23 + $0x1e0] sm:$0xff]  ;;  %v292_v31 = vld [vmem:[%s988_s23 + $0x1f0] sm:$0xff] }
  0x21   : > { %291 = vst [vmem:[%s993_s24 + $0xf0] sm:$0xff] %v290_v30  ;;  %293 = vst [vmem:[%s993_s24 + $0xf8] sm:$0xff] %v292_v31 }
  0x22 PF: > { %p753_p6 = scmp.ge.s32.totalorder %s928_s13, 1  ;;  %p298_p7 = scmp.lt.s32.totalorder %s928_s13, 3 }
  0x24   : > { %p299_p8 = pnand %p753_p6, %p298_p7 }
  0x25   : > { %s305_s25 = sand.u32 (!%p299_p8), 1, %s912_s9   ;;  %v1062_v32 = vld [vmem:[%s1121_s0] sm:$0xff] (!%p299_p8)  ;;  %s755_s30 = sshll.u32 (!%p299_p8), %s920_s11, 1 }
  0x26   : > { %302 = sbr.rel (%p299_p8) target bundleno = 356 (0x164), region = 62  ;;  %s754_s28 = sshll.u32 (!%p299_p8), %s305_s25, 8  ;;  %v758_v33 = vcombine.high (!%p299_p8), %v1062_v32, %v1062_v32  ;;  %v757_v2 = vcombine.low (!%p299_p8), %v1062_v32, %v1062_v32 }
  0x27   : > { %s1066_s29 = scalar_lea.vmem (!%p299_p8), [#allocation3], %s754_s28  ;;  %p340_p9 = scmp.lt.s32.totalorder (!%p299_p8), %s755_s30, 3 }
  0x28   : > { %v836_v34 = vld [vmem:[%s1066_s29 + $0x4] ss:$8 sps:$4 sm:$0xff] (!%p299_p8)   ;;  %585 = vmatprep.mubr.bf16.mxu0 (!%p299_p8), %v758_v33  ;;  %v838_v35 = vld [vmem:[%s1066_s29] ss:$8 sps:$4 sm:$0xff] (!%p299_p8)   ;;  %v839_v36 = vld [vmem:[%s1066_s29 + $0x14] ss:$8 sps:$4 sm:$0xff] (!%p299_p8)  }
  0x29   : > { %553 = vmatprep.subr.bf16.mxu0 (!%p299_p8), %v836_v34  ;;  %v841_v37 = vld [vmem:[%s1066_s29 + $0x10] ss:$8 sps:$4 sm:$0xff] (!%p299_p8)   ;;  %v842_v38 = vld [vmem:[%s1066_s29 + $0x24] ss:$8 sps:$4 sm:$0xff] (!%p299_p8)   ;;  %v844_v39 = vld [vmem:[%s1066_s29 + $0x20] ss:$8 sps:$4 sm:$0xff] (!%p299_p8)  }
  0x2a   : > { %554 = vmatpush1.bf16.msra.mxu0 (!%p299_p8), %v838_v35  ;;  %v845_v40 = vld [vmem:[%s1066_s29 + $0x34] ss:$8 sps:$4 sm:$0xff] (!%p299_p8)   ;;  %v847_v41 = vld [vmem:[%s1066_s29 + $0x30] ss:$8 sps:$4 sm:$0xff] (!%p299_p8)   ;;  %v848_v42 = vld [vmem:[%s1066_s29 + $0x44] ss:$8 sps:$4 sm:$0xff] (!%p299_p8)  }
  0x2b   : > { %555 = vmatprep.subr.bf16.mxu0 (!%p299_p8), %v839_v36  ;;  %v850_v43 = vld [vmem:[%s1066_s29 + $0x40] ss:$8 sps:$4 sm:$0xff] (!%p299_p8)   ;;  %v851_v44 = vld [vmem:[%s1066_s29 + $0x54] ss:$8 sps:$4 sm:$0xff] (!%p299_p8)   ;;  %v853_v45 = vld [vmem:[%s1066_s29 + $0x50] ss:$8 sps:$4 sm:$0xff] (!%p299_p8)  }
  0x2c   : > { %v854_v46 = vld [vmem:[%s1066_s29 + $0x64] ss:$8 sps:$4 sm:$0xff] (!%p299_p8)   ;;  %v856_v47 = vld [vmem:[%s1066_s29 + $0x60] ss:$8 sps:$4 sm:$0xff] (!%p299_p8)   ;;  %v857_v48 = vld [vmem:[%s1066_s29 + $0x74] ss:$8 sps:$4 sm:$0xff] (!%p299_p8)  }
  0x2d   : > { %v859_v49 = vld [vmem:[%s1066_s29 + $0x70] ss:$8 sps:$4 sm:$0xff]   ;;  %v860_v50 = vld [vmem:[%s1066_s29 + $0x84] ss:$8 sps:$4 sm:$0xff]   ;;  %v862_v51 = vld [vmem:[%s1066_s29 + $0x80] ss:$8 sps:$4 sm:$0xff]  }
  0x2e   : > { %556 = vmatpush1.bf16.msra.mxu0 %v841_v37  ;;  %v863_v52 = vld [vmem:[%s1066_s29 + $0x94] ss:$8 sps:$4 sm:$0xff]   ;;  %v865_v53 = vld [vmem:[%s1066_s29 + $0x90] ss:$8 sps:$4 sm:$0xff]   ;;  %v866_v54 = vld [vmem:[%s1066_s29 + $0xa4] ss:$8 sps:$4 sm:$0xff]  }
  0x2f   : > { %557 = vmatprep.subr.bf16.mxu0 %v842_v38  ;;  %v868_v55 = vld [vmem:[%s1066_s29 + $0xa0] ss:$8 sps:$4 sm:$0xff]   ;;  %v869_v56 = vld [vmem:[%s1066_s29 + $0xb4] ss:$8 sps:$4 sm:$0xff]   ;;  %v871_v57 = vld [vmem:[%s1066_s29 + $0xb0] ss:$8 sps:$4 sm:$0xff]  }
  0x30   : > { %v872_v58 = vld [vmem:[%s1066_s29 + $0xc4] ss:$8 sps:$4 sm:$0xff]   ;;  %v874_v59 = vld [vmem:[%s1066_s29 + $0xc0] ss:$8 sps:$4 sm:$0xff]   ;;  %v875_v60 = vld [vmem:[%s1066_s29 + $0xd4] ss:$8 sps:$4 sm:$0xff]  }
  0x31   : > { %v877_v61 = vld [vmem:[%s1066_s29 + $0xd0] ss:$8 sps:$4 sm:$0xff]   ;;  %v878_v62 = vld [vmem:[%s1066_s29 + $0xe4] ss:$8 sps:$4 sm:$0xff]   ;;  %v880_v63 = vld [vmem:[%s1066_s29 + $0xe0] ss:$8 sps:$4 sm:$0xff]  }
  0x32   : > { %558 = vmatpush1.bf16.msra.mxu0 %v844_v39  ;;  %v881_v0 = vld [vmem:[%s1066_s29 + $0xf4] ss:$8 sps:$4 sm:$0xff]   ;;  %v883_v1 = vld [vmem:[%s1066_s29 + $0xf0] ss:$8 sps:$4 sm:$0xff]   ;;  %s1131_s30 = smov (!%p340_p9, %s755_s30), 3 }
  0x33   : > { %559 = vmatprep.subr.bf16.mxu0 %v845_v40  ;;  %s756_s3 = sshll.u32 %s1131_s30, 2 }
  0x34   : > { %s343_s6 = scalar_lea.vmem %s1123_s2, %s756_s3 }
  0x36   : > { %560 = vmatpush1.bf16.msra.mxu0 %v847_v41 }
  0x37   : > { %561 = vmatprep.subr.bf16.mxu0 %v848_v42 }
  0x3a   : > { %562 = vmatpush1.bf16.msra.mxu0 %v850_v43 }
  0x3b   : > { %563 = vmatprep.subr.bf16.mxu0 %v851_v44 }
  0x3e   : > { %564 = vmatpush1.bf16.msra.mxu0 %v853_v45 }
  0x3f   : > { %565 = vmatprep.subr.bf16.mxu0 %v854_v46 }
  0x42   : > { %566 = vmatpush1.bf16.msra.mxu0 %v856_v47 }
  0x43   : > { %567 = vmatprep.subr.bf16.mxu0 %v857_v48 }
  0x46   : > { %568 = vmatpush1.bf16.msra.mxu0 %v859_v49 }
  0x47   : > { %569 = vmatprep.subr.bf16.mxu0 %v860_v50 }
  0x4a   : > { %570 = vmatpush1.bf16.msra.mxu0 %v862_v51 }
  0x4b   : > { %571 = vmatprep.subr.bf16.mxu0 %v863_v52 }
  0x4e   : > { %572 = vmatpush1.bf16.msra.mxu0 %v865_v53 }
  0x4f   : > { %573 = vmatprep.subr.bf16.mxu0 %v866_v54 }
  0x52   : > { %574 = vmatpush1.bf16.msra.mxu0 %v868_v55 }
  0x53   : > { %575 = vmatprep.subr.bf16.mxu0 %v869_v56 }
  0x56   : > { %576 = vmatpush1.bf16.msra.mxu0 %v871_v57 }
  0x57   : > { %577 = vmatprep.subr.bf16.mxu0 %v872_v58 }
  0x5a   : > { %578 = vmatpush1.bf16.msra.mxu0 %v874_v59 }
  0x5b   : > { %579 = vmatprep.subr.bf16.mxu0 %v875_v60 }
  0x5e   : > { %580 = vmatpush1.bf16.msra.mxu0 %v877_v61 }
  0x5f   : > { %581 = vmatprep.subr.bf16.mxu0 %v878_v62 }
  0x62   : > { %582 = vmatpush1.bf16.msra.mxu0 %v880_v63 }
  0x63   : > { %583 = vmatprep.subr.bf16.mxu0 %v881_v0 }
  0x66   : > { %584 = vmatpush1.bf16.msra.mxu0 %v883_v1 }
  0x69   : > { %586 = vmatmul.mubr.bf16.vlgmr.msra.gmra.mrb[0].mxu0 %v757_v2 }
 0x13c   : > { %v587_v3 = vpop.f32.mrb[0].mxu0 }
 0x13d   : > { %v603_v4 = vrot.slane %v587_v3, 4  ;;  %v617_v5 = vmul.f32 %v587_v3, %v587_v3  ;;  %v589_v6 = vpop.f32.mrb[1].mxu0 }
 0x13e   : > { %v609_v7 = vrot.slane %v589_v6, 4  ;;  %v618_v8 = vmul.f32 %v589_v6, %v589_v6  ;;  %v591_v9 = vpop.f32.mrb[2].mxu0 }
 0x13f   : > { %v604_v10 = vadd.f32 %v603_v4, %v587_v3  ;;  %v619_v11 = vrot.slane %v617_v5, 4  ;;  %v592_v12 = vpop.f32.mrb[3].mxu0 }
 0x140   : > { %v610_v13 = vadd.f32 %v609_v7, %v589_v6  ;;  %v625_v14 = vrot.slane %v618_v8, 4 }
 0x141   : > { %v605_v15 = vrot.slane %v604_v10, 2  ;;  %v620_v16 = vadd.f32 %v619_v11, %v617_v5 }
 0x142   : > { %v611_v17 = vrot.slane %v610_v13, 2  ;;  %v626_v18 = vadd.f32 %v625_v14, %v618_v8 }
 0x143   : > { %v606_v19 = vadd.f32 %v605_v15, %v604_v10  ;;  %v621_v20 = vrot.slane %v620_v16, 2 }
 0x144   : > { %v612_v21 = vadd.f32 %v611_v17, %v610_v13  ;;  %v627_v22 = vrot.slane %v626_v18, 2 }
 0x145   : > { %v607_v23 = vrot.slane %v606_v19, 1  ;;  %v622_v24 = vadd.f32 %v621_v20, %v620_v16 }
 0x146   : > { %v613_v25 = vrot.slane %v612_v21, 1  ;;  %v628_v26 = vadd.f32 %v627_v22, %v626_v18 }
 0x147   : > { %v608_v27 = vadd.f32 %v607_v23, %v606_v19  ;;  %v623_v28 = vrot.slane %v622_v24, 1 }
 0x148   : > { %v614_v29 = vadd.f32 %v613_v25, %v612_v21  ;;  %v629_v30 = vrot.slane %v628_v26, 1 }
 0x149   : > { %v615_v31 = vmul.f32 0.5, %v608_v27  ;;  %v624_v32 = vadd.f32 %v623_v28, %v622_v24 }
 0x14a   : > { %v616_v33 = vmul.f32 0.5, %v614_v29  ;;  %v630_v34 = vadd.f32 %v629_v30, %v628_v26 }
 0x14b   : > { %v631_v35 = vmul.f32 0.5, %v624_v32  ;;  %v633_v36 = vmul.f32 %v615_v31, %v615_v31  ;;  %v639_v45 = vsub.f32 %v587_v3, %v615_v31 }
 0x14c   : > { %v632_v37 = vmul.f32 0.5, %v630_v34  ;;  %v634_v38 = vmul.f32 %v616_v33, %v616_v33  ;;  %v640_v47 = vsub.f32 %v589_v6, %v616_v33 }
 0x14d   : > { %v635_v39 = vsub.f32 %v631_v35, %v633_v36 }
 0x14e   : > { %v636_v40 = vsub.f32 %v632_v37, %v634_v38 }
 0x14f   : > { %v637_v41 = vmax.f32 %v635_v39, 0.0 }
 0x150   : > { %v638_v42 = vmax.f32 %v636_v40, 0.0 }
 0x151   : > { %v641_v43 = vadd.f32 1e-05, %v637_v41 }
 0x152   : > { %v642_v44 = vadd.f32 1e-05, %v638_v42 }
 0x153   : > { %886 = vrsqrt.f32 %v641_v43 }
 0x154   : > { %888 = vrsqrt.f32 %v642_v44 }
 0x15d   : > { %v887_v46 = vpop.eup %886 }
 0x15e   : > { %v889_v48 = vpop.eup %888  ;;  %v645_v49 = vmul.f32 %v887_v46, %v639_v45 }
 0x15f   : > { %v646_v50 = vmul.f32 %v889_v48, %v640_v47 }
 0x161   : > { %v795_v51 = vpack.c.bf16 %v646_v50, %v645_v49 }
 0x163   : > { %655 = vst [vmem:[%s343_s6] sm:$0xff] %v795_v51 }
 0x164 PF: > { %s12_s13 = sadd.s32 1, %s928_s13   ;;  %s1124_s9 = smov %s916_s10 }
 0x165   : > { %p9_p10 = scmp.ge.s32.totalorder %s12_s13, 4   ;;  %s1125_s10 = smov %s980_s17 }
 0x166   : > { %s1126_s11 = smov %s924_s12  ;;  %s1127_s12 = smov %s1129_s14 }
 0x167   :  { %11 = sbr.rel (!%p9_p10) target bundleno = 3 (0x3), region = 112 }

// kernel: _lambda_.26
= control target key start
LH: loop header
LB: loop body
LE: loop exit
PB: predicated region body
PF: predicated region fallthrough
CT: control target
= control target key end

     0   :  { %s1513_s12 = smov 0   ;;  %s1515_s13 = smov 0   ;;  %s1818_s0 = inlined_call_operand.vmem [shape: bf16[8,4608], index: 0, kind: input, shape index: {}]   ;;  %s1819_s1 = inlined_call_operand.vmem [shape: bf16[4608,512], index: 1, kind: input, shape index: {}]   ;;  %s1820_s2 = inlined_call_operand.vmem [shape: bf16[8,512], index: 2, kind: input, shape index: {}]   ;;  %s1821_s3 = inlined_call_operand.vmem [shape: bf16[8,512], index: 3, kind: output, shape index: {}]  }
   0x1   :  { %s1517_s14 = smov 0   ;;  %s1519_s15 = smov 0  }
   0x2   :  { %s1521_s16 = smov 0   ;;  %s1523_s17 = smov 0  }
   0x3   :  { %s1525_s18 = smov 0  }
   0x4 LB: > { %s22_s19 = sadd.s32 1, %s1482_s16  ;;  %s25_s20 = sadd.s32 1, %s1486_s17  ;;  %s1490_s18 = sphi %s1525_s18, %s13_s18   ;;  %s1486_s17 = sphi %s1523_s17, %s1827_s17   ;;  %s1482_s16 = sphi %s1521_s16, %s1826_s16   ;;  %s1478_s15 = sphi %s1519_s15, %s1825_s15   ;;  %s1474_s14 = sphi %s1517_s14, %s1824_s14   ;;  %s1470_s13 = sphi %s1515_s13, %s1823_s13   ;;  %s1466_s12 = sphi %s1513_s12, %s1822_s12  }
   0x5   : > { %p23_p0 = scmp.ge.s32.totalorder %s22_s19, 9  ;;  %p67_p1 = scmp.ne.s32.totalorder %s1470_s13, %s1466_s12 }
   0x6   : > { %p68_p2 = scmp.eq.s32.totalorder %s1490_s18, 0  ;;  %s60_s24 = sadd.s32 1, %s1470_s13 }
   0x7   : > { %s1829_s19 = smov (%p23_p0, %s22_s19), 0  ;;  %s1831_s20 = smov (!%p23_p0, %s25_s20), %s1486_s17 }
   0x8   : > { %p69_p3 = por %p68_p2, %p67_p1  ;;  %p27_p4 = scmp.ge.s32.totalorder %s1831_s20, 2 }
   0x9   : > { %s55_s21 = ssub.s32 %s1482_s16, %s1829_s19  ;;  %p1186_p6 = scmp.ge.s32.totalorder %s1490_s18, 18 }
   0xa   : > { %s1833_s20 = smov (%p27_p4, %s1831_s20), 0 }
   0xb   : > { %s56_s22 = ssub.s32 %s1486_s17, %s1833_s20  ;;  %145 = sbr.rel (%p1186_p6) target bundleno = 57 (0x39), region = 16 }
   0xc   : > { %s57_s23 = sor.u32 %s56_s22, %s55_s21 }
   0xd   : > { %p58_p5 = scmp.eq.s32.totalorder %s57_s23, 0 }
   0xf   : > { %s1564_s25 = scalar_select %p58_p5, %s1470_s13, %s60_s24  }
  0x12   : > { %157 = sbr.rel (!%p69_p3) target bundleno = 57 (0x39), region = 24  ;;  %s159_s26 = sand.u32 (%p69_p3), 1, %s1470_s13  }
  0x13   : > { %s1189_s27 = sshll.u32 (%p69_p3), %s1486_s17, 1  ;;  %s1187_s28 = sshll.u32 (%p69_p3), %s159_s26, 9 }
  0x14   : > { %s1273_s29 = sshll.u32 (%p69_p3), %s1482_s16, 8  ;;  %s1578_s8 = scalar_lea.vmem (%p69_p3), [#allocation3], %s1187_s28 }
  0x15   : > { %s165_s30 = sadd.s32 (%p69_p3), %s1273_s29, %s1189_s27 }
  0x16   : > { %s1191_s4 = sshll.u32 (%p69_p3), %s165_s30, 2 }
  0x17   : > { %s1573_s7 = scalar_lea.vmem (%p69_p3), %s1819_s1, %s1191_s4 }
  0x18   : > { %v321_v0 = vld [vmem:[%s1573_s7] sm:$0xff] (%p69_p3)  ;;  %v323_v1 = vld [vmem:[%s1573_s7 + $0x10] sm:$0xff] (%p69_p3) }
  0x19   : > { %v325_v2 = vld [vmem:[%s1573_s7 + $0x20] sm:$0xff]  ;;  %322 = vst [vmem:[%s1578_s8] sm:$0xff] %v321_v0  ;;  %324 = vst [vmem:[%s1578_s8 + $0x8] sm:$0xff] %v323_v1  ;;  %v327_v3 = vld [vmem:[%s1573_s7 + $0x30] sm:$0xff] }
  0x1a   : > { %326 = vst [vmem:[%s1578_s8 + $0x10] sm:$0xff] %v325_v2  ;;  %v329_v4 = vld [vmem:[%s1573_s7 + $0x40] sm:$0xff]  ;;  %v331_v5 = vld [vmem:[%s1573_s7 + $0x50] sm:$0xff]  ;;  %328 = vst [vmem:[%s1578_s8 + $0x18] sm:$0xff] %v327_v3 }
  0x1b   : > { %330 = vst [vmem:[%s1578_s8 + $0x20] sm:$0xff] %v329_v4  ;;  %332 = vst [vmem:[%s1578_s8 + $0x28] sm:$0xff] %v331_v5  ;;  %v333_v6 = vld [vmem:[%s1573_s7 + $0x60] sm:$0xff]  ;;  %v335_v7 = vld [vmem:[%s1573_s7 + $0x70] sm:$0xff] }
  0x1c   : > { %v337_v8 = vld [vmem:[%s1573_s7 + $0x80] sm:$0xff]  ;;  %334 = vst [vmem:[%s1578_s8 + $0x30] sm:$0xff] %v333_v6  ;;  %336 = vst [vmem:[%s1578_s8 + $0x38] sm:$0xff] %v335_v7  ;;  %v339_v9 = vld [vmem:[%s1573_s7 + $0x90] sm:$0xff] }
  0x1d   : > { %338 = vst [vmem:[%s1578_s8 + $0x40] sm:$0xff] %v337_v8  ;;  %v341_v10 = vld [vmem:[%s1573_s7 + $0xa0] sm:$0xff]  ;;  %v343_v11 = vld [vmem:[%s1573_s7 + $0xb0] sm:$0xff]  ;;  %340 = vst [vmem:[%s1578_s8 + $0x48] sm:$0xff] %v339_v9 }
  0x1e   : > { %342 = vst [vmem:[%s1578_s8 + $0x50] sm:$0xff] %v341_v10  ;;  %344 = vst [vmem:[%s1578_s8 + $0x58] sm:$0xff] %v343_v11  ;;  %v345_v12 = vld [vmem:[%s1573_s7 + $0xc0] sm:$0xff]  ;;  %v347_v13 = vld [vmem:[%s1573_s7 + $0xd0] sm:$0xff] }
  0x1f   : > { %v349_v14 = vld [vmem:[%s1573_s7 + $0xe0] sm:$0xff]  ;;  %346 = vst [vmem:[%s1578_s8 + $0x60] sm:$0xff] %v345_v12  ;;  %348 = vst [vmem:[%s1578_s8 + $0x68] sm:$0xff] %v347_v13  ;;  %v351_v15 = vld [vmem:[%s1573_s7 + $0xf0] sm:$0xff] }
  0x20   : > { %350 = vst [vmem:[%s1578_s8 + $0x70] sm:$0xff] %v349_v14  ;;  %v353_v16 = vld [vmem:[%s1573_s7 + $0x100] sm:$0xff]  ;;  %v355_v17 = vld [vmem:[%s1573_s7 + $0x110] sm:$0xff]  ;;  %352 = vst [vmem:[%s1578_s8 + $0x78] sm:$0xff] %v351_v15 }
  0x21   : > { %354 = vst [vmem:[%s1578_s8 + $0x80] sm:$0xff] %v353_v16  ;;  %356 = vst [vmem:[%s1578_s8 + $0x88] sm:$0xff] %v355_v17  ;;  %v357_v18 = vld [vmem:[%s1573_s7 + $0x120] sm:$0xff]  ;;  %v359_v19 = vld [vmem:[%s1573_s7 + $0x130] sm:$0xff] }
  0x22   : > { %v361_v20 = vld [vmem:[%s1573_s7 + $0x140] sm:$0xff]  ;;  %358 = vst [vmem:[%s1578_s8 + $0x90] sm:$0xff] %v357_v18  ;;  %360 = vst [vmem:[%s1578_s8 + $0x98] sm:$0xff] %v359_v19  ;;  %v363_v21 = vld [vmem:[%s1573_s7 + $0x150] sm:$0xff] }
  0x23   : > { %362 = vst [vmem:[%s1578_s8 + $0xa0] sm:$0xff] %v361_v20  ;;  %v365_v22 = vld [vmem:[%s1573_s7 + $0x160] sm:$0xff]  ;;  %v367_v23 = vld [vmem:[%s1573_s7 + $0x170] sm:$0xff]  ;;  %364 = vst [vmem:[%s1578_s8 + $0xa8] sm:$0xff] %v363_v21 }
  0x24   : > { %366 = vst [vmem:[%s1578_s8 + $0xb0] sm:$0xff] %v365_v22  ;;  %368 = vst [vmem:[%s1578_s8 + $0xb8] sm:$0xff] %v367_v23  ;;  %v369_v24 = vld [vmem:[%s1573_s7 + $0x180] sm:$0xff]  ;;  %v371_v25 = vld [vmem:[%s1573_s7 + $0x190] sm:$0xff] }
  0x25   : > { %v373_v26 = vld [vmem:[%s1573_s7 + $0x1a0] sm:$0xff]  ;;  %370 = vst [vmem:[%s1578_s8 + $0xc0] sm:$0xff] %v369_v24  ;;  %372 = vst [vmem:[%s1578_s8 + $0xc8] sm:$0xff] %v371_v25  ;;  %v375_v27 = vld [vmem:[%s1573_s7 + $0x1b0] sm:$0xff] }
  0x26   : > { %374 = vst [vmem:[%s1578_s8 + $0xd0] sm:$0xff] %v373_v26  ;;  %v377_v28 = vld [vmem:[%s1573_s7 + $0x1c0] sm:$0xff]  ;;  %v379_v29 = vld [vmem:[%s1573_s7 + $0x1d0] sm:$0xff]  ;;  %376 = vst [vmem:[%s1578_s8 + $0xd8] sm:$0xff] %v375_v27 }
  0x27   : > { %378 = vst [vmem:[%s1578_s8 + $0xe0] sm:$0xff] %v377_v28  ;;  %380 = vst [vmem:[%s1578_s8 + $0xe8] sm:$0xff] %v379_v29  ;;  %v381_v30 = vld [vmem:[%s1573_s7 + $0x1e0] sm:$0xff]  ;;  %v383_v31 = vld [vmem:[%s1573_s7 + $0x1f0] sm:$0xff] }
  0x28   : > { %v385_v32 = vld [vmem:[%s1573_s7 + $0x200] sm:$0xff]  ;;  %382 = vst [vmem:[%s1578_s8 + $0xf0] sm:$0xff] %v381_v30  ;;  %384 = vst [vmem:[%s1578_s8 + $0xf8] sm:$0xff] %v383_v31  ;;  %v387_v33 = vld [vmem:[%s1573_s7 + $0x210] sm:$0xff] }
  0x29   : > { %386 = vst [vmem:[%s1578_s8 + $0x100] sm:$0xff] %v385_v32  ;;  %v389_v34 = vld [vmem:[%s1573_s7 + $0x220] sm:$0xff]  ;;  %v391_v35 = vld [vmem:[%s1573_s7 + $0x230] sm:$0xff]  ;;  %388 = vst [vmem:[%s1578_s8 + $0x108] sm:$0xff] %v387_v33 }
  0x2a   : > { %390 = vst [vmem:[%s1578_s8 + $0x110] sm:$0xff] %v389_v34  ;;  %392 = vst [vmem:[%s1578_s8 + $0x118] sm:$0xff] %v391_v35  ;;  %v393_v36 = vld [vmem:[%s1573_s7 + $0x240] sm:$0xff]  ;;  %v395_v37 = vld [vmem:[%s1573_s7 + $0x250] sm:$0xff] }
  0x2b   : > { %v397_v38 = vld [vmem:[%s1573_s7 + $0x260] sm:$0xff]  ;;  %394 = vst [vmem:[%s1578_s8 + $0x120] sm:$0xff] %v393_v36  ;;  %396 = vst [vmem:[%s1578_s8 + $0x128] sm:$0xff] %v395_v37  ;;  %v399_v39 = vld [vmem:[%s1573_s7 + $0x270] sm:$0xff] }
  0x2c   : > { %398 = vst [vmem:[%s1578_s8 + $0x130] sm:$0xff] %v397_v38  ;;  %v401_v40 = vld [vmem:[%s1573_s7 + $0x280] sm:$0xff]  ;;  %v403_v41 = vld [vmem:[%s1573_s7 + $0x290] sm:$0xff]  ;;  %400 = vst [vmem:[%s1578_s8 + $0x138] sm:$0xff] %v399_v39 }
  0x2d   : > { %402 = vst [vmem:[%s1578_s8 + $0x140] sm:$0xff] %v401_v40  ;;  %404 = vst [vmem:[%s1578_s8 + $0x148] sm:$0xff] %v403_v41  ;;  %v405_v42 = vld [vmem:[%s1573_s7 + $0x2a0] sm:$0xff]  ;;  %v407_v43 = vld [vmem:[%s1573_s7 + $0x2b0] sm:$0xff] }
  0x2e   : > { %v409_v44 = vld [vmem:[%s1573_s7 + $0x2c0] sm:$0xff]  ;;  %406 = vst [vmem:[%s1578_s8 + $0x150] sm:$0xff] %v405_v42  ;;  %408 = vst [vmem:[%s1578_s8 + $0x158] sm:$0xff] %v407_v43  ;;  %v411_v45 = vld [vmem:[%s1573_s7 + $0x2d0] sm:$0xff] }
  0x2f   : > { %410 = vst [vmem:[%s1578_s8 + $0x160] sm:$0xff] %v409_v44  ;;  %v413_v46 = vld [vmem:[%s1573_s7 + $0x2e0] sm:$0xff]  ;;  %v415_v47 = vld [vmem:[%s1573_s7 + $0x2f0] sm:$0xff]  ;;  %412 = vst [vmem:[%s1578_s8 + $0x168] sm:$0xff] %v411_v45 }
  0x30   : > { %414 = vst [vmem:[%s1578_s8 + $0x170] sm:$0xff] %v413_v46  ;;  %416 = vst [vmem:[%s1578_s8 + $0x178] sm:$0xff] %v415_v47  ;;  %v417_v48 = vld [vmem:[%s1573_s7 + $0x300] sm:$0xff]  ;;  %v419_v49 = vld [vmem:[%s1573_s7 + $0x310] sm:$0xff] }
  0x31   : > { %v421_v50 = vld [vmem:[%s1573_s7 + $0x320] sm:$0xff]  ;;  %418 = vst [vmem:[%s1578_s8 + $0x180] sm:$0xff] %v417_v48  ;;  %420 = vst [vmem:[%s1578_s8 + $0x188] sm:$0xff] %v419_v49  ;;  %v423_v51 = vld [vmem:[%s1573_s7 + $0x330] sm:$0xff] }
  0x32   : > { %422 = vst [vmem:[%s1578_s8 + $0x190] sm:$0xff] %v421_v50  ;;  %v425_v52 = vld [vmem:[%s1573_s7 + $0x340] sm:$0xff]  ;;  %v427_v53 = vld [vmem:[%s1573_s7 + $0x350] sm:$0xff]  ;;  %424 = vst [vmem:[%s1578_s8 + $0x198] sm:$0xff] %v423_v51 }
  0x33   : > { %426 = vst [vmem:[%s1578_s8 + $0x1a0] sm:$0xff] %v425_v52  ;;  %428 = vst [vmem:[%s1578_s8 + $0x1a8] sm:$0xff] %v427_v53  ;;  %v429_v54 = vld [vmem:[%s1573_s7 + $0x360] sm:$0xff]  ;;  %v431_v55 = vld [vmem:[%s1573_s7 + $0x370] sm:$0xff] }
  0x34   : > { %v433_v56 = vld [vmem:[%s1573_s7 + $0x380] sm:$0xff]  ;;  %430 = vst [vmem:[%s1578_s8 + $0x1b0] sm:$0xff] %v429_v54  ;;  %432 = vst [vmem:[%s1578_s8 + $0x1b8] sm:$0xff] %v431_v55  ;;  %v435_v57 = vld [vmem:[%s1573_s7 + $0x390] sm:$0xff] }
  0x35   : > { %434 = vst [vmem:[%s1578_s8 + $0x1c0] sm:$0xff] %v433_v56  ;;  %v437_v58 = vld [vmem:[%s1573_s7 + $0x3a0] sm:$0xff]  ;;  %v439_v59 = vld [vmem:[%s1573_s7 + $0x3b0] sm:$0xff]  ;;  %436 = vst [vmem:[%s1578_s8 + $0x1c8] sm:$0xff] %v435_v57 }
  0x36   : > { %438 = vst [vmem:[%s1578_s8 + $0x1d0] sm:$0xff] %v437_v58  ;;  %440 = vst [vmem:[%s1578_s8 + $0x1d8] sm:$0xff] %v439_v59  ;;  %v441_v60 = vld [vmem:[%s1573_s7 + $0x3c0] sm:$0xff]  ;;  %v443_v61 = vld [vmem:[%s1573_s7 + $0x3d0] sm:$0xff] }
  0x37   : > { %v445_v62 = vld [vmem:[%s1573_s7 + $0x3e0] sm:$0xff]  ;;  %442 = vst [vmem:[%s1578_s8 + $0x1e0] sm:$0xff] %v441_v60  ;;  %444 = vst [vmem:[%s1578_s8 + $0x1e8] sm:$0xff] %v443_v61  ;;  %v447_v63 = vld [vmem:[%s1573_s7 + $0x3f0] sm:$0xff] }
  0x38   : > { %446 = vst [vmem:[%s1578_s8 + $0x1f0] sm:$0xff] %v445_v62  ;;  %448 = vst [vmem:[%s1578_s8 + $0x1f8] sm:$0xff] %v447_v63 }
  0x39 PF: > { %p1192_p7 = scmp.ge.s32.totalorder %s1490_s18, 1  ;;  %p462_p8 = scmp.lt.s32.totalorder %s1490_s18, 19 }
  0x3b   : > { %p463_p9 = pnand %p1192_p7, %p462_p8 }
  0x3c   : > { %s469_s9 = sand.u32 (!%p463_p9), 1, %s1466_s12   ;;  %s1194_s10 = sshll.u32 (!%p463_p9), %s1474_s14, 2 }
  0x3d   : > { %466 = sbr.rel (%p463_p9) target bundleno = 411 (0x19b), region = 66  ;;  %s1193_s11 = sshll.u32 (!%p463_p9), %s469_s9, 9 }
  0x3e   : > { %p503_p10 = scmp.lt.s32.totalorder (!%p463_p9), %s1194_s10, 35  ;;  %s1196_s21 = sshll.u32 (!%p463_p9), %s1478_s15, 1 }
  0x3f   : > { %p511_p11 = scmp.lt.s32.totalorder (!%p463_p9), %s1196_s21, 3  ;;  %s1725_s15 = scalar_lea.vmem (!%p463_p9), [#allocation3], %s1193_s11 }
  0x40   : > { %p1200_p12 = scmp.ne.s32.totalorder (!%p463_p9), %s1474_s14, 0 }
  0x44   : > { %s1835_s10 = smov (!%p503_p10, %s1194_s10), 35  ;;  %s1837_s21 = smov (!%p511_p11, %s1196_s21), 3 }
  0x45   : > { %s1195_s22 = sshll.u32 %s1835_s10, 2  ;;  %s1197_s27 = sshll.u32 %s1837_s21, 2  ;;  %v1492_v0 = vmov (!%p1200_p12), 0.0  }
  0x46   : > { %s1713_s26 = scalar_lea.vmem %s1818_s0, %s1195_s22  ;;  %s1718_s30 = scalar_lea.vmem %s1820_s2, %s1197_s27  ;;  %526 = vst [vmem:[#allocation2] sm:$0xff] (!%p1200_p12), %v1492_v0  ;;  %527 = vst [vmem:[#allocation2 + $0x8] sm:$0xff] (!%p1200_p12), %v1492_v0 }
  0x47   : > { %s1723_s5 = scalar_lea.vmem %s1821_s3, %s1197_s27  ;;  %525 = sbr.rel (%p1200_p12) target bundleno = 78 (0x4e), region = 74 }
  0x4e PF: > { %v1332_v1 = vld [vmem:[%s1725_s15 + $0x4] ss:$8 sps:$4 sm:$0xff]   ;;  %v1336_v3 = vld [vmem:[%s1725_s15] ss:$8 sps:$4 sm:$0xff]   ;;  %v1338_v5 = vld [vmem:[%s1725_s15 + $0x14] ss:$8 sps:$4 sm:$0xff]  }
  0x4f   : > { %v1334_v2 = vld [vmem:[%s1725_s15 + $0x104] ss:$8 sps:$4 sm:$0xff]   ;;  %930 = vmatprep.subr.bf16.mxu0 %v1332_v1  ;;  %v1337_v4 = vld [vmem:[%s1725_s15 + $0x100] ss:$8 sps:$4 sm:$0xff]   ;;  %v1340_v6 = vld [vmem:[%s1725_s15 + $0x114] ss:$8 sps:$4 sm:$0xff]  }
  0x50   : > { %971 = vmatprep.subr.bf16.mxu1 %v1334_v2  ;;  %931 = vmatpush1.bf16.msra.mxu0 %v1336_v3  ;;  %v1342_v7 = vld [vmem:[%s1725_s15 + $0x10] ss:$8 sps:$4 sm:$0xff]   ;;  %v1344_v9 = vld [vmem:[%s1725_s15 + $0x24] ss:$8 sps:$4 sm:$0xff]   ;;  %v1348_v11 = vld [vmem:[%s1725_s15 + $0x20] ss:$8 sps:$4 sm:$0xff]  }
  0x51   : > { %972 = vmatpush1.bf16.msra.mxu1 %v1337_v4  ;;  %932 = vmatprep.subr.bf16.mxu0 %v1338_v5  ;;  %v1343_v8 = vld [vmem:[%s1725_s15 + $0x110] ss:$8 sps:$4 sm:$0xff]   ;;  %v1346_v10 = vld [vmem:[%s1725_s15 + $0x124] ss:$8 sps:$4 sm:$0xff]   ;;  %v1349_v12 = vld [vmem:[%s1725_s15 + $0x120] ss:$8 sps:$4 sm:$0xff]  }
  0x52   : > { %973 = vmatprep.subr.bf16.mxu1 %v1340_v6  ;;  %v1350_v13 = vld [vmem:[%s1725_s15 + $0x34] ss:$8 sps:$4 sm:$0xff]   ;;  %v1354_v15 = vld [vmem:[%s1725_s15 + $0x30] ss:$8 sps:$4 sm:$0xff]   ;;  %v1356_v17 = vld [vmem:[%s1725_s15 + $0x44] ss:$8 sps:$4 sm:$0xff]  }
  0x53   : > { %v1352_v14 = vld [vmem:[%s1725_s15 + $0x134] ss:$8 sps:$4 sm:$0xff]   ;;  %v1355_v16 = vld [vmem:[%s1725_s15 + $0x130] ss:$8 sps:$4 sm:$0xff]   ;;  %v1358_v18 = vld [vmem:[%s1725_s15 + $0x144] ss:$8 sps:$4 sm:$0xff]  }
  0x54   : > { %933 = vmatpush1.bf16.msra.mxu0 %v1342_v7  ;;  %v1360_v19 = vld [vmem:[%s1725_s15 + $0x40] ss:$8 sps:$4 sm:$0xff]   ;;  %v1362_v21 = vld [vmem:[%s1725_s15 + $0x54] ss:$8 sps:$4 sm:$0xff]   ;;  %v1366_v23 = vld [vmem:[%s1725_s15 + $0x50] ss:$8 sps:$4 sm:$0xff]  }
  0x55   : > { %974 = vmatpush1.bf16.msra.mxu1 %v1343_v8  ;;  %934 = vmatprep.subr.bf16.mxu0 %v1344_v9  ;;  %v1361_v20 = vld [vmem:[%s1725_s15 + $0x140] ss:$8 sps:$4 sm:$0xff]   ;;  %v1364_v22 = vld [vmem:[%s1725_s15 + $0x154] ss:$8 sps:$4 sm:$0xff]   ;;  %v1367_v24 = vld [vmem:[%s1725_s15 + $0x150] ss:$8 sps:$4 sm:$0xff]  }
  0x56   : > { %975 = vmatprep.subr.bf16.mxu1 %v1346_v10  ;;  %v1368_v25 = vld [vmem:[%s1725_s15 + $0x64] ss:$8 sps:$4 sm:$0xff]   ;;  %v1372_v27 = vld [vmem:[%s1725_s15 + $0x60] ss:$8 sps:$4 sm:$0xff]   ;;  %v1374_v29 = vld [vmem:[%s1725_s15 + $0x74] ss:$8 sps:$4 sm:$0xff]  }
  0x57   : > { %v1370_v26 = vld [vmem:[%s1725_s15 + $0x164] ss:$8 sps:$4 sm:$0xff]   ;;  %v1373_v28 = vld [vmem:[%s1725_s15 + $0x160] ss:$8 sps:$4 sm:$0xff]   ;;  %v1376_v30 = vld [vmem:[%s1725_s15 + $0x174] ss:$8 sps:$4 sm:$0xff]  }
  0x58   : > { %935 = vmatpush1.bf16.msra.mxu0 %v1348_v11  ;;  %v1378_v31 = vld [vmem:[%s1725_s15 + $0x70] ss:$8 sps:$4 sm:$0xff]   ;;  %v1380_v33 = vld [vmem:[%s1725_s15 + $0x84] ss:$8 sps:$4 sm:$0xff]   ;;  %v1384_v35 = vld [vmem:[%s1725_s15 + $0x80] ss:$8 sps:$4 sm:$0xff]  }
  0x59   : > { %976 = vmatpush1.bf16.msra.mxu1 %v1349_v12  ;;  %936 = vmatprep.subr.bf16.mxu0 %v1350_v13  ;;  %v1379_v32 = vld [vmem:[%s1725_s15 + $0x170] ss:$8 sps:$4 sm:$0xff]   ;;  %v1382_v34 = vld [vmem:[%s1725_s15 + $0x184] ss:$8 sps:$4 sm:$0xff]   ;;  %v1385_v36 = vld [vmem:[%s1725_s15 + $0x180] ss:$8 sps:$4 sm:$0xff]  }
  0x5a   : > { %977 = vmatprep.subr.bf16.mxu1 %v1352_v14  ;;  %v1386_v37 = vld [vmem:[%s1725_s15 + $0x94] ss:$8 sps:$4 sm:$0xff]   ;;  %v1390_v39 = vld [vmem:[%s1725_s15 + $0x90] ss:$8 sps:$4 sm:$0xff]   ;;  %v1392_v41 = vld [vmem:[%s1725_s15 + $0xa4] ss:$8 sps:$4 sm:$0xff]  }
  0x5b   : > { %v1388_v38 = vld [vmem:[%s1725_s15 + $0x194] ss:$8 sps:$4 sm:$0xff]   ;;  %v1391_v40 = vld [vmem:[%s1725_s15 + $0x190] ss:$8 sps:$4 sm:$0xff]   ;;  %v1394_v42 = vld [vmem:[%s1725_s15 + $0x1a4] ss:$8 sps:$4 sm:$0xff]  }
  0x5c   : > { %937 = vmatpush1.bf16.msra.mxu0 %v1354_v15  ;;  %v1396_v43 = vld [vmem:[%s1725_s15 + $0xa0] ss:$8 sps:$4 sm:$0xff]   ;;  %v1398_v45 = vld [vmem:[%s1725_s15 + $0xb4] ss:$8 sps:$4 sm:$0xff]   ;;  %v1402_v50 = vld [vmem:[%s1725_s15 + $0xb0] ss:$8 sps:$4 sm:$0xff]  }
  0x5d   : > { %978 = vmatpush1.bf16.msra.mxu1 %v1355_v16  ;;  %938 = vmatprep.subr.bf16.mxu0 %v1356_v17  ;;  %v1397_v44 = vld [vmem:[%s1725_s15 + $0x1a0] ss:$8 sps:$4 sm:$0xff]   ;;  %v1400_v46 = vld [vmem:[%s1725_s15 + $0x1b4] ss:$8 sps:$4 sm:$0xff]   ;;  %v1403_v51 = vld [vmem:[%s1725_s15 + $0x1b0] ss:$8 sps:$4 sm:$0xff]  }
  0x5e   : > { %979 = vmatprep.subr.bf16.mxu1 %v1358_v18  ;;  %v530_v47 = vld [vmem:[%s1713_s26] sm:$0xff]  ;;  %v531_v49 = vld [vmem:[%s1713_s26 + $0x8] sm:$0xff]  ;;  %v1404_v53 = vld [vmem:[%s1725_s15 + $0xc4] ss:$8 sps:$4 sm:$0xff]   ;;  %p1269_p13 = scmp.ne.s32.totalorder %s1474_s14, 8 }
  0x5f   : > { %v1202_v48 = vcombine.high %v530_v47, %v530_v47  ;;  %v1204_v52 = vcombine.high %v531_v49, %v531_v49  ;;  %v1406_v54 = vld [vmem:[%s1725_s15 + $0x1c4] ss:$8 sps:$4 sm:$0xff]   ;;  %v1408_v55 = vld [vmem:[%s1725_s15 + $0xc0] ss:$8 sps:$4 sm:$0xff]   ;;  %v1410_v57 = vld [vmem:[%s1725_s15 + $0xd4] ss:$8 sps:$4 sm:$0xff]   ;;  %v1201_v5 = vcombine.low %v530_v47, %v530_v47  ;;  %v1203_v6 = vcombine.low %v531_v49, %v531_v49 }
  0x60   : > { %939 = vmatpush1.bf16.msra.mxu0 %v1360_v19  ;;  %v1409_v56 = vld [vmem:[%s1725_s15 + $0x1c0] ss:$8 sps:$4 sm:$0xff]   ;;  %v1412_v58 = vld [vmem:[%s1725_s15 + $0x1d4] ss:$8 sps:$4 sm:$0xff]   ;;  %v1414_v59 = vld [vmem:[%s1725_s15 + $0xd0] ss:$8 sps:$4 sm:$0xff]  }
  0x61   : > { %980 = vmatpush1.bf16.msra.mxu1 %v1361_v20  ;;  %940 = vmatprep.subr.bf16.mxu0 %v1362_v21  ;;  %v1415_v60 = vld [vmem:[%s1725_s15 + $0x1d0] ss:$8 sps:$4 sm:$0xff]   ;;  %v1416_v61 = vld [vmem:[%s1725_s15 + $0xe4] ss:$8 sps:$4 sm:$0xff]   ;;  %v1420_v63 = vld [vmem:[%s1725_s15 + $0xe0] ss:$8 sps:$4 sm:$0xff]  }
  0x62   : > { %981 = vmatprep.subr.bf16.mxu1 %v1364_v22  ;;  %962 = vmatprep.mubr.bf16.mxu0 %v1202_v48  ;;  %v1418_v62 = vld [vmem:[%s1725_s15 + $0x1e4] ss:$8 sps:$4 sm:$0xff]   ;;  %v1421_v0 = vld [vmem:[%s1725_s15 + $0x1e0] ss:$8 sps:$4 sm:$0xff]   ;;  %v1422_v1 = vld [vmem:[%s1725_s15 + $0xf4] ss:$8 sps:$4 sm:$0xff]  }
  0x63   : > { %1003 = vmatprep.mubr.bf16.mxu1 %v1204_v52  ;;  %v1424_v2 = vld [vmem:[%s1725_s15 + $0x1f4] ss:$8 sps:$4 sm:$0xff]   ;;  %v1426_v3 = vld [vmem:[%s1725_s15 + $0xf0] ss:$8 sps:$4 sm:$0xff]  }
  0x64   : > { %941 = vmatpush1.bf16.msra.mxu0 %v1366_v23  ;;  %v1427_v4 = vld [vmem:[%s1725_s15 + $0x1f0] ss:$8 sps:$4 sm:$0xff]  }
  0x65   : > { %982 = vmatpush1.bf16.msra.mxu1 %v1367_v24  ;;  %942 = vmatprep.subr.bf16.mxu0 %v1368_v25  ;;  %v528_v8 = vld [vmem:[#allocation2] sm:$0xff]  ;;  %v529_v12 = vld [vmem:[#allocation2 + $0x8] sm:$0xff] }
  0x66   : > { %983 = vmatprep.subr.bf16.mxu1 %v1370_v26 }
  0x68   : > { %943 = vmatpush1.bf16.msra.mxu0 %v1372_v27 }
  0x69   : > { %984 = vmatpush1.bf16.msra.mxu1 %v1373_v28  ;;  %944 = vmatprep.subr.bf16.mxu0 %v1374_v29 }
  0x6a   : > { %985 = vmatprep.subr.bf16.mxu1 %v1376_v30 }
  0x6c   : > { %945 = vmatpush1.bf16.msra.mxu0 %v1378_v31 }
  0x6d   : > { %986 = vmatpush1.bf16.msra.mxu1 %v1379_v32  ;;  %946 = vmatprep.subr.bf16.mxu0 %v1380_v33 }
  0x6e   : > { %987 = vmatprep.subr.bf16.mxu1 %v1382_v34 }
  0x70   : > { %947 = vmatpush1.bf16.msra.mxu0 %v1384_v35 }
  0x71   : > { %988 = vmatpush1.bf16.msra.mxu1 %v1385_v36  ;;  %948 = vmatprep.subr.bf16.mxu0 %v1386_v37 }
  0x72   : > { %989 = vmatprep.subr.bf16.mxu1 %v1388_v38 }
  0x74   : > { %949 = vmatpush1.bf16.msra.mxu0 %v1390_v39 }
  0x75   : > { %990 = vmatpush1.bf16.msra.mxu1 %v1391_v40  ;;  %950 = vmatprep.subr.bf16.mxu0 %v1392_v41 }
  0x76   : > { %991 = vmatprep.subr.bf16.mxu1 %v1394_v42 }
  0x78   : > { %951 = vmatpush1.bf16.msra.mxu0 %v1396_v43 }
  0x79   : > { %992 = vmatpush1.bf16.msra.mxu1 %v1397_v44  ;;  %952 = vmatprep.subr.bf16.mxu0 %v1398_v45 }
  0x7a   : > { %993 = vmatprep.subr.bf16.mxu1 %v1400_v46 }
  0x7c   : > { %953 = vmatpush1.bf16.msra.mxu0 %v1402_v50 }
  0x7d   : > { %994 = vmatpush1.bf16.msra.mxu1 %v1403_v51  ;;  %954 = vmatprep.subr.bf16.mxu0 %v1404_v53 }
  0x7e   : > { %995 = vmatprep.subr.bf16.mxu1 %v1406_v54 }
  0x80   : > { %955 = vmatpush1.bf16.msra.mxu0 %v1408_v55 }
  0x81   : > { %996 = vmatpush1.bf16.msra.mxu1 %v1409_v56  ;;  %956 = vmatprep.subr.bf16.mxu0 %v1410_v57 }
  0x82   : > { %997 = vmatprep.subr.bf16.mxu1 %v1412_v58 }
  0x84   : > { %957 = vmatpush1.bf16.msra.mxu0 %v1414_v59 }
  0x85   : > { %998 = vmatpush1.bf16.msra.mxu1 %v1415_v60  ;;  %958 = vmatprep.subr.bf16.mxu0 %v1416_v61  ;;  %v1066_v61 = vld [vmem:[%s1718_s30] sm:$0xff] (!%p1269_p13) }
  0x86   : > { %999 = vmatprep.subr.bf16.mxu1 %v1418_v62 }
  0x88   : > { %959 = vmatpush1.bf16.msra.mxu0 %v1420_v63 }
  0x89   : > { %1000 = vmatpush1.bf16.msra.mxu1 %v1421_v0  ;;  %960 = vmatprep.subr.bf16.mxu0 %v1422_v1  ;;  %v1067_v0 = vunpack.c.l.bf16 (!%p1269_p13), %v1066_v61 }
  0x8a   : > { %1001 = vmatprep.subr.bf16.mxu1 %v1424_v2  ;;  %v1068_v2 = vunpack.c.h.bf16 (!%p1269_p13), %v1066_v61 }
  0x8c   : > { %961 = vmatpush1.bf16.msra.mxu0 %v1426_v3 }
  0x8d   : > { %1002 = vmatpush1.bf16.msra.mxu1 %v1427_v4 }
  0x8f   : > { %963 = vmatmul.mubr.bf16.vlgmr.msra.gmra.mrb[0].mxu0 %v1201_v5 }
  0x90   : > { %1004 = vmatmul.mubr.bf16.vlgmr.msra.gmra.mrb[0].mxu1 %v1203_v6 }
 0x162   : > { %v964_v7 = vpop.f32.mrb[0].mxu0 }
 0x163   : > { %v1005_v9 = vpop.f32.mrb[0].mxu1  ;;  %v966_v11 = vpop.f32.mrb[1].mxu0  ;;  %1019 = sbr.rel (%p1269_p13) target bundleno = 411 (0x19b), region = 78 }
 0x164   : > { %v1006_v10 = vadd.f32 %v1005_v9, %v964_v7  ;;  %v1007_v13 = vpop.f32.mrb[1].mxu1  ;;  %v968_v15 = vpop.f32.mrb[2].mxu0 }
 0x165   : > { %v1008_v14 = vadd.f32 %v1007_v13, %v966_v11  ;;  %v1009_v16 = vpop.f32.mrb[2].mxu1  ;;  %v969_v18 = vpop.f32.mrb[3].mxu0 }
 0x166   : > { %v1012_v17 = vadd.f32 %v1006_v10, %v528_v8  ;;  %v1010_v19 = vpop.f32.mrb[3].mxu1 }
 0x167   : > { %v1013_v20 = vadd.f32 %v1008_v14, %v529_v12 }
 0x168   : > { %1014 = vst [vmem:[#allocation2] sm:$0xff] %v1012_v17 }
 0x169   : > { %1015 = vst [vmem:[#allocation2 + $0x8] sm:$0xff] %v1013_v20 }
 0x16f   : > { %v1020_v21 = vld [vmem:[#allocation2] sm:$0xff] }
 0x170   : > { %v1021_v22 = vld [vmem:[#allocation2 + $0x8] sm:$0xff]  ;;  %v1022_v23 = vrot.slane %v1020_v21, 4  ;;  %v1036_v25 = vmul.f32 %v1020_v21, %v1020_v21 }
 0x171   : > { %v1028_v24 = vrot.slane %v1021_v22, 4  ;;  %v1037_v26 = vmul.f32 %v1021_v22, %v1021_v22 }
 0x172   : > { %v1023_v27 = vadd.f32 %v1022_v23, %v1020_v21  ;;  %v1038_v29 = vrot.slane %v1036_v25, 4 }
 0x173   : > { %v1029_v28 = vadd.f32 %v1028_v24, %v1021_v22  ;;  %v1044_v30 = vrot.slane %v1037_v26, 4 }
 0x174   : > { %v1024_v31 = vrot.slane %v1023_v27, 2  ;;  %v1039_v33 = vadd.f32 %v1038_v29, %v1036_v25 }
 0x175   : > { %v1030_v32 = vrot.slane %v1029_v28, 2  ;;  %v1045_v34 = vadd.f32 %v1044_v30, %v1037_v26 }
 0x176   : > { %v1025_v35 = vadd.f32 %v1024_v31, %v1023_v27  ;;  %v1040_v37 = vrot.slane %v1039_v33, 2 }
 0x177   : > { %v1031_v36 = vadd.f32 %v1030_v32, %v1029_v28  ;;  %v1046_v38 = vrot.slane %v1045_v34, 2 }
 0x178   : > { %v1026_v39 = vrot.slane %v1025_v35, 1  ;;  %v1041_v41 = vadd.f32 %v1040_v37, %v1039_v33 }
 0x179   : > { %v1032_v40 = vrot.slane %v1031_v36, 1  ;;  %v1047_v42 = vadd.f32 %v1046_v38, %v1045_v34 }
 0x17a   : > { %v1027_v43 = vadd.f32 %v1026_v39, %v1025_v35  ;;  %v1042_v45 = vrot.slane %v1041_v41, 1 }
 0x17b   : > { %v1033_v44 = vadd.f32 %v1032_v40, %v1031_v36  ;;  %v1048_v46 = vrot.slane %v1047_v42, 1 }
 0x17c   : > { %v1034_v47 = vmul.f32 0.5, %v1027_v43  ;;  %v1043_v49 = vadd.f32 %v1042_v45, %v1041_v41 }
 0x17d   : > { %v1035_v48 = vmul.f32 0.5, %v1033_v44  ;;  %v1049_v50 = vadd.f32 %v1048_v46, %v1047_v42 }
 0x17e   : > { %v1050_v51 = vmul.f32 0.5, %v1043_v49  ;;  %v1052_v53 = vmul.f32 %v1034_v47, %v1034_v47  ;;  %v1058_v62 = vsub.f32 %v1020_v21, %v1034_v47 }
 0x17f   : > { %v1051_v52 = vmul.f32 0.5, %v1049_v50  ;;  %v1053_v54 = vmul.f32 %v1035_v48, %v1035_v48  ;;  %v1059_v63 = vsub.f32 %v1021_v22, %v1035_v48 }
 0x180   : > { %v1054_v55 = vsub.f32 %v1050_v51, %v1052_v53 }
 0x181   : > { %v1055_v56 = vsub.f32 %v1051_v52, %v1053_v54 }
 0x182   : > { %v1056_v57 = vmax.f32 %v1054_v55, 0.0 }
 0x183   : > { %v1057_v58 = vmax.f32 %v1055_v56, 0.0 }
 0x184   : > { %v1060_v59 = vadd.f32 1e-05, %v1056_v57 }
 0x185   : > { %v1061_v60 = vadd.f32 1e-05, %v1057_v58 }
 0x186   : > { %1432 = vrsqrt.f32 %v1060_v59 }
 0x187   : > { %1434 = vrsqrt.f32 %v1061_v60 }
 0x190   : > { %v1433_v1 = vpop.eup %1432 }
 0x191   : > { %v1435_v3 = vpop.eup %1434  ;;  %v1064_v4 = vmul.f32 %v1433_v1, %v1058_v62 }
 0x192   : > { %v1065_v5 = vmul.f32 %v1435_v3, %v1059_v63 }
 0x193   : > { %v1069_v6 = vadd.f32 %v1067_v0, %v1064_v4 }
 0x194   : > { %v1070_v7 = vadd.f32 %v1068_v2, %v1065_v5 }
 0x195   : > { %v1071_v8 = vmax.f32 %v1069_v6, 0.0 }
 0x196   : > { %v1072_v9 = vmax.f32 %v1070_v7, 0.0 }
 0x198   : > { %v1274_v10 = vpack.c.bf16 %v1072_v9, %v1071_v8 }
 0x19a   : > { %1081 = vst [vmem:[%s1723_s5] sm:$0xff] %v1274_v10 }
 0x19b PF: > { %s13_s18 = sadd.s32 1, %s1490_s18   ;;  %s1822_s12 = smov %s1470_s13 }
 0x19c   : > { %p10_p0 = scmp.ge.s32.totalorder %s13_s18, 20   ;;  %s1823_s13 = smov %s1564_s25 }
 0x19d   : > { %s1824_s14 = smov %s1482_s16  ;;  %s1825_s15 = smov %s1486_s17 }
 0x19e   : > { %s1826_s16 = smov %s1829_s19  ;;  %s1827_s17 = smov %s1833_s20 }
 0x19f   :  { %12 = sbr.rel (!%p10_p0) target bundleno = 4 (0x4), region = 119 }

// kernel: _lambda_.27
= control target key start
LH: loop header
LB: loop body
LE: loop exit
PB: predicated region body
PF: predicated region fallthrough
CT: control target
= control target key end

     0   :  { %s637_s1 = inlined_call_operand.vmem [shape: bf16[512,128], index: 1, kind: input, shape index: {}]   ;;  %s638_s0 = inlined_call_operand.vmem [shape: bf16[8,512], index: 0, kind: input, shape index: {}]   ;;  %s639_s2 = inlined_call_operand.vmem [shape: f32[1,128], index: 2, kind: input, shape index: {}]   ;;  %s640_s3 = inlined_call_operand.vmem [shape: f32[8,128], index: 3, kind: output, shape index: {}]  }
   0x1   :  { %v473_v0 = vld [vmem:[%s637_s1 + $0x40] sm:$0xff]   ;;  %v477_v4 = vld [vmem:[%s637_s1 + $0x48] sm:$0xff]   ;;  %v481_v8 = vld [vmem:[%s637_s1 + $0x50] sm:$0xff]  }
   0x2   :  { %v474_v1 = vld [vmem:[%s637_s1 + $0xc0] sm:$0xff]   ;;  %429 = vmatprep.subr.bf16.mxu0 %v473_v0  ;;  %v478_v5 = vld [vmem:[%s637_s1 + $0xc8] sm:$0xff]   ;;  %v482_v9 = vld [vmem:[%s637_s1 + $0xd0] sm:$0xff]  }
   0x3   :  { %v475_v2 = vld [vmem:[%s637_s1] sm:$0xff]   ;;  %451 = vmatprep.subr.bf16.mxu1 %v474_v1  ;;  %v479_v6 = vld [vmem:[%s637_s1 + $0x8] sm:$0xff]   ;;  %v483_v10 = vld [vmem:[%s637_s1 + $0x10] sm:$0xff]  }
   0x4   :  { %v476_v3 = vld [vmem:[%s637_s1 + $0x80] sm:$0xff]   ;;  %430 = vmatpush3.bf16.msra.mxu0 %v475_v2  ;;  %v480_v7 = vld [vmem:[%s637_s1 + $0x88] sm:$0xff]   ;;  %v484_v11 = vld [vmem:[%s637_s1 + $0x90] sm:$0xff]  }
   0x5   :  { %452 = vmatpush3.bf16.msra.mxu1 %v476_v3  ;;  %431 = vmatprep.subr.bf16.mxu0 %v477_v4  ;;  %v485_v12 = vld [vmem:[%s637_s1 + $0x58] sm:$0xff]   ;;  %v489_v16 = vld [vmem:[%s637_s1 + $0x60] sm:$0xff]   ;;  %v493_v20 = vld [vmem:[%s637_s1 + $0x68] sm:$0xff]  }
   0x6   :  { %453 = vmatprep.subr.bf16.mxu1 %v478_v5  ;;  %v486_v13 = vld [vmem:[%s637_s1 + $0xd8] sm:$0xff]   ;;  %v490_v17 = vld [vmem:[%s637_s1 + $0xe0] sm:$0xff]   ;;  %v494_v21 = vld [vmem:[%s637_s1 + $0xe8] sm:$0xff]  }
   0x7   :  { %v487_v14 = vld [vmem:[%s637_s1 + $0x18] sm:$0xff]   ;;  %v491_v18 = vld [vmem:[%s637_s1 + $0x20] sm:$0xff]   ;;  %v495_v22 = vld [vmem:[%s637_s1 + $0x28] sm:$0xff]  }
   0x8   :  { %432 = vmatpush3.bf16.msra.mxu0 %v479_v6  ;;  %v488_v15 = vld [vmem:[%s637_s1 + $0x98] sm:$0xff]   ;;  %v492_v19 = vld [vmem:[%s637_s1 + $0xa0] sm:$0xff]   ;;  %v496_v23 = vld [vmem:[%s637_s1 + $0xa8] sm:$0xff]  }
   0x9   :  { %454 = vmatpush3.bf16.msra.mxu1 %v480_v7  ;;  %433 = vmatprep.subr.bf16.mxu0 %v481_v8  ;;  %v497_v24 = vld [vmem:[%s637_s1 + $0x70] sm:$0xff]   ;;  %v501_v28 = vld [vmem:[%s637_s1 + $0x78] sm:$0xff]   ;;  %v21_v32 = vld [vmem:[%s638_s0] sm:$0xff] }
   0xa   :  { %455 = vmatprep.subr.bf16.mxu1 %v482_v9  ;;  %v498_v25 = vld [vmem:[%s637_s1 + $0xf0] sm:$0xff]   ;;  %v502_v29 = vld [vmem:[%s637_s1 + $0xf8] sm:$0xff]   ;;  %v22_v33 = vld [vmem:[%s638_s0 + $0x8] sm:$0xff]  ;;  %v392_v34 = vcombine.low %v21_v32, %v21_v32  ;;  %v393_v35 = vcombine.high %v21_v32, %v21_v32 }
   0xb   :  { %v499_v26 = vld [vmem:[%s637_s1 + $0x30] sm:$0xff]   ;;  %v503_v30 = vld [vmem:[%s637_s1 + $0x38] sm:$0xff]   ;;  %v394_v36 = vcombine.low %v22_v33, %v22_v33  ;;  %v395_v37 = vcombine.high %v22_v33, %v22_v33  ;;  %v428_v46 = vld [vmem:[%s639_s2] ss:$0 sm:$0xff] }
   0xc   :  { %434 = vmatpush3.bf16.msra.mxu0 %v483_v10  ;;  %v500_v27 = vld [vmem:[%s637_s1 + $0xb0] sm:$0xff]   ;;  %v504_v31 = vld [vmem:[%s637_s1 + $0xb8] sm:$0xff]   ;;  %325 = vmatprep.mubr.bf16.mxu0 %v393_v35 }
   0xd   :  { %456 = vmatpush3.bf16.msra.mxu1 %v484_v11  ;;  %435 = vmatprep.subr.bf16.mxu0 %v485_v12 }
   0xe   :  { %457 = vmatprep.subr.bf16.mxu1 %v486_v13  ;;  %365 = vmatprep.mubr.bf16.mxu1 %v395_v37 }
  0x10   :  { %436 = vmatpush3.bf16.msra.mxu0 %v487_v14 }
  0x11   :  { %458 = vmatpush3.bf16.msra.mxu1 %v488_v15  ;;  %437 = vmatprep.subr.bf16.mxu0 %v489_v16 }
  0x12   :  { %459 = vmatprep.subr.bf16.mxu1 %v490_v17 }
  0x14   :  { %438 = vmatpush3.bf16.msra.mxu0 %v491_v18 }
  0x15   :  { %460 = vmatpush3.bf16.msra.mxu1 %v492_v19  ;;  %439 = vmatprep.subr.bf16.mxu0 %v493_v20 }
  0x16   :  { %461 = vmatprep.subr.bf16.mxu1 %v494_v21 }
  0x18   :  { %440 = vmatpush3.bf16.msra.mxu0 %v495_v22 }
  0x19   :  { %462 = vmatpush3.bf16.msra.mxu1 %v496_v23  ;;  %441 = vmatprep.subr.bf16.mxu0 %v497_v24 }
  0x1a   :  { %463 = vmatprep.subr.bf16.mxu1 %v498_v25 }
  0x1c   :  { %442 = vmatpush3.bf16.msra.mxu0 %v499_v26 }
  0x1d   :  { %464 = vmatpush3.bf16.msra.mxu1 %v500_v27  ;;  %443 = vmatprep.subr.bf16.mxu0 %v501_v28 }
  0x1e   :  { %465 = vmatprep.subr.bf16.mxu1 %v502_v29 }
  0x20   :  { %444 = vmatpush3.bf16.msra.mxu0 %v503_v30 }
  0x21   :  { %466 = vmatpush3.bf16.msra.mxu1 %v504_v31 }
  0x23   :  { %326 = vmatmul.mubr.bf16.vlgmr.msra.gmra.mrb[0].mxu0 %v392_v34 }
  0x24   :  { %366 = vmatmul.mubr.bf16.vlgmr.msra.gmra.mrb[0].mxu1 %v394_v36 }
  0xf6   :  { %v445_v38 = vpop.f32.mrb[0].mxu0 }
  0xf7   :  { %v467_v39 = vpop.f32.mrb[0].mxu1  ;;  %v446_v40 = vpop.f32.mrb[1].mxu0 }
  0xf8   :  { %v468_v41 = vpop.f32.mrb[1].mxu1  ;;  %v447_v42 = vadd.f32 %v446_v40, %v445_v38  ;;  %v448_v44 = vpop.f32.mrb[2].mxu0 }
  0xf9   :  { %v469_v43 = vadd.f32 %v468_v41, %v467_v39  ;;  %v470_v45 = vpop.f32.mrb[2].mxu1  ;;  %v449_v47 = vpop.f32.mrb[3].mxu0 }
  0xfa   :  { %v471_v48 = vpop.f32.mrb[3].mxu1 }
  0xfb   :  { %v368_v49 = vadd.f32 %v469_v43, %v447_v42 }
  0xfd   :  { %v386_v50 = vadd.f32 %v428_v46, %v368_v49 }
  0xff   :  { %387 = vst [vmem:[%s640_s3] sm:$0xff] %v386_v50 }

</bundles_post_ra>
